<compile_context>
chip_gen: v7x
topology: tpu7x:2x2x1
jax: 0.10.0
libtpu: 0.0.40
codegen_flags: <defaults>
</compile_context>

<pallas_src>
import jax
import jax.numpy as jnp
from jax import lax
from jax.experimental import pallas as pl
from jax.experimental.pallas import tpu as pltpu

NEG_SLOPE = 0.01   # F.leaky_relu default
BN_EPS = 1e-5      # nn.BatchNorm2d default
LEAD = 6           # leading zero rows in every padded activation buffer
TAIL = 8           # trailing zero rows (slack for the shifted tap reads)


def _leaky(x):
    return jnp.where(x >= 0, x, NEG_SLOPE * x)


# ----------------------------------------------------------------------------
# One-time host-side parameter preparation (kept out of the per-forward path):
# BN folding, conv/fc weight packing + transposition, bf16 cast, bias packing.
# ----------------------------------------------------------------------------
def prepare_fused_params(params):
    E = params["emb_w"].shape[0]
    t = params["conv1_w"].shape[1]
    fp = {"emb": jnp.stack([params["emb_w"].reshape(-1),
                            params["emb_b"].reshape(-1)]).astype(jnp.float32)}   # (2, E)

    bias_rows = []
    for i in range(1, 5):
        w = params[f"conv{i}_w"].astype(jnp.float32)          # (C_out, C_in, 3, 3)
        scale = params[f"bn{i}_g"] / jnp.sqrt(params[f"bn{i}_v"] + BN_EPS)
        shift = params[f"bn{i}_b"] - params[f"bn{i}_m"] * scale
        wf = w * scale[:, None, None, None]                   # fold BN scale into conv
        c_out, c_in = w.shape[0], w.shape[1]
        # rows ordered (kh*3+kw)*C_in + c_in, columns = c_out
        fp[f"w{i}"] = (jnp.transpose(wf, (2, 3, 1, 0))
                       .reshape(9 * c_in, c_out).astype(jnp.bfloat16))
        bias_rows.append(params[f"conv{i}_b"].astype(jnp.float32) * scale + shift)

    # interm_fc1: (n1, c5*h5) with feature index c*h5 + h  ->  packed rows h*c5 + c
    c5, h5 = 8 * t, E - 16
    fc1_w = params["fc1_w"].astype(jnp.float32)
    n1 = fc1_w.shape[0]
    assert fc1_w.shape[1] == c5 * h5, "interm_fc1 requires embedding_size == 32"
    fp["wfc1"] = (jnp.transpose(fc1_w.reshape(n1, c5, h5), (2, 1, 0))
                  .reshape(h5 * c5, n1).astype(jnp.bfloat16))
    fp["wout"] = params["out_w"].T.astype(jnp.bfloat16)       # (n1, output_size)

    bias_rows += [params["fc1_b"].astype(jnp.float32), params["out_b"].astype(jnp.float32)]
    bias_pack = jnp.zeros((8, 128), jnp.float32)
    for r, v in enumerate(bias_rows):
        bias_pack = bias_pack.at[r, :v.shape[0]].set(v)
    fp["biases"] = bias_pack
    return fp


# ----------------------------------------------------------------------------
# Full forward in a single fused Pallas kernel
# ----------------------------------------------------------------------------
@jax.jit
def cnn_trajnet_forward(fp, x):
    """x: (1, 2m, t) float -> (1, 2m, 1, output_size), matching the PyTorch forward."""
    _, two_m, t = x.shape
    E = fp["emb"].shape[1]
    out_size = fp["wout"].shape[1]
    assert E == 32, "interm_fc1 = Linear(8*16*input_size, .) requires embedding_size == 32"

    W = two_m
    Wp = W + 4                                     # conv width padding (2 each side) built in
    heights = [E, E - 4, E - 8, E - 12, E - 16]    # H of activation buffers P1..P5
    chans = [t, 2 * t, 4 * t, 6 * t, 8 * t]        # C of activation buffers P1..P5
    n1 = 8 * t
    g_max = heights[1] * Wp                        # largest conv-output row count

    # Static valid-column mask (periodic with period Wp, identical for every layer).
    mask = (jnp.arange(g_max) % Wp < W).astype(jnp.float32).reshape(g_max, 1)

    def kernel(x_ref, emb_ref, bias_ref, mask_ref,
               w1_ref, w2_ref, w3_ref, w4_ref, wfc1_ref, wout_ref,
               out_ref, p1, p2, p3, p4, p5):
        bufs = [p1, p2, p3, p4, p5]
        conv_w_refs = [w1_ref, w2_ref, w3_ref, w4_ref]

        # Zero-init the padded activation buffers (VMEM scratch is uninitialized;
        # the zero rows/columns double as the conv width padding).
        for b in bufs:
            b[...] = jnp.zeros(b.shape, jnp.float32)

        biases = bias_ref[...]                      # (8, 128) f32, one vreg

        # --- input_embedding_layer (Linear(1, E)) + leaky_relu, written straight
        #     into the conv-input layout: row = h(=e)*Wp + (w+2), column = time c.
        xv = x_ref[...]                             # (2m, t) f32
        for e in range(E):
            w_e = emb_ref[0, e]
            b_e = emb_ref[1, e]
            p1[pl.ds(LEAD + e * Wp + 2, W), :] = _leaky(xv * w_e + b_e)

        # --- conv{1..4} (k=3, dilation=2, pad=(0,2)) + folded BN + leaky_relu,
        #     each as 9 shifted bf16 matmuls with f32 accumulation.
        for layer in range(4):
            pin, pout = bufs[layer], bufs[layer + 1]
            c_in, c_out = chans[layer], chans[layer + 1]
            g = heights[layer + 1] * Wp
            wref = conv_w_refs[layer]
            acc = jnp.zeros((g, c_out), jnp.float32)
            for kh in range(3):
                for kw in range(3):
                    shift = 2 * kh * Wp + 2 * kw
                    a = pin[pl.ds(LEAD + shift, g), :].astype(jnp.bfloat16)
                    wt = wref[pl.ds((kh * 3 + kw) * c_in, c_in), :]      # (c_in, c_out) bf16
                    acc = acc + jnp.dot(a, wt, preferred_element_type=jnp.float32)
            z = _leaky(acc + biases[layer:layer + 1, :c_out])
            z = z * mask_ref[pl.ds(0, g), :]        # zero cross-row garbage columns
            pout[pl.ds(LEAD + 2, g), :] = z

        # --- interm_fc1 as 16 per-height matmuls directly on the conv4 buffer
        #     (equivalent to cat(split(.,1),2)+transposes), then output_fc + leaky fused.
        c5, h5 = chans[4], heights[4]
        acc = jnp.zeros((W, n1), jnp.float32)
        for h in range(h5):
            a = p5[pl.ds(LEAD + h * Wp + 2, W), :].astype(jnp.bfloat16)  # (2m, c5)
            wt = wfc1_ref[pl.ds(h * c5, c5), :]                          # (c5, n1) bf16
            acc = acc + jnp.dot(a, wt, preferred_element_type=jnp.float32)
        y1 = acc + biases[4:5, :n1]
        # TODO(synk): F.dropout skipped — dropout_rate == 0, exactly as the guard in forward().
        y2 = jnp.dot(y1.astype(jnp.bfloat16), wout_ref[...],
                     preferred_element_type=jnp.float32) + biases[5:6, :out_size]
        out_ref[...] = _leaky(y2)

    vmem = pl.BlockSpec(memory_space=pltpu.MemorySpace.VMEM)
    smem = pl.BlockSpec(memory_space=pltpu.MemorySpace.SMEM)
    scratch = [pltpu.VMEM((LEAD + heights[l] * Wp + TAIL, chans[l]), jnp.float32)
               for l in range(5)]

    # TODO(synk): for large 2m on v7x, add a grid over the width axis with
    # dimension_semantics=("parallel",) so both TensorCores share the work.
    out2d = pl.pallas_call(
        kernel,
        out_shape=jax.ShapeDtypeStruct((W, out_size), jnp.float32),
        in_specs=[vmem, smem, vmem, vmem] + [vmem] * 6,
        out_specs=vmem,
        scratch_shapes=scratch,
    )(x.reshape(W, t).astype(jnp.float32), fp["emb"], fp["biases"], mask,
      fp["w1"], fp["w2"], fp["w3"], fp["w4"], fp["wfc1"], fp["wout"])

    return out2d.reshape(1, W, 1, out_size)


# ----------------------------------------------------------------------------
# Pure-JAX reference (mirrors the PyTorch forward literally) for validation
# ----------------------------------------------------------------------------
def reference_forward(params, x):
    x = x.astype(jnp.float32)[..., None]                       # (1, 2m, t, 1)
    x = _leaky(x @ params["emb_w"].T + params["emb_b"])        # (1, 2m, t, E)
    x = jnp.transpose(x, (0, 3, 2, 1))                         # transpose(1,3)
    x = jnp.transpose(x, (0, 2, 1, 3))                         # transpose(1,2) -> (1,t,E,2m)
    for i in range(1, 5):
        w, b = params[f"conv{i}_w"], params[f"conv{i}_b"]
        x = lax.conv_general_dilated(x, w, (1, 1), ((0, 0), (2, 2)),
                                     rhs_dilation=(2, 2),
                                     dimension_numbers=("NCHW", "OIHW", "NCHW"))
        x = x + b[None, :, None, None]
        g, bb = params[f"bn{i}_g"], params[f"bn{i}_b"]
        m, v = params[f"bn{i}_m"], params[f"bn{i}_v"]
        x = (x - m[None, :, None, None]) / jnp.sqrt(v[None, :, None, None] + BN_EPS)
        x = _leaky(x * g[None, :, None, None] + bb[None, :, None, None])
    N, C, H, W = x.shape
    x = x.reshape(1, 1, C * H, W)                              # cat(split(.,1,dim=1),2)
    x = jnp.transpose(x, (0, 1, 3, 2))                         # transpose(2,3)
    x = jnp.transpose(x, (0, 2, 1, 3))                         # transpose(1,2) -> (1,2m,1,C*H)
    x = x @ params["fc1_w"].T + params["fc1_b"]
    x = x @ params["out_w"].T + params["out_b"]
    return _leaky(x)


# ----------------------------------------------------------------------------
# Deterministic parameter init (shapes from CNNTrajNet.__init__)
# ----------------------------------------------------------------------------
def init_params(key, input_size, embedding_size, output_size):
    ks = jax.random.split(key, 16)
    p = {}
    p["emb_w"] = 0.3 * jax.random.normal(ks[0], (embedding_size, 1), jnp.float32)
    p["emb_b"] = 0.1 * jax.random.normal(ks[1], (embedding_size,), jnp.float32)
    cins = [input_size, 2 * input_size, 4 * input_size, 6 * input_size]
    couts = [2 * input_size, 4 * input_size, 6 * input_size, 8 * input_size]
    for i in range(4):
        kk = jax.random.split(ks[2 + i], 6)
        cin, cout = cins[i], couts[i]
        p[f"conv{i+1}_w"] = (0.5 / (cin * 9) ** 0.5) * jax.random.normal(kk[0], (cout, cin, 3, 3), jnp.float32)
        p[f"conv{i+1}_b"] = 0.05 * jax.random.normal(kk[1], (cout,), jnp.float32)
        p[f"bn{i+1}_g"] = 1.0 + 0.1 * jax.random.normal(kk[2], (cout,), jnp.float32)
        p[f"bn{i+1}_b"] = 0.1 * jax.random.normal(kk[3], (cout,), jnp.float32)
        p[f"bn{i+1}_m"] = 0.05 * jax.random.normal(kk[4], (cout,), jnp.float32)
        p[f"bn{i+1}_v"] = 0.5 + jax.random.uniform(kk[5], (cout,), jnp.float32)
    fc1_in = 8 * 16 * input_size
    fc1_out = 8 * input_size
    p["fc1_w"] = (1.0 / fc1_in ** 0.5) * jax.random.normal(ks[6], (fc1_out, fc1_in), jnp.float32)
    p["fc1_b"] = 0.05 * jax.random.normal(ks[7], (fc1_out,), jnp.float32)
    p["out_w"] = (1.0 / fc1_out ** 0.5) * jax.random.normal(ks[8], (output_size, fc1_out), jnp.float32)
    p["out_b"] = 0.05 * jax.random.normal(ks[9], (output_size,), jnp.float32)
    return p


if __name__ == "__main__":
    # args: input_size = t = 4, embedding_size = 32 (required by interm_fc1 = 8*16*input_size),
    #       output_size = 2, dropout_rate = 0.0; example has m = 3 pedestrians -> 2m = 6.
    input_size, embedding_size, output_size = 4, 32, 2
    two_m, t = 6, input_size

    key = jax.random.PRNGKey(0)
    kp, kx = jax.random.split(key)
    params = init_params(kp, input_size, embedding_size, output_size)
    x = jax.random.normal(kx, (1, two_m, t), jnp.float32)

    fused = prepare_fused_params(params)           # one-time host-side prep (BN fold, packing, bf16)
    out = jax.block_until_ready(cnn_trajnet_forward(fused, x))
    ref = jax.block_until_ready(reference_forward(params, x))

    assert out.shape == (1, two_m, 1, output_size), out.shape
    assert bool(jnp.all(jnp.isfinite(out)))
    max_err = float(jnp.max(jnp.abs(out - ref)))
    assert max_err < 2e-2, f"mismatch vs reference: {max_err}"   # bf16 MXU operands, f32 accumulation

    print("KERNEL_OK")
</pallas_src>

<mosaic_0001>
module attributes {stable_mosaic.version = 11 : i64} {
  func.func @kernel(%arg0: memref<6x4xf32, #tpu.memory_space<vmem>>, %arg1: memref<2x32xf32, #tpu.memory_space<smem>>, %arg2: memref<8x128xf32, #tpu.memory_space<vmem>>, %arg3: memref<280x1xf32, #tpu.memory_space<vmem>>, %arg4: memref<36x8xbf16, #tpu.memory_space<vmem>>, %arg5: memref<72x16xbf16, #tpu.memory_space<vmem>>, %arg6: memref<144x24xbf16, #tpu.memory_space<vmem>>, %arg7: memref<216x32xbf16, #tpu.memory_space<vmem>>, %arg8: memref<512x32xbf16, #tpu.memory_space<vmem>>, %arg9: memref<32x2xbf16, #tpu.memory_space<vmem>>, %arg10: memref<6x2xf32, #tpu.memory_space<vmem>>, %arg11: memref<334x4xf32, #tpu.memory_space<vmem>>, %arg12: memref<294x8xf32, #tpu.memory_space<vmem>>, %arg13: memref<254x16xf32, #tpu.memory_space<vmem>>, %arg14: memref<214x24xf32, #tpu.memory_space<vmem>>, %arg15: memref<174x32xf32, #tpu.memory_space<vmem>>) attributes {dimension_semantics = [], scalar_prefetch = 0 : i64, scratch_operands = 5 : i64, tpu.core_type = #tpu.core_type<tc>} {
    %cst = arith.constant 0.000000e+00 : f32
    %0 = vector.broadcast %cst : f32 to vector<334x4xf32>
    %c0 = arith.constant 0 : index
    %c0_0 = arith.constant 0 : index
    %1 = vector.load %arg11[%c0, %c0_0] : memref<334x4xf32, #tpu.memory_space<vmem>>, vector<334x4xf32>
    tpu.vector_store %arg11[%c0, %c0_0], %0 {strides = array<i32>} : memref<334x4xf32, #tpu.memory_space<vmem>>, vector<334x4xf32>,
    %cst_1 = arith.constant 0.000000e+00 : f32
    %2 = vector.broadcast %cst_1 : f32 to vector<294x8xf32>
    %c0_2 = arith.constant 0 : index
    %c0_3 = arith.constant 0 : index
    %3 = vector.load %arg12[%c0_2, %c0_3] : memref<294x8xf32, #tpu.memory_space<vmem>>, vector<294x8xf32>
    tpu.vector_store %arg12[%c0_2, %c0_3], %2 {strides = array<i32>} : memref<294x8xf32, #tpu.memory_space<vmem>>, vector<294x8xf32>,
    %cst_4 = arith.constant 0.000000e+00 : f32
    %4 = vector.broadcast %cst_4 : f32 to vector<254x16xf32>
    %c0_5 = arith.constant 0 : index
    %c0_6 = arith.constant 0 : index
    %5 = vector.load %arg13[%c0_5, %c0_6] : memref<254x16xf32, #tpu.memory_space<vmem>>, vector<254x16xf32>
    tpu.vector_store %arg13[%c0_5, %c0_6], %4 {strides = array<i32>} : memref<254x16xf32, #tpu.memory_space<vmem>>, vector<254x16xf32>,
    %cst_7 = arith.constant 0.000000e+00 : f32
    %6 = vector.broadcast %cst_7 : f32 to vector<214x24xf32>
    %c0_8 = arith.constant 0 : index
    %c0_9 = arith.constant 0 : index
    %7 = vector.load %arg14[%c0_8, %c0_9] : memref<214x24xf32, #tpu.memory_space<vmem>>, vector<214x24xf32>
    tpu.vector_store %arg14[%c0_8, %c0_9], %6 {strides = array<i32>} : memref<214x24xf32, #tpu.memory_space<vmem>>, vector<214x24xf32>,
    %cst_10 = arith.constant 0.000000e+00 : f32
    %8 = vector.broadcast %cst_10 : f32 to vector<174x32xf32>
    %c0_11 = arith.constant 0 : index
    %c0_12 = arith.constant 0 : index
    %9 = vector.load %arg15[%c0_11, %c0_12] : memref<174x32xf32, #tpu.memory_space<vmem>>, vector<174x32xf32>
    tpu.vector_store %arg15[%c0_11, %c0_12], %8 {strides = array<i32>} : memref<174x32xf32, #tpu.memory_space<vmem>>, vector<174x32xf32>,
    %c0_13 = arith.constant 0 : index
    %c0_14 = arith.constant 0 : index
    %10 = vector.load %arg2[%c0_13, %c0_14] : memref<8x128xf32, #tpu.memory_space<vmem>>, vector<8x128xf32>
    %c0_15 = arith.constant 0 : index
    %c0_16 = arith.constant 0 : index
    %11 = vector.load %arg0[%c0_15, %c0_16] : memref<6x4xf32, #tpu.memory_space<vmem>>, vector<6x4xf32>
    %c0_17 = arith.constant 0 : index
    %c0_18 = arith.constant 0 : index
    %12 = memref.load %arg1[%c0_17, %c0_18] : memref<2x32xf32, #tpu.memory_space<smem>>
    %c1 = arith.constant 1 : index
    %c0_19 = arith.constant 0 : index
    %13 = memref.load %arg1[%c1, %c0_19] : memref<2x32xf32, #tpu.memory_space<smem>>
    %14 = vector.broadcast %12 : f32 to vector<6x4xf32>
    %15 = arith.mulf %11, %14 : vector<6x4xf32>
    %16 = vector.broadcast %13 : f32 to vector<6x4xf32>
    %17 = arith.addf %15, %16 : vector<6x4xf32>
    %cst_20 = arith.constant 0.000000e+00 : f32
    %18 = vector.broadcast %cst_20 : f32 to vector<6x4xf32>
    %19 = arith.cmpf oge, %17, %18 : vector<6x4xf32>
    %cst_21 = arith.constant 0.00999999977 : f32
    %20 = vector.broadcast %cst_21 : f32 to vector<6x4xf32>
    %21 = arith.mulf %20, %17 : vector<6x4xf32>
    %22 = arith.select %19, %17, %21 : vector<6x4xi1>, vector<6x4xf32>
    %c8 = arith.constant 8 : index
    %c0_22 = arith.constant 0 : index
    %23 = vector.load %arg11[%c8, %c0_22] : memref<334x4xf32, #tpu.memory_space<vmem>>, vector<6x4xf32>
    tpu.vector_store %arg11[%c8, %c0_22], %22 {strides = array<i32>} : memref<334x4xf32, #tpu.memory_space<vmem>>, vector<6x4xf32>,
    %c0_23 = arith.constant 0 : index
    %c1_24 = arith.constant 1 : index
    %24 = memref.load %arg1[%c0_23, %c1_24] : memref<2x32xf32, #tpu.memory_space<smem>>
    %c1_25 = arith.constant 1 : index
    %c1_26 = arith.constant 1 : index
    %25 = memref.load %arg1[%c1_25, %c1_26] : memref<2x32xf32, #tpu.memory_space<smem>>
    %26 = vector.broadcast %24 : f32 to vector<6x4xf32>
    %27 = arith.mulf %11, %26 : vector<6x4xf32>
    %28 = vector.broadcast %25 : f32 to vector<6x4xf32>
    %29 = arith.addf %27, %28 : vector<6x4xf32>
    %cst_27 = arith.constant 0.000000e+00 : f32
    %30 = vector.broadcast %cst_27 : f32 to vector<6x4xf32>
    %31 = arith.cmpf oge, %29, %30 : vector<6x4xf32>
    %cst_28 = arith.constant 0.00999999977 : f32
    %32 = vector.broadcast %cst_28 : f32 to vector<6x4xf32>
    %33 = arith.mulf %32, %29 : vector<6x4xf32>
    %34 = arith.select %31, %29, %33 : vector<6x4xi1>, vector<6x4xf32>
    %c18 = arith.constant 18 : index
    %c0_29 = arith.constant 0 : index
    %35 = vector.load %arg11[%c18, %c0_29] : memref<334x4xf32, #tpu.memory_space<vmem>>, vector<6x4xf32>
    tpu.vector_store %arg11[%c18, %c0_29], %34 {strides = array<i32>} : memref<334x4xf32, #tpu.memory_space<vmem>>, vector<6x4xf32>,
    %c0_30 = arith.constant 0 : index
    %c2 = arith.constant 2 : index
    %36 = memref.load %arg1[%c0_30, %c2] : memref<2x32xf32, #tpu.memory_space<smem>>
    %c1_31 = arith.constant 1 : index
    %c2_32 = arith.constant 2 : index
    %37 = memref.load %arg1[%c1_31, %c2_32] : memref<2x32xf32, #tpu.memory_space<smem>>
    %38 = vector.broadcast %36 : f32 to vector<6x4xf32>
    %39 = arith.mulf %11, %38 : vector<6x4xf32>
    %40 = vector.broadcast %37 : f32 to vector<6x4xf32>
    %41 = arith.addf %39, %40 : vector<6x4xf32>
    %cst_33 = arith.constant 0.000000e+00 : f32
    %42 = vector.broadcast %cst_33 : f32 to vector<6x4xf32>
    %43 = arith.cmpf oge, %41, %42 : vector<6x4xf32>
    %cst_34 = arith.constant 0.00999999977 : f32
    %44 = vector.broadcast %cst_34 : f32 to vector<6x4xf32>
    %45 = arith.mulf %44, %41 : vector<6x4xf32>
    %46 = arith.select %43, %41, %45 : vector<6x4xi1>, vector<6x4xf32>
    %c28 = arith.constant 28 : index
    %c0_35 = arith.constant 0 : index
    %47 = vector.load %arg11[%c28, %c0_35] : memref<334x4xf32, #tpu.memory_space<vmem>>, vector<6x4xf32>
    tpu.vector_store %arg11[%c28, %c0_35], %46 {strides = array<i32>} : memref<334x4xf32, #tpu.memory_space<vmem>>, vector<6x4xf32>,
    %c0_36 = arith.constant 0 : index
    %c3 = arith.constant 3 : index
    %48 = memref.load %arg1[%c0_36, %c3] : memref<2x32xf32, #tpu.memory_space<smem>>
    %c1_37 = arith.constant 1 : index
    %c3_38 = arith.constant 3 : index
    %49 = memref.load %arg1[%c1_37, %c3_38] : memref<2x32xf32, #tpu.memory_space<smem>>
    %50 = vector.broadcast %48 : f32 to vector<6x4xf32>
    %51 = arith.mulf %11, %50 : vector<6x4xf32>
    %52 = vector.broadcast %49 : f32 to vector<6x4xf32>
    %53 = arith.addf %51, %52 : vector<6x4xf32>
    %cst_39 = arith.constant 0.000000e+00 : f32
    %54 = vector.broadcast %cst_39 : f32 to vector<6x4xf32>
    %55 = arith.cmpf oge, %53, %54 : vector<6x4xf32>
    %cst_40 = arith.constant 0.00999999977 : f32
    %56 = vector.broadcast %cst_40 : f32 to vector<6x4xf32>
    %57 = arith.mulf %56, %53 : vector<6x4xf32>
    %58 = arith.select %55, %53, %57 : vector<6x4xi1>, vector<6x4xf32>
    %c38 = arith.constant 38 : index
    %c0_41 = arith.constant 0 : index
    %59 = vector.load %arg11[%c38, %c0_41] : memref<334x4xf32, #tpu.memory_space<vmem>>, vector<6x4xf32>
    tpu.vector_store %arg11[%c38, %c0_41], %58 {strides = array<i32>} : memref<334x4xf32, #tpu.memory_space<vmem>>, vector<6x4xf32>,
    %c0_42 = arith.constant 0 : index
    %c4 = arith.constant 4 : index
    %60 = memref.load %arg1[%c0_42, %c4] : memref<2x32xf32, #tpu.memory_space<smem>>
    %c1_43 = arith.constant 1 : index
    %c4_44 = arith.constant 4 : index
    %61 = memref.load %arg1[%c1_43, %c4_44] : memref<2x32xf32, #tpu.memory_space<smem>>
    %62 = vector.broadcast %60 : f32 to vector<6x4xf32>
    %63 = arith.mulf %11, %62 : vector<6x4xf32>
    %64 = vector.broadcast %61 : f32 to vector<6x4xf32>
    %65 = arith.addf %63, %64 : vector<6x4xf32>
    %cst_45 = arith.constant 0.000000e+00 : f32
    %66 = vector.broadcast %cst_45 : f32 to vector<6x4xf32>
    %67 = arith.cmpf oge, %65, %66 : vector<6x4xf32>
    %cst_46 = arith.constant 0.00999999977 : f32
    %68 = vector.broadcast %cst_46 : f32 to vector<6x4xf32>
    %69 = arith.mulf %68, %65 : vector<6x4xf32>
    %70 = arith.select %67, %65, %69 : vector<6x4xi1>, vector<6x4xf32>
    %c48 = arith.constant 48 : index
    %c0_47 = arith.constant 0 : index
    %71 = vector.load %arg11[%c48, %c0_47] : memref<334x4xf32, #tpu.memory_space<vmem>>, vector<6x4xf32>
    tpu.vector_store %arg11[%c48, %c0_47], %70 {strides = array<i32>} : memref<334x4xf32, #tpu.memory_space<vmem>>, vector<6x4xf32>,
    %c0_48 = arith.constant 0 : index
    %c5 = arith.constant 5 : index
    %72 = memref.load %arg1[%c0_48, %c5] : memref<2x32xf32, #tpu.memory_space<smem>>
    %c1_49 = arith.constant 1 : index
    %c5_50 = arith.constant 5 : index
    %73 = memref.load %arg1[%c1_49, %c5_50] : memref<2x32xf32, #tpu.memory_space<smem>>
    %74 = vector.broadcast %72 : f32 to vector<6x4xf32>
    %75 = arith.mulf %11, %74 : vector<6x4xf32>
    %76 = vector.broadcast %73 : f32 to vector<6x4xf32>
    %77 = arith.addf %75, %76 : vector<6x4xf32>
    %cst_51 = arith.constant 0.000000e+00 : f32
    %78 = vector.broadcast %cst_51 : f32 to vector<6x4xf32>
    %79 = arith.cmpf oge, %77, %78 : vector<6x4xf32>
    %cst_52 = arith.constant 0.00999999977 : f32
    %80 = vector.broadcast %cst_52 : f32 to vector<6x4xf32>
    %81 = arith.mulf %80, %77 : vector<6x4xf32>
    %82 = arith.select %79, %77, %81 : vector<6x4xi1>, vector<6x4xf32>
    %c58 = arith.constant 58 : index
    %c0_53 = arith.constant 0 : index
    %83 = vector.load %arg11[%c58, %c0_53] : memref<334x4xf32, #tpu.memory_space<vmem>>, vector<6x4xf32>
    tpu.vector_store %arg11[%c58, %c0_53], %82 {strides = array<i32>} : memref<334x4xf32, #tpu.memory_space<vmem>>, vector<6x4xf32>,
    %c0_54 = arith.constant 0 : index
    %c6 = arith.constant 6 : index
    %84 = memref.load %arg1[%c0_54, %c6] : memref<2x32xf32, #tpu.memory_space<smem>>
    %c1_55 = arith.constant 1 : index
    %c6_56 = arith.constant 6 : index
    %85 = memref.load %arg1[%c1_55, %c6_56] : memref<2x32xf32, #tpu.memory_space<smem>>
    %86 = vector.broadcast %84 : f32 to vector<6x4xf32>
    %87 = arith.mulf %11, %86 : vector<6x4xf32>
    %88 = vector.broadcast %85 : f32 to vector<6x4xf32>
    %89 = arith.addf %87, %88 : vector<6x4xf32>
    %cst_57 = arith.constant 0.000000e+00 : f32
    %90 = vector.broadcast %cst_57 : f32 to vector<6x4xf32>
    %91 = arith.cmpf oge, %89, %90 : vector<6x4xf32>
    %cst_58 = arith.constant 0.00999999977 : f32
    %92 = vector.broadcast %cst_58 : f32 to vector<6x4xf32>
    %93 = arith.mulf %92, %89 : vector<6x4xf32>
    %94 = arith.select %91, %89, %93 : vector<6x4xi1>, vector<6x4xf32>
    %c68 = arith.constant 68 : index
    %c0_59 = arith.constant 0 : index
    %95 = vector.load %arg11[%c68, %c0_59] : memref<334x4xf32, #tpu.memory_space<vmem>>, vector<6x4xf32>
    tpu.vector_store %arg11[%c68, %c0_59], %94 {strides = array<i32>} : memref<334x4xf32, #tpu.memory_space<vmem>>, vector<6x4xf32>,
    %c0_60 = arith.constant 0 : index
    %c7 = arith.constant 7 : index
    %96 = memref.load %arg1[%c0_60, %c7] : memref<2x32xf32, #tpu.memory_space<smem>>
    %c1_61 = arith.constant 1 : index
    %c7_62 = arith.constant 7 : index
    %97 = memref.load %arg1[%c1_61, %c7_62] : memref<2x32xf32, #tpu.memory_space<smem>>
    %98 = vector.broadcast %96 : f32 to vector<6x4xf32>
    %99 = arith.mulf %11, %98 : vector<6x4xf32>
    %100 = vector.broadcast %97 : f32 to vector<6x4xf32>
    %101 = arith.addf %99, %100 : vector<6x4xf32>
    %cst_63 = arith.constant 0.000000e+00 : f32
    %102 = vector.broadcast %cst_63 : f32 to vector<6x4xf32>
    %103 = arith.cmpf oge, %101, %102 : vector<6x4xf32>
    %cst_64 = arith.constant 0.00999999977 : f32
    %104 = vector.broadcast %cst_64 : f32 to vector<6x4xf32>
    %105 = arith.mulf %104, %101 : vector<6x4xf32>
    %106 = arith.select %103, %101, %105 : vector<6x4xi1>, vector<6x4xf32>
    %c78 = arith.constant 78 : index
    %c0_65 = arith.constant 0 : index
    %107 = vector.load %arg11[%c78, %c0_65] : memref<334x4xf32, #tpu.memory_space<vmem>>, vector<6x4xf32>
    tpu.vector_store %arg11[%c78, %c0_65], %106 {strides = array<i32>} : memref<334x4xf32, #tpu.memory_space<vmem>>, vector<6x4xf32>,
    %c0_66 = arith.constant 0 : index
    %c8_67 = arith.constant 8 : index
    %108 = memref.load %arg1[%c0_66, %c8_67] : memref<2x32xf32, #tpu.memory_space<smem>>
    %c1_68 = arith.constant 1 : index
    %c8_69 = arith.constant 8 : index
    %109 = memref.load %arg1[%c1_68, %c8_69] : memref<2x32xf32, #tpu.memory_space<smem>>
    %110 = vector.broadcast %108 : f32 to vector<6x4xf32>
    %111 = arith.mulf %11, %110 : vector<6x4xf32>
    %112 = vector.broadcast %109 : f32 to vector<6x4xf32>
    %113 = arith.addf %111, %112 : vector<6x4xf32>
    %cst_70 = arith.constant 0.000000e+00 : f32
    %114 = vector.broadcast %cst_70 : f32 to vector<6x4xf32>
    %115 = arith.cmpf oge, %113, %114 : vector<6x4xf32>
    %cst_71 = arith.constant 0.00999999977 : f32
    %116 = vector.broadcast %cst_71 : f32 to vector<6x4xf32>
    %117 = arith.mulf %116, %113 : vector<6x4xf32>
    %118 = arith.select %115, %113, %117 : vector<6x4xi1>, vector<6x4xf32>
    %c88 = arith.constant 88 : index
    %c0_72 = arith.constant 0 : index
    %119 = vector.load %arg11[%c88, %c0_72] : memref<334x4xf32, #tpu.memory_space<vmem>>, vector<6x4xf32>
    tpu.vector_store %arg11[%c88, %c0_72], %118 {strides = array<i32>} : memref<334x4xf32, #tpu.memory_space<vmem>>, vector<6x4xf32>,
    %c0_73 = arith.constant 0 : index
    %c9 = arith.constant 9 : index
    %120 = memref.load %arg1[%c0_73, %c9] : memref<2x32xf32, #tpu.memory_space<smem>>
    %c1_74 = arith.constant 1 : index
    %c9_75 = arith.constant 9 : index
    %121 = memref.load %arg1[%c1_74, %c9_75] : memref<2x32xf32, #tpu.memory_space<smem>>
    %122 = vector.broadcast %120 : f32 to vector<6x4xf32>
    %123 = arith.mulf %11, %122 : vector<6x4xf32>
    %124 = vector.broadcast %121 : f32 to vector<6x4xf32>
    %125 = arith.addf %123, %124 : vector<6x4xf32>
    %cst_76 = arith.constant 0.000000e+00 : f32
    %126 = vector.broadcast %cst_76 : f32 to vector<6x4xf32>
    %127 = arith.cmpf oge, %125, %126 : vector<6x4xf32>
    %cst_77 = arith.constant 0.00999999977 : f32
    %128 = vector.broadcast %cst_77 : f32 to vector<6x4xf32>
    %129 = arith.mulf %128, %125 : vector<6x4xf32>
    %130 = arith.select %127, %125, %129 : vector<6x4xi1>, vector<6x4xf32>
    %c98 = arith.constant 98 : index
    %c0_78 = arith.constant 0 : index
    %131 = vector.load %arg11[%c98, %c0_78] : memref<334x4xf32, #tpu.memory_space<vmem>>, vector<6x4xf32>
    tpu.vector_store %arg11[%c98, %c0_78], %130 {strides = array<i32>} : memref<334x4xf32, #tpu.memory_space<vmem>>, vector<6x4xf32>,
    %c0_79 = arith.constant 0 : index
    %c10 = arith.constant 10 : index
    %132 = memref.load %arg1[%c0_79, %c10] : memref<2x32xf32, #tpu.memory_space<smem>>
    %c1_80 = arith.constant 1 : index
    %c10_81 = arith.constant 10 : index
    %133 = memref.load %arg1[%c1_80, %c10_81] : memref<2x32xf32, #tpu.memory_space<smem>>
    %134 = vector.broadcast %132 : f32 to vector<6x4xf32>
    %135 = arith.mulf %11, %134 : vector<6x4xf32>
    %136 = vector.broadcast %133 : f32 to vector<6x4xf32>
    %137 = arith.addf %135, %136 : vector<6x4xf32>
    %cst_82 = arith.constant 0.000000e+00 : f32
    %138 = vector.broadcast %cst_82 : f32 to vector<6x4xf32>
    %139 = arith.cmpf oge, %137, %138 : vector<6x4xf32>
    %cst_83 = arith.constant 0.00999999977 : f32
    %140 = vector.broadcast %cst_83 : f32 to vector<6x4xf32>
    %141 = arith.mulf %140, %137 : vector<6x4xf32>
    %142 = arith.select %139, %137, %141 : vector<6x4xi1>, vector<6x4xf32>
    %c108 = arith.constant 108 : index
    %c0_84 = arith.constant 0 : index
    %143 = vector.load %arg11[%c108, %c0_84] : memref<334x4xf32, #tpu.memory_space<vmem>>, vector<6x4xf32>
    tpu.vector_store %arg11[%c108, %c0_84], %142 {strides = array<i32>} : memref<334x4xf32, #tpu.memory_space<vmem>>, vector<6x4xf32>,
    %c0_85 = arith.constant 0 : index
    %c11 = arith.constant 11 : index
    %144 = memref.load %arg1[%c0_85, %c11] : memref<2x32xf32, #tpu.memory_space<smem>>
    %c1_86 = arith.constant 1 : index
    %c11_87 = arith.constant 11 : index
    %145 = memref.load %arg1[%c1_86, %c11_87] : memref<2x32xf32, #tpu.memory_space<smem>>
    %146 = vector.broadcast %144 : f32 to vector<6x4xf32>
    %147 = arith.mulf %11, %146 : vector<6x4xf32>
    %148 = vector.broadcast %145 : f32 to vector<6x4xf32>
    %149 = arith.addf %147, %148 : vector<6x4xf32>
    %cst_88 = arith.constant 0.000000e+00 : f32
    %150 = vector.broadcast %cst_88 : f32 to vector<6x4xf32>
    %151 = arith.cmpf oge, %149, %150 : vector<6x4xf32>
    %cst_89 = arith.constant 0.00999999977 : f32
    %152 = vector.broadcast %cst_89 : f32 to vector<6x4xf32>
    %153 = arith.mulf %152, %149 : vector<6x4xf32>
    %154 = arith.select %151, %149, %153 : vector<6x4xi1>, vector<6x4xf32>
    %c118 = arith.constant 118 : index
    %c0_90 = arith.constant 0 : index
    %155 = vector.load %arg11[%c118, %c0_90] : memref<334x4xf32, #tpu.memory_space<vmem>>, vector<6x4xf32>
    tpu.vector_store %arg11[%c118, %c0_90], %154 {strides = array<i32>} : memref<334x4xf32, #tpu.memory_space<vmem>>, vector<6x4xf32>,
    %c0_91 = arith.constant 0 : index
    %c12 = arith.constant 12 : index
    %156 = memref.load %arg1[%c0_91, %c12] : memref<2x32xf32, #tpu.memory_space<smem>>
    %c1_92 = arith.constant 1 : index
    %c12_93 = arith.constant 12 : index
    %157 = memref.load %arg1[%c1_92, %c12_93] : memref<2x32xf32, #tpu.memory_space<smem>>
    %158 = vector.broadcast %156 : f32 to vector<6x4xf32>
    %159 = arith.mulf %11, %158 : vector<6x4xf32>
    %160 = vector.broadcast %157 : f32 to vector<6x4xf32>
    %161 = arith.addf %159, %160 : vector<6x4xf32>
    %cst_94 = arith.constant 0.000000e+00 : f32
    %162 = vector.broadcast %cst_94 : f32 to vector<6x4xf32>
    %163 = arith.cmpf oge, %161, %162 : vector<6x4xf32>
    %cst_95 = arith.constant 0.00999999977 : f32
    %164 = vector.broadcast %cst_95 : f32 to vector<6x4xf32>
    %165 = arith.mulf %164, %161 : vector<6x4xf32>
    %166 = arith.select %163, %161, %165 : vector<6x4xi1>, vector<6x4xf32>
    %c128 = arith.constant 128 : index
    %c0_96 = arith.constant 0 : index
    %167 = vector.load %arg11[%c128, %c0_96] : memref<334x4xf32, #tpu.memory_space<vmem>>, vector<6x4xf32>
    tpu.vector_store %arg11[%c128, %c0_96], %166 {strides = array<i32>} : memref<334x4xf32, #tpu.memory_space<vmem>>, vector<6x4xf32>,
    %c0_97 = arith.constant 0 : index
    %c13 = arith.constant 13 : index
    %168 = memref.load %arg1[%c0_97, %c13] : memref<2x32xf32, #tpu.memory_space<smem>>
    %c1_98 = arith.constant 1 : index
    %c13_99 = arith.constant 13 : index
    %169 = memref.load %arg1[%c1_98, %c13_99] : memref<2x32xf32, #tpu.memory_space<smem>>
    %170 = vector.broadcast %168 : f32 to vector<6x4xf32>
    %171 = arith.mulf %11, %170 : vector<6x4xf32>
    %172 = vector.broadcast %169 : f32 to vector<6x4xf32>
    %173 = arith.addf %171, %172 : vector<6x4xf32>
    %cst_100 = arith.constant 0.000000e+00 : f32
    %174 = vector.broadcast %cst_100 : f32 to vector<6x4xf32>
    %175 = arith.cmpf oge, %173, %174 : vector<6x4xf32>
    %cst_101 = arith.constant 0.00999999977 : f32
    %176 = vector.broadcast %cst_101 : f32 to vector<6x4xf32>
    %177 = arith.mulf %176, %173 : vector<6x4xf32>
    %178 = arith.select %175, %173, %177 : vector<6x4xi1>, vector<6x4xf32>
    %c138 = arith.constant 138 : index
    %c0_102 = arith.constant 0 : index
    %179 = vector.load %arg11[%c138, %c0_102] : memref<334x4xf32, #tpu.memory_space<vmem>>, vector<6x4xf32>
    tpu.vector_store %arg11[%c138, %c0_102], %178 {strides = array<i32>} : memref<334x4xf32, #tpu.memory_space<vmem>>, vector<6x4xf32>,
    %c0_103 = arith.constant 0 : index
    %c14 = arith.constant 14 : index
    %180 = memref.load %arg1[%c0_103, %c14] : memref<2x32xf32, #tpu.memory_space<smem>>
    %c1_104 = arith.constant 1 : index
    %c14_105 = arith.constant 14 : index
    %181 = memref.load %arg1[%c1_104, %c14_105] : memref<2x32xf32, #tpu.memory_space<smem>>
    %182 = vector.broadcast %180 : f32 to vector<6x4xf32>
    %183 = arith.mulf %11, %182 : vector<6x4xf32>
    %184 = vector.broadcast %181 : f32 to vector<6x4xf32>
    %185 = arith.addf %183, %184 : vector<6x4xf32>
    %cst_106 = arith.constant 0.000000e+00 : f32
    %186 = vector.broadcast %cst_106 : f32 to vector<6x4xf32>
    %187 = arith.cmpf oge, %185, %186 : vector<6x4xf32>
    %cst_107 = arith.constant 0.00999999977 : f32
    %188 = vector.broadcast %cst_107 : f32 to vector<6x4xf32>
    %189 = arith.mulf %188, %185 : vector<6x4xf32>
    %190 = arith.select %187, %185, %189 : vector<6x4xi1>, vector<6x4xf32>
    %c148 = arith.constant 148 : index
    %c0_108 = arith.constant 0 : index
    %191 = vector.load %arg11[%c148, %c0_108] : memref<334x4xf32, #tpu.memory_space<vmem>>, vector<6x4xf32>
    tpu.vector_store %arg11[%c148, %c0_108], %190 {strides = array<i32>} : memref<334x4xf32, #tpu.memory_space<vmem>>, vector<6x4xf32>,
    %c0_109 = arith.constant 0 : index
    %c15 = arith.constant 15 : index
    %192 = memref.load %arg1[%c0_109, %c15] : memref<2x32xf32, #tpu.memory_space<smem>>
    %c1_110 = arith.constant 1 : index
    %c15_111 = arith.constant 15 : index
    %193 = memref.load %arg1[%c1_110, %c15_111] : memref<2x32xf32, #tpu.memory_space<smem>>
    %194 = vector.broadcast %192 : f32 to vector<6x4xf32>
    %195 = arith.mulf %11, %194 : vector<6x4xf32>
    %196 = vector.broadcast %193 : f32 to vector<6x4xf32>
    %197 = arith.addf %195, %196 : vector<6x4xf32>
    %cst_112 = arith.constant 0.000000e+00 : f32
    %198 = vector.broadcast %cst_112 : f32 to vector<6x4xf32>
    %199 = arith.cmpf oge, %197, %198 : vector<6x4xf32>
    %cst_113 = arith.constant 0.00999999977 : f32
    %200 = vector.broadcast %cst_113 : f32 to vector<6x4xf32>
    %201 = arith.mulf %200, %197 : vector<6x4xf32>
    %202 = arith.select %199, %197, %201 : vector<6x4xi1>, vector<6x4xf32>
    %c158 = arith.constant 158 : index
    %c0_114 = arith.constant 0 : index
    %203 = vector.load %arg11[%c158, %c0_114] : memref<334x4xf32, #tpu.memory_space<vmem>>, vector<6x4xf32>
    tpu.vector_store %arg11[%c158, %c0_114], %202 {strides = array<i32>} : memref<334x4xf32, #tpu.memory_space<vmem>>, vector<6x4xf32>,
    %c0_115 = arith.constant 0 : index
    %c16 = arith.constant 16 : index
    %204 = memref.load %arg1[%c0_115, %c16] : memref<2x32xf32, #tpu.memory_space<smem>>
    %c1_116 = arith.constant 1 : index
    %c16_117 = arith.constant 16 : index
    %205 = memref.load %arg1[%c1_116, %c16_117] : memref<2x32xf32, #tpu.memory_space<smem>>
    %206 = vector.broadcast %204 : f32 to vector<6x4xf32>
    %207 = arith.mulf %11, %206 : vector<6x4xf32>
    %208 = vector.broadcast %205 : f32 to vector<6x4xf32>
    %209 = arith.addf %207, %208 : vector<6x4xf32>
    %cst_118 = arith.constant 0.000000e+00 : f32
    %210 = vector.broadcast %cst_118 : f32 to vector<6x4xf32>
    %211 = arith.cmpf oge, %209, %210 : vector<6x4xf32>
    %cst_119 = arith.constant 0.00999999977 : f32
    %212 = vector.broadcast %cst_119 : f32 to vector<6x4xf32>
    %213 = arith.mulf %212, %209 : vector<6x4xf32>
    %214 = arith.select %211, %209, %213 : vector<6x4xi1>, vector<6x4xf32>
    %c168 = arith.constant 168 : index
    %c0_120 = arith.constant 0 : index
    %215 = vector.load %arg11[%c168, %c0_120] : memref<334x4xf32, #tpu.memory_space<vmem>>, vector<6x4xf32>
    tpu.vector_store %arg11[%c168, %c0_120], %214 {strides = array<i32>} : memref<334x4xf32, #tpu.memory_space<vmem>>, vector<6x4xf32>,
    %c0_121 = arith.constant 0 : index
    %c17 = arith.constant 17 : index
    %216 = memref.load %arg1[%c0_121, %c17] : memref<2x32xf32, #tpu.memory_space<smem>>
    %c1_122 = arith.constant 1 : index
    %c17_123 = arith.constant 17 : index
    %217 = memref.load %arg1[%c1_122, %c17_123] : memref<2x32xf32, #tpu.memory_space<smem>>
    %218 = vector.broadcast %216 : f32 to vector<6x4xf32>
    %219 = arith.mulf %11, %218 : vector<6x4xf32>
    %220 = vector.broadcast %217 : f32 to vector<6x4xf32>
    %221 = arith.addf %219, %220 : vector<6x4xf32>
    %cst_124 = arith.constant 0.000000e+00 : f32
    %222 = vector.broadcast %cst_124 : f32 to vector<6x4xf32>
    %223 = arith.cmpf oge, %221, %222 : vector<6x4xf32>
    %cst_125 = arith.constant 0.00999999977 : f32
    %224 = vector.broadcast %cst_125 : f32 to vector<6x4xf32>
    %225 = arith.mulf %224, %221 : vector<6x4xf32>
    %226 = arith.select %223, %221, %225 : vector<6x4xi1>, vector<6x4xf32>
    %c178 = arith.constant 178 : index
    %c0_126 = arith.constant 0 : index
    %227 = vector.load %arg11[%c178, %c0_126] : memref<334x4xf32, #tpu.memory_space<vmem>>, vector<6x4xf32>
    tpu.vector_store %arg11[%c178, %c0_126], %226 {strides = array<i32>} : memref<334x4xf32, #tpu.memory_space<vmem>>, vector<6x4xf32>,
    %c0_127 = arith.constant 0 : index
    %c18_128 = arith.constant 18 : index
    %228 = memref.load %arg1[%c0_127, %c18_128] : memref<2x32xf32, #tpu.memory_space<smem>>
    %c1_129 = arith.constant 1 : index
    %c18_130 = arith.constant 18 : index
    %229 = memref.load %arg1[%c1_129, %c18_130] : memref<2x32xf32, #tpu.memory_space<smem>>
    %230 = vector.broadcast %228 : f32 to vector<6x4xf32>
    %231 = arith.mulf %11, %230 : vector<6x4xf32>
    %232 = vector.broadcast %229 : f32 to vector<6x4xf32>
    %233 = arith.addf %231, %232 : vector<6x4xf32>
    %cst_131 = arith.constant 0.000000e+00 : f32
    %234 = vector.broadcast %cst_131 : f32 to vector<6x4xf32>
    %235 = arith.cmpf oge, %233, %234 : vector<6x4xf32>
    %cst_132 = arith.constant 0.00999999977 : f32
    %236 = vector.broadcast %cst_132 : f32 to vector<6x4xf32>
    %237 = arith.mulf %236, %233 : vector<6x4xf32>
    %238 = arith.select %235, %233, %237 : vector<6x4xi1>, vector<6x4xf32>
    %c188 = arith.constant 188 : index
    %c0_133 = arith.constant 0 : index
    %239 = vector.load %arg11[%c188, %c0_133] : memref<334x4xf32, #tpu.memory_space<vmem>>, vector<6x4xf32>
    tpu.vector_store %arg11[%c188, %c0_133], %238 {strides = array<i32>} : memref<334x4xf32, #tpu.memory_space<vmem>>, vector<6x4xf32>,
    %c0_134 = arith.constant 0 : index
    %c19 = arith.constant 19 : index
    %240 = memref.load %arg1[%c0_134, %c19] : memref<2x32xf32, #tpu.memory_space<smem>>
    %c1_135 = arith.constant 1 : index
    %c19_136 = arith.constant 19 : index
    %241 = memref.load %arg1[%c1_135, %c19_136] : memref<2x32xf32, #tpu.memory_space<smem>>
    %242 = vector.broadcast %240 : f32 to vector<6x4xf32>
    %243 = arith.mulf %11, %242 : vector<6x4xf32>
    %244 = vector.broadcast %241 : f32 to vector<6x4xf32>
    %245 = arith.addf %243, %244 : vector<6x4xf32>
    %cst_137 = arith.constant 0.000000e+00 : f32
    %246 = vector.broadcast %cst_137 : f32 to vector<6x4xf32>
    %247 = arith.cmpf oge, %245, %246 : vector<6x4xf32>
    %cst_138 = arith.constant 0.00999999977 : f32
    %248 = vector.broadcast %cst_138 : f32 to vector<6x4xf32>
    %249 = arith.mulf %248, %245 : vector<6x4xf32>
    %250 = arith.select %247, %245, %249 : vector<6x4xi1>, vector<6x4xf32>
    %c198 = arith.constant 198 : index
    %c0_139 = arith.constant 0 : index
    %251 = vector.load %arg11[%c198, %c0_139] : memref<334x4xf32, #tpu.memory_space<vmem>>, vector<6x4xf32>
    tpu.vector_store %arg11[%c198, %c0_139], %250 {strides = array<i32>} : memref<334x4xf32, #tpu.memory_space<vmem>>, vector<6x4xf32>,
    %c0_140 = arith.constant 0 : index
    %c20 = arith.constant 20 : index
    %252 = memref.load %arg1[%c0_140, %c20] : memref<2x32xf32, #tpu.memory_space<smem>>
    %c1_141 = arith.constant 1 : index
    %c20_142 = arith.constant 20 : index
    %253 = memref.load %arg1[%c1_141, %c20_142] : memref<2x32xf32, #tpu.memory_space<smem>>
    %254 = vector.broadcast %252 : f32 to vector<6x4xf32>
    %255 = arith.mulf %11, %254 : vector<6x4xf32>
    %256 = vector.broadcast %253 : f32 to vector<6x4xf32>
    %257 = arith.addf %255, %256 : vector<6x4xf32>
    %cst_143 = arith.constant 0.000000e+00 : f32
    %258 = vector.broadcast %cst_143 : f32 to vector<6x4xf32>
    %259 = arith.cmpf oge, %257, %258 : vector<6x4xf32>
    %cst_144 = arith.constant 0.00999999977 : f32
    %260 = vector.broadcast %cst_144 : f32 to vector<6x4xf32>
    %261 = arith.mulf %260, %257 : vector<6x4xf32>
    %262 = arith.select %259, %257, %261 : vector<6x4xi1>, vector<6x4xf32>
    %c208 = arith.constant 208 : index
    %c0_145 = arith.constant 0 : index
    %263 = vector.load %arg11[%c208, %c0_145] : memref<334x4xf32, #tpu.memory_space<vmem>>, vector<6x4xf32>
    tpu.vector_store %arg11[%c208, %c0_145], %262 {strides = array<i32>} : memref<334x4xf32, #tpu.memory_space<vmem>>, vector<6x4xf32>,
    %c0_146 = arith.constant 0 : index
    %c21 = arith.constant 21 : index
    %264 = memref.load %arg1[%c0_146, %c21] : memref<2x32xf32, #tpu.memory_space<smem>>
    %c1_147 = arith.constant 1 : index
    %c21_148 = arith.constant 21 : index
    %265 = memref.load %arg1[%c1_147, %c21_148] : memref<2x32xf32, #tpu.memory_space<smem>>
    %266 = vector.broadcast %264 : f32 to vector<6x4xf32>
    %267 = arith.mulf %11, %266 : vector<6x4xf32>
    %268 = vector.broadcast %265 : f32 to vector<6x4xf32>
    %269 = arith.addf %267, %268 : vector<6x4xf32>
    %cst_149 = arith.constant 0.000000e+00 : f32
    %270 = vector.broadcast %cst_149 : f32 to vector<6x4xf32>
    %271 = arith.cmpf oge, %269, %270 : vector<6x4xf32>
    %cst_150 = arith.constant 0.00999999977 : f32
    %272 = vector.broadcast %cst_150 : f32 to vector<6x4xf32>
    %273 = arith.mulf %272, %269 : vector<6x4xf32>
    %274 = arith.select %271, %269, %273 : vector<6x4xi1>, vector<6x4xf32>
    %c218 = arith.constant 218 : index
    %c0_151 = arith.constant 0 : index
    %275 = vector.load %arg11[%c218, %c0_151] : memref<334x4xf32, #tpu.memory_space<vmem>>, vector<6x4xf32>
    tpu.vector_store %arg11[%c218, %c0_151], %274 {strides = array<i32>} : memref<334x4xf32, #tpu.memory_space<vmem>>, vector<6x4xf32>,
    %c0_152 = arith.constant 0 : index
    %c22 = arith.constant 22 : index
    %276 = memref.load %arg1[%c0_152, %c22] : memref<2x32xf32, #tpu.memory_space<smem>>
    %c1_153 = arith.constant 1 : index
    %c22_154 = arith.constant 22 : index
    %277 = memref.load %arg1[%c1_153, %c22_154] : memref<2x32xf32, #tpu.memory_space<smem>>
    %278 = vector.broadcast %276 : f32 to vector<6x4xf32>
    %279 = arith.mulf %11, %278 : vector<6x4xf32>
    %280 = vector.broadcast %277 : f32 to vector<6x4xf32>
    %281 = arith.addf %279, %280 : vector<6x4xf32>
    %cst_155 = arith.constant 0.000000e+00 : f32
    %282 = vector.broadcast %cst_155 : f32 to vector<6x4xf32>
    %283 = arith.cmpf oge, %281, %282 : vector<6x4xf32>
    %cst_156 = arith.constant 0.00999999977 : f32
    %284 = vector.broadcast %cst_156 : f32 to vector<6x4xf32>
    %285 = arith.mulf %284, %281 : vector<6x4xf32>
    %286 = arith.select %283, %281, %285 : vector<6x4xi1>, vector<6x4xf32>
    %c228 = arith.constant 228 : index
    %c0_157 = arith.constant 0 : index
    %287 = vector.load %arg11[%c228, %c0_157] : memref<334x4xf32, #tpu.memory_space<vmem>>, vector<6x4xf32>
    tpu.vector_store %arg11[%c228, %c0_157], %286 {strides = array<i32>} : memref<334x4xf32, #tpu.memory_space<vmem>>, vector<6x4xf32>,
    %c0_158 = arith.constant 0 : index
    %c23 = arith.constant 23 : index
    %288 = memref.load %arg1[%c0_158, %c23] : memref<2x32xf32, #tpu.memory_space<smem>>
    %c1_159 = arith.constant 1 : index
    %c23_160 = arith.constant 23 : index
    %289 = memref.load %arg1[%c1_159, %c23_160] : memref<2x32xf32, #tpu.memory_space<smem>>
    %290 = vector.broadcast %288 : f32 to vector<6x4xf32>
    %291 = arith.mulf %11, %290 : vector<6x4xf32>
    %292 = vector.broadcast %289 : f32 to vector<6x4xf32>
    %293 = arith.addf %291, %292 : vector<6x4xf32>
    %cst_161 = arith.constant 0.000000e+00 : f32
    %294 = vector.broadcast %cst_161 : f32 to vector<6x4xf32>
    %295 = arith.cmpf oge, %293, %294 : vector<6x4xf32>
    %cst_162 = arith.constant 0.00999999977 : f32
    %296 = vector.broadcast %cst_162 : f32 to vector<6x4xf32>
    %297 = arith.mulf %296, %293 : vector<6x4xf32>
    %298 = arith.select %295, %293, %297 : vector<6x4xi1>, vector<6x4xf32>
    %c238 = arith.constant 238 : index
    %c0_163 = arith.constant 0 : index
    %299 = vector.load %arg11[%c238, %c0_163] : memref<334x4xf32, #tpu.memory_space<vmem>>, vector<6x4xf32>
    tpu.vector_store %arg11[%c238, %c0_163], %298 {strides = array<i32>} : memref<334x4xf32, #tpu.memory_space<vmem>>, vector<6x4xf32>,
    %c0_164 = arith.constant 0 : index
    %c24 = arith.constant 24 : index
    %300 = memref.load %arg1[%c0_164, %c24] : memref<2x32xf32, #tpu.memory_space<smem>>
    %c1_165 = arith.constant 1 : index
    %c24_166 = arith.constant 24 : index
    %301 = memref.load %arg1[%c1_165, %c24_166] : memref<2x32xf32, #tpu.memory_space<smem>>
    %302 = vector.broadcast %300 : f32 to vector<6x4xf32>
    %303 = arith.mulf %11, %302 : vector<6x4xf32>
    %304 = vector.broadcast %301 : f32 to vector<6x4xf32>
    %305 = arith.addf %303, %304 : vector<6x4xf32>
    %cst_167 = arith.constant 0.000000e+00 : f32
    %306 = vector.broadcast %cst_167 : f32 to vector<6x4xf32>
    %307 = arith.cmpf oge, %305, %306 : vector<6x4xf32>
    %cst_168 = arith.constant 0.00999999977 : f32
    %308 = vector.broadcast %cst_168 : f32 to vector<6x4xf32>
    %309 = arith.mulf %308, %305 : vector<6x4xf32>
    %310 = arith.select %307, %305, %309 : vector<6x4xi1>, vector<6x4xf32>
    %c248 = arith.constant 248 : index
    %c0_169 = arith.constant 0 : index
    %311 = vector.load %arg11[%c248, %c0_169] : memref<334x4xf32, #tpu.memory_space<vmem>>, vector<6x4xf32>
    tpu.vector_store %arg11[%c248, %c0_169], %310 {strides = array<i32>} : memref<334x4xf32, #tpu.memory_space<vmem>>, vector<6x4xf32>,
    %c0_170 = arith.constant 0 : index
    %c25 = arith.constant 25 : index
    %312 = memref.load %arg1[%c0_170, %c25] : memref<2x32xf32, #tpu.memory_space<smem>>
    %c1_171 = arith.constant 1 : index
    %c25_172 = arith.constant 25 : index
    %313 = memref.load %arg1[%c1_171, %c25_172] : memref<2x32xf32, #tpu.memory_space<smem>>
    %314 = vector.broadcast %312 : f32 to vector<6x4xf32>
    %315 = arith.mulf %11, %314 : vector<6x4xf32>
    %316 = vector.broadcast %313 : f32 to vector<6x4xf32>
    %317 = arith.addf %315, %316 : vector<6x4xf32>
    %cst_173 = arith.constant 0.000000e+00 : f32
    %318 = vector.broadcast %cst_173 : f32 to vector<6x4xf32>
    %319 = arith.cmpf oge, %317, %318 : vector<6x4xf32>
    %cst_174 = arith.constant 0.00999999977 : f32
    %320 = vector.broadcast %cst_174 : f32 to vector<6x4xf32>
    %321 = arith.mulf %320, %317 : vector<6x4xf32>
    %322 = arith.select %319, %317, %321 : vector<6x4xi1>, vector<6x4xf32>
    %c258 = arith.constant 258 : index
    %c0_175 = arith.constant 0 : index
    %323 = vector.load %arg11[%c258, %c0_175] : memref<334x4xf32, #tpu.memory_space<vmem>>, vector<6x4xf32>
    tpu.vector_store %arg11[%c258, %c0_175], %322 {strides = array<i32>} : memref<334x4xf32, #tpu.memory_space<vmem>>, vector<6x4xf32>,
    %c0_176 = arith.constant 0 : index
    %c26 = arith.constant 26 : index
    %324 = memref.load %arg1[%c0_176, %c26] : memref<2x32xf32, #tpu.memory_space<smem>>
    %c1_177 = arith.constant 1 : index
    %c26_178 = arith.constant 26 : index
    %325 = memref.load %arg1[%c1_177, %c26_178] : memref<2x32xf32, #tpu.memory_space<smem>>
    %326 = vector.broadcast %324 : f32 to vector<6x4xf32>
    %327 = arith.mulf %11, %326 : vector<6x4xf32>
    %328 = vector.broadcast %325 : f32 to vector<6x4xf32>
    %329 = arith.addf %327, %328 : vector<6x4xf32>
    %cst_179 = arith.constant 0.000000e+00 : f32
    %330 = vector.broadcast %cst_179 : f32 to vector<6x4xf32>
    %331 = arith.cmpf oge, %329, %330 : vector<6x4xf32>
    %cst_180 = arith.constant 0.00999999977 : f32
    %332 = vector.broadcast %cst_180 : f32 to vector<6x4xf32>
    %333 = arith.mulf %332, %329 : vector<6x4xf32>
    %334 = arith.select %331, %329, %333 : vector<6x4xi1>, vector<6x4xf32>
    %c268 = arith.constant 268 : index
    %c0_181 = arith.constant 0 : index
    %335 = vector.load %arg11[%c268, %c0_181] : memref<334x4xf32, #tpu.memory_space<vmem>>, vector<6x4xf32>
    tpu.vector_store %arg11[%c268, %c0_181], %334 {strides = array<i32>} : memref<334x4xf32, #tpu.memory_space<vmem>>, vector<6x4xf32>,
    %c0_182 = arith.constant 0 : index
    %c27 = arith.constant 27 : index
    %336 = memref.load %arg1[%c0_182, %c27] : memref<2x32xf32, #tpu.memory_space<smem>>
    %c1_183 = arith.constant 1 : index
    %c27_184 = arith.constant 27 : index
    %337 = memref.load %arg1[%c1_183, %c27_184] : memref<2x32xf32, #tpu.memory_space<smem>>
    %338 = vector.broadcast %336 : f32 to vector<6x4xf32>
    %339 = arith.mulf %11, %338 : vector<6x4xf32>
    %340 = vector.broadcast %337 : f32 to vector<6x4xf32>
    %341 = arith.addf %339, %340 : vector<6x4xf32>
    %cst_185 = arith.constant 0.000000e+00 : f32
    %342 = vector.broadcast %cst_185 : f32 to vector<6x4xf32>
    %343 = arith.cmpf oge, %341, %342 : vector<6x4xf32>
    %cst_186 = arith.constant 0.00999999977 : f32
    %344 = vector.broadcast %cst_186 : f32 to vector<6x4xf32>
    %345 = arith.mulf %344, %341 : vector<6x4xf32>
    %346 = arith.select %343, %341, %345 : vector<6x4xi1>, vector<6x4xf32>
    %c278 = arith.constant 278 : index
    %c0_187 = arith.constant 0 : index
    %347 = vector.load %arg11[%c278, %c0_187] : memref<334x4xf32, #tpu.memory_space<vmem>>, vector<6x4xf32>
    tpu.vector_store %arg11[%c278, %c0_187], %346 {strides = array<i32>} : memref<334x4xf32, #tpu.memory_space<vmem>>, vector<6x4xf32>,
    %c0_188 = arith.constant 0 : index
    %c28_189 = arith.constant 28 : index
    %348 = memref.load %arg1[%c0_188, %c28_189] : memref<2x32xf32, #tpu.memory_space<smem>>
    %c1_190 = arith.constant 1 : index
    %c28_191 = arith.constant 28 : index
    %349 = memref.load %arg1[%c1_190, %c28_191] : memref<2x32xf32, #tpu.memory_space<smem>>
    %350 = vector.broadcast %348 : f32 to vector<6x4xf32>
    %351 = arith.mulf %11, %350 : vector<6x4xf32>
    %352 = vector.broadcast %349 : f32 to vector<6x4xf32>
    %353 = arith.addf %351, %352 : vector<6x4xf32>
    %cst_192 = arith.constant 0.000000e+00 : f32
    %354 = vector.broadcast %cst_192 : f32 to vector<6x4xf32>
    %355 = arith.cmpf oge, %353, %354 : vector<6x4xf32>
    %cst_193 = arith.constant 0.00999999977 : f32
    %356 = vector.broadcast %cst_193 : f32 to vector<6x4xf32>
    %357 = arith.mulf %356, %353 : vector<6x4xf32>
    %358 = arith.select %355, %353, %357 : vector<6x4xi1>, vector<6x4xf32>
    %c288 = arith.constant 288 : index
    %c0_194 = arith.constant 0 : index
    %359 = vector.load %arg11[%c288, %c0_194] : memref<334x4xf32, #tpu.memory_space<vmem>>, vector<6x4xf32>
    tpu.vector_store %arg11[%c288, %c0_194], %358 {strides = array<i32>} : memref<334x4xf32, #tpu.memory_space<vmem>>, vector<6x4xf32>,
    %c0_195 = arith.constant 0 : index
    %c29 = arith.constant 29 : index
    %360 = memref.load %arg1[%c0_195, %c29] : memref<2x32xf32, #tpu.memory_space<smem>>
    %c1_196 = arith.constant 1 : index
    %c29_197 = arith.constant 29 : index
    %361 = memref.load %arg1[%c1_196, %c29_197] : memref<2x32xf32, #tpu.memory_space<smem>>
    %362 = vector.broadcast %360 : f32 to vector<6x4xf32>
    %363 = arith.mulf %11, %362 : vector<6x4xf32>
    %364 = vector.broadcast %361 : f32 to vector<6x4xf32>
    %365 = arith.addf %363, %364 : vector<6x4xf32>
    %cst_198 = arith.constant 0.000000e+00 : f32
    %366 = vector.broadcast %cst_198 : f32 to vector<6x4xf32>
    %367 = arith.cmpf oge, %365, %366 : vector<6x4xf32>
    %cst_199 = arith.constant 0.00999999977 : f32
    %368 = vector.broadcast %cst_199 : f32 to vector<6x4xf32>
    %369 = arith.mulf %368, %365 : vector<6x4xf32>
    %370 = arith.select %367, %365, %369 : vector<6x4xi1>, vector<6x4xf32>
    %c298 = arith.constant 298 : index
    %c0_200 = arith.constant 0 : index
    %371 = vector.load %arg11[%c298, %c0_200] : memref<334x4xf32, #tpu.memory_space<vmem>>, vector<6x4xf32>
    tpu.vector_store %arg11[%c298, %c0_200], %370 {strides = array<i32>} : memref<334x4xf32, #tpu.memory_space<vmem>>, vector<6x4xf32>,
    %c0_201 = arith.constant 0 : index
    %c30 = arith.constant 30 : index
    %372 = memref.load %arg1[%c0_201, %c30] : memref<2x32xf32, #tpu.memory_space<smem>>
    %c1_202 = arith.constant 1 : index
    %c30_203 = arith.constant 30 : index
    %373 = memref.load %arg1[%c1_202, %c30_203] : memref<2x32xf32, #tpu.memory_space<smem>>
    %374 = vector.broadcast %372 : f32 to vector<6x4xf32>
    %375 = arith.mulf %11, %374 : vector<6x4xf32>
    %376 = vector.broadcast %373 : f32 to vector<6x4xf32>
    %377 = arith.addf %375, %376 : vector<6x4xf32>
    %cst_204 = arith.constant 0.000000e+00 : f32
    %378 = vector.broadcast %cst_204 : f32 to vector<6x4xf32>
    %379 = arith.cmpf oge, %377, %378 : vector<6x4xf32>
    %cst_205 = arith.constant 0.00999999977 : f32
    %380 = vector.broadcast %cst_205 : f32 to vector<6x4xf32>
    %381 = arith.mulf %380, %377 : vector<6x4xf32>
    %382 = arith.select %379, %377, %381 : vector<6x4xi1>, vector<6x4xf32>
    %c308 = arith.constant 308 : index
    %c0_206 = arith.constant 0 : index
    %383 = vector.load %arg11[%c308, %c0_206] : memref<334x4xf32, #tpu.memory_space<vmem>>, vector<6x4xf32>
    tpu.vector_store %arg11[%c308, %c0_206], %382 {strides = array<i32>} : memref<334x4xf32, #tpu.memory_space<vmem>>, vector<6x4xf32>,
    %c0_207 = arith.constant 0 : index
    %c31 = arith.constant 31 : index
    %384 = memref.load %arg1[%c0_207, %c31] : memref<2x32xf32, #tpu.memory_space<smem>>
    %c1_208 = arith.constant 1 : index
    %c31_209 = arith.constant 31 : index
    %385 = memref.load %arg1[%c1_208, %c31_209] : memref<2x32xf32, #tpu.memory_space<smem>>
    %386 = vector.broadcast %384 : f32 to vector<6x4xf32>
    %387 = arith.mulf %11, %386 : vector<6x4xf32>
    %388 = vector.broadcast %385 : f32 to vector<6x4xf32>
    %389 = arith.addf %387, %388 : vector<6x4xf32>
    %cst_210 = arith.constant 0.000000e+00 : f32
    %390 = vector.broadcast %cst_210 : f32 to vector<6x4xf32>
    %391 = arith.cmpf oge, %389, %390 : vector<6x4xf32>
    %cst_211 = arith.constant 0.00999999977 : f32
    %392 = vector.broadcast %cst_211 : f32 to vector<6x4xf32>
    %393 = arith.mulf %392, %389 : vector<6x4xf32>
    %394 = arith.select %391, %389, %393 : vector<6x4xi1>, vector<6x4xf32>
    %c318 = arith.constant 318 : index
    %c0_212 = arith.constant 0 : index
    %395 = vector.load %arg11[%c318, %c0_212] : memref<334x4xf32, #tpu.memory_space<vmem>>, vector<6x4xf32>
    tpu.vector_store %arg11[%c318, %c0_212], %394 {strides = array<i32>} : memref<334x4xf32, #tpu.memory_space<vmem>>, vector<6x4xf32>,
    %cst_213 = arith.constant 0.000000e+00 : f32
    %396 = vector.broadcast %cst_213 : f32 to vector<280x8xf32>
    %c6_214 = arith.constant 6 : index
    %c0_215 = arith.constant 0 : index
    %397 = vector.load %arg11[%c6_214, %c0_215] : memref<334x4xf32, #tpu.memory_space<vmem>>, vector<280x4xf32>
    %398 = arith.truncf %397 : vector<280x4xf32> to vector<280x4xbf16>
    %c0_216 = arith.constant 0 : index
    %c0_217 = arith.constant 0 : index
    %399 = vector.load %arg4[%c0_216, %c0_217] : memref<36x8xbf16, #tpu.memory_space<vmem>>, vector<4x8xbf16>
    %cst_218 = arith.constant dense<0.000000e+00> : vector<280x8xf32>
    %400 = tpu.matmul %398, %399, %cst_218 {dimension_numbers = #tpu.dot_dimension_numbers<[1], [0], [0], [1], [0, 0, 1, 1], [], []>} : vector<280x4xbf16>, vector<4x8xbf16>, vector<280x8xf32> -> vector<280x8xf32>
    %401 = arith.addf %396, %400 : vector<280x8xf32>
    %c8_219 = arith.constant 8 : index
    %c0_220 = arith.constant 0 : index
    %402 = vector.load %arg11[%c8_219, %c0_220] : memref<334x4xf32, #tpu.memory_space<vmem>>, vector<280x4xf32>
    %403 = arith.truncf %402 : vector<280x4xf32> to vector<280x4xbf16>
    %c4_221 = arith.constant 4 : index
    %c0_222 = arith.constant 0 : index
    %404 = vector.load %arg4[%c4_221, %c0_222] : memref<36x8xbf16, #tpu.memory_space<vmem>>, vector<4x8xbf16>
    %cst_223 = arith.constant dense<0.000000e+00> : vector<280x8xf32>
    %405 = tpu.matmul %403, %404, %cst_223 {dimension_numbers = #tpu.dot_dimension_numbers<[1], [0], [0], [1], [0, 0, 1, 1], [], []>} : vector<280x4xbf16>, vector<4x8xbf16>, vector<280x8xf32> -> vector<280x8xf32>
    %406 = arith.addf %401, %405 : vector<280x8xf32>
    %c10_224 = arith.constant 10 : index
    %c0_225 = arith.constant 0 : index
    %407 = vector.load %arg11[%c10_224, %c0_225] : memref<334x4xf32, #tpu.memory_space<vmem>>, vector<280x4xf32>
    %408 = arith.truncf %407 : vector<280x4xf32> to vector<280x4xbf16>
    %c8_226 = arith.constant 8 : index
    %c0_227 = arith.constant 0 : index
    %409 = vector.load %arg4[%c8_226, %c0_227] : memref<36x8xbf16, #tpu.memory_space<vmem>>, vector<4x8xbf16>
    %cst_228 = arith.constant dense<0.000000e+00> : vector<280x8xf32>
    %410 = tpu.matmul %408, %409, %cst_228 {dimension_numbers = #tpu.dot_dimension_numbers<[1], [0], [0], [1], [0, 0, 1, 1], [], []>} : vector<280x4xbf16>, vector<4x8xbf16>, vector<280x8xf32> -> vector<280x8xf32>
    %411 = arith.addf %406, %410 : vector<280x8xf32>
    %c26_229 = arith.constant 26 : index
    %c0_230 = arith.constant 0 : index
    %412 = vector.load %arg11[%c26_229, %c0_230] : memref<334x4xf32, #tpu.memory_space<vmem>>, vector<280x4xf32>
    %413 = arith.truncf %412 : vector<280x4xf32> to vector<280x4xbf16>
    %c12_231 = arith.constant 12 : index
    %c0_232 = arith.constant 0 : index
    %414 = vector.load %arg4[%c12_231, %c0_232] : memref<36x8xbf16, #tpu.memory_space<vmem>>, vector<4x8xbf16>
    %cst_233 = arith.constant dense<0.000000e+00> : vector<280x8xf32>
    %415 = tpu.matmul %413, %414, %cst_233 {dimension_numbers = #tpu.dot_dimension_numbers<[1], [0], [0], [1], [0, 0, 1, 1], [], []>} : vector<280x4xbf16>, vector<4x8xbf16>, vector<280x8xf32> -> vector<280x8xf32>
    %416 = arith.addf %411, %415 : vector<280x8xf32>
    %c28_234 = arith.constant 28 : index
    %c0_235 = arith.constant 0 : index
    %417 = vector.load %arg11[%c28_234, %c0_235] : memref<334x4xf32, #tpu.memory_space<vmem>>, vector<280x4xf32>
    %418 = arith.truncf %417 : vector<280x4xf32> to vector<280x4xbf16>
    %c16_236 = arith.constant 16 : index
    %c0_237 = arith.constant 0 : index
    %419 = vector.load %arg4[%c16_236, %c0_237] : memref<36x8xbf16, #tpu.memory_space<vmem>>, vector<4x8xbf16>
    %cst_238 = arith.constant dense<0.000000e+00> : vector<280x8xf32>
    %420 = tpu.matmul %418, %419, %cst_238 {dimension_numbers = #tpu.dot_dimension_numbers<[1], [0], [0], [1], [0, 0, 1, 1], [], []>} : vector<280x4xbf16>, vector<4x8xbf16>, vector<280x8xf32> -> vector<280x8xf32>
    %421 = arith.addf %416, %420 : vector<280x8xf32>
    %c30_239 = arith.constant 30 : index
    %c0_240 = arith.constant 0 : index
    %422 = vector.load %arg11[%c30_239, %c0_240] : memref<334x4xf32, #tpu.memory_space<vmem>>, vector<280x4xf32>
    %423 = arith.truncf %422 : vector<280x4xf32> to vector<280x4xbf16>
    %c20_241 = arith.constant 20 : index
    %c0_242 = arith.constant 0 : index
    %424 = vector.load %arg4[%c20_241, %c0_242] : memref<36x8xbf16, #tpu.memory_space<vmem>>, vector<4x8xbf16>
    %cst_243 = arith.constant dense<0.000000e+00> : vector<280x8xf32>
    %425 = tpu.matmul %423, %424, %cst_243 {dimension_numbers = #tpu.dot_dimension_numbers<[1], [0], [0], [1], [0, 0, 1, 1], [], []>} : vector<280x4xbf16>, vector<4x8xbf16>, vector<280x8xf32> -> vector<280x8xf32>
    %426 = arith.addf %421, %425 : vector<280x8xf32>
    %c46 = arith.constant 46 : index
    %c0_244 = arith.constant 0 : index
    %427 = vector.load %arg11[%c46, %c0_244] : memref<334x4xf32, #tpu.memory_space<vmem>>, vector<280x4xf32>
    %428 = arith.truncf %427 : vector<280x4xf32> to vector<280x4xbf16>
    %c24_245 = arith.constant 24 : index
    %c0_246 = arith.constant 0 : index
    %429 = vector.load %arg4[%c24_245, %c0_246] : memref<36x8xbf16, #tpu.memory_space<vmem>>, vector<4x8xbf16>
    %cst_247 = arith.constant dense<0.000000e+00> : vector<280x8xf32>
    %430 = tpu.matmul %428, %429, %cst_247 {dimension_numbers = #tpu.dot_dimension_numbers<[1], [0], [0], [1], [0, 0, 1, 1], [], []>} : vector<280x4xbf16>, vector<4x8xbf16>, vector<280x8xf32> -> vector<280x8xf32>
    %431 = arith.addf %426, %430 : vector<280x8xf32>
    %c48_248 = arith.constant 48 : index
    %c0_249 = arith.constant 0 : index
    %432 = vector.load %arg11[%c48_248, %c0_249] : memref<334x4xf32, #tpu.memory_space<vmem>>, vector<280x4xf32>
    %433 = arith.truncf %432 : vector<280x4xf32> to vector<280x4xbf16>
    %c28_250 = arith.constant 28 : index
    %c0_251 = arith.constant 0 : index
    %434 = vector.load %arg4[%c28_250, %c0_251] : memref<36x8xbf16, #tpu.memory_space<vmem>>, vector<4x8xbf16>
    %cst_252 = arith.constant dense<0.000000e+00> : vector<280x8xf32>
    %435 = tpu.matmul %433, %434, %cst_252 {dimension_numbers = #tpu.dot_dimension_numbers<[1], [0], [0], [1], [0, 0, 1, 1], [], []>} : vector<280x4xbf16>, vector<4x8xbf16>, vector<280x8xf32> -> vector<280x8xf32>
    %436 = arith.addf %431, %435 : vector<280x8xf32>
    %c50 = arith.constant 50 : index
    %c0_253 = arith.constant 0 : index
    %437 = vector.load %arg11[%c50, %c0_253] : memref<334x4xf32, #tpu.memory_space<vmem>>, vector<280x4xf32>
    %438 = arith.truncf %437 : vector<280x4xf32> to vector<280x4xbf16>
    %c32 = arith.constant 32 : index
    %c0_254 = arith.constant 0 : index
    %439 = vector.load %arg4[%c32, %c0_254] : memref<36x8xbf16, #tpu.memory_space<vmem>>, vector<4x8xbf16>
    %cst_255 = arith.constant dense<0.000000e+00> : vector<280x8xf32>
    %440 = tpu.matmul %438, %439, %cst_255 {dimension_numbers = #tpu.dot_dimension_numbers<[1], [0], [0], [1], [0, 0, 1, 1], [], []>} : vector<280x4xbf16>, vector<4x8xbf16>, vector<280x8xf32> -> vector<280x8xf32>
    %441 = arith.addf %436, %440 : vector<280x8xf32>
    %442 = vector.extract_strided_slice %10 {offsets = [0, 0], sizes = [1, 8], strides = [1, 1]} : vector<8x128xf32> to vector<1x8xf32>
    %443 = vector.broadcast %442 : vector<1x8xf32> to vector<280x8xf32>
    %444 = arith.addf %441, %443 : vector<280x8xf32>
    %cst_256 = arith.constant 0.000000e+00 : f32
    %445 = vector.broadcast %cst_256 : f32 to vector<280x8xf32>
    %446 = arith.cmpf oge, %444, %445 : vector<280x8xf32>
    %cst_257 = arith.constant 0.00999999977 : f32
    %447 = vector.broadcast %cst_257 : f32 to vector<280x8xf32>
    %448 = arith.mulf %447, %444 : vector<280x8xf32>
    %449 = arith.select %446, %444, %448 : vector<280x8xi1>, vector<280x8xf32>
    %c0_258 = arith.constant 0 : index
    %c0_259 = arith.constant 0 : index
    %450 = vector.load %arg3[%c0_258, %c0_259] : memref<280x1xf32, #tpu.memory_space<vmem>>, vector<280x1xf32>
    %451 = vector.broadcast %450 : vector<280x1xf32> to vector<280x8xf32>
    %452 = arith.mulf %449, %451 : vector<280x8xf32>
    %c8_260 = arith.constant 8 : index
    %c0_261 = arith.constant 0 : index
    %453 = vector.load %arg12[%c8_260, %c0_261] : memref<294x8xf32, #tpu.memory_space<vmem>>, vector<280x8xf32>
    tpu.vector_store %arg12[%c8_260, %c0_261], %452 {strides = array<i32>} : memref<294x8xf32, #tpu.memory_space<vmem>>, vector<280x8xf32>,
    %cst_262 = arith.constant 0.000000e+00 : f32
    %454 = vector.broadcast %cst_262 : f32 to vector<240x16xf32>
    %c6_263 = arith.constant 6 : index
    %c0_264 = arith.constant 0 : index
    %455 = vector.load %arg12[%c6_263, %c0_264] : memref<294x8xf32, #tpu.memory_space<vmem>>, vector<240x8xf32>
    %456 = arith.truncf %455 : vector<240x8xf32> to vector<240x8xbf16>
    %c0_265 = arith.constant 0 : index
    %c0_266 = arith.constant 0 : index
    %457 = vector.load %arg5[%c0_265, %c0_266] : memref<72x16xbf16, #tpu.memory_space<vmem>>, vector<8x16xbf16>
    %cst_267 = arith.constant dense<0.000000e+00> : vector<240x16xf32>
    %458 = tpu.matmul %456, %457, %cst_267 {dimension_numbers = #tpu.dot_dimension_numbers<[1], [0], [0], [1], [0, 0, 1, 1], [], []>} : vector<240x8xbf16>, vector<8x16xbf16>, vector<240x16xf32> -> vector<240x16xf32>
    %459 = arith.addf %454, %458 : vector<240x16xf32>
    %c8_268 = arith.constant 8 : index
    %c0_269 = arith.constant 0 : index
    %460 = vector.load %arg12[%c8_268, %c0_269] : memref<294x8xf32, #tpu.memory_space<vmem>>, vector<240x8xf32>
    %461 = arith.truncf %460 : vector<240x8xf32> to vector<240x8xbf16>
    %c8_270 = arith.constant 8 : index
    %c0_271 = arith.constant 0 : index
    %462 = vector.load %arg5[%c8_270, %c0_271] : memref<72x16xbf16, #tpu.memory_space<vmem>>, vector<8x16xbf16>
    %cst_272 = arith.constant dense<0.000000e+00> : vector<240x16xf32>
    %463 = tpu.matmul %461, %462, %cst_272 {dimension_numbers = #tpu.dot_dimension_numbers<[1], [0], [0], [1], [0, 0, 1, 1], [], []>} : vector<240x8xbf16>, vector<8x16xbf16>, vector<240x16xf32> -> vector<240x16xf32>
    %464 = arith.addf %459, %463 : vector<240x16xf32>
    %c10_273 = arith.constant 10 : index
    %c0_274 = arith.constant 0 : index
    %465 = vector.load %arg12[%c10_273, %c0_274] : memref<294x8xf32, #tpu.memory_space<vmem>>, vector<240x8xf32>
    %466 = arith.truncf %465 : vector<240x8xf32> to vector<240x8xbf16>
    %c16_275 = arith.constant 16 : index
    %c0_276 = arith.constant 0 : index
    %467 = vector.load %arg5[%c16_275, %c0_276] : memref<72x16xbf16, #tpu.memory_space<vmem>>, vector<8x16xbf16>
    %cst_277 = arith.constant dense<0.000000e+00> : vector<240x16xf32>
    %468 = tpu.matmul %466, %467, %cst_277 {dimension_numbers = #tpu.dot_dimension_numbers<[1], [0], [0], [1], [0, 0, 1, 1], [], []>} : vector<240x8xbf16>, vector<8x16xbf16>, vector<240x16xf32> -> vector<240x16xf32>
    %469 = arith.addf %464, %468 : vector<240x16xf32>
    %c26_278 = arith.constant 26 : index
    %c0_279 = arith.constant 0 : index
    %470 = vector.load %arg12[%c26_278, %c0_279] : memref<294x8xf32, #tpu.memory_space<vmem>>, vector<240x8xf32>
    %471 = arith.truncf %470 : vector<240x8xf32> to vector<240x8xbf16>
    %c24_280 = arith.constant 24 : index
    %c0_281 = arith.constant 0 : index
    %472 = vector.load %arg5[%c24_280, %c0_281] : memref<72x16xbf16, #tpu.memory_space<vmem>>, vector<8x16xbf16>
    %cst_282 = arith.constant dense<0.000000e+00> : vector<240x16xf32>
    %473 = tpu.matmul %471, %472, %cst_282 {dimension_numbers = #tpu.dot_dimension_numbers<[1], [0], [0], [1], [0, 0, 1, 1], [], []>} : vector<240x8xbf16>, vector<8x16xbf16>, vector<240x16xf32> -> vector<240x16xf32>
    %474 = arith.addf %469, %473 : vector<240x16xf32>
    %c28_283 = arith.constant 28 : index
    %c0_284 = arith.constant 0 : index
    %475 = vector.load %arg12[%c28_283, %c0_284] : memref<294x8xf32, #tpu.memory_space<vmem>>, vector<240x8xf32>
    %476 = arith.truncf %475 : vector<240x8xf32> to vector<240x8xbf16>
    %c32_285 = arith.constant 32 : index
    %c0_286 = arith.constant 0 : index
    %477 = vector.load %arg5[%c32_285, %c0_286] : memref<72x16xbf16, #tpu.memory_space<vmem>>, vector<8x16xbf16>
    %cst_287 = arith.constant dense<0.000000e+00> : vector<240x16xf32>
    %478 = tpu.matmul %476, %477, %cst_287 {dimension_numbers = #tpu.dot_dimension_numbers<[1], [0], [0], [1], [0, 0, 1, 1], [], []>} : vector<240x8xbf16>, vector<8x16xbf16>, vector<240x16xf32> -> vector<240x16xf32>
    %479 = arith.addf %474, %478 : vector<240x16xf32>
    %c30_288 = arith.constant 30 : index
    %c0_289 = arith.constant 0 : index
    %480 = vector.load %arg12[%c30_288, %c0_289] : memref<294x8xf32, #tpu.memory_space<vmem>>, vector<240x8xf32>
    %481 = arith.truncf %480 : vector<240x8xf32> to vector<240x8xbf16>
    %c40 = arith.constant 40 : index
    %c0_290 = arith.constant 0 : index
    %482 = vector.load %arg5[%c40, %c0_290] : memref<72x16xbf16, #tpu.memory_space<vmem>>, vector<8x16xbf16>
    %cst_291 = arith.constant dense<0.000000e+00> : vector<240x16xf32>
    %483 = tpu.matmul %481, %482, %cst_291 {dimension_numbers = #tpu.dot_dimension_numbers<[1], [0], [0], [1], [0, 0, 1, 1], [], []>} : vector<240x8xbf16>, vector<8x16xbf16>, vector<240x16xf32> -> vector<240x16xf32>
    %484 = arith.addf %479, %483 : vector<240x16xf32>
    %c46_292 = arith.constant 46 : index
    %c0_293 = arith.constant 0 : index
    %485 = vector.load %arg12[%c46_292, %c0_293] : memref<294x8xf32, #tpu.memory_space<vmem>>, vector<240x8xf32>
    %486 = arith.truncf %485 : vector<240x8xf32> to vector<240x8xbf16>
    %c48_294 = arith.constant 48 : index
    %c0_295 = arith.constant 0 : index
    %487 = vector.load %arg5[%c48_294, %c0_295] : memref<72x16xbf16, #tpu.memory_space<vmem>>, vector<8x16xbf16>
    %cst_296 = arith.constant dense<0.000000e+00> : vector<240x16xf32>
    %488 = tpu.matmul %486, %487, %cst_296 {dimension_numbers = #tpu.dot_dimension_numbers<[1], [0], [0], [1], [0, 0, 1, 1], [], []>} : vector<240x8xbf16>, vector<8x16xbf16>, vector<240x16xf32> -> vector<240x16xf32>
    %489 = arith.addf %484, %488 : vector<240x16xf32>
    %c48_297 = arith.constant 48 : index
    %c0_298 = arith.constant 0 : index
    %490 = vector.load %arg12[%c48_297, %c0_298] : memref<294x8xf32, #tpu.memory_space<vmem>>, vector<240x8xf32>
    %491 = arith.truncf %490 : vector<240x8xf32> to vector<240x8xbf16>
    %c56 = arith.constant 56 : index
    %c0_299 = arith.constant 0 : index
    %492 = vector.load %arg5[%c56, %c0_299] : memref<72x16xbf16, #tpu.memory_space<vmem>>, vector<8x16xbf16>
    %cst_300 = arith.constant dense<0.000000e+00> : vector<240x16xf32>
    %493 = tpu.matmul %491, %492, %cst_300 {dimension_numbers = #tpu.dot_dimension_numbers<[1], [0], [0], [1], [0, 0, 1, 1], [], []>} : vector<240x8xbf16>, vector<8x16xbf16>, vector<240x16xf32> -> vector<240x16xf32>
    %494 = arith.addf %489, %493 : vector<240x16xf32>
    %c50_301 = arith.constant 50 : index
    %c0_302 = arith.constant 0 : index
    %495 = vector.load %arg12[%c50_301, %c0_302] : memref<294x8xf32, #tpu.memory_space<vmem>>, vector<240x8xf32>
    %496 = arith.truncf %495 : vector<240x8xf32> to vector<240x8xbf16>
    %c64 = arith.constant 64 : index
    %c0_303 = arith.constant 0 : index
    %497 = vector.load %arg5[%c64, %c0_303] : memref<72x16xbf16, #tpu.memory_space<vmem>>, vector<8x16xbf16>
    %cst_304 = arith.constant dense<0.000000e+00> : vector<240x16xf32>
    %498 = tpu.matmul %496, %497, %cst_304 {dimension_numbers = #tpu.dot_dimension_numbers<[1], [0], [0], [1], [0, 0, 1, 1], [], []>} : vector<240x8xbf16>, vector<8x16xbf16>, vector<240x16xf32> -> vector<240x16xf32>
    %499 = arith.addf %494, %498 : vector<240x16xf32>
    %500 = vector.extract_strided_slice %10 {offsets = [1, 0], sizes = [1, 16], strides = [1, 1]} : vector<8x128xf32> to vector<1x16xf32>
    %501 = vector.broadcast %500 : vector<1x16xf32> to vector<240x16xf32>
    %502 = arith.addf %499, %501 : vector<240x16xf32>
    %cst_305 = arith.constant 0.000000e+00 : f32
    %503 = vector.broadcast %cst_305 : f32 to vector<240x16xf32>
    %504 = arith.cmpf oge, %502, %503 : vector<240x16xf32>
    %cst_306 = arith.constant 0.00999999977 : f32
    %505 = vector.broadcast %cst_306 : f32 to vector<240x16xf32>
    %506 = arith.mulf %505, %502 : vector<240x16xf32>
    %507 = arith.select %504, %502, %506 : vector<240x16xi1>, vector<240x16xf32>
    %c0_307 = arith.constant 0 : index
    %c0_308 = arith.constant 0 : index
    %508 = vector.load %arg3[%c0_307, %c0_308] : memref<280x1xf32, #tpu.memory_space<vmem>>, vector<240x1xf32>
    %509 = vector.broadcast %508 : vector<240x1xf32> to vector<240x16xf32>
    %510 = arith.mulf %507, %509 : vector<240x16xf32>
    %c8_309 = arith.constant 8 : index
    %c0_310 = arith.constant 0 : index
    %511 = vector.load %arg13[%c8_309, %c0_310] : memref<254x16xf32, #tpu.memory_space<vmem>>, vector<240x16xf32>
    tpu.vector_store %arg13[%c8_309, %c0_310], %510 {strides = array<i32>} : memref<254x16xf32, #tpu.memory_space<vmem>>, vector<240x16xf32>,
    %cst_311 = arith.constant 0.000000e+00 : f32
    %512 = vector.broadcast %cst_311 : f32 to vector<200x24xf32>
    %c6_312 = arith.constant 6 : index
    %c0_313 = arith.constant 0 : index
    %513 = vector.load %arg13[%c6_312, %c0_313] : memref<254x16xf32, #tpu.memory_space<vmem>>, vector<200x16xf32>
    %514 = arith.truncf %513 : vector<200x16xf32> to vector<200x16xbf16>
    %c0_314 = arith.constant 0 : index
    %c0_315 = arith.constant 0 : index
    %515 = vector.load %arg6[%c0_314, %c0_315] : memref<144x24xbf16, #tpu.memory_space<vmem>>, vector<16x24xbf16>
    %cst_316 = arith.constant dense<0.000000e+00> : vector<200x24xf32>
    %516 = tpu.matmul %514, %515, %cst_316 {dimension_numbers = #tpu.dot_dimension_numbers<[1], [0], [0], [1], [0, 0, 1, 1], [], []>} : vector<200x16xbf16>, vector<16x24xbf16>, vector<200x24xf32> -> vector<200x24xf32>
    %517 = arith.addf %512, %516 : vector<200x24xf32>
    %c8_317 = arith.constant 8 : index
    %c0_318 = arith.constant 0 : index
    %518 = vector.load %arg13[%c8_317, %c0_318] : memref<254x16xf32, #tpu.memory_space<vmem>>, vector<200x16xf32>
    %519 = arith.truncf %518 : vector<200x16xf32> to vector<200x16xbf16>
    %c16_319 = arith.constant 16 : index
    %c0_320 = arith.constant 0 : index
    %520 = vector.load %arg6[%c16_319, %c0_320] : memref<144x24xbf16, #tpu.memory_space<vmem>>, vector<16x24xbf16>
    %cst_321 = arith.constant dense<0.000000e+00> : vector<200x24xf32>
    %521 = tpu.matmul %519, %520, %cst_321 {dimension_numbers = #tpu.dot_dimension_numbers<[1], [0], [0], [1], [0, 0, 1, 1], [], []>} : vector<200x16xbf16>, vector<16x24xbf16>, vector<200x24xf32> -> vector<200x24xf32>
    %522 = arith.addf %517, %521 : vector<200x24xf32>
    %c10_322 = arith.constant 10 : index
    %c0_323 = arith.constant 0 : index
    %523 = vector.load %arg13[%c10_322, %c0_323] : memref<254x16xf32, #tpu.memory_space<vmem>>, vector<200x16xf32>
    %524 = arith.truncf %523 : vector<200x16xf32> to vector<200x16xbf16>
    %c32_324 = arith.constant 32 : index
    %c0_325 = arith.constant 0 : index
    %525 = vector.load %arg6[%c32_324, %c0_325] : memref<144x24xbf16, #tpu.memory_space<vmem>>, vector<16x24xbf16>
    %cst_326 = arith.constant dense<0.000000e+00> : vector<200x24xf32>
    %526 = tpu.matmul %524, %525, %cst_326 {dimension_numbers = #tpu.dot_dimension_numbers<[1], [0], [0], [1], [0, 0, 1, 1], [], []>} : vector<200x16xbf16>, vector<16x24xbf16>, vector<200x24xf32> -> vector<200x24xf32>
    %527 = arith.addf %522, %526 : vector<200x24xf32>
    %c26_327 = arith.constant 26 : index
    %c0_328 = arith.constant 0 : index
    %528 = vector.load %arg13[%c26_327, %c0_328] : memref<254x16xf32, #tpu.memory_space<vmem>>, vector<200x16xf32>
    %529 = arith.truncf %528 : vector<200x16xf32> to vector<200x16xbf16>
    %c48_329 = arith.constant 48 : index
    %c0_330 = arith.constant 0 : index
    %530 = vector.load %arg6[%c48_329, %c0_330] : memref<144x24xbf16, #tpu.memory_space<vmem>>, vector<16x24xbf16>
    %cst_331 = arith.constant dense<0.000000e+00> : vector<200x24xf32>
    %531 = tpu.matmul %529, %530, %cst_331 {dimension_numbers = #tpu.dot_dimension_numbers<[1], [0], [0], [1], [0, 0, 1, 1], [], []>} : vector<200x16xbf16>, vector<16x24xbf16>, vector<200x24xf32> -> vector<200x24xf32>
    %532 = arith.addf %527, %531 : vector<200x24xf32>
    %c28_332 = arith.constant 28 : index
    %c0_333 = arith.constant 0 : index
    %533 = vector.load %arg13[%c28_332, %c0_333] : memref<254x16xf32, #tpu.memory_space<vmem>>, vector<200x16xf32>
    %534 = arith.truncf %533 : vector<200x16xf32> to vector<200x16xbf16>
    %c64_334 = arith.constant 64 : index
    %c0_335 = arith.constant 0 : index
    %535 = vector.load %arg6[%c64_334, %c0_335] : memref<144x24xbf16, #tpu.memory_space<vmem>>, vector<16x24xbf16>
    %cst_336 = arith.constant dense<0.000000e+00> : vector<200x24xf32>
    %536 = tpu.matmul %534, %535, %cst_336 {dimension_numbers = #tpu.dot_dimension_numbers<[1], [0], [0], [1], [0, 0, 1, 1], [], []>} : vector<200x16xbf16>, vector<16x24xbf16>, vector<200x24xf32> -> vector<200x24xf32>
    %537 = arith.addf %532, %536 : vector<200x24xf32>
    %c30_337 = arith.constant 30 : index
    %c0_338 = arith.constant 0 : index
    %538 = vector.load %arg13[%c30_337, %c0_338] : memref<254x16xf32, #tpu.memory_space<vmem>>, vector<200x16xf32>
    %539 = arith.truncf %538 : vector<200x16xf32> to vector<200x16xbf16>
    %c80 = arith.constant 80 : index
    %c0_339 = arith.constant 0 : index
    %540 = vector.load %arg6[%c80, %c0_339] : memref<144x24xbf16, #tpu.memory_space<vmem>>, vector<16x24xbf16>
    %cst_340 = arith.constant dense<0.000000e+00> : vector<200x24xf32>
    %541 = tpu.matmul %539, %540, %cst_340 {dimension_numbers = #tpu.dot_dimension_numbers<[1], [0], [0], [1], [0, 0, 1, 1], [], []>} : vector<200x16xbf16>, vector<16x24xbf16>, vector<200x24xf32> -> vector<200x24xf32>
    %542 = arith.addf %537, %541 : vector<200x24xf32>
    %c46_341 = arith.constant 46 : index
    %c0_342 = arith.constant 0 : index
    %543 = vector.load %arg13[%c46_341, %c0_342] : memref<254x16xf32, #tpu.memory_space<vmem>>, vector<200x16xf32>
    %544 = arith.truncf %543 : vector<200x16xf32> to vector<200x16xbf16>
    %c96 = arith.constant 96 : index
    %c0_343 = arith.constant 0 : index
    %545 = vector.load %arg6[%c96, %c0_343] : memref<144x24xbf16, #tpu.memory_space<vmem>>, vector<16x24xbf16>
    %cst_344 = arith.constant dense<0.000000e+00> : vector<200x24xf32>
    %546 = tpu.matmul %544, %545, %cst_344 {dimension_numbers = #tpu.dot_dimension_numbers<[1], [0], [0], [1], [0, 0, 1, 1], [], []>} : vector<200x16xbf16>, vector<16x24xbf16>, vector<200x24xf32> -> vector<200x24xf32>
    %547 = arith.addf %542, %546 : vector<200x24xf32>
    %c48_345 = arith.constant 48 : index
    %c0_346 = arith.constant 0 : index
    %548 = vector.load %arg13[%c48_345, %c0_346] : memref<254x16xf32, #tpu.memory_space<vmem>>, vector<200x16xf32>
    %549 = arith.truncf %548 : vector<200x16xf32> to vector<200x16xbf16>
    %c112 = arith.constant 112 : index
    %c0_347 = arith.constant 0 : index
    %550 = vector.load %arg6[%c112, %c0_347] : memref<144x24xbf16, #tpu.memory_space<vmem>>, vector<16x24xbf16>
    %cst_348 = arith.constant dense<0.000000e+00> : vector<200x24xf32>
    %551 = tpu.matmul %549, %550, %cst_348 {dimension_numbers = #tpu.dot_dimension_numbers<[1], [0], [0], [1], [0, 0, 1, 1], [], []>} : vector<200x16xbf16>, vector<16x24xbf16>, vector<200x24xf32> -> vector<200x24xf32>
    %552 = arith.addf %547, %551 : vector<200x24xf32>
    %c50_349 = arith.constant 50 : index
    %c0_350 = arith.constant 0 : index
    %553 = vector.load %arg13[%c50_349, %c0_350] : memref<254x16xf32, #tpu.memory_space<vmem>>, vector<200x16xf32>
    %554 = arith.truncf %553 : vector<200x16xf32> to vector<200x16xbf16>
    %c128_351 = arith.constant 128 : index
    %c0_352 = arith.constant 0 : index
    %555 = vector.load %arg6[%c128_351, %c0_352] : memref<144x24xbf16, #tpu.memory_space<vmem>>, vector<16x24xbf16>
    %cst_353 = arith.constant dense<0.000000e+00> : vector<200x24xf32>
    %556 = tpu.matmul %554, %555, %cst_353 {dimension_numbers = #tpu.dot_dimension_numbers<[1], [0], [0], [1], [0, 0, 1, 1], [], []>} : vector<200x16xbf16>, vector<16x24xbf16>, vector<200x24xf32> -> vector<200x24xf32>
    %557 = arith.addf %552, %556 : vector<200x24xf32>
    %558 = vector.extract_strided_slice %10 {offsets = [2, 0], sizes = [1, 24], strides = [1, 1]} : vector<8x128xf32> to vector<1x24xf32>
    %559 = vector.broadcast %558 : vector<1x24xf32> to vector<200x24xf32>
    %560 = arith.addf %557, %559 : vector<200x24xf32>
    %cst_354 = arith.constant 0.000000e+00 : f32
    %561 = vector.broadcast %cst_354 : f32 to vector<200x24xf32>
    %562 = arith.cmpf oge, %560, %561 : vector<200x24xf32>
    %cst_355 = arith.constant 0.00999999977 : f32
    %563 = vector.broadcast %cst_355 : f32 to vector<200x24xf32>
    %564 = arith.mulf %563, %560 : vector<200x24xf32>
    %565 = arith.select %562, %560, %564 : vector<200x24xi1>, vector<200x24xf32>
    %c0_356 = arith.constant 0 : index
    %c0_357 = arith.constant 0 : index
    %566 = vector.load %arg3[%c0_356, %c0_357] : memref<280x1xf32, #tpu.memory_space<vmem>>, vector<200x1xf32>
    %567 = vector.broadcast %566 : vector<200x1xf32> to vector<200x24xf32>
    %568 = arith.mulf %565, %567 : vector<200x24xf32>
    %c8_358 = arith.constant 8 : index
    %c0_359 = arith.constant 0 : index
    %569 = vector.load %arg14[%c8_358, %c0_359] : memref<214x24xf32, #tpu.memory_space<vmem>>, vector<200x24xf32>
    tpu.vector_store %arg14[%c8_358, %c0_359], %568 {strides = array<i32>} : memref<214x24xf32, #tpu.memory_space<vmem>>, vector<200x24xf32>,
    %cst_360 = arith.constant 0.000000e+00 : f32
    %570 = vector.broadcast %cst_360 : f32 to vector<160x32xf32>
    %c6_361 = arith.constant 6 : index
    %c0_362 = arith.constant 0 : index
    %571 = vector.load %arg14[%c6_361, %c0_362] : memref<214x24xf32, #tpu.memory_space<vmem>>, vector<160x24xf32>
    %572 = arith.truncf %571 : vector<160x24xf32> to vector<160x24xbf16>
    %c0_363 = arith.constant 0 : index
    %c0_364 = arith.constant 0 : index
    %573 = vector.load %arg7[%c0_363, %c0_364] : memref<216x32xbf16, #tpu.memory_space<vmem>>, vector<24x32xbf16>
    %cst_365 = arith.constant dense<0.000000e+00> : vector<160x32xf32>
    %574 = tpu.matmul %572, %573, %cst_365 {dimension_numbers = #tpu.dot_dimension_numbers<[1], [0], [0], [1], [0, 0, 1, 1], [], []>} : vector<160x24xbf16>, vector<24x32xbf16>, vector<160x32xf32> -> vector<160x32xf32>
    %575 = arith.addf %570, %574 : vector<160x32xf32>
    %c8_366 = arith.constant 8 : index
    %c0_367 = arith.constant 0 : index
    %576 = vector.load %arg14[%c8_366, %c0_367] : memref<214x24xf32, #tpu.memory_space<vmem>>, vector<160x24xf32>
    %577 = arith.truncf %576 : vector<160x24xf32> to vector<160x24xbf16>
    %c24_368 = arith.constant 24 : index
    %c0_369 = arith.constant 0 : index
    %578 = vector.load %arg7[%c24_368, %c0_369] : memref<216x32xbf16, #tpu.memory_space<vmem>>, vector<24x32xbf16>
    %cst_370 = arith.constant dense<0.000000e+00> : vector<160x32xf32>
    %579 = tpu.matmul %577, %578, %cst_370 {dimension_numbers = #tpu.dot_dimension_numbers<[1], [0], [0], [1], [0, 0, 1, 1], [], []>} : vector<160x24xbf16>, vector<24x32xbf16>, vector<160x32xf32> -> vector<160x32xf32>
    %580 = arith.addf %575, %579 : vector<160x32xf32>
    %c10_371 = arith.constant 10 : index
    %c0_372 = arith.constant 0 : index
    %581 = vector.load %arg14[%c10_371, %c0_372] : memref<214x24xf32, #tpu.memory_space<vmem>>, vector<160x24xf32>
    %582 = arith.truncf %581 : vector<160x24xf32> to vector<160x24xbf16>
    %c48_373 = arith.constant 48 : index
    %c0_374 = arith.constant 0 : index
    %583 = vector.load %arg7[%c48_373, %c0_374] : memref<216x32xbf16, #tpu.memory_space<vmem>>, vector<24x32xbf16>
    %cst_375 = arith.constant dense<0.000000e+00> : vector<160x32xf32>
    %584 = tpu.matmul %582, %583, %cst_375 {dimension_numbers = #tpu.dot_dimension_numbers<[1], [0], [0], [1], [0, 0, 1, 1], [], []>} : vector<160x24xbf16>, vector<24x32xbf16>, vector<160x32xf32> -> vector<160x32xf32>
    %585 = arith.addf %580, %584 : vector<160x32xf32>
    %c26_376 = arith.constant 26 : index
    %c0_377 = arith.constant 0 : index
    %586 = vector.load %arg14[%c26_376, %c0_377] : memref<214x24xf32, #tpu.memory_space<vmem>>, vector<160x24xf32>
    %587 = arith.truncf %586 : vector<160x24xf32> to vector<160x24xbf16>
    %c72 = arith.constant 72 : index
    %c0_378 = arith.constant 0 : index
    %588 = vector.load %arg7[%c72, %c0_378] : memref<216x32xbf16, #tpu.memory_space<vmem>>, vector<24x32xbf16>
    %cst_379 = arith.constant dense<0.000000e+00> : vector<160x32xf32>
    %589 = tpu.matmul %587, %588, %cst_379 {dimension_numbers = #tpu.dot_dimension_numbers<[1], [0], [0], [1], [0, 0, 1, 1], [], []>} : vector<160x24xbf16>, vector<24x32xbf16>, vector<160x32xf32> -> vector<160x32xf32>
    %590 = arith.addf %585, %589 : vector<160x32xf32>
    %c28_380 = arith.constant 28 : index
    %c0_381 = arith.constant 0 : index
    %591 = vector.load %arg14[%c28_380, %c0_381] : memref<214x24xf32, #tpu.memory_space<vmem>>, vector<160x24xf32>
    %592 = arith.truncf %591 : vector<160x24xf32> to vector<160x24xbf16>
    %c96_382 = arith.constant 96 : index
    %c0_383 = arith.constant 0 : index
    %593 = vector.load %arg7[%c96_382, %c0_383] : memref<216x32xbf16, #tpu.memory_space<vmem>>, vector<24x32xbf16>
    %cst_384 = arith.constant dense<0.000000e+00> : vector<160x32xf32>
    %594 = tpu.matmul %592, %593, %cst_384 {dimension_numbers = #tpu.dot_dimension_numbers<[1], [0], [0], [1], [0, 0, 1, 1], [], []>} : vector<160x24xbf16>, vector<24x32xbf16>, vector<160x32xf32> -> vector<160x32xf32>
    %595 = arith.addf %590, %594 : vector<160x32xf32>
    %c30_385 = arith.constant 30 : index
    %c0_386 = arith.constant 0 : index
    %596 = vector.load %arg14[%c30_385, %c0_386] : memref<214x24xf32, #tpu.memory_space<vmem>>, vector<160x24xf32>
    %597 = arith.truncf %596 : vector<160x24xf32> to vector<160x24xbf16>
    %c120 = arith.constant 120 : index
    %c0_387 = arith.constant 0 : index
    %598 = vector.load %arg7[%c120, %c0_387] : memref<216x32xbf16, #tpu.memory_space<vmem>>, vector<24x32xbf16>
    %cst_388 = arith.constant dense<0.000000e+00> : vector<160x32xf32>
    %599 = tpu.matmul %597, %598, %cst_388 {dimension_numbers = #tpu.dot_dimension_numbers<[1], [0], [0], [1], [0, 0, 1, 1], [], []>} : vector<160x24xbf16>, vector<24x32xbf16>, vector<160x32xf32> -> vector<160x32xf32>
    %600 = arith.addf %595, %599 : vector<160x32xf32>
    %c46_389 = arith.constant 46 : index
    %c0_390 = arith.constant 0 : index
    %601 = vector.load %arg14[%c46_389, %c0_390] : memref<214x24xf32, #tpu.memory_space<vmem>>, vector<160x24xf32>
    %602 = arith.truncf %601 : vector<160x24xf32> to vector<160x24xbf16>
    %c144 = arith.constant 144 : index
    %c0_391 = arith.constant 0 : index
    %603 = vector.load %arg7[%c144, %c0_391] : memref<216x32xbf16, #tpu.memory_space<vmem>>, vector<24x32xbf16>
    %cst_392 = arith.constant dense<0.000000e+00> : vector<160x32xf32>
    %604 = tpu.matmul %602, %603, %cst_392 {dimension_numbers = #tpu.dot_dimension_numbers<[1], [0], [0], [1], [0, 0, 1, 1], [], []>} : vector<160x24xbf16>, vector<24x32xbf16>, vector<160x32xf32> -> vector<160x32xf32>
    %605 = arith.addf %600, %604 : vector<160x32xf32>
    %c48_393 = arith.constant 48 : index
    %c0_394 = arith.constant 0 : index
    %606 = vector.load %arg14[%c48_393, %c0_394] : memref<214x24xf32, #tpu.memory_space<vmem>>, vector<160x24xf32>
    %607 = arith.truncf %606 : vector<160x24xf32> to vector<160x24xbf16>
    %c168_395 = arith.constant 168 : index
    %c0_396 = arith.constant 0 : index
    %608 = vector.load %arg7[%c168_395, %c0_396] : memref<216x32xbf16, #tpu.memory_space<vmem>>, vector<24x32xbf16>
    %cst_397 = arith.constant dense<0.000000e+00> : vector<160x32xf32>
    %609 = tpu.matmul %607, %608, %cst_397 {dimension_numbers = #tpu.dot_dimension_numbers<[1], [0], [0], [1], [0, 0, 1, 1], [], []>} : vector<160x24xbf16>, vector<24x32xbf16>, vector<160x32xf32> -> vector<160x32xf32>
    %610 = arith.addf %605, %609 : vector<160x32xf32>
    %c50_398 = arith.constant 50 : index
    %c0_399 = arith.constant 0 : index
    %611 = vector.load %arg14[%c50_398, %c0_399] : memref<214x24xf32, #tpu.memory_space<vmem>>, vector<160x24xf32>
    %612 = arith.truncf %611 : vector<160x24xf32> to vector<160x24xbf16>
    %c192 = arith.constant 192 : index
    %c0_400 = arith.constant 0 : index
    %613 = vector.load %arg7[%c192, %c0_400] : memref<216x32xbf16, #tpu.memory_space<vmem>>, vector<24x32xbf16>
    %cst_401 = arith.constant dense<0.000000e+00> : vector<160x32xf32>
    %614 = tpu.matmul %612, %613, %cst_401 {dimension_numbers = #tpu.dot_dimension_numbers<[1], [0], [0], [1], [0, 0, 1, 1], [], []>} : vector<160x24xbf16>, vector<24x32xbf16>, vector<160x32xf32> -> vector<160x32xf32>
    %615 = arith.addf %610, %614 : vector<160x32xf32>
    %616 = vector.extract_strided_slice %10 {offsets = [3, 0], sizes = [1, 32], strides = [1, 1]} : vector<8x128xf32> to vector<1x32xf32>
    %617 = vector.broadcast %616 : vector<1x32xf32> to vector<160x32xf32>
    %618 = arith.addf %615, %617 : vector<160x32xf32>
    %cst_402 = arith.constant 0.000000e+00 : f32
    %619 = vector.broadcast %cst_402 : f32 to vector<160x32xf32>
    %620 = arith.cmpf oge, %618, %619 : vector<160x32xf32>
    %cst_403 = arith.constant 0.00999999977 : f32
    %621 = vector.broadcast %cst_403 : f32 to vector<160x32xf32>
    %622 = arith.mulf %621, %618 : vector<160x32xf32>
    %623 = arith.select %620, %618, %622 : vector<160x32xi1>, vector<160x32xf32>
    %c0_404 = arith.constant 0 : index
    %c0_405 = arith.constant 0 : index
    %624 = vector.load %arg3[%c0_404, %c0_405] : memref<280x1xf32, #tpu.memory_space<vmem>>, vector<160x1xf32>
    %625 = vector.broadcast %624 : vector<160x1xf32> to vector<160x32xf32>
    %626 = arith.mulf %623, %625 : vector<160x32xf32>
    %c8_406 = arith.constant 8 : index
    %c0_407 = arith.constant 0 : index
    %627 = vector.load %arg15[%c8_406, %c0_407] : memref<174x32xf32, #tpu.memory_space<vmem>>, vector<160x32xf32>
    tpu.vector_store %arg15[%c8_406, %c0_407], %626 {strides = array<i32>} : memref<174x32xf32, #tpu.memory_space<vmem>>, vector<160x32xf32>,
    %cst_408 = arith.constant 0.000000e+00 : f32
    %628 = vector.broadcast %cst_408 : f32 to vector<6x32xf32>
    %c8_409 = arith.constant 8 : index
    %c0_410 = arith.constant 0 : index
    %629 = vector.load %arg15[%c8_409, %c0_410] : memref<174x32xf32, #tpu.memory_space<vmem>>, vector<6x32xf32>
    %630 = arith.truncf %629 : vector<6x32xf32> to vector<6x32xbf16>
    %c0_411 = arith.constant 0 : index
    %c0_412 = arith.constant 0 : index
    %631 = vector.load %arg8[%c0_411, %c0_412] : memref<512x32xbf16, #tpu.memory_space<vmem>>, vector<32x32xbf16>
    %cst_413 = arith.constant dense<0.000000e+00> : vector<6x32xf32>
    %632 = tpu.matmul %630, %631, %cst_413 {dimension_numbers = #tpu.dot_dimension_numbers<[1], [0], [0], [1], [0, 0, 1, 1], [], []>} : vector<6x32xbf16>, vector<32x32xbf16>, vector<6x32xf32> -> vector<6x32xf32>
    %633 = arith.addf %628, %632 : vector<6x32xf32>
    %c18_414 = arith.constant 18 : index
    %c0_415 = arith.constant 0 : index
    %634 = vector.load %arg15[%c18_414, %c0_415] : memref<174x32xf32, #tpu.memory_space<vmem>>, vector<6x32xf32>
    %635 = arith.truncf %634 : vector<6x32xf32> to vector<6x32xbf16>
    %c32_416 = arith.constant 32 : index
    %c0_417 = arith.constant 0 : index
    %636 = vector.load %arg8[%c32_416, %c0_417] : memref<512x32xbf16, #tpu.memory_space<vmem>>, vector<32x32xbf16>
    %cst_418 = arith.constant dense<0.000000e+00> : vector<6x32xf32>
    %637 = tpu.matmul %635, %636, %cst_418 {dimension_numbers = #tpu.dot_dimension_numbers<[1], [0], [0], [1], [0, 0, 1, 1], [], []>} : vector<6x32xbf16>, vector<32x32xbf16>, vector<6x32xf32> -> vector<6x32xf32>
    %638 = arith.addf %633, %637 : vector<6x32xf32>
    %c28_419 = arith.constant 28 : index
    %c0_420 = arith.constant 0 : index
    %639 = vector.load %arg15[%c28_419, %c0_420] : memref<174x32xf32, #tpu.memory_space<vmem>>, vector<6x32xf32>
    %640 = arith.truncf %639 : vector<6x32xf32> to vector<6x32xbf16>
    %c64_421 = arith.constant 64 : index
    %c0_422 = arith.constant 0 : index
    %641 = vector.load %arg8[%c64_421, %c0_422] : memref<512x32xbf16, #tpu.memory_space<vmem>>, vector<32x32xbf16>
    %cst_423 = arith.constant dense<0.000000e+00> : vector<6x32xf32>
    %642 = tpu.matmul %640, %641, %cst_423 {dimension_numbers = #tpu.dot_dimension_numbers<[1], [0], [0], [1], [0, 0, 1, 1], [], []>} : vector<6x32xbf16>, vector<32x32xbf16>, vector<6x32xf32> -> vector<6x32xf32>
    %643 = arith.addf %638, %642 : vector<6x32xf32>
    %c38_424 = arith.constant 38 : index
    %c0_425 = arith.constant 0 : index
    %644 = vector.load %arg15[%c38_424, %c0_425] : memref<174x32xf32, #tpu.memory_space<vmem>>, vector<6x32xf32>
    %645 = arith.truncf %644 : vector<6x32xf32> to vector<6x32xbf16>
    %c96_426 = arith.constant 96 : index
    %c0_427 = arith.constant 0 : index
    %646 = vector.load %arg8[%c96_426, %c0_427] : memref<512x32xbf16, #tpu.memory_space<vmem>>, vector<32x32xbf16>
    %cst_428 = arith.constant dense<0.000000e+00> : vector<6x32xf32>
    %647 = tpu.matmul %645, %646, %cst_428 {dimension_numbers = #tpu.dot_dimension_numbers<[1], [0], [0], [1], [0, 0, 1, 1], [], []>} : vector<6x32xbf16>, vector<32x32xbf16>, vector<6x32xf32> -> vector<6x32xf32>
    %648 = arith.addf %643, %647 : vector<6x32xf32>
    %c48_429 = arith.constant 48 : index
    %c0_430 = arith.constant 0 : index
    %649 = vector.load %arg15[%c48_429, %c0_430] : memref<174x32xf32, #tpu.memory_space<vmem>>, vector<6x32xf32>
    %650 = arith.truncf %649 : vector<6x32xf32> to vector<6x32xbf16>
    %c128_431 = arith.constant 128 : index
    %c0_432 = arith.constant 0 : index
    %651 = vector.load %arg8[%c128_431, %c0_432] : memref<512x32xbf16, #tpu.memory_space<vmem>>, vector<32x32xbf16>
    %cst_433 = arith.constant dense<0.000000e+00> : vector<6x32xf32>
    %652 = tpu.matmul %650, %651, %cst_433 {dimension_numbers = #tpu.dot_dimension_numbers<[1], [0], [0], [1], [0, 0, 1, 1], [], []>} : vector<6x32xbf16>, vector<32x32xbf16>, vector<6x32xf32> -> vector<6x32xf32>
    %653 = arith.addf %648, %652 : vector<6x32xf32>
    %c58_434 = arith.constant 58 : index
    %c0_435 = arith.constant 0 : index
    %654 = vector.load %arg15[%c58_434, %c0_435] : memref<174x32xf32, #tpu.memory_space<vmem>>, vector<6x32xf32>
    %655 = arith.truncf %654 : vector<6x32xf32> to vector<6x32xbf16>
    %c160 = arith.constant 160 : index
    %c0_436 = arith.constant 0 : index
    %656 = vector.load %arg8[%c160, %c0_436] : memref<512x32xbf16, #tpu.memory_space<vmem>>, vector<32x32xbf16>
    %cst_437 = arith.constant dense<0.000000e+00> : vector<6x32xf32>
    %657 = tpu.matmul %655, %656, %cst_437 {dimension_numbers = #tpu.dot_dimension_numbers<[1], [0], [0], [1], [0, 0, 1, 1], [], []>} : vector<6x32xbf16>, vector<32x32xbf16>, vector<6x32xf32> -> vector<6x32xf32>
    %658 = arith.addf %653, %657 : vector<6x32xf32>
    %c68_438 = arith.constant 68 : index
    %c0_439 = arith.constant 0 : index
    %659 = vector.load %arg15[%c68_438, %c0_439] : memref<174x32xf32, #tpu.memory_space<vmem>>, vector<6x32xf32>
    %660 = arith.truncf %659 : vector<6x32xf32> to vector<6x32xbf16>
    %c192_440 = arith.constant 192 : index
    %c0_441 = arith.constant 0 : index
    %661 = vector.load %arg8[%c192_440, %c0_441] : memref<512x32xbf16, #tpu.memory_space<vmem>>, vector<32x32xbf16>
    %cst_442 = arith.constant dense<0.000000e+00> : vector<6x32xf32>
    %662 = tpu.matmul %660, %661, %cst_442 {dimension_numbers = #tpu.dot_dimension_numbers<[1], [0], [0], [1], [0, 0, 1, 1], [], []>} : vector<6x32xbf16>, vector<32x32xbf16>, vector<6x32xf32> -> vector<6x32xf32>
    %663 = arith.addf %658, %662 : vector<6x32xf32>
    %c78_443 = arith.constant 78 : index
    %c0_444 = arith.constant 0 : index
    %664 = vector.load %arg15[%c78_443, %c0_444] : memref<174x32xf32, #tpu.memory_space<vmem>>, vector<6x32xf32>
    %665 = arith.truncf %664 : vector<6x32xf32> to vector<6x32xbf16>
    %c224 = arith.constant 224 : index
    %c0_445 = arith.constant 0 : index
    %666 = vector.load %arg8[%c224, %c0_445] : memref<512x32xbf16, #tpu.memory_space<vmem>>, vector<32x32xbf16>
    %cst_446 = arith.constant dense<0.000000e+00> : vector<6x32xf32>
    %667 = tpu.matmul %665, %666, %cst_446 {dimension_numbers = #tpu.dot_dimension_numbers<[1], [0], [0], [1], [0, 0, 1, 1], [], []>} : vector<6x32xbf16>, vector<32x32xbf16>, vector<6x32xf32> -> vector<6x32xf32>
    %668 = arith.addf %663, %667 : vector<6x32xf32>
    %c88_447 = arith.constant 88 : index
    %c0_448 = arith.constant 0 : index
    %669 = vector.load %arg15[%c88_447, %c0_448] : memref<174x32xf32, #tpu.memory_space<vmem>>, vector<6x32xf32>
    %670 = arith.truncf %669 : vector<6x32xf32> to vector<6x32xbf16>
    %c256 = arith.constant 256 : index
    %c0_449 = arith.constant 0 : index
    %671 = vector.load %arg8[%c256, %c0_449] : memref<512x32xbf16, #tpu.memory_space<vmem>>, vector<32x32xbf16>
    %cst_450 = arith.constant dense<0.000000e+00> : vector<6x32xf32>
    %672 = tpu.matmul %670, %671, %cst_450 {dimension_numbers = #tpu.dot_dimension_numbers<[1], [0], [0], [1], [0, 0, 1, 1], [], []>} : vector<6x32xbf16>, vector<32x32xbf16>, vector<6x32xf32> -> vector<6x32xf32>
    %673 = arith.addf %668, %672 : vector<6x32xf32>
    %c98_451 = arith.constant 98 : index
    %c0_452 = arith.constant 0 : index
    %674 = vector.load %arg15[%c98_451, %c0_452] : memref<174x32xf32, #tpu.memory_space<vmem>>, vector<6x32xf32>
    %675 = arith.truncf %674 : vector<6x32xf32> to vector<6x32xbf16>
    %c288_453 = arith.constant 288 : index
    %c0_454 = arith.constant 0 : index
    %676 = vector.load %arg8[%c288_453, %c0_454] : memref<512x32xbf16, #tpu.memory_space<vmem>>, vector<32x32xbf16>
    %cst_455 = arith.constant dense<0.000000e+00> : vector<6x32xf32>
    %677 = tpu.matmul %675, %676, %cst_455 {dimension_numbers = #tpu.dot_dimension_numbers<[1], [0], [0], [1], [0, 0, 1, 1], [], []>} : vector<6x32xbf16>, vector<32x32xbf16>, vector<6x32xf32> -> vector<6x32xf32>
    %678 = arith.addf %673, %677 : vector<6x32xf32>
    %c108_456 = arith.constant 108 : index
    %c0_457 = arith.constant 0 : index
    %679 = vector.load %arg15[%c108_456, %c0_457] : memref<174x32xf32, #tpu.memory_space<vmem>>, vector<6x32xf32>
    %680 = arith.truncf %679 : vector<6x32xf32> to vector<6x32xbf16>
    %c320 = arith.constant 320 : index
    %c0_458 = arith.constant 0 : index
    %681 = vector.load %arg8[%c320, %c0_458] : memref<512x32xbf16, #tpu.memory_space<vmem>>, vector<32x32xbf16>
    %cst_459 = arith.constant dense<0.000000e+00> : vector<6x32xf32>
    %682 = tpu.matmul %680, %681, %cst_459 {dimension_numbers = #tpu.dot_dimension_numbers<[1], [0], [0], [1], [0, 0, 1, 1], [], []>} : vector<6x32xbf16>, vector<32x32xbf16>, vector<6x32xf32> -> vector<6x32xf32>
    %683 = arith.addf %678, %682 : vector<6x32xf32>
    %c118_460 = arith.constant 118 : index
    %c0_461 = arith.constant 0 : index
    %684 = vector.load %arg15[%c118_460, %c0_461] : memref<174x32xf32, #tpu.memory_space<vmem>>, vector<6x32xf32>
    %685 = arith.truncf %684 : vector<6x32xf32> to vector<6x32xbf16>
    %c352 = arith.constant 352 : index
    %c0_462 = arith.constant 0 : index
    %686 = vector.load %arg8[%c352, %c0_462] : memref<512x32xbf16, #tpu.memory_space<vmem>>, vector<32x32xbf16>
    %cst_463 = arith.constant dense<0.000000e+00> : vector<6x32xf32>
    %687 = tpu.matmul %685, %686, %cst_463 {dimension_numbers = #tpu.dot_dimension_numbers<[1], [0], [0], [1], [0, 0, 1, 1], [], []>} : vector<6x32xbf16>, vector<32x32xbf16>, vector<6x32xf32> -> vector<6x32xf32>
    %688 = arith.addf %683, %687 : vector<6x32xf32>
    %c128_464 = arith.constant 128 : index
    %c0_465 = arith.constant 0 : index
    %689 = vector.load %arg15[%c128_464, %c0_465] : memref<174x32xf32, #tpu.memory_space<vmem>>, vector<6x32xf32>
    %690 = arith.truncf %689 : vector<6x32xf32> to vector<6x32xbf16>
    %c384 = arith.constant 384 : index
    %c0_466 = arith.constant 0 : index
    %691 = vector.load %arg8[%c384, %c0_466] : memref<512x32xbf16, #tpu.memory_space<vmem>>, vector<32x32xbf16>
    %cst_467 = arith.constant dense<0.000000e+00> : vector<6x32xf32>
    %692 = tpu.matmul %690, %691, %cst_467 {dimension_numbers = #tpu.dot_dimension_numbers<[1], [0], [0], [1], [0, 0, 1, 1], [], []>} : vector<6x32xbf16>, vector<32x32xbf16>, vector<6x32xf32> -> vector<6x32xf32>
    %693 = arith.addf %688, %692 : vector<6x32xf32>
    %c138_468 = arith.constant 138 : index
    %c0_469 = arith.constant 0 : index
    %694 = vector.load %arg15[%c138_468, %c0_469] : memref<174x32xf32, #tpu.memory_space<vmem>>, vector<6x32xf32>
    %695 = arith.truncf %694 : vector<6x32xf32> to vector<6x32xbf16>
    %c416 = arith.constant 416 : index
    %c0_470 = arith.constant 0 : index
    %696 = vector.load %arg8[%c416, %c0_470] : memref<512x32xbf16, #tpu.memory_space<vmem>>, vector<32x32xbf16>
    %cst_471 = arith.constant dense<0.000000e+00> : vector<6x32xf32>
    %697 = tpu.matmul %695, %696, %cst_471 {dimension_numbers = #tpu.dot_dimension_numbers<[1], [0], [0], [1], [0, 0, 1, 1], [], []>} : vector<6x32xbf16>, vector<32x32xbf16>, vector<6x32xf32> -> vector<6x32xf32>
    %698 = arith.addf %693, %697 : vector<6x32xf32>
    %c148_472 = arith.constant 148 : index
    %c0_473 = arith.constant 0 : index
    %699 = vector.load %arg15[%c148_472, %c0_473] : memref<174x32xf32, #tpu.memory_space<vmem>>, vector<6x32xf32>
    %700 = arith.truncf %699 : vector<6x32xf32> to vector<6x32xbf16>
    %c448 = arith.constant 448 : index
    %c0_474 = arith.constant 0 : index
    %701 = vector.load %arg8[%c448, %c0_474] : memref<512x32xbf16, #tpu.memory_space<vmem>>, vector<32x32xbf16>
    %cst_475 = arith.constant dense<0.000000e+00> : vector<6x32xf32>
    %702 = tpu.matmul %700, %701, %cst_475 {dimension_numbers = #tpu.dot_dimension_numbers<[1], [0], [0], [1], [0, 0, 1, 1], [], []>} : vector<6x32xbf16>, vector<32x32xbf16>, vector<6x32xf32> -> vector<6x32xf32>
    %703 = arith.addf %698, %702 : vector<6x32xf32>
    %c158_476 = arith.constant 158 : index
    %c0_477 = arith.constant 0 : index
    %704 = vector.load %arg15[%c158_476, %c0_477] : memref<174x32xf32, #tpu.memory_space<vmem>>, vector<6x32xf32>
    %705 = arith.truncf %704 : vector<6x32xf32> to vector<6x32xbf16>
    %c480 = arith.constant 480 : index
    %c0_478 = arith.constant 0 : index
    %706 = vector.load %arg8[%c480, %c0_478] : memref<512x32xbf16, #tpu.memory_space<vmem>>, vector<32x32xbf16>
    %cst_479 = arith.constant dense<0.000000e+00> : vector<6x32xf32>
    %707 = tpu.matmul %705, %706, %cst_479 {dimension_numbers = #tpu.dot_dimension_numbers<[1], [0], [0], [1], [0, 0, 1, 1], [], []>} : vector<6x32xbf16>, vector<32x32xbf16>, vector<6x32xf32> -> vector<6x32xf32>
    %708 = arith.addf %703, %707 : vector<6x32xf32>
    %709 = vector.extract_strided_slice %10 {offsets = [4, 0], sizes = [1, 32], strides = [1, 1]} : vector<8x128xf32> to vector<1x32xf32>
    %710 = vector.broadcast %709 : vector<1x32xf32> to vector<6x32xf32>
    %711 = arith.addf %708, %710 : vector<6x32xf32>
    %712 = arith.truncf %711 : vector<6x32xf32> to vector<6x32xbf16>
    %c0_480 = arith.constant 0 : index
    %c0_481 = arith.constant 0 : index
    %713 = vector.load %arg9[%c0_480, %c0_481] : memref<32x2xbf16, #tpu.memory_space<vmem>>, vector<32x2xbf16>
    %cst_482 = arith.constant dense<0.000000e+00> : vector<6x2xf32>
    %714 = tpu.matmul %712, %713, %cst_482 {dimension_numbers = #tpu.dot_dimension_numbers<[1], [0], [0], [1], [0, 0, 1, 1], [], []>} : vector<6x32xbf16>, vector<32x2xbf16>, vector<6x2xf32> -> vector<6x2xf32>
    %715 = vector.extract_strided_slice %10 {offsets = [5, 0], sizes = [1, 2], strides = [1, 1]} : vector<8x128xf32> to vector<1x2xf32>
    %716 = vector.broadcast %715 : vector<1x2xf32> to vector<6x2xf32>
    %717 = arith.addf %714, %716 : vector<6x2xf32>
    %cst_483 = arith.constant 0.000000e+00 : f32
    %718 = vector.broadcast %cst_483 : f32 to vector<6x2xf32>
    %719 = arith.cmpf oge, %717, %718 : vector<6x2xf32>
    %cst_484 = arith.constant 0.00999999977 : f32
    %720 = vector.broadcast %cst_484 : f32 to vector<6x2xf32>
    %721 = arith.mulf %720, %717 : vector<6x2xf32>
    %722 = arith.select %719, %717, %721 : vector<6x2xi1>, vector<6x2xf32>
    %c0_485 = arith.constant 0 : index
    %c0_486 = arith.constant 0 : index
    %723 = vector.load %arg10[%c0_485, %c0_486] : memref<6x2xf32, #tpu.memory_space<vmem>>, vector<6x2xf32>
    tpu.vector_store %arg10[%c0_485, %c0_486], %722 {strides = array<i32>} : memref<6x2xf32, #tpu.memory_space<vmem>>, vector<6x2xf32>,
    return
  }
}

</mosaic_0001>

<bundles_post_ra>
// kernel: cnn_trajnet_forward.1
= control target key start
LH: loop header
LB: loop body
LE: loop exit
PB: predicated region body
PF: predicated region fallthrough
CT: control target
= control target key end

     0   :  { %15 = vsyncpa [#allocation8], 0  ;;  %s20366_s0 = inlined_call_operand.vmem [shape: f32[6,4], index: 0, kind: input, shape index: {}]   ;;  %s20367_s1 = inlined_call_operand.vmem [shape: f32[2,32], index: 1, kind: input, shape index: {}]   ;;  %s20368_s2 = inlined_call_operand.vmem [shape: f32[8,128], index: 2, kind: input, shape index: {}]   ;;  %s20369_s3 = inlined_call_operand.vmem [shape: f32[280,1], index: 3, kind: input, shape index: {}]   ;;  %s20370_s4 = inlined_call_operand.vmem [shape: bf16[36,8], index: 4, kind: input, shape index: {}]   ;;  %s20371_s5 = inlined_call_operand.vmem [shape: bf16[72,16], index: 5, kind: input, shape index: {}]   ;;  %s20372_s6 = inlined_call_operand.vmem [shape: bf16[144,24], index: 6, kind: input, shape index: {}]   ;;  %s20373_s7 = inlined_call_operand.vmem [shape: bf16[216,32], index: 7, kind: input, shape index: {}]   ;;  %s20374_s8 = inlined_call_operand.vmem [shape: bf16[512,32], index: 8, kind: input, shape index: {}]   ;;  %s20375_s9 = inlined_call_operand.vmem [shape: bf16[32,2], index: 9, kind: input, shape index: {}]   ;;  %s20376_s10 = inlined_call_operand.vmem [shape: f32[6,2], index: 10, kind: output, shape index: {}]  }
   0x1   :  { %s24_s15 = sshll.u32 %s20367_s1, 4  ;;  %s25_s15 = int_to_ptr.vmem [resolvable:$true] %s24_s15 }
   0x2   :  { %s15719_s16 = scalar_lea.vmem %s25_s15, 32  ;;  %p15724_p1 = scmp.lt.s32.totalorder %s25_s15, %s25_s15 }
   0x3   :  { %p15720_p0 = scmp.ne.s32.totalorder %s25_s15, %s15719_s16  ;;  %p15725_p2 = scmp.lt.s32.totalorder %s15719_s16, %s15719_s16 }
   0x5   :  { %p15726_p3 = por %p15725_p2, %p15724_p1 }
   0x7   :  { %p15727_p4 = pnand %p15726_p3, %p15720_p0 }
   0x9   :  { %15730 = shalt.err (!%p15727_p4)
}
   0xa   :  { %s15733_s17 = smov [#allocation7]  }
   0xb   :  { %27 = dma.vmem_to_smem %s25_s15, 32, %s15733_s17, [#allocation8]  }
   0xc   :  { %15731 = dma.done.wait [#allocation8], 32  }
   0xd   :  { %15732 = vsyncadd [#allocation8], 4294967264 }
   0xe   :  { %47 = sfence }
   0xf   :  { %v15650_v0 = vld [vmem:[%s20370_s4] ss:$0 sps:$4 sm:$0xcc]   ;;  %vm707_vm0 = vcmask 1041408   ;;  %vm49_vm1 = vcmask 31744   ;;  %vm91_vm2 = vcmask 29696  }
  0x10   :  { %v652_v1 = vrot.slane %v15650_v0, 2  ;;  %v20377_v2 = vmov 0.0   ;;  %s15802_s1 = sld [smem:[#allocation7]]  ;;  %s12222_s21 = sld [smem:[#allocation7 + $0x1]]  ;;  %v594_v3 = vld [vmem:[%s20370_s4] sm:$0x3] }
  0x11   :  { %51 = vst.msk [vmem:[#allocation2 + $0x8] sm:$0xff] %vm49_vm1, %v20377_v2  ;;  %52 = vst.msk [vmem:[#allocation2 + $0x10] sm:$0xff] %vm49_vm1, %v20377_v2  ;;  %s15804_s20 = sld [smem:[#allocation7 + $0x80]]  ;;  %13812 = vmatprep.subr.bf16.mxu1 %v20377_v2  ;;  %s15887_s22 = sld [smem:[#allocation7 + $0x81]]  ;;  %v15901_v5 = vld [vmem:[%s20366_s0] sm:$0x3f] }
  0x12   :  { %50 = vst.msk [vmem:[#allocation2] sm:$0xff] %vm49_vm1, %v20377_v2  ;;  %53 = vst.msk [vmem:[#allocation2 + $0x18] sm:$0xff] %vm49_vm1, %v20377_v2  ;;  %15626 = vmatprep.subr.msk.bf16.mxu0 %vm707_vm0, %v652_v1  ;;  %v709_v4 = vsel %vm707_vm0, %v652_v1, 0  ;;  %s12224_s25 = sld [smem:[#allocation7 + $0x2]]  ;;  %s12226_s27 = sld [smem:[#allocation7 + $0x3]]  ;;  %v15913_v11 = vsel %vm707_vm0, %v594_v3, 0 }
  0x13   :  { %54 = vst.msk [vmem:[#allocation2 + $0x20] sm:$0xff] %vm49_vm1, %v20377_v2  ;;  %55 = vst.msk [vmem:[#allocation2 + $0x28] sm:$0xff] %vm49_vm1, %v20377_v2  ;;  %s15894_s26 = sld [smem:[#allocation7 + $0x82]]  ;;  %13471 = vmatpush3.bf16.msra.mxu0 %v709_v4  ;;  %s15896_s28 = sld [smem:[#allocation7 + $0x83]] }
  0x14   :  { %56 = vst.msk [vmem:[#allocation2 + $0x30] sm:$0xff] %vm49_vm1, %v20377_v2  ;;  %57 = vst.msk [vmem:[#allocation2 + $0x38] sm:$0xff] %vm49_vm1, %v20377_v2  ;;  %15627 = vmatprep.subr.msk.bf16.mxu0 %vm707_vm0, %v594_v3  ;;  %s12228_s11 = sld [smem:[#allocation7 + $0x4]]  ;;  %s15906_s13 = sld [smem:[#allocation7 + $0x5]] }
  0x15   :  { %58 = vst.msk [vmem:[#allocation2 + $0x40] sm:$0xff] %vm49_vm1, %v20377_v2  ;;  %59 = vst.msk [vmem:[#allocation2 + $0x48] sm:$0xff] %vm49_vm1, %v20377_v2  ;;  %s15904_s12 = sld [smem:[#allocation7 + $0x84]]  ;;  %s15915_s14 = sld [smem:[#allocation7 + $0x85]] }
  0x16   :  { %60 = vst.msk [vmem:[#allocation2 + $0x50] sm:$0xff] %vm49_vm1, %v20377_v2  ;;  %61 = vst.msk [vmem:[#allocation2 + $0x58] sm:$0xff] %vm49_vm1, %v20377_v2  ;;  %v223_v6 = vstv %s15802_s1  ;;  %v233_v9 = vstv %s12222_s21  ;;  %s15919_s15 = sld [smem:[#allocation7 + $0x6]]  ;;  %s15925_s17 = sld [smem:[#allocation7 + $0x7]] }
  0x17   :  { %62 = vst.msk [vmem:[#allocation2 + $0x60] sm:$0xff] %vm49_vm1, %v20377_v2  ;;  %63 = vst.msk [vmem:[#allocation2 + $0x68] sm:$0xff] %vm49_vm1, %v20377_v2  ;;  %v225_v7 = vstv %s15804_s20  ;;  %v224_v8 = vmul.f32 %v223_v6, %v15901_v5  ;;  %v235_v10 = vstv %s15887_s22  ;;  %v234_v12 = vmul.f32 %v233_v9, %v15901_v5  ;;  %s15921_s16 = sld [smem:[#allocation7 + $0x86]]  ;;  %s15927_s18 = sld [smem:[#allocation7 + $0x87]] }
  0x18   :  { %64 = vst.msk [vmem:[#allocation2 + $0x70] sm:$0xff] %vm49_vm1, %v20377_v2  ;;  %65 = vst.msk [vmem:[#allocation2 + $0x78] sm:$0xff] %vm49_vm1, %v20377_v2  ;;  %v243_v13 = vstv %s12224_s25  ;;  %v253_v17 = vstv %s12226_s27  ;;  %s15931_s19 = sld [smem:[#allocation7 + $0x8]]  ;;  %s15936_s20 = sld [smem:[#allocation7 + $0x9]] }
  0x19   :  { %66 = vst.msk [vmem:[#allocation2 + $0x80] sm:$0xff] %vm49_vm1, %v20377_v2  ;;  %67 = vst.msk [vmem:[#allocation2 + $0x88] sm:$0xff] %vm49_vm1, %v20377_v2  ;;  %v245_v14 = vstv %s15894_s26  ;;  %v226_v15 = vadd.f32 %v225_v7, %v224_v8  ;;  %v244_v16 = vmul.f32 %v243_v13, %v15901_v5  ;;  %v255_v18 = vstv %s15896_s28  ;;  %s15933_s1 = sld [smem:[#allocation7 + $0x88]]  ;;  %s15939_s21 = sld [smem:[#allocation7 + $0x89]] }
  0x1a   :  { %68 = vst.msk [vmem:[#allocation2 + $0x90] sm:$0xff] %vm49_vm1, %v20377_v2  ;;  %69 = vst.msk [vmem:[#allocation2 + $0x98] sm:$0xff] %vm49_vm1, %v20377_v2  ;;  %v236_v19 = vadd.f32 %v235_v10, %v234_v12  ;;  %v254_v20 = vmul.f32 %v253_v17, %v15901_v5  ;;  %v263_v21 = vstv %s12228_s11  ;;  %v273_v28 = vstv %s15906_s13  ;;  %s15941_s22 = sld [smem:[#allocation7 + $0xa]]  ;;  %s15952_s24 = sld [smem:[#allocation7 + $0xb]] }
  0x1b   :  { %70 = vst.msk [vmem:[#allocation2 + $0xa0] sm:$0xff] %vm49_vm1, %v20377_v2  ;;  %71 = vst.msk [vmem:[#allocation2 + $0xa8] sm:$0xff] %vm49_vm1, %v20377_v2  ;;  %v265_v22 = vstv %s15904_s12  ;;  %vm227_vm3 = vcmp.ge.f32.partialorder %v226_v15, 0.0  ;;  %v228_v23 = vmul.f32 0.01, %v226_v15  ;;  %v246_v24 = vadd.f32 %v245_v14, %v244_v16  ;;  %s15950_s23 = sld [smem:[#allocation7 + $0x8a]] }
  0x1c   :  { %72 = vst.msk [vmem:[#allocation2 + $0xb0] sm:$0xff] %vm49_vm1, %v20377_v2  ;;  %73 = vst.msk [vmem:[#allocation2 + $0xb8] sm:$0xff] %vm49_vm1, %v20377_v2  ;;  %v264_v25 = vmul.f32 %v263_v21, %v15901_v5  ;;  %vm237_vm4 = vcmp.ge.f32.partialorder %v236_v19, 0.0  ;;  %v238_v26 = vmul.f32 0.01, %v236_v19  ;;  %v256_v27 = vadd.f32 %v255_v18, %v254_v20  ;;  %s15958_s25 = sld [smem:[#allocation7 + $0x8b]] }
  0x1d   :  { %74 = vst.msk [vmem:[#allocation2 + $0xc0] sm:$0xff] %vm49_vm1, %v20377_v2  ;;  %75 = vst.msk [vmem:[#allocation2 + $0xc8] sm:$0xff] %vm49_vm1, %v20377_v2  ;;  %v229_v29 = vsel %vm227_vm3, %v226_v15, %v228_v23  ;;  %vm247_vm5 = vcmp.ge.f32.partialorder %v246_v24, 0.0  ;;  %v248_v30 = vmul.f32 0.01, %v246_v24  ;;  %v274_v34 = vmul.f32 %v273_v28, %v15901_v5  ;;  %s15960_s26 = sld [smem:[#allocation7 + $0xc]] }
  0x1e   :  { %76 = vst.msk [vmem:[#allocation2 + $0xd0] sm:$0xff] %vm49_vm1, %v20377_v2  ;;  %77 = vst.msk [vmem:[#allocation2 + $0xd8] sm:$0xff] %vm49_vm1, %v20377_v2  ;;  %v266_v31 = vadd.f32 %v265_v22, %v264_v25  ;;  %v239_v32 = vsel %vm237_vm4, %v236_v19, %v238_v26  ;;  %vm257_vm6 = vcmp.ge.f32.partialorder %v256_v27, 0.0  ;;  %v258_v33 = vmul.f32 0.01, %v256_v27  ;;  %s15965_s27 = sld [smem:[#allocation7 + $0x8c]] }
  0x1f   :  { %78 = vst.msk [vmem:[#allocation2 + $0xe0] sm:$0xff] %vm49_vm1, %v20377_v2  ;;  %79 = vst.msk [vmem:[#allocation2 + $0xe8] sm:$0xff] %vm49_vm1, %v20377_v2  ;;  %v249_v35 = vsel %vm247_vm5, %v246_v24, %v248_v30  ;;  %v275_v37 = vstv %s15915_s14  ;;  %v283_v40 = vstv %s15919_s15  ;;  %v285_v41 = vstv %s15921_s16  ;;  %s15970_s28 = sld [smem:[#allocation7 + $0xd]]  ;;  %s15976_s30 = sld [smem:[#allocation7 + $0xe]]  ;;  %v16002_v22 = vld [vmem:[%s20370_s4 + $0x4] sm:$0x3] }
  0x20   :  { %80 = vst.msk [vmem:[#allocation2 + $0xf0] sm:$0xff] %vm49_vm1, %v20377_v2  ;;  %81 = vst.msk [vmem:[#allocation2 + $0xf8] sm:$0xff] %vm49_vm1, %v20377_v2  ;;  %vm267_vm7 = vcmp.ge.f32.partialorder %v266_v31, 0.0  ;;  %v268_v36 = vmul.f32 0.01, %v266_v31  ;;  %v259_v38 = vsel %vm257_vm6, %v256_v27, %v258_v33  ;;  %v276_v39 = vadd.f32 %v275_v37, %v274_v34  ;;  %s15972_s29 = sld [smem:[#allocation7 + $0x8d]] }
  0x21   :  { %82 = vst.msk [vmem:[#allocation2 + $0x100] sm:$0xff] %vm49_vm1, %v20377_v2  ;;  %83 = vst.msk [vmem:[#allocation2 + $0x108] sm:$0xff] %vm49_vm1, %v20377_v2  ;;  %v284_v43 = vmul.f32 %v283_v40, %v15901_v5  ;;  %v293_v44 = vstv %s15925_s17  ;;  %v295_v45 = vstv %s15927_s18  ;;  %v303_v48 = vstv %s15931_s19  ;;  %s15978_s11 = sld [smem:[#allocation7 + $0x8e]]  ;;  %s15982_s12 = sld [smem:[#allocation7 + $0xf]] }
  0x22   :  { %84 = vst.msk [vmem:[#allocation2 + $0x110] sm:$0xff] %vm49_vm1, %v20377_v2  ;;  %85 = vst.msk [vmem:[#allocation2 + $0x118] sm:$0xff] %vm49_vm1, %v20377_v2  ;;  %v269_v42 = vsel %vm267_vm7, %v266_v31, %v268_v36  ;;  %vm277_vm8 = vcmp.ge.f32.partialorder %v276_v39, 0.0  ;;  %v278_v46 = vmul.f32 0.01, %v276_v39  ;;  %v294_v47 = vmul.f32 %v293_v44, %v15901_v5  ;;  %s15985_s13 = sld [smem:[#allocation7 + $0x8f]] }
  0x23   :  { %86 = vst.msk [vmem:[#allocation2 + $0x120] sm:$0xff] %vm49_vm1, %v20377_v2  ;;  %87 = vst.msk [vmem:[#allocation2 + $0x128] sm:$0xff] %vm49_vm1, %v20377_v2  ;;  %v286_v49 = vadd.f32 %v285_v41, %v284_v43  ;;  %v304_v50 = vmul.f32 %v303_v48, %v15901_v5  ;;  %v305_v51 = vstv %s15933_s1  ;;  %v313_v52 = vstv %s15936_s20  ;;  %s15987_s14 = sld [smem:[#allocation7 + $0x10]]  ;;  %s16013_s18 = sld [smem:[#allocation7 + $0x11]] }
  0x24   :  { %88 = vst.msk [vmem:[#allocation2 + $0x130] sm:$0xff] %vm49_vm1, %v20377_v2  ;;  %89 = vst.msk [vmem:[#allocation2 + $0x138] sm:$0xff] %vm49_vm1, %v20377_v2  ;;  %v279_v53 = vsel %vm277_vm8, %v276_v39, %v278_v46  ;;  %v296_v54 = vadd.f32 %v295_v45, %v294_v47  ;;  %v314_v55 = vmul.f32 %v313_v52, %v15901_v5  ;;  %v315_v56 = vstv %s15939_s21  ;;  %s15997_s15 = sld [smem:[#allocation7 + $0x90]]  ;;  %s16015_s19 = sld [smem:[#allocation7 + $0x91]] }
  0x25   :  { %90 = vst.msk [vmem:[#allocation2 + $0x140] sm:$0xff] %vm49_vm1, %v20377_v2  ;;  %vm287_vm9 = vcmp.ge.f32.partialorder %v286_v49, 0.0  ;;  %v288_v58 = vmul.f32 0.01, %v286_v49  ;;  %v306_v59 = vadd.f32 %v305_v51, %v304_v50  ;;  %v323_v60 = vstv %s15941_s22  ;;  %s16020_s1 = sld [smem:[#allocation7 + $0x12]]  ;;  %s16028_s21 = sld [smem:[#allocation7 + $0x13]] }
  0x26   :  { %92 = vst.msk [vmem:[#allocation2 + $0x148] sm:$0x3f] %vm91_vm2, %v20377_v2  ;;  %230 = vst.msk [vmem:[#allocation2 + $0x8] sm:$0x3f] %vm91_vm2, %v229_v29  ;;  %vm297_vm10 = vcmp.ge.f32.partialorder %v296_v54, 0.0  ;;  %v316_v63 = vadd.f32 %v315_v56, %v314_v55  ;;  %v324_v0 = vmul.f32 %v323_v60, %v15901_v5  ;;  %v325_v12 = vstv %s15950_s23  ;;  %s16022_s20 = sld [smem:[#allocation7 + $0x92]] }
  0x27   :  { %240 = vst.msk [vmem:[#allocation2 + $0x12] sm:$0x3f] %vm91_vm2, %v239_v32  ;;  %250 = vst.msk [vmem:[#allocation2 + $0x1c] sm:$0x3f] %vm91_vm2, %v249_v35  ;;  %v298_v62 = vmul.f32 0.01, %v296_v54  ;;  %v289_v4 = vsel %vm287_vm9, %v286_v49, %v288_v58  ;;  %v333_v17 = vstv %s15952_s24  ;;  %v335_v21 = vstv %s15958_s25 }
  0x28   :  { %260 = vst.msk [vmem:[#allocation2 + $0x26] sm:$0x3f] %vm91_vm2, %v259_v38  ;;  %270 = vst.msk [vmem:[#allocation2 + $0x30] sm:$0x3f] %vm91_vm2, %v269_v42  ;;  %vm307_vm11 = vcmp.ge.f32.partialorder %v306_v59, 0.0  ;;  %vm317_vm12 = vcmp.ge.f32.partialorder %v316_v63, 0.0  ;;  %v326_v16 = vadd.f32 %v325_v12, %v324_v0  ;;  %v334_v20 = vmul.f32 %v333_v17, %v15901_v5 }
  0x29   :  { %280 = vst.msk [vmem:[#allocation2 + $0x3a] sm:$0x3f] %vm91_vm2, %v279_v53  ;;  %v308_v6 = vmul.f32 0.01, %v306_v59  ;;  %290 = vst.msk [vmem:[#allocation2 + $0x44] sm:$0x3f] %vm91_vm2, %v289_v4  ;;  %v299_v9 = vsel %vm297_vm10, %v296_v54, %v298_v62  ;;  %v343_v24 = vstv %s15960_s26  ;;  %v345_v25 = vstv %s15965_s27 }
  0x2a   :  { %v318_v10 = vmul.f32 0.01, %v316_v63  ;;  %300 = vst.msk [vmem:[#allocation2 + $0x4e] sm:$0x3f] %vm91_vm2, %v299_v9  ;;  %vm327_vm13 = vcmp.ge.f32.partialorder %v326_v16, 0.0  ;;  %v336_v26 = vadd.f32 %v335_v21, %v334_v20  ;;  %v344_v27 = vmul.f32 %v343_v24, %v15901_v5  ;;  %s16033_s22 = sld [smem:[#allocation7 + $0x93]] }
  0x2b   :  { %v309_v15 = vsel %vm307_vm11, %v306_v59, %v308_v6  ;;  %v328_v23 = vmul.f32 0.01, %v326_v16  ;;  %v353_v28 = vstv %s15970_s28  ;;  %v355_v29 = vstv %s15972_s29  ;;  %s16035_s23 = sld [smem:[#allocation7 + $0x14]]  ;;  %s16045_s25 = sld [smem:[#allocation7 + $0x15]] }
  0x2c   :  { %310 = vst.msk [vmem:[#allocation2 + $0x58] sm:$0x3f] %vm91_vm2, %v309_v15  ;;  %v319_v19 = vsel %vm317_vm12, %v316_v63, %v318_v10  ;;  %v354_v32 = vmul.f32 %v353_v28, %v15901_v5  ;;  %v363_v33 = vstv %s15976_s30  ;;  %vm337_vm14 = vcmp.ge.f32.partialorder %v336_v26, 0.0  ;;  %s16043_s24 = sld [smem:[#allocation7 + $0x94]]  ;;  %s16054_s26 = sld [smem:[#allocation7 + $0x95]] }
  0x2d   :  { %v595_v57 = vld [vmem:[#allocation2 + $0x8] sm:$0xff]  ;;  %320 = vst.msk [vmem:[#allocation2 + $0x62] sm:$0x3f] %vm91_vm2, %v319_v19  ;;  %v329_v31 = vsel %vm327_vm13, %v326_v16, %v328_v23  ;;  %v338_v34 = vmul.f32 0.01, %v336_v26  ;;  %v346_v35 = vadd.f32 %v345_v25, %v344_v27  ;;  %v364_v36 = vmul.f32 %v363_v33, %v15901_v5  ;;  %s16056_s27 = sld [smem:[#allocation7 + $0x16]] }
  0x2e   :  { %v596_v61 = vld [vmem:[#allocation2 + $0x10] sm:$0xff]  ;;  %v597_v3 = vld [vmem:[#allocation2 + $0x18] sm:$0xff]  ;;  %330 = vst.msk [vmem:[#allocation2 + $0x6c] sm:$0x3f] %vm91_vm2, %v329_v31  ;;  %v356_v38 = vadd.f32 %v355_v29, %v354_v32  ;;  %v373_v39 = vstv %s15982_s12  ;;  %v375_v40 = vstv %s15985_s13  ;;  %v383_v41 = vstv %s15987_s14  ;;  %s16061_s28 = sld [smem:[#allocation7 + $0x96]]  ;;  %s16063_s29 = sld [smem:[#allocation7 + $0x17]] }
  0x2f   :  { %v630_v1 = vpack.c.bf16 %v596_v61, %v595_v57  ;;  %v598_v7 = vld [vmem:[#allocation2 + $0x20] sm:$0xff]  ;;  %v599_v8 = vld [vmem:[#allocation2 + $0x28] sm:$0xff]  ;;  %v600_v14 = vld [vmem:[#allocation2 + $0x30] sm:$0xff]  ;;  %v339_v45 = vsel %vm337_vm14, %v336_v26, %v338_v34  ;;  %vm347_vm15 = vcmp.ge.f32.partialorder %v346_v35, 0.0  ;;  %v348_v46 = vmul.f32 0.01, %v346_v35 }
  0x30   :  { %v631_v13 = vpack.c.bf16 %v598_v7, %v597_v3  ;;  %v632_v18 = vpack.c.bf16 %v600_v14, %v599_v8  ;;  %v601_v30 = vld [vmem:[#allocation2 + $0x38] sm:$0xff]  ;;  %v602_v37 = vld [vmem:[#allocation2 + $0x40] sm:$0xff]  ;;  %340 = vst.msk [vmem:[#allocation2 + $0x76] sm:$0x3f] %vm91_vm2, %v339_v45  ;;  %vm357_vm3 = vcmp.ge.f32.partialorder %v356_v38, 0.0  ;;  %v374_v53 = vmul.f32 %v373_v39, %v15901_v5  ;;  %s16069_s30 = sld [smem:[#allocation7 + $0x97]] }
  0x31   :  { %13472 = vmatprep.mubr.msk.bf16.mxu0 %vm49_vm1, %v630_v1  ;;  %v633_v42 = vpack.c.bf16 %v602_v37, %v601_v30  ;;  %v603_v43 = vld [vmem:[#allocation2 + $0x48] sm:$0xff]  ;;  %v604_v44 = vld [vmem:[#allocation2 + $0x50] sm:$0xff]  ;;  %v358_v49 = vmul.f32 0.01, %v356_v38  ;;  %v349_v52 = vsel %vm347_vm15, %v346_v35, %v348_v46  ;;  %v384_v54 = vmul.f32 %v383_v41, %v15901_v5  ;;  %s16075_s12 = sld [smem:[#allocation7 + $0x98]]  ;;  %s16077_s13 = sld [smem:[#allocation7 + $0x19]] }
  0x32   :  { %13473 = vmatmul.mubr.msk.bf16.vlgmr.msra.gmra.mrb[0].mxu0 %vm49_vm1, %v631_v13  ;;  %v634_v47 = vpack.c.bf16 %v604_v44, %v603_v43  ;;  %v385_v55 = vstv %s15997_s15  ;;  %350 = vst.msk [vmem:[#allocation2 + $0x80] sm:$0x3f] %vm91_vm2, %v349_v52  ;;  %v376_v59 = vadd.f32 %v375_v40, %v374_v53  ;;  %v393_v61 = vstv %s16013_s18  ;;  %s16084_s14 = sld [smem:[#allocation7 + $0x99]]  ;;  %s16092_s15 = sld [smem:[#allocation7 + $0x1a]] }
  0x33   :  { %13509 = vmatpush3.bf16.msra.mxu0 %v15913_v11  ;;  %13476 = vmatprep.mubr.msk.bf16.mxu0 %vm49_vm1, %v632_v18  ;;  %v365_v11 = vstv %s15978_s11  ;;  %v16037_v48 = vld [vmem:[#allocation2 + $0x58] sm:$0xff]  ;;  %v359_v57 = vsel %vm357_vm3, %v356_v38, %v358_v49  ;;  %v386_v60 = vadd.f32 %v385_v55, %v384_v54  ;;  %v395_v62 = vstv %s16015_s19  ;;  %s16071_s11 = sld [smem:[#allocation7 + $0x18]]  ;;  %s16094_s16 = sld [smem:[#allocation7 + $0x9a]] }
  0x34   :  { %15628 = vmatprep.subr.msk.bf16.mxu0 %vm707_vm0, %v16002_v22  ;;  %v366_v50 = vadd.f32 %v365_v11, %v364_v36  ;;  %v606_v51 = vld [vmem:[#allocation2 + $0x60] sm:$0xff]  ;;  %360 = vst.msk [vmem:[#allocation2 + $0x8a] sm:$0x3f] %vm91_vm2, %v359_v57  ;;  %v394_v1 = vmul.f32 %v393_v61, %v15901_v5  ;;  %v403_v3 = vstv %s16020_s1  ;;  %v405_v4 = vstv %s16022_s20  ;;  %s16102_s17 = sld [smem:[#allocation7 + $0x1b]]  ;;  %s12276_s19 = sld [smem:[#allocation7 + $0x1c]] }
  0x35   :  { %v635_v56 = vpack.c.bf16 %v606_v51, %v16037_v48  ;;  %v607_v63 = vld [vmem:[#allocation2 + $0x68] sm:$0xff]  ;;  %vm377_vm5 = vcmp.ge.f32.partialorder %v376_v59, 0.0  ;;  %v378_v6 = vmul.f32 0.01, %v376_v59  ;;  %vm387_vm6 = vcmp.ge.f32.partialorder %v386_v60, 0.0  ;;  %s16106_s18 = sld [smem:[#allocation7 + $0x9b]] }
  0x36   :  { %vm367_vm4 = vcmp.ge.f32.partialorder %v366_v50, 0.0  ;;  %v368_v58 = vmul.f32 0.01, %v366_v50  ;;  %v388_v7 = vmul.f32 0.01, %v386_v60  ;;  %v396_v8 = vadd.f32 %v395_v62, %v394_v1  ;;  %s12277_s1 = sld [smem:[#allocation7 + $0x9c]] }
  0x37   :  { %v404_v9 = vmul.f32 %v403_v3, %v15901_v5  ;;  %v413_v10 = vstv %s16028_s21  ;;  %v415_v12 = vstv %s16033_s22  ;;  %v608_v13 = vld [vmem:[#allocation2 + $0x70] sm:$0xff]  ;;  %v379_v14 = vsel %vm377_vm5, %v376_v59, %v378_v6  ;;  %v609_v21 = vld [vmem:[#allocation2 + $0x78] sm:$0xff]  ;;  %s12278_s22 = sld [smem:[#allocation7 + $0x1d]]  ;;  %s12283_s21 = sld [smem:[#allocation7 + $0x9f]] }
  0x38   :  { %v369_v0 = vsel %vm367_vm4, %v366_v50, %v368_v58  ;;  %v389_v15 = vsel %vm387_vm6, %v386_v60, %v388_v7  ;;  %v414_v16 = vmul.f32 %v413_v10, %v15901_v5  ;;  %v423_v17 = vstv %s16035_s23  ;;  %380 = vst.msk [vmem:[#allocation2 + $0x9e] sm:$0x3f] %vm91_vm2, %v379_v14  ;;  %s12279_s23 = sld [smem:[#allocation7 + $0x9d]] }
  0x39   :  { %370 = vst.msk [vmem:[#allocation2 + $0x94] sm:$0x3f] %vm91_vm2, %v369_v0  ;;  %v636_v18 = vpack.c.bf16 %v608_v13, %v607_v63  ;;  %390 = vst.msk [vmem:[#allocation2 + $0xa8] sm:$0x3f] %vm91_vm2, %v389_v15  ;;  %vm397_vm7 = vcmp.ge.f32.partialorder %v396_v8, 0.0  ;;  %v406_v20 = vadd.f32 %v405_v4, %v404_v9  ;;  %v610_v23 = vld [vmem:[#allocation2 + $0x80] sm:$0xff]  ;;  %v424_v25 = vmul.f32 %v423_v17, %v15901_v5 }
  0x3a   :  { %13477 = vmatmul.mubr.msk.bf16.gmra.mrb[4].mxu0 %vm49_vm1, %v633_v42  ;;  %v398_v19 = vmul.f32 0.01, %v396_v8  ;;  %v416_v24 = vadd.f32 %v415_v12, %v414_v16  ;;  %v425_v26 = vstv %s16043_s24  ;;  %v433_v27 = vstv %s16045_s25 }
  0x3b   :  { %13480 = vmatprep.mubr.msk.bf16.mxu0 %vm49_vm1, %v634_v47  ;;  %vm407_vm8 = vcmp.ge.f32.partialorder %v406_v20, 0.0  ;;  %v408_v29 = vmul.f32 0.01, %v406_v20  ;;  %v426_v31 = vadd.f32 %v425_v26, %v424_v25  ;;  %v434_v32 = vmul.f32 %v433_v27, %v15901_v5  ;;  %v611_v11 = vld [vmem:[#allocation2 + $0x88] sm:$0xff] }
  0x3c   :  { %v399_v28 = vsel %vm397_vm7, %v396_v8, %v398_v19  ;;  %vm417_vm9 = vcmp.ge.f32.partialorder %v416_v24, 0.0  ;;  %v418_v30 = vmul.f32 0.01, %v416_v24  ;;  %v637_v33 = vpack.c.bf16 %v610_v23, %v609_v21 }
  0x3d   :  { %400 = vst.msk [vmem:[#allocation2 + $0xb2] sm:$0x3f] %vm91_vm2, %v399_v28  ;;  %v409_v35 = vsel %vm407_vm8, %v406_v20, %v408_v29  ;;  %v435_v36 = vstv %s16054_s26  ;;  %v443_v37 = vstv %s16056_s27  ;;  %vm427_vm10 = vcmp.ge.f32.partialorder %v426_v31, 0.0 }
  0x3e   :  { %410 = vst.msk [vmem:[#allocation2 + $0xbc] sm:$0x3f] %vm91_vm2, %v409_v35  ;;  %v419_v38 = vsel %vm417_vm9, %v416_v24, %v418_v30  ;;  %v428_v39 = vmul.f32 0.01, %v426_v31  ;;  %v445_v40 = vstv %s16061_s28  ;;  %v436_v41 = vadd.f32 %v435_v36, %v434_v32 }
  0x3f   :  { %420 = vst.msk [vmem:[#allocation2 + $0xc6] sm:$0x3f] %vm91_vm2, %v419_v38  ;;  %v444_v42 = vmul.f32 %v443_v37, %v15901_v5  ;;  %v453_v43 = vstv %s16063_s29  ;;  %v455_v44 = vstv %s16069_s30  ;;  %v463_v48 = vstv %s16071_s11  ;;  %v614_v50 = vld [vmem:[#allocation2 + $0xa0] sm:$0xff]  ;;  %s12280_s29 = sld [smem:[#allocation7 + $0x1e]] }
  0x40   :  { %v612_v34 = vld [vmem:[#allocation2 + $0x90] sm:$0xff]  ;;  %v429_v46 = vsel %vm427_vm10, %v426_v31, %v428_v39  ;;  %v454_v47 = vmul.f32 %v453_v43, %v15901_v5  ;;  %v613_v49 = vld [vmem:[#allocation2 + $0x98] sm:$0xff]  ;;  %vm437_vm11 = vcmp.ge.f32.partialorder %v436_v41, 0.0  ;;  %v438_v51 = vmul.f32 0.01, %v436_v41  ;;  %v615_v62 = vld [vmem:[#allocation2 + $0xa8] sm:$0xff] }
  0x41   :  { %v638_v45 = vpack.c.bf16 %v612_v34, %v611_v11  ;;  %430 = vst.msk [vmem:[#allocation2 + $0xd0] sm:$0x3f] %vm91_vm2, %v429_v46  ;;  %v446_v52 = vadd.f32 %v445_v40, %v444_v42  ;;  %v465_v53 = vstv %s16075_s12  ;;  %v464_v55 = vmul.f32 %v463_v48, %v15901_v5  ;;  %v541_v43 = vld [vmem:[#allocation2 + $0x6] sm:$0xff]  ;;  %s12281_s30 = sld [smem:[#allocation7 + $0x9e]] }
  0x42   :  { %13481 = vmatmul.mubr.msk.bf16.gmra.mrb[8].mxu0 %vm49_vm1, %v635_v56  ;;  %v456_v54 = vadd.f32 %v455_v44, %v454_v47  ;;  %v473_v56 = vstv %s16077_s13  ;;  %v475_v57 = vstv %s16084_s14  ;;  %v439_v58 = vsel %vm437_vm11, %v436_v41, %v438_v51  ;;  %v16139_v51 = vld [vmem:[#allocation2 + $0x1e] sm:$0xff] }
  0x43   :  { %13484 = vmatprep.mubr.msk.bf16.mxu0 %vm49_vm1, %v636_v18  ;;  %vm447_vm12 = vcmp.ge.f32.partialorder %v446_v52, 0.0  ;;  %v448_v59 = vmul.f32 0.01, %v446_v52  ;;  %v474_v60 = vmul.f32 %v473_v56, %v15901_v5  ;;  %v639_v61 = vpack.c.bf16 %v614_v50, %v613_v49  ;;  %440 = vst.msk [vmem:[#allocation2 + $0xda] sm:$0x3f] %vm91_vm2, %v439_v58  ;;  %v543_v49 = vld [vmem:[#allocation2 + $0x16] sm:$0xff] }
  0x44   :  { %v616_v63 = vld [vmem:[#allocation2 + $0xb0] sm:$0xff]  ;;  %vm457_vm13 = vcmp.ge.f32.partialorder %v456_v54, 0.0  ;;  %v458_v0 = vmul.f32 0.01, %v456_v54  ;;  %v466_v1 = vadd.f32 %v465_v53, %v464_v55  ;;  %v483_v6 = vstv %s16092_s15  ;;  %v16149_v55 = vld [vmem:[#allocation2 + $0x26] sm:$0xff] }
  0x45   :  { %v449_v3 = vsel %vm447_vm12, %v446_v52, %v448_v59  ;;  %v476_v4 = vadd.f32 %v475_v57, %v474_v60  ;;  %v485_v7 = vstv %s16094_s16  ;;  %v484_v10 = vmul.f32 %v483_v6, %v15901_v5  ;;  %v617_v23 = vld [vmem:[#allocation2 + $0xb8] sm:$0xff]  ;;  %v16144_v52 = vld [vmem:[%s20370_s4 + $0x4] ss:$0 sps:$4 sm:$0xcc]   ;;  %v16151_v56 = vld [vmem:[#allocation2 + $0x2e] sm:$0xff] }
  0x46   :  { %450 = vst.msk [vmem:[#allocation2 + $0xe4] sm:$0x3f] %vm91_vm2, %v449_v3  ;;  %v459_v8 = vsel %vm457_vm13, %v456_v54, %v458_v0  ;;  %vm467_vm14 = vcmp.ge.f32.partialorder %v466_v1, 0.0  ;;  %v468_v9 = vmul.f32 0.01, %v466_v1  ;;  %v640_v12 = vpack.c.bf16 %v616_v63, %v615_v62  ;;  %v618_v24 = vld [vmem:[#allocation2 + $0xc0] sm:$0xff] }
  0x47   :  { %460 = vst.msk [vmem:[#allocation2 + $0xee] sm:$0x3f] %vm91_vm2, %v459_v8  ;;  %vm477_vm15 = vcmp.ge.f32.partialorder %v476_v4, 0.0  ;;  %v478_v13 = vmul.f32 0.01, %v476_v4  ;;  %v493_v14 = vstv %s16102_s17  ;;  %v486_v16 = vadd.f32 %v485_v7, %v484_v10  ;;  %v619_v27 = vld [vmem:[#allocation2 + $0xc8] sm:$0xff] }
  0x48   :  { %v469_v15 = vsel %vm467_vm14, %v466_v1, %v468_v9  ;;  %v494_v17 = vmul.f32 %v493_v14, %v15901_v5  ;;  %v495_v18 = vstv %s16106_s18  ;;  %v620_v28 = vld [vmem:[#allocation2 + $0xd0] sm:$0xff]  ;;  %v641_v30 = vpack.c.bf16 %v618_v24, %v617_v23  ;;  %v16163_v63 = vld [vmem:[#allocation2 + $0x46] sm:$0xff]  ;;  %v16179_v6 = vld [vmem:[#allocation2 + $0x5e] sm:$0xff] }
  0x49   :  { %470 = vst.msk [vmem:[#allocation2 + $0xf8] sm:$0x3f] %vm91_vm2, %v469_v15  ;;  %v479_v19 = vsel %vm477_vm15, %v476_v4, %v478_v13  ;;  %vm487_vm3 = vcmp.ge.f32.partialorder %v486_v16, 0.0  ;;  %v488_v20 = vmul.f32 0.01, %v486_v16  ;;  %v642_v31 = vpack.c.bf16 %v620_v28, %v619_v27  ;;  %v16158_v62 = vld [vmem:[#allocation2 + $0x36] sm:$0xff] }
  0x4a   :  { %13485 = vmatmul.mubr.msk.bf16.gmra.mrb[12].mxu0 %vm49_vm1, %v637_v33  ;;  %480 = vst.msk [vmem:[#allocation2 + $0x102] sm:$0x3f] %vm91_vm2, %v479_v19  ;;  %v496_v21 = vadd.f32 %v495_v18, %v494_v17  ;;  %v621_v32 = vld [vmem:[#allocation2 + $0xd8] sm:$0xff]  ;;  %v503_v48 = vstv %s12276_s19  ;;  %v505_v53 = vstv %s12277_s1  ;;  %v1229_v54 = vsel %vm707_vm0, %v16002_v22, 0  ;;  %v16165_v0 = vld [vmem:[#allocation2 + $0x4e] sm:$0xff]  ;;  %v16181_v7 = vld [vmem:[#allocation2 + $0x66] sm:$0xff] }
  0x4b   :  { %13488 = vmatprep.mubr.msk.bf16.mxu0 %vm49_vm1, %v638_v45  ;;  %v489_v25 = vsel %vm487_vm3, %v486_v16, %v488_v20  ;;  %v542_v45 = vld [vmem:[#allocation2 + $0xe] sm:$0xff]  ;;  %v504_v50 = vmul.f32 %v503_v48, %v15901_v5  ;;  %v577_v58 = vpack.c.bf16 %v16139_v51, %v543_v49  ;;  %v1499_v59 = vrot.slane %v16144_v52, 2  ;;  %v16160_v22 = vld [vmem:[#allocation2 + $0x3e] sm:$0xff]  ;;  %v16177_v4 = vld [vmem:[#allocation2 + $0x56] sm:$0xff]  ;;  %s12282_s19 = sld [smem:[#allocation7 + $0x1f]] }
  0x4c   :  { %vm497_vm4 = vcmp.ge.f32.partialorder %v496_v21, 0.0  ;;  %v498_v26 = vmul.f32 0.01, %v496_v21  ;;  %490 = vst.msk [vmem:[#allocation2 + $0x10c] sm:$0x3f] %vm91_vm2, %v489_v25  ;;  %v576_v47 = vpack.c.bf16 %v542_v45, %v541_v43  ;;  %v578_v60 = vpack.c.bf16 %v16151_v56, %v16149_v55  ;;  %v16183_v8 = vld [vmem:[#allocation2 + $0x6e] sm:$0xff] }
  0x4d   :  { %v622_v33 = vld [vmem:[#allocation2 + $0xe0] sm:$0xff]  ;;  %v506_v5 = vadd.f32 %v505_v53, %v504_v50  ;;  %v579_v1 = vpack.c.bf16 %v16160_v22, %v16158_v62  ;;  %v580_v3 = vpack.c.bf16 %v16165_v0, %v16163_v63  ;;  %v581_v9 = vpack.c.bf16 %v16179_v6, %v16177_v4  ;;  %v16197_v15 = vld [vmem:[#allocation2 + $0x8e] sm:$0xff]  ;;  %v16205_v18 = vld [vmem:[#allocation2 + $0x96] sm:$0xff] }
  0x4e   :  { %v499_v29 = vsel %vm497_vm4, %v496_v21, %v498_v26  ;;  %v623_v11 = vld [vmem:[#allocation2 + $0xe8] sm:$0xff]  ;;  %v624_v34 = vld [vmem:[#allocation2 + $0xf0] sm:$0xff]  ;;  %v643_v35 = vpack.c.bf16 %v622_v33, %v621_v32  ;;  %v582_v10 = vpack.c.bf16 %v16183_v8, %v16181_v7  ;;  %v16193_v13 = vld [vmem:[#allocation2 + $0x7e] sm:$0xff]  ;;  %v515_v50 = vstv %s12279_s23 }
  0x4f   :  { %500 = vst.msk [vmem:[#allocation2 + $0x116] sm:$0x3f] %vm91_vm2, %v499_v29  ;;  %v644_v36 = vpack.c.bf16 %v624_v34, %v623_v11  ;;  %v508_v57 = vmul.f32 0.01, %v506_v5  ;;  %vm507_vm5 = vcmp.ge.f32.partialorder %v506_v5, 0.0  ;;  %v16195_v14 = vld [vmem:[#allocation2 + $0x86] sm:$0xff] }
  0x50   :  { %v625_v37 = vld [vmem:[#allocation2 + $0xf8] sm:$0xff]  ;;  %v584_v17 = vpack.c.bf16 %v16197_v15, %v16195_v14  ;;  %v16209_v20 = vld [vmem:[#allocation2 + $0xa6] sm:$0xff]  ;;  %v16211_v21 = vld [vmem:[#allocation2 + $0xae] sm:$0xff]  ;;  %vm130_vm9 = vcmask 62464  }
  0x51   :  { %v626_v38 = vld [vmem:[#allocation2 + $0x100] sm:$0xff]  ;;  %v586_v24 = vpack.c.bf16 %v16211_v21, %v16209_v20  ;;  %v16219_v25 = vld [vmem:[#allocation2 + $0xb6] sm:$0xff]  ;;  %v16225_v28 = vld [vmem:[#allocation2 + $0xce] sm:$0xff] }
  0x52   :  { %13489 = vmatmul.mubr.msk.bf16.gmra.mrb[16].mxu0 %vm49_vm1, %v639_v61  ;;  %v645_v41 = vpack.c.bf16 %v626_v38, %v625_v37  ;;  %v509_v61 = vsel %vm507_vm5, %v506_v5, %v508_v57  ;;  %v16207_v19 = vld [vmem:[#allocation2 + $0x9e] sm:$0xff]  ;;  %v16223_v27 = vld [vmem:[#allocation2 + $0xc6] sm:$0xff]  ;;  %v16239_v11 = vld [vmem:[#allocation2 + $0xee] sm:$0xff] }
  0x53   :  { %13492 = vmatprep.mubr.msk.bf16.mxu0 %vm49_vm1, %v640_v12  ;;  %v627_v39 = vld [vmem:[#allocation2 + $0x108] sm:$0xff]  ;;  %510 = vst.msk [vmem:[#allocation2 + $0x120] sm:$0x3f] %vm91_vm2, %v509_v61  ;;  %v16191_v12 = vld [vmem:[#allocation2 + $0x76] sm:$0xff]  ;;  %v585_v23 = vpack.c.bf16 %v16207_v19, %v16205_v18  ;;  %v16221_v26 = vld [vmem:[#allocation2 + $0xbe] sm:$0xff] }
  0x54   :  { %v583_v16 = vpack.c.bf16 %v16193_v13, %v16191_v12  ;;  %v587_v29 = vpack.c.bf16 %v16221_v26, %v16219_v25  ;;  %v16235_v32 = vld [vmem:[#allocation2 + $0xde] sm:$0xff]  ;;  %v16237_v33 = vld [vmem:[#allocation2 + $0xe6] sm:$0xff]  ;;  %v1129_v52 = vld [vmem:[#allocation2 + $0x52] sm:$0xff] }
  0x55   :  { %v16249_v37 = vld [vmem:[#allocation2 + $0xfe] sm:$0xff]  ;;  %v16251_v38 = vld [vmem:[#allocation2 + $0x106] sm:$0xff] }
  0x56   :  { %v628_v40 = vld [vmem:[#allocation2 + $0x110] sm:$0xff]  ;;  %v629_v44 = vld [vmem:[#allocation2 + $0x118] sm:$0xff]  ;;  %v16268_v48 = vld [vmem:[%s20366_s0] sm:$0x3f] }
  0x57   :  { %v646_v42 = vpack.c.bf16 %v628_v40, %v627_v39  ;;  %v647_v46 = vpack.c.bf16 %v629_v44, %v629_v44  ;;  %v16253_v39 = vld [vmem:[#allocation2 + $0x10e] sm:$0xff]  ;;  %v1122_v53 = vld [vmem:[#allocation2 + $0x1a] sm:$0xff] }
  0x58   :  { %v1120_v43 = vld [vmem:[#allocation2 + $0xa] sm:$0xff]  ;;  %v1121_v44 = vld [vmem:[#allocation2 + $0x12] sm:$0xff] }
  0x59   :  { %v1124_v57 = vld [vmem:[#allocation2 + $0x2a] sm:$0xff] }
  0x5a   :  { %13493 = vmatmul.mubr.msk.bf16.gmra.mrb[20].mxu0 %vm49_vm1, %v641_v30  ;;  %v588_v30 = vpack.c.bf16 %v16225_v28, %v16223_v27 }
  0x5b   :  { %13496 = vmatprep.mubr.msk.bf16.mxu0 %vm49_vm1, %v642_v31  ;;  %v16233_v31 = vld [vmem:[#allocation2 + $0xd6] sm:$0xff] }
  0x5c   :  { %v589_v34 = vpack.c.bf16 %v16235_v32, %v16233_v31 }
  0x62   :  { %13497 = vmatmul.mubr.msk.bf16.gmra.mrb[24].mxu0 %vm49_vm1, %v643_v35  ;;  %v590_v35 = vpack.c.bf16 %v16239_v11, %v16237_v33 }
  0x63   :  { %13500 = vmatprep.mubr.msk.bf16.mxu0 %vm49_vm1, %v644_v36  ;;  %v16247_v36 = vld [vmem:[#allocation2 + $0xf6] sm:$0xff] }
  0x64   :  { %v591_v40 = vpack.c.bf16 %v16249_v37, %v16247_v36 }
  0x6a   :  { %13501 = vmatmul.mubr.msk.bf16.gmra.mrb[28].mxu0 %vm49_vm1, %v645_v41  ;;  %v592_v41 = vpack.c.bf16 %v16253_v39, %v16251_v38 }
  0x6b   :  { %13504 = vmatprep.mubr.msk.bf16.mxu0 %vm49_vm1, %v646_v42  ;;  %v16261_v42 = vld [vmem:[#allocation2 + $0x116] sm:$0xff] }
  0x6c   :  { %v593_v45 = vpack.c.bf16 %v16261_v42, %v16261_v42 }
  0x72   :  { %13505 = vmatmul.mubr.msk.bf16.gmra.mrb[32].mxu0 %vm49_vm1, %v647_v46  ;;  %v1155_v46 = vpack.c.bf16 %v1121_v44, %v1120_v43  ;;  %v1134_v43 = vld [vmem:[#allocation2 + $0x7a] sm:$0xff]  ;;  %v1135_v44 = vld [vmem:[#allocation2 + $0x82] sm:$0xff] }
  0x73   :  { %13510 = vmatprep.mubr.msk.bf16.mxu0 %vm49_vm1, %v576_v47  ;;  %v513_v47 = vstv %s12278_s22 }
  0x74   :  { %v514_v49 = vmul.f32 %v16268_v48, %v513_v47  ;;  %v1162_v47 = vpack.c.bf16 %v1135_v44, %v1134_v43  ;;  %v1150_v44 = vld [vmem:[#allocation2 + $0xfa] sm:$0xff] }
  0x76   :  { %v516_v5 = vadd.f32 %v515_v50, %v514_v49  ;;  %v1138_v50 = vld [vmem:[#allocation2 + $0x9a] sm:$0xff] }
  0x78   :  { %vm517_vm6 = vcmp.ge.f32.partialorder %v516_v5, 0.0 }
  0x7a   :  { %13511 = vmatmul.mubr.msk.bf16.vlgmr.msra.gmra.mrb[0].mxu0 %vm49_vm1, %v577_v58  ;;  %v1125_v58 = vld [vmem:[#allocation2 + $0x32] sm:$0xff] }
  0x7b   :  { %13547 = vmatpush3.bf16.msra.mxu0 %v1229_v54  ;;  %13514 = vmatprep.mubr.msk.bf16.mxu0 %vm49_vm1, %v578_v60  ;;  %v1123_v54 = vld [vmem:[#allocation2 + $0x22] sm:$0xff]  ;;  %v518_v60 = vmul.f32 0.01, %v516_v5 }
  0x7c   :  { %15629 = vmatprep.subr.msk.bf16.mxu0 %vm707_vm0, %v1499_v59  ;;  %v16273_v61 = vpack.c.bf16 %v1123_v54, %v1122_v53  ;;  %v1139_v53 = vld [vmem:[#allocation2 + $0xa2] sm:$0xff]  ;;  %v1140_v54 = vld [vmem:[#allocation2 + $0xaa] sm:$0xff] }
  0x82   :  { %13515 = vmatmul.mubr.msk.bf16.gmra.mrb[4].mxu0 %vm49_vm1, %v579_v1  ;;  %v16275_v1 = vpack.c.bf16 %v1125_v58, %v1124_v57  ;;  %v1164_v57 = vpack.c.bf16 %v1139_v53, %v1138_v50  ;;  %v1153_v50 = vld [vmem:[#allocation2 + $0x112] sm:$0xff] }
  0x83   :  { %13518 = vmatprep.mubr.msk.bf16.mxu0 %vm49_vm1, %v580_v3  ;;  %v519_v3 = vsel %vm517_vm6, %v516_v5, %v518_v60  ;;  %v1141_v5 = vld [vmem:[#allocation2 + $0xb2] sm:$0xff]  ;;  %v1142_v60 = vld [vmem:[#allocation2 + $0xba] sm:$0xff] }
  0x84   :  { %520 = vst.msk [vmem:[#allocation2 + $0x12a] sm:$0x3f] %vm91_vm2, %v519_v3  ;;  %v1165_v58 = vpack.c.bf16 %v1141_v5, %v1140_v54  ;;  %v1143_v3 = vld [vmem:[#allocation2 + $0xc2] sm:$0xff]  ;;  %v1154_v5 = vld [vmem:[#allocation2 + $0x11a] sm:$0xff] }
  0x8a   :  { %13519 = vmatmul.mubr.msk.bf16.gmra.mrb[8].mxu0 %vm49_vm1, %v581_v9  ;;  %v1555_v9 = vsel %vm707_vm0, %v1499_v59, 0 }
  0x8b   :  { %13522 = vmatprep.mubr.msk.bf16.mxu0 %vm49_vm1, %v582_v10  ;;  %v16284_v10 = vld [vmem:[%s20370_s4 + $0x8] sm:$0x3] }
  0x92   :  { %13523 = vmatmul.mubr.msk.bf16.gmra.mrb[12].mxu0 %vm49_vm1, %v583_v16  ;;  %v1126_v16 = vld [vmem:[#allocation2 + $0x3a] sm:$0xff] }
  0x93   :  { %13526 = vmatprep.mubr.msk.bf16.mxu0 %vm49_vm1, %v584_v17  ;;  %v1127_v17 = vld [vmem:[#allocation2 + $0x42] sm:$0xff] }
  0x94   :  { %v1158_v59 = vpack.c.bf16 %v1127_v17, %v1126_v16  ;;  %v1145_v16 = vld [vmem:[#allocation2 + $0xd2] sm:$0xff]  ;;  %v1166_v17 = vpack.c.bf16 %v1143_v3, %v1142_v60  ;;  %v1172_v60 = vpack.c.bf16 %v1154_v5, %v1154_v5  ;;  %v15652_v3 = vld [vmem:[%s20370_s4 + $0x8] ss:$0 sps:$4 sm:$0xcc]  }
  0x9a   :  { %13527 = vmatmul.mubr.msk.bf16.gmra.mrb[16].mxu0 %vm49_vm1, %v585_v23  ;;  %v1128_v23 = vld [vmem:[#allocation2 + $0x4a] sm:$0xff] }
  0x9b   :  { %13530 = vmatprep.mubr.msk.bf16.mxu0 %vm49_vm1, %v586_v24  ;;  %v1159_v24 = vpack.c.bf16 %v1129_v52, %v1128_v23  ;;  %v1146_v52 = vld [vmem:[#allocation2 + $0xda] sm:$0xff] }
  0xa2   :  { %13531 = vmatmul.mubr.msk.bf16.gmra.mrb[20].mxu0 %vm49_vm1, %v587_v29  ;;  %v1130_v29 = vld [vmem:[#allocation2 + $0x5a] sm:$0xff] }
  0xa3   :  { %13534 = vmatprep.mubr.msk.bf16.mxu0 %vm49_vm1, %v588_v30  ;;  %v1131_v30 = vld [vmem:[#allocation2 + $0x62] sm:$0xff] }
  0xaa   :  { %13535 = vmatmul.mubr.msk.bf16.gmra.mrb[24].mxu0 %vm49_vm1, %v589_v34  ;;  %v1132_v34 = vld [vmem:[#allocation2 + $0x6a] sm:$0xff] }
  0xab   :  { %13538 = vmatprep.mubr.msk.bf16.mxu0 %vm49_vm1, %v590_v35  ;;  %v1133_v35 = vld [vmem:[#allocation2 + $0x72] sm:$0xff] }
  0xb2   :  { %13539 = vmatmul.mubr.msk.bf16.gmra.mrb[28].mxu0 %vm49_vm1, %v591_v40  ;;  %v1160_v40 = vpack.c.bf16 %v1131_v30, %v1130_v29  ;;  %v1147_v29 = vld [vmem:[#allocation2 + $0xe2] sm:$0xff]  ;;  %v1148_v30 = vld [vmem:[#allocation2 + $0xea] sm:$0xff] }
  0xb3   :  { %13542 = vmatprep.mubr.msk.bf16.mxu0 %vm49_vm1, %v592_v41  ;;  %v1161_v41 = vpack.c.bf16 %v1133_v35, %v1132_v34  ;;  %v1149_v34 = vld [vmem:[#allocation2 + $0xf2] sm:$0xff]  ;;  %v1168_v35 = vpack.c.bf16 %v1147_v29, %v1146_v52  ;;  %v525_v52 = vstv %s12281_s30 }
  0xb4   :  { %v1169_v43 = vpack.c.bf16 %v1149_v34, %v1148_v30  ;;  %v1770_v29 = vld [vmem:[#allocation2 + $0x2c] sm:$0xff]  ;;  %v1771_v30 = vld [vmem:[#allocation2 + $0x34] sm:$0xff] }
  0xba   :  { %13543 = vmatmul.mubr.msk.bf16.gmra.mrb[36].mxu0 %vm49_vm1, %v593_v45  ;;  %v1136_v45 = vld [vmem:[#allocation2 + $0x8a] sm:$0xff] }
  0xbb   :  { %13548 = vmatprep.mubr.msk.bf16.mxu0 %vm49_vm1, %v1155_v46  ;;  %v1137_v46 = vld [vmem:[#allocation2 + $0x92] sm:$0xff] }
  0xbc   :  { %v1163_v49 = vpack.c.bf16 %v1137_v46, %v1136_v45  ;;  %v1151_v45 = vld [vmem:[#allocation2 + $0x102] sm:$0xff]  ;;  %v1152_v46 = vld [vmem:[#allocation2 + $0x10a] sm:$0xff] }
  0xbd   :  { %v1170_v53 = vpack.c.bf16 %v1151_v45, %v1150_v44  ;;  %v1171_v54 = vpack.c.bf16 %v1153_v50, %v1152_v46  ;;  %v1804_v45 = vpack.c.bf16 %v1771_v30, %v1770_v29 }
  0xc2   :  { %13549 = vmatmul.mubr.msk.bf16.vlgmr.msra.gmra.mrb[0].mxu0 %vm49_vm1, %v16273_v61 }
  0xc3   :  { %13585 = vmatpush3.bf16.msra.mxu0 %v1555_v9  ;;  %13552 = vmatprep.mubr.msk.bf16.mxu0 %vm49_vm1, %v16275_v1  ;;  %v1144_v9 = vld [vmem:[#allocation2 + $0xca] sm:$0xff] }
  0xc4   :  { %15630 = vmatprep.subr.msk.bf16.mxu0 %vm707_vm0, %v16284_v10  ;;  %v1167_v23 = vpack.c.bf16 %v1145_v16, %v1144_v9  ;;  %v1877_v9 = vsel %vm707_vm0, %v16284_v10, 0  ;;  %v2147_v16 = vrot.slane %v15652_v3, 2  ;;  %v1476_v10 = vld [vmem:[#allocation2 + $0x12a] sm:$0xff]  ;;  %v1776_v3 = vld [vmem:[#allocation2 + $0x5c] sm:$0xff] }
  0xca   :  { %13553 = vmatmul.mubr.msk.bf16.gmra.mrb[4].mxu0 %vm49_vm1, %v1158_v59 }
  0xcb   :  { %13556 = vmatprep.mubr.msk.bf16.mxu0 %vm49_vm1, %v1159_v24 }
  0xd2   :  { %13557 = vmatmul.mubr.msk.bf16.gmra.mrb[8].mxu0 %vm49_vm1, %v1160_v40 }
  0xd3   :  { %13560 = vmatprep.mubr.msk.bf16.mxu0 %vm49_vm1, %v1161_v41 }
  0xda   :  { %13561 = vmatmul.mubr.msk.bf16.gmra.mrb[12].mxu0 %vm49_vm1, %v1162_v47 }
  0xdb   :  { %13564 = vmatprep.mubr.msk.bf16.mxu0 %vm49_vm1, %v1163_v49 }
  0xe2   :  { %13565 = vmatmul.mubr.msk.bf16.gmra.mrb[16].mxu0 %vm49_vm1, %v1164_v57 }
  0xe3   :  { %13568 = vmatprep.mubr.msk.bf16.mxu0 %vm49_vm1, %v1165_v58 }
  0xea   :  { %13569 = vmatmul.mubr.msk.bf16.gmra.mrb[20].mxu0 %vm49_vm1, %v1166_v17 }
  0xeb   :  { %13572 = vmatprep.mubr.msk.bf16.mxu0 %vm49_vm1, %v1167_v23 }
  0xf2   :  { %13573 = vmatmul.mubr.msk.bf16.gmra.mrb[24].mxu0 %vm49_vm1, %v1168_v35 }
  0xf3   :  { %13576 = vmatprep.mubr.msk.bf16.mxu0 %vm49_vm1, %v1169_v43 }
  0xfa   :  { %13577 = vmatmul.mubr.msk.bf16.gmra.mrb[28].mxu0 %vm49_vm1, %v1170_v53 }
  0xfb   :  { %13580 = vmatprep.mubr.msk.bf16.mxu0 %vm49_vm1, %v1171_v54 }
 0x102   :  { %13581 = vmatmul.mubr.msk.bf16.gmra.mrb[40].mxu0 %vm49_vm1, %v1172_v60  ;;  %v1775_v60 = vld [vmem:[#allocation2 + $0x54] sm:$0xff] }
 0x103   :  { %13586 = vmatprep.mubr.msk.bf16.mxu0 %vm49_vm1, %v16273_v61  ;;  %v1475_v61 = vld [vmem:[#allocation2 + $0x122] sm:$0xff] }
 0x10a   :  { %13587 = vmatmul.mubr.msk.bf16.vlgmr.msra.gmra.mrb[0].mxu0 %vm49_vm1, %v16275_v1  ;;  %v1493_v1 = vpack.c.bf16 %v1475_v61, %v1154_v5  ;;  %v1774_v5 = vld [vmem:[#allocation2 + $0x4c] sm:$0xff] }
 0x10b   :  { %13623 = vmatpush3.bf16.msra.mxu0 %v1877_v9  ;;  %13590 = vmatprep.mubr.msk.bf16.mxu0 %vm49_vm1, %v1158_v59  ;;  %v1768_v59 = vld [vmem:[#allocation2 + $0x1c] sm:$0xff]  ;;  %v1777_v9 = vld [vmem:[#allocation2 + $0x64] sm:$0xff] }
 0x10c   :  { %15631 = vmatprep.subr.msk.bf16.mxu0 %vm707_vm0, %v2147_v16  ;;  %v1807_v61 = vpack.c.bf16 %v1777_v9, %v1776_v3  ;;  %v1791_v3 = vld [vmem:[#allocation2 + $0xd4] sm:$0xff] }
 0x10d   :  { %v16375_v9 = vld [vmem:[%s20369_s3 + $0x10] sm:$0xff] }
 0x112   :  { %13591 = vmatmul.mubr.msk.bf16.gmra.mrb[4].mxu0 %vm49_vm1, %v1159_v24  ;;  %v1769_v24 = vld [vmem:[#allocation2 + $0x24] sm:$0xff] }
 0x113   :  { %13594 = vmatprep.mubr.msk.bf16.mxu0 %vm49_vm1, %v1160_v40 }
 0x11a   :  { %13595 = vmatmul.mubr.msk.bf16.gmra.mrb[8].mxu0 %vm49_vm1, %v1161_v41 }
 0x11b   :  { %13598 = vmatprep.mubr.msk.bf16.mxu0 %vm49_vm1, %v1162_v47  ;;  %v1494_v47 = vpack.c.bf16 %v1476_v10, %v1476_v10  ;;  %v1779_v10 = vld [vmem:[#allocation2 + $0x74] sm:$0xff] }
 0x122   :  { %13599 = vmatmul.mubr.msk.bf16.gmra.mrb[12].mxu0 %vm49_vm1, %v1163_v49 }
 0x123   :  { %13602 = vmatprep.mubr.msk.bf16.mxu0 %vm49_vm1, %v1164_v57  ;;  %v1803_v57 = vpack.c.bf16 %v1769_v24, %v1768_v59  ;;  %v1780_v59 = vld [vmem:[#allocation2 + $0x7c] sm:$0xff]  ;;  %v1781_v24 = vld [vmem:[#allocation2 + $0x84] sm:$0xff] }
 0x12a   :  { %13603 = vmatmul.mubr.msk.bf16.gmra.mrb[16].mxu0 %vm49_vm1, %v1165_v58 }
 0x12b   :  { %13606 = vmatprep.mubr.msk.bf16.mxu0 %vm49_vm1, %v1166_v17  ;;  %v523_v17 = vstv %s12280_s29 }
 0x132   :  { %13607 = vmatmul.mubr.msk.bf16.gmra.mrb[20].mxu0 %vm49_vm1, %v1167_v23  ;;  %v524_v23 = vmul.f32 %v16268_v48, %v523_v17  ;;  %v1783_v17 = vld [vmem:[#allocation2 + $0x94] sm:$0xff] }
 0x133   :  { %13610 = vmatprep.mubr.msk.bf16.mxu0 %vm49_vm1, %v1168_v35  ;;  %v1772_v35 = vld [vmem:[#allocation2 + $0x3c] sm:$0xff] }
 0x134   :  { %v526_v34 = vadd.f32 %v525_v52, %v524_v23  ;;  %v1784_v23 = vld [vmem:[#allocation2 + $0x9c] sm:$0xff]  ;;  %v1785_v52 = vld [vmem:[#allocation2 + $0xa4] sm:$0xff] }
 0x135   :  { %v1811_v30 = vpack.c.bf16 %v1785_v52, %v1784_v23  ;;  %v1797_v23 = vld [vmem:[#allocation2 + $0x104] sm:$0xff] }
 0x136   :  { %v528_v44 = vmul.f32 0.01, %v526_v34  ;;  %vm527_vm7 = vcmp.ge.f32.partialorder %v526_v34, 0.0  ;;  %v16401_v52 = vld [vmem:[%s20369_s3 + $0x28] sm:$0xff] }
 0x138   :  { %v529_v50 = vsel %vm527_vm7, %v526_v34, %v528_v44  ;;  %v1786_v34 = vld [vmem:[#allocation2 + $0xac] sm:$0xff]  ;;  %v16361_v44 = vld [vmem:[%s20369_s3] sm:$0xff] }
 0x139   :  { %530 = vst.msk [vmem:[#allocation2 + $0x134] sm:$0x3f] %vm91_vm2, %v529_v50 }
 0x13a   :  { %13611 = vmatmul.mubr.msk.bf16.gmra.mrb[24].mxu0 %vm49_vm1, %v1169_v43  ;;  %v1773_v43 = vld [vmem:[#allocation2 + $0x44] sm:$0xff] }
 0x13b   :  { %13614 = vmatprep.mubr.msk.bf16.mxu0 %vm49_vm1, %v1170_v53  ;;  %v1805_v46 = vpack.c.bf16 %v1773_v43, %v1772_v35  ;;  %v2203_v53 = vsel %vm707_vm0, %v2147_v16, 0  ;;  %v1806_v16 = vpack.c.bf16 %v1775_v60, %v1774_v5  ;;  %v1787_v35 = vld [vmem:[#allocation2 + $0xb4] sm:$0xff]  ;;  %v15735_v43 = vmov 0   ;;  %v16368_v5 = vld [vmem:[%s20369_s3 + $0x8] sm:$0xff] }
 0x13c   :  { %15648 = vset.pattern.permute.xlu0 %v15735_v43  ;;  %15649 = vset.pattern.permute.xlu1 %v15735_v43  ;;  %v1812_v50 = vpack.c.bf16 %v1787_v35, %v1786_v34  ;;  %v1790_v60 = vld [vmem:[#allocation2 + $0xcc] sm:$0xff]  ;;  %v16414_v35 = vld [vmem:[%s20369_s3 + $0x38] sm:$0xff] }
 0x13d   :  { %3567 = vperm.xlu0 %15648, %v16361_v44   ;;  %3577 = vperm.xlu1 %15649, %v16375_v9   ;;  %v16419_v43 = vld [vmem:[%s20369_s3 + $0x50] sm:$0xff] }
 0x141   :  { %3572 = vperm.xlu0 %15648, %v16368_v5  }
 0x142   :  { %13615 = vmatmul.mubr.msk.bf16.gmra.mrb[28].mxu0 %vm49_vm1, %v1171_v54  ;;  %v16346_v54 = vld [vmem:[%s20370_s4 + $0xc] sm:$0x3] }
 0x143   :  { %13618 = vmatprep.mubr.msk.bf16.mxu0 %vm49_vm1, %v1493_v1  ;;  %v1778_v1 = vld [vmem:[#allocation2 + $0x6c] sm:$0xff] }
 0x145   :  { %v16332_v40 = vpop.f32.mrb[32].mxu0 }
 0x146   :  { %v16334_v41 = vpop.f32.mrb[33].mxu0 }
 0x147   :  { %v13507_v49 = vpop.f32.mrb[34].mxu0 }
 0x148   :  { %v16336_v58 = vpop.f32.mrb[35].mxu0  ;;  %v1809_v49 = vpack.c.bf16 %v1781_v24, %v1780_v59  ;;  %v16388_v24 = vld [vmem:[%s20369_s3 + $0x18] sm:$0xff] }
 0x149   :  { %3582 = vperm.xlu1 %15649, %v16388_v24  }
 0x14a   :  { %13619 = vmatmul.mubr.msk.bf16.gmra.mrb[44].mxu0 %vm49_vm1, %v1494_v47  ;;  %v1808_v47 = vpack.c.bf16 %v1779_v10, %v1778_v1  ;;  %v16381_v1 = vld [vmem:[%s20369_s3 + $0x20] sm:$0xff]  ;;  %v1814_v10 = vpack.c.bf16 %v1791_v3, %v1790_v60  ;;  %v16427_v60 = vld [vmem:[%s20369_s3 + $0x48] sm:$0xff] }
 0x14b   :  { %13624 = vmatprep.mubr.msk.bf16.mxu0 %vm49_vm1, %v1803_v57  ;;  %v1782_v57 = vld [vmem:[#allocation2 + $0x8c] sm:$0xff]  ;;  %3587 = vperm.xlu0 %15648, %v16381_v1   ;;  %v16432_v3 = vld [vmem:[%s20369_s3 + $0x60] sm:$0xff] }
 0x14c   :  { %v1810_v29 = vpack.c.bf16 %v1783_v17, %v1782_v57  ;;  %v1795_v57 = vld [vmem:[#allocation2 + $0xf4] sm:$0xff]  ;;  %v1796_v17 = vld [vmem:[#allocation2 + $0xfc] sm:$0xff] }
 0x14d   :  { %v1817_v34 = vpack.c.bf16 %v1797_v23, %v1796_v17  ;;  %3592 = vperm.xlu1 %15649, %v16401_v52   ;;  %v16458_v23 = vld [vmem:[%s20369_s3 + $0x80] sm:$0xff] }
 0x151   :  { %3602 = vperm.xlu1 %15649, %v16414_v35  }
 0x152   :  { %13625 = vmatmul.mubr.msk.bf16.vlgmr.msra.gmra.mrb[0].mxu0 %vm49_vm1, %v1804_v45  ;;  %v1788_v45 = vld [vmem:[#allocation2 + $0xbc] sm:$0xff] }
 0x153   :  { %13661 = vmatpush3.bf16.msra.mxu0 %v2203_v53  ;;  %13628 = vmatprep.mubr.msk.bf16.mxu0 %vm49_vm1, %v1805_v46  ;;  %v1789_v46 = vld [vmem:[#allocation2 + $0xc4] sm:$0xff] }
 0x154   :  { %15632 = vmatprep.subr.msk.bf16.mxu0 %vm707_vm0, %v16346_v54  ;;  %v1813_v53 = vpack.c.bf16 %v1789_v46, %v1788_v45  ;;  %v1798_v45 = vld [vmem:[#allocation2 + $0x10c] sm:$0xff]  ;;  %v1799_v46 = vld [vmem:[#allocation2 + $0x114] sm:$0xff] }
 0x155   :  { %3612 = vperm.xlu1 %15649, %v16427_v60  }
 0x15a   :  { %13629 = vmatmul.mubr.msk.bf16.gmra.mrb[4].mxu0 %vm49_vm1, %v1806_v16  ;;  %v1792_v16 = vld [vmem:[#allocation2 + $0xdc] sm:$0xff] }
 0x15b   :  { %13632 = vmatprep.mubr.msk.bf16.mxu0 %vm49_vm1, %v1807_v61  ;;  %v1793_v61 = vld [vmem:[#allocation2 + $0xe4] sm:$0xff] }
 0x15c   :  { %v1815_v59 = vpack.c.bf16 %v1793_v61, %v1792_v16  ;;  %v1818_v16 = vpack.c.bf16 %v1799_v46, %v1798_v45 }
 0x162   :  { %13633 = vmatmul.mubr.msk.bf16.gmra.mrb[8].mxu0 %vm49_vm1, %v1808_v47  ;;  %v16393_v47 = vld [vmem:[%s20369_s3 + $0x30] sm:$0xff] }
 0x163   :  { %13636 = vmatprep.mubr.msk.bf16.mxu0 %vm49_vm1, %v1809_v49  ;;  %v1794_v49 = vld [vmem:[#allocation2 + $0xec] sm:$0xff]  ;;  %3597 = vperm.xlu0 %15648, %v16393_v47  }
 0x16a   :  { %13637 = vmatmul.mubr.msk.bf16.gmra.mrb[12].mxu0 %vm49_vm1, %v1810_v29  ;;  %v16406_v29 = vld [vmem:[%s20369_s3 + $0x40] sm:$0xff] }
 0x16b   :  { %13640 = vmatprep.mubr.msk.bf16.mxu0 %vm49_vm1, %v1811_v30  ;;  %v1816_v30 = vpack.c.bf16 %v1795_v57, %v1794_v49  ;;  %3607 = vperm.xlu0 %15648, %v16406_v29   ;;  %v1802_v49 = vld [vmem:[#allocation2 + $0x12c] sm:$0xff] }
 0x16c   :  { %v16453_v57 = vld [vmem:[%s20369_s3 + $0x68] sm:$0xff]  ;;  %v1820_v45 = vpack.c.bf16 %v1802_v49, %v1802_v49 }
 0x16d   :  { %v16496_v49 = vld [vmem:[%s20369_s3 + $0x88] sm:$0xff] }
 0x16f   :  { %3617 = vperm.xlu0 %15648, %v16419_v43  }
 0x172   :  { %13641 = vmatmul.mubr.msk.bf16.gmra.mrb[16].mxu0 %vm49_vm1, %v1812_v50  ;;  %v1800_v50 = vld [vmem:[#allocation2 + $0x11c] sm:$0xff] }
 0x173   :  { %13644 = vmatprep.mubr.msk.bf16.mxu0 %vm49_vm1, %v1813_v53  ;;  %v1801_v53 = vld [vmem:[#allocation2 + $0x124] sm:$0xff]  ;;  %3627 = vperm.xlu0 %15648, %v16432_v3  }
 0x174   :  { %v1819_v61 = vpack.c.bf16 %v1801_v53, %v1800_v50  ;;  %v2125_v53 = vpack.c.bf16 %v16149_v55, %v16139_v51  ;;  %v16483_v51 = vld [vmem:[%s20369_s3 + $0x90] sm:$0xff]  ;;  %v535_v55 = vstv %s12283_s21 }
 0x17a   :  { %13645 = vmatmul.mubr.msk.bf16.gmra.mrb[20].mxu0 %vm49_vm1, %v1814_v10  ;;  %v16440_v10 = vld [vmem:[%s20369_s3 + $0x58] sm:$0xff] }
 0x17b   :  { %13648 = vmatprep.mubr.msk.bf16.mxu0 %vm49_vm1, %v1815_v59  ;;  %v16445_v59 = vld [vmem:[%s20369_s3 + $0x70] sm:$0xff]  ;;  %3622 = vperm.xlu1 %15649, %v16440_v10  }
 0x17c   :  { %3637 = vperm.xlu0 %15648, %v16445_v59  }
 0x17f   :  { %3632 = vperm.xlu1 %15649, %v16453_v57  }
 0x180   :  { %3647 = vperm.xlu0 %15648, %v16458_v23  }
 0x182   :  { %13649 = vmatmul.mubr.msk.bf16.gmra.mrb[24].mxu0 %vm49_vm1, %v1816_v30 }
 0x183   :  { %13652 = vmatprep.mubr.msk.bf16.mxu0 %vm49_vm1, %v1817_v34 }
 0x184   :  { %3657 = vperm.xlu0 %15648, %v16483_v51  }
 0x18a   :  { %13653 = vmatmul.mubr.msk.bf16.gmra.mrb[28].mxu0 %vm49_vm1, %v1818_v16 }
 0x18b   :  { %13656 = vmatprep.mubr.msk.bf16.mxu0 %vm49_vm1, %v1819_v61  ;;  %v533_v61 = vstv %s12282_s19 }
 0x18d   :  { %v13544_v17 = vpop.f32.mrb[36].mxu0 }
 0x18e   :  { %v16461_v30 = vadd.f32 %v13544_v17, %v16332_v40  ;;  %v1106_v34 = vpop.f32.mrb[37].mxu0  ;;  %v534_v40 = vmul.f32 %v16268_v48, %v533_v61  ;;  %v16490_v48 = vld [vmem:[%s20370_s4 + $0xc] ss:$0 sps:$4 sm:$0xcc]   ;;  %v16501_v17 = vld [vmem:[%s20369_s3 + $0xa0] sm:$0xff] }
 0x18f   :  { %v16464_v46 = vadd.f32 %v1106_v34, %v16334_v41  ;;  %v13545_v50 = vpop.f32.mrb[38].mxu0  ;;  %v16478_v41 = vld [vmem:[%s20369_s3 + $0x78] sm:$0xff]  ;;  %v2795_v61 = vrot.slane %v16490_v48, 2  ;;  %3667 = vperm.xlu0 %15648, %v16501_v17  }
 0x190   :  { %v1109_v16 = vpop.f32.mrb[39].mxu0  ;;  %3642 = vperm.xlu1 %15649, %v16478_v41   ;;  %v16509_v50 = vpack.c.bf16 %v16163_v63, %v16160_v22  ;;  %v16536_v22 = vpack.c.bf16 %v16177_v4, %v16165_v0  ;;  %v16542_v63 = vpack.c.bf16 %v16181_v7, %v16179_v6  ;;  %v16563_v0 = vld [vmem:[%s20369_s3 + $0xb8] sm:$0xff]  ;;  %v16568_v4 = vld [vmem:[%s20369_s3 + $0xd0] sm:$0xff]  ;;  %v16572_v6 = vpack.c.bf16 %v16191_v12, %v16183_v8 }
 0x191   :  { %v16471_v2 = vadd.f32 %v1109_v16, %v16336_v58  ;;  %v536_v58 = vadd.f32 %v535_v55, %v534_v40  ;;  %v2525_v16 = vsel %vm707_vm0, %v16346_v54, 0  ;;  %v16547_v54 = vld [vmem:[%s20369_s3 + $0xa8] sm:$0xff]  ;;  %v16552_v40 = vld [vmem:[%s20369_s3 + $0xc0] sm:$0xff]  ;;  %v16577_v7 = vpack.c.bf16 %v16195_v14, %v16193_v13  ;;  %v16599_v8 = vld [vmem:[%s20369_s3 + $0xd8] sm:$0xff] }
 0x192   :  { %13657 = vmatmul.mubr.msk.bf16.gmra.mrb[48].mxu0 %vm49_vm1, %v1820_v45  ;;  %v16505_v45 = vpack.c.bf16 %v16158_v62, %v16151_v56  ;;  %v16527_v56 = vld [vmem:[%s20369_s3 + $0x98] sm:$0xff]  ;;  %v16532_v62 = vld [vmem:[%s20369_s3 + $0xb0] sm:$0xff]  ;;  %v16583_v55 = vld [vmem:[%s20369_s3 + $0xc8] sm:$0xff]  ;;  %v16606_v13 = vpack.c.bf16 %v16205_v18, %v16197_v15  ;;  %v16611_v14 = vpack.c.bf16 %v16209_v20, %v16207_v19  ;;  %v16634_v19 = vpack.c.bf16 %v16219_v25, %v16211_v21 }
 0x193   :  { %13662 = vmatprep.mubr.msk.bf16.mxu0 %vm49_vm1, %v2125_v53  ;;  %v538_v34 = vmul.f32 0.01, %v536_v58  ;;  %vm537_vm8 = vcmp.ge.f32.partialorder %v536_v58, 0.0  ;;  %3677 = vperm.xlu0 %15648, %v16532_v62   ;;  %v3560_v12 = vld [vmem:[%s20369_s3 + $0xf0] sm:$0xff]  ;;  %v3561_v15 = vld [vmem:[%s20369_s3 + $0xf8] sm:$0xff]  ;;  %v16638_v20 = vpack.c.bf16 %v16223_v27, %v16221_v26  ;;  %v16650_v21 = vpack.c.bf16 %v16233_v31, %v16225_v28  ;;  %v2123_v31 = vld [vmem:[#allocation2 + $0x126] sm:$0xff] }
 0x194   :  { %3652 = vperm.xlu1 %15649, %v16496_v49   ;;  %v3564_v18 = vld [vmem:[%s20369_s3 + $0x110] sm:$0xff]  ;;  %v16655_v25 = vpack.c.bf16 %v16237_v33, %v16235_v32  ;;  %v16666_v26 = vpack.c.bf16 %v16247_v36, %v16239_v11  ;;  %v16671_v27 = vpack.c.bf16 %v16251_v38, %v16249_v37  ;;  %v2122_v28 = vld [vmem:[#allocation2 + $0x11e] sm:$0xff]  ;;  %v16682_v32 = vpack.c.bf16 %v16261_v42, %v16253_v39 }
 0x195   :  { %v539_v53 = vsel %vm537_vm8, %v536_v58, %v538_v34  ;;  %v16588_v58 = vld [vmem:[%s20369_s3 + $0xe0] sm:$0xff]  ;;  %v16616_v34 = vld [vmem:[%s20369_s3 + $0xe8] sm:$0xff]  ;;  %v16685_v33 = vpack.c.bf16 %v2123_v31, %v2122_v28  ;;  %v2750_v31 = vld [vmem:[#allocation2 + $0x90] sm:$0xff] }
 0x196   :  { %540 = vst.msk [vmem:[#allocation2 + $0x13e] sm:$0x3f] %vm91_vm2, %v539_v53  ;;  %v3562_v53 = vld [vmem:[%s20369_s3 + $0x100] sm:$0xff]  ;;  %v16693_v11 = vld [vmem:[#allocation2 + $0x12e] sm:$0xff]  ;;  %vm15736_vm2 = vmmov 0  }
 0x197   :  { %3687 = vperm.xlu0 %15648, %v16552_v40   ;;  %v2142_v39 = vpack.c.bf16 %v16693_v11, %v16693_v11  ;;  %v2749_v28 = vld [vmem:[#allocation2 + $0x88] sm:$0xff] }
 0x198   :  { %3662 = vperm.xlu1 %15649, %v16527_v56  }
 0x19a   :  { %13663 = vmatmul.mubr.msk.bf16.vlgmr.msra.gmra.mrb[0].mxu0 %vm49_vm1, %v16505_v45 }
 0x19b   :  { %13699 = vmatpush3.bf16.msra.mxu0 %v2525_v16  ;;  %13666 = vmatprep.mubr.msk.bf16.mxu0 %vm49_vm1, %v16509_v50  ;;  %v3563_v16 = vld [vmem:[%s20369_s3 + $0x108] sm:$0xff] }
 0x19c   :  { %15633 = vmatprep.subr.msk.bf16.mxu0 %vm707_vm0, %v2795_v61  ;;  %3672 = vperm.xlu1 %15649, %v16547_v54  }
 0x19d   :  { %3697 = vperm.xlu0 %15648, %v16568_v4  }
 0x1a0   :  { %3682 = vperm.xlu1 %15649, %v16563_v0  }
 0x1a1   :  { %3707 = vperm.xlu0 %15648, %v16588_v58  }
 0x1a2   :  { %13667 = vmatmul.mubr.msk.bf16.gmra.mrb[4].mxu0 %vm49_vm1, %v16536_v22 }
 0x1a3   :  { %13670 = vmatprep.mubr.msk.bf16.mxu0 %vm49_vm1, %v16542_v63 }
 0x1a4   :  { %3692 = vperm.xlu1 %15649, %v16583_v55  }
 0x1a5   :  { %3717 = vperm.xlu0 %15648, %v3560_v12  }
 0x1a8   :  { %3702 = vperm.xlu1 %15649, %v16599_v8  }
 0x1a9   :  { %3727 = vperm.xlu0 %15648, %v3562_v53  }
 0x1aa   :  { %13671 = vmatmul.mubr.msk.bf16.gmra.mrb[8].mxu0 %vm49_vm1, %v16572_v6 }
 0x1ab   :  { %13674 = vmatprep.mubr.msk.bf16.mxu0 %vm49_vm1, %v16577_v7 }
 0x1ac   :  { %3712 = vperm.xlu1 %15649, %v16616_v34  }
 0x1ad   :  { %3737 = vperm.xlu0 %15648, %v3564_v18   ;;  %v2742_v18 = vld [vmem:[#allocation2 + $0x50] sm:$0xff] }
 0x1b0   :  { %3722 = vperm.xlu1 %15649, %v3561_v15  }
 0x1b1   :  { %6405 = vperm.xlu0 %15648, %v16368_v5  }
 0x1b2   :  { %13675 = vmatmul.mubr.msk.bf16.gmra.mrb[12].mxu0 %vm49_vm1, %v16606_v13 }
 0x1b3   :  { %13678 = vmatprep.mubr.msk.bf16.mxu0 %vm49_vm1, %v16611_v14 }
 0x1b4   :  { %3732 = vperm.xlu1 %15649, %v3563_v16  }
 0x1b5   :  { %6415 = vperm.xlu0 %15648, %v16388_v24  }
 0x1b8   :  { %6400 = vperm.xlu1 %15649, %v16361_v44  }
 0x1b9   :  { %6425 = vperm.xlu0 %15648, %v16401_v52  }
 0x1ba   :  { %13679 = vmatmul.mubr.msk.bf16.gmra.mrb[16].mxu0 %vm49_vm1, %v16634_v19 }
 0x1bb   :  { %13682 = vmatprep.mubr.msk.bf16.mxu0 %vm49_vm1, %v16638_v20 }
 0x1bc   :  { %6410 = vperm.xlu1 %15649, %v16375_v9  }
 0x1bd   :  { %6435 = vperm.xlu0 %15648, %v16414_v35  }
 0x1c0   :  { %6420 = vperm.xlu1 %15649, %v16381_v1  }
 0x1c1   :  { %6445 = vperm.xlu0 %15648, %v16427_v60  }
 0x1c2   :  { %13683 = vmatmul.mubr.msk.bf16.gmra.mrb[20].mxu0 %vm49_vm1, %v16650_v21 }
 0x1c3   :  { %13686 = vmatprep.mubr.msk.bf16.mxu0 %vm49_vm1, %v16655_v25 }
 0x1c4   :  { %6430 = vperm.xlu1 %15649, %v16393_v47  }
 0x1c5   :  { %6455 = vperm.xlu0 %15648, %v16440_v10  }
 0x1c8   :  { %6440 = vperm.xlu1 %15649, %v16406_v29  }
 0x1c9   :  { %6465 = vperm.xlu0 %15648, %v16453_v57  }
 0x1ca   :  { %13687 = vmatmul.mubr.msk.bf16.gmra.mrb[24].mxu0 %vm49_vm1, %v16666_v26 }
 0x1cb   :  { %13690 = vmatprep.mubr.msk.bf16.mxu0 %vm49_vm1, %v16671_v27 }
 0x1cc   :  { %6450 = vperm.xlu1 %15649, %v16419_v43  }
 0x1cd   :  { %6475 = vperm.xlu0 %15648, %v16478_v41  }
 0x1d0   :  { %6460 = vperm.xlu1 %15649, %v16432_v3  }
 0x1d1   :  { %6485 = vperm.xlu0 %15648, %v16496_v49  }
 0x1d2   :  { %13691 = vmatmul.mubr.msk.bf16.gmra.mrb[28].mxu0 %vm49_vm1, %v16682_v32 }
 0x1d3   :  { %13694 = vmatprep.mubr.msk.bf16.mxu0 %vm49_vm1, %v16685_v33 }
 0x1d4   :  { %6470 = vperm.xlu1 %15649, %v16445_v59  }
 0x1d5   :  { %v13582_v36 = vpop.f32.mrb[40].mxu0  ;;  %6495 = vperm.xlu0 %15648, %v16527_v56  }
 0x1d6   :  { %v16697_v37 = vadd.f32 %v13582_v36, %v16461_v30  ;;  %v1393_v38 = vpop.f32.mrb[41].mxu0  ;;  %v2851_v30 = vsel %vm707_vm0, %v2795_v61, 0  ;;  %v2739_v61 = vld [vmem:[#allocation2 + $0x38] sm:$0xff]  ;;  %v2752_v36 = vld [vmem:[#allocation2 + $0xa0] sm:$0xff] }
 0x1d7   :  { %v16703_v42 = vadd.f32 %v1393_v38, %v16464_v46  ;;  %v13583_v12 = vpop.f32.mrb[42].mxu0  ;;  %v2449_v46 = vld [vmem:[#allocation2 + $0x136] sm:$0xff] }
 0x1d8   :  { %v1396_v53 = vpop.f32.mrb[43].mxu0  ;;  %6480 = vperm.xlu1 %15649, %v16458_v23   ;;  %v2467_v48 = vpack.c.bf16 %v2449_v46, %v16693_v11  ;;  %v2754_v38 = vld [vmem:[#allocation2 + $0xb0] sm:$0xff]  ;;  %v2757_v12 = vld [vmem:[#allocation2 + $0xc8] sm:$0xff] }
 0x1d9   :  { %v16707_v15 = vadd.f32 %v1396_v53, %v16471_v2  ;;  %v16722_v2 = vld [vmem:[%s20370_s4 + $0x10] sm:$0x3]  ;;  %6505 = vperm.xlu0 %15648, %v16547_v54  }
 0x1da   :  { %13695 = vmatmul.mubr.msk.bf16.gmra.mrb[52].mxu0 %vm49_vm1, %v2142_v39  ;;  %v2758_v53 = vld [vmem:[#allocation2 + $0xd0] sm:$0xff] }
 0x1db   :  { %13700 = vmatprep.mubr.msk.bf16.mxu0 %vm49_vm1, %v16505_v45  ;;  %v2450_v45 = vld [vmem:[#allocation2 + $0x13e] sm:$0xff]  ;;  %v2762_v46 = vld [vmem:[#allocation2 + $0xf0] sm:$0xff] }
 0x1dc   :  { %6490 = vperm.xlu1 %15649, %v16483_v51  }
 0x1dd   :  { %6515 = vperm.xlu0 %15648, %v16563_v0  }
 0x1e0   :  { %6500 = vperm.xlu1 %15649, %v16501_v17  }
 0x1e1   :  { %6525 = vperm.xlu0 %15648, %v16583_v55  }
 0x1e2   :  { %13701 = vmatmul.mubr.msk.bf16.vlgmr.msra.gmra.mrb[0].mxu0 %vm49_vm1, %v16509_v50  ;;  %v2738_v50 = vld [vmem:[#allocation2 + $0x30] sm:$0xff] }
 0x1e3   :  { %13737 = vmatpush3.bf16.msra.mxu0 %v2851_v30  ;;  %13704 = vmatprep.mubr.msk.bf16.mxu0 %vm49_vm1, %v16536_v22 }
 0x1e4   :  { %15634 = vmatprep.subr.msk.bf16.mxu0 %vm707_vm0, %v16722_v2  ;;  %6510 = vperm.xlu1 %15649, %v16532_v62  }
 0x1e5   :  { %6535 = vperm.xlu0 %15648, %v16599_v8  }
 0x1e8   :  { %6520 = vperm.xlu1 %15649, %v16552_v40  }
 0x1e9   :  { %6545 = vperm.xlu0 %15648, %v16616_v34   ;;  %v2741_v34 = vld [vmem:[#allocation2 + $0x48] sm:$0xff] }
 0x1ea   :  { %13705 = vmatmul.mubr.msk.bf16.gmra.mrb[4].mxu0 %vm49_vm1, %v16542_v63 }
 0x1eb   :  { %13708 = vmatprep.mubr.msk.bf16.mxu0 %vm49_vm1, %v16572_v6  ;;  %v2468_v6 = vpack.c.bf16 %v2450_v45, %v2450_v45 }
 0x1ec   :  { %6530 = vperm.xlu1 %15649, %v16568_v4  }
 0x1ed   :  { %8908 = vperm.xlu0 %15648, %v16368_v5  }
 0x1f0   :  { %6540 = vperm.xlu1 %15649, %v16588_v58   ;;  %v2773_v58 = vpack.c.bf16 %v2739_v61, %v2738_v50  ;;  %v2765_v61 = vld [vmem:[#allocation2 + $0x108] sm:$0xff] }
 0x1f1   :  { %8918 = vperm.xlu0 %15648, %v16388_v24  }
 0x1f2   :  { %13709 = vmatmul.mubr.msk.bf16.gmra.mrb[8].mxu0 %vm49_vm1, %v16577_v7 }
 0x1f3   :  { %13712 = vmatprep.mubr.msk.bf16.mxu0 %vm49_vm1, %v16606_v13 }
 0x1f4   :  { %8903 = vperm.xlu1 %15649, %v16361_v44  }
 0x1f5   :  { %8928 = vperm.xlu0 %15648, %v16401_v52  }
 0x1f8   :  { %8913 = vperm.xlu1 %15649, %v16375_v9  }
 0x1f9   :  { %8938 = vperm.xlu0 %15648, %v16414_v35  }
 0x1fa   :  { %13713 = vmatmul.mubr.msk.bf16.gmra.mrb[12].mxu0 %vm49_vm1, %v16611_v14  ;;  %v2740_v14 = vld [vmem:[#allocation2 + $0x40] sm:$0xff] }
 0x1fb   :  { %13716 = vmatprep.mubr.msk.bf16.mxu0 %vm49_vm1, %v16634_v19  ;;  %v2743_v19 = vld [vmem:[#allocation2 + $0x58] sm:$0xff] }
 0x1fc   :  { %8923 = vperm.xlu1 %15649, %v16381_v1   ;;  %v2775_v16 = vpack.c.bf16 %v2743_v19, %v2742_v18  ;;  %v3064_v18 = vld [vmem:[#allocation2 + $0x32] sm:$0xff]  ;;  %v3065_v19 = vld [vmem:[#allocation2 + $0x3a] sm:$0xff] }
 0x1fd   :  { %8948 = vperm.xlu0 %15648, %v16427_v60  }
 0x200   :  { %8933 = vperm.xlu1 %15649, %v16393_v47  }
 0x201   :  { %8958 = vperm.xlu0 %15648, %v16440_v10  }
 0x202   :  { %13717 = vmatmul.mubr.msk.bf16.gmra.mrb[16].mxu0 %vm49_vm1, %v16638_v20  ;;  %v2774_v20 = vpack.c.bf16 %v2741_v34, %v2740_v14 }
 0x203   :  { %13720 = vmatprep.mubr.msk.bf16.mxu0 %vm49_vm1, %v16650_v21  ;;  %v2745_v21 = vld [vmem:[#allocation2 + $0x68] sm:$0xff] }
 0x204   :  { %8943 = vperm.xlu1 %15649, %v16406_v29  }
 0x205   :  { %8968 = vperm.xlu0 %15648, %v16453_v57  }
 0x208   :  { %8953 = vperm.xlu1 %15649, %v16419_v43  }
 0x209   :  { %8978 = vperm.xlu0 %15648, %v16478_v41  }
 0x20a   :  { %13721 = vmatmul.mubr.msk.bf16.gmra.mrb[20].mxu0 %vm49_vm1, %v16655_v25  ;;  %v2746_v25 = vld [vmem:[#allocation2 + $0x70] sm:$0xff] }
 0x20b   :  { %13724 = vmatprep.mubr.msk.bf16.mxu0 %vm49_vm1, %v16666_v26 }
 0x20c   :  { %8963 = vperm.xlu1 %15649, %v16432_v3  }
 0x20d   :  { %8988 = vperm.xlu0 %15648, %v16496_v49  }
 0x210   :  { %8973 = vperm.xlu1 %15649, %v16445_v59  }
 0x211   :  { %8998 = vperm.xlu0 %15648, %v16527_v56  }
 0x212   :  { %13725 = vmatmul.mubr.msk.bf16.gmra.mrb[24].mxu0 %vm49_vm1, %v16671_v27  ;;  %v16812_v27 = vpop.permute.xlu0 %3567 }
 0x213   :  { %13728 = vmatprep.mubr.msk.bf16.mxu0 %vm49_vm1, %v16682_v32 }
 0x214   :  { %8983 = vperm.xlu1 %15649, %v16458_v23  }
 0x215   :  { %9008 = vperm.xlu0 %15648, %v16547_v54   ;;  %v3173_v54 = vsel %vm707_vm0, %v16722_v2, 0  ;;  %v2761_v2 = vld [vmem:[#allocation2 + $0xe8] sm:$0xff]  ;;  %vm93_vm0 = vcmask 64512  }
 0x216   :  { %v16819_v32 = vpop.permute.xlu0 %3572 }
 0x218   :  { %8993 = vperm.xlu1 %15649, %v16483_v51  }
 0x219   :  { %9018 = vperm.xlu0 %15648, %v16563_v0   ;;  %v2747_v0 = vld [vmem:[#allocation2 + $0x78] sm:$0xff] }
 0x21a   :  { %13729 = vmatmul.mubr.msk.bf16.gmra.mrb[28].mxu0 %vm49_vm1, %v16685_v33  ;;  %v16821_v33 = vpop.permute.xlu1 %3577 }
 0x21b   :  { %13732 = vmatprep.mubr.msk.bf16.mxu0 %vm49_vm1, %v2467_v48 }
 0x21c   :  { %9003 = vperm.xlu1 %15649, %v16501_v17   ;;  %v2744_v17 = vld [vmem:[#allocation2 + $0x60] sm:$0xff] }
 0x21d   :  { %v13620_v22 = vpop.f32.mrb[44].mxu0  ;;  %11019 = vperm.xlu0 %15648, %v16368_v5   ;;  %v2776_v26 = vpack.c.bf16 %v2745_v21, %v2744_v17  ;;  %v2777_v5 = vpack.c.bf16 %v2747_v0, %v2746_v25  ;;  %v3099_v0 = vpack.c.bf16 %v3065_v19, %v3064_v18 }
 0x21e   :  { %v16789_v63 = vadd.f32 %v13620_v22, %v16697_v37  ;;  %v1719_v4 = vpop.f32.mrb[45].mxu0  ;;  %v16829_v11 = vpop.permute.xlu1 %3582  ;;  %v2753_v37 = vld [vmem:[#allocation2 + $0xa8] sm:$0xff]  ;;  %v2766_v22 = vld [vmem:[#allocation2 + $0x110] sm:$0xff] }
 0x21f   :  { %v16793_v7 = vadd.f32 %v1719_v4, %v16703_v42  ;;  %v13621_v55 = vpop.f32.mrb[46].mxu0  ;;  %v2767_v4 = vld [vmem:[#allocation2 + $0x118] sm:$0xff] }
 0x220   :  { %v1722_v8 = vpop.f32.mrb[47].mxu0  ;;  %9013 = vperm.xlu1 %15649, %v16532_v62   ;;  %v20392_v62 = vmov 0.0   ;;  %v2787_v55 = vpack.c.bf16 %v2767_v4, %v2766_v22  ;;  %v3086_v4 = vld [vmem:[#allocation2 + $0xe2] sm:$0xff] }
 0x221   :  { %v16797_v13 = vadd.f32 %v1722_v8, %v16707_v15  ;;  %11024 = vperm.xlu0 %15648, %v16375_v9   ;;  %v2751_v9 = vld [vmem:[#allocation2 + $0x98] sm:$0xff]  ;;  %97 = vst.msk [vmem:[#allocation3 + $0x18] sm:$0xff] %vm93_vm0, %v20392_v62  ;;  %94 = vst.msk [vmem:[#allocation3] sm:$0xff] %vm93_vm0, %v20392_v62  ;;  %13814 = vmatprep.mubr.msk.bf16.mxu1 %vm15736_vm2, %v20392_v62 }
 0x222   :  { %13733 = vmatmul.mubr.msk.bf16.gmra.mrb[56].mxu0 %vm49_vm1, %v2468_v6  ;;  %v16837_v42 = vpop.permute.xlu1 %3592  ;;  %v2771_v8 = vld [vmem:[#allocation2 + $0x138] sm:$0xff]  ;;  %95 = vst.msk [vmem:[#allocation3 + $0x8] sm:$0xff] %vm93_vm0, %v20392_v62  ;;  %96 = vst.msk [vmem:[#allocation3 + $0x10] sm:$0xff] %vm93_vm0, %v20392_v62 }
 0x223   :  { %13738 = vmatprep.mubr.msk.bf16.mxu0 %vm49_vm1, %v2773_v58  ;;  %v2770_v58 = vld [vmem:[#allocation2 + $0x130] sm:$0xff]  ;;  %98 = vst.msk [vmem:[#allocation3 + $0x20] sm:$0xff] %vm93_vm0, %v20392_v62  ;;  %99 = vst.msk [vmem:[#allocation3 + $0x28] sm:$0xff] %vm93_vm0, %v20392_v62 }
 0x224   :  { %9023 = vperm.xlu1 %15649, %v16552_v40   ;;  %v2748_v40 = vld [vmem:[#allocation2 + $0x80] sm:$0xff]  ;;  %v2789_v34 = vpack.c.bf16 %v2771_v8, %v2770_v58  ;;  %100 = vst.msk [vmem:[#allocation3 + $0x30] sm:$0xff] %vm93_vm0, %v20392_v62  ;;  %101 = vst.msk [vmem:[#allocation3 + $0x38] sm:$0xff] %vm93_vm0, %v20392_v62 }
 0x225   :  { %11034 = vperm.xlu0 %15648, %v16381_v1   ;;  %v2779_v1 = vpack.c.bf16 %v2751_v9, %v2750_v31  ;;  %v3068_v31 = vld [vmem:[#allocation2 + $0x52] sm:$0xff]  ;;  %v3090_v8 = vld [vmem:[#allocation2 + $0x102] sm:$0xff]  ;;  %102 = vst.msk [vmem:[#allocation3 + $0x40] sm:$0xff] %vm93_vm0, %v20392_v62  ;;  %103 = vst.msk [vmem:[#allocation3 + $0x48] sm:$0xff] %vm93_vm0, %v20392_v62 }
 0x226   :  { %v16846_v30 = vpop.permute.xlu1 %3602  ;;  %104 = vst.msk [vmem:[#allocation3 + $0x50] sm:$0xff] %vm93_vm0, %v20392_v62  ;;  %105 = vst.msk [vmem:[#allocation3 + $0x58] sm:$0xff] %vm93_vm0, %v20392_v62 }
 0x227   :  { %106 = vst.msk [vmem:[#allocation3 + $0x60] sm:$0xff] %vm93_vm0, %v20392_v62  ;;  %107 = vst.msk [vmem:[#allocation3 + $0x68] sm:$0xff] %vm93_vm0, %v20392_v62 }
 0x228   :  { %11014 = vperm.xlu1 %15649, %v16361_v44   ;;  %v2778_v44 = vpack.c.bf16 %v2749_v28, %v2748_v40  ;;  %v3066_v40 = vld [vmem:[#allocation2 + $0x42] sm:$0xff]  ;;  %v3067_v28 = vld [vmem:[#allocation2 + $0x4a] sm:$0xff]  ;;  %108 = vst.msk [vmem:[#allocation3 + $0x70] sm:$0xff] %vm93_vm0, %v20392_v62  ;;  %109 = vst.msk [vmem:[#allocation3 + $0x78] sm:$0xff] %vm93_vm0, %v20392_v62 }
 0x229   :  { %11044 = vperm.xlu0 %15648, %v16393_v47   ;;  %v2755_v47 = vld [vmem:[#allocation2 + $0xb8] sm:$0xff]  ;;  %v3100_v9 = vpack.c.bf16 %v3067_v28, %v3066_v40  ;;  %v3098_v40 = vld [vmem:[#allocation2 + $0x142] sm:$0xff]  ;;  %110 = vst.msk [vmem:[#allocation3 + $0x80] sm:$0xff] %vm93_vm0, %v20392_v62  ;;  %111 = vst.msk [vmem:[#allocation3 + $0x88] sm:$0xff] %vm93_vm0, %v20392_v62 }
 0x22a   :  { %13739 = vmatmul.mubr.msk.bf16.vlgmr.msra.gmra.mrb[0].mxu0 %vm49_vm1, %v2774_v20  ;;  %v16855_v45 = vpop.permute.xlu1 %3612  ;;  %112 = vst.msk [vmem:[#allocation3 + $0x90] sm:$0xff] %vm93_vm0, %v20392_v62  ;;  %113 = vst.msk [vmem:[#allocation3 + $0x98] sm:$0xff] %vm93_vm0, %v20392_v62 }
 0x22b   :  { %13775 = vmatpush3.bf16.msra.mxu0 %v3173_v54  ;;  %13742 = vmatprep.mubr.msk.bf16.mxu0 %vm49_vm1, %v2775_v16  ;;  %114 = vst.msk [vmem:[#allocation3 + $0xa0] sm:$0xff] %vm93_vm0, %v20392_v62  ;;  %115 = vst.msk [vmem:[#allocation3 + $0xa8] sm:$0xff] %vm93_vm0, %v20392_v62 }
 0x22c   :  { %14184 = vmatprep.subr.bf16.mxu0 %v20392_v62  ;;  %11029 = vperm.xlu1 %15649, %v16388_v24   ;;  %v16827_v24 = vpop.permute.xlu0 %3587  ;;  %116 = vst.msk [vmem:[#allocation3 + $0xb0] sm:$0xff] %vm93_vm0, %v20392_v62  ;;  %117 = vst.msk [vmem:[#allocation3 + $0xb8] sm:$0xff] %vm93_vm0, %v20392_v62 }
 0x22d   :  { %11054 = vperm.xlu0 %15648, %v16406_v29   ;;  %v2781_v29 = vpack.c.bf16 %v2755_v47, %v2754_v38  ;;  %v3074_v47 = vld [vmem:[#allocation2 + $0x82] sm:$0xff]  ;;  %118 = vst.msk [vmem:[#allocation3 + $0xc0] sm:$0xff] %vm93_vm0, %v20392_v62  ;;  %119 = vst.msk [vmem:[#allocation3 + $0xc8] sm:$0xff] %vm93_vm0, %v20392_v62 }
 0x22e   :  { %v16860_v50 = vpop.permute.xlu1 %3622  ;;  %120 = vst.msk [vmem:[#allocation3 + $0xd0] sm:$0xff] %vm93_vm0, %v20392_v62  ;;  %121 = vst.msk [vmem:[#allocation3 + $0xd8] sm:$0xff] %vm93_vm0, %v20392_v62 }
 0x22f   :  { %122 = vst.msk [vmem:[#allocation3 + $0xe0] sm:$0xff] %vm93_vm0, %v20392_v62  ;;  %123 = vst.msk [vmem:[#allocation3 + $0xe8] sm:$0xff] %vm93_vm0, %v20392_v62 }
 0x230   :  { %11039 = vperm.xlu1 %15649, %v16401_v52   ;;  %v2780_v52 = vpack.c.bf16 %v2753_v37, %v2752_v36  ;;  %v16835_v39 = vpop.permute.xlu0 %3597  ;;  %v3072_v36 = vld [vmem:[#allocation2 + $0x72] sm:$0xff]  ;;  %v3073_v37 = vld [vmem:[#allocation2 + $0x7a] sm:$0xff]  ;;  %124 = vst.msk [vmem:[#allocation3 + $0xf0] sm:$0xff] %vm93_vm0, %v20392_v62  ;;  %125 = vst.msk [vmem:[#allocation3 + $0xf8] sm:$0xff] %vm93_vm0, %v20392_v62 }
 0x231   :  { %11064 = vperm.xlu0 %15648, %v16419_v43   ;;  %v2759_v43 = vld [vmem:[#allocation2 + $0xd8] sm:$0xff]  ;;  %v3103_v38 = vpack.c.bf16 %v3073_v37, %v3072_v36  ;;  %126 = vst.msk [vmem:[#allocation3 + $0x100] sm:$0xff] %vm93_vm0, %v20392_v62  ;;  %127 = vst.msk [vmem:[#allocation3 + $0x108] sm:$0xff] %vm93_vm0, %v20392_v62 }
 0x232   :  { %13743 = vmatmul.mubr.msk.bf16.gmra.mrb[4].mxu0 %vm49_vm1, %v2776_v26  ;;  %128 = vst.msk [vmem:[#allocation3 + $0x110] sm:$0xff] %vm93_vm0, %v20392_v62  ;;  %129 = vst.msk [vmem:[#allocation3 + $0x118] sm:$0xff] %vm93_vm0, %v20392_v62 }
 0x233   :  { %13746 = vmatprep.mubr.msk.bf16.mxu0 %vm49_vm1, %v2777_v5  ;;  %131 = vst.msk [vmem:[#allocation3 + $0x120] sm:$0x3f] %vm130_vm9, %v20392_v62 }
 0x234   :  { %11049 = vperm.xlu1 %15649, %v16414_v35   ;;  %v2756_v35 = vld [vmem:[#allocation2 + $0xc0] sm:$0xff]  ;;  %v16844_v15 = vpop.permute.xlu0 %3607 }
 0x235   :  { %11074 = vperm.xlu0 %15648, %v16432_v3   ;;  %v2783_v3 = vpack.c.bf16 %v2759_v43, %v2758_v53  ;;  %v3078_v43 = vld [vmem:[#allocation2 + $0xa2] sm:$0xff] }
 0x238   :  { %11059 = vperm.xlu1 %15649, %v16427_v60   ;;  %v2782_v60 = vpack.c.bf16 %v2757_v12, %v2756_v35  ;;  %v16853_v48 = vpop.permute.xlu0 %3617  ;;  %v3077_v35 = vld [vmem:[#allocation2 + $0x9a] sm:$0xff] }
 0x239   :  { %11084 = vperm.xlu0 %15648, %v16445_v59   ;;  %v2763_v59 = vld [vmem:[#allocation2 + $0xf8] sm:$0xff] }
 0x23a   :  { %13747 = vmatmul.mubr.msk.bf16.gmra.mrb[8].mxu0 %vm49_vm1, %v2778_v44 }
 0x23b   :  { %13750 = vmatprep.mubr.msk.bf16.mxu0 %vm49_vm1, %v2779_v1  ;;  %v3071_v1 = vld [vmem:[#allocation2 + $0x6a] sm:$0xff] }
 0x23c   :  { %11069 = vperm.xlu1 %15649, %v16440_v10   ;;  %v2760_v10 = vld [vmem:[#allocation2 + $0xe0] sm:$0xff] }
 0x23d   :  { %11094 = vperm.xlu0 %15648, %v16458_v23   ;;  %v2785_v23 = vpack.c.bf16 %v2763_v59, %v2762_v46  ;;  %v3082_v59 = vld [vmem:[#allocation2 + $0xc2] sm:$0xff] }
 0x240   :  { %11079 = vperm.xlu1 %15649, %v16453_v57   ;;  %v2784_v57 = vpack.c.bf16 %v2761_v2, %v2760_v10  ;;  %v3081_v10 = vld [vmem:[#allocation2 + $0xba] sm:$0xff] }
 0x241   :  { %11104 = vperm.xlu0 %15648, %v16483_v51   ;;  %v2768_v51 = vld [vmem:[#allocation2 + $0x120] sm:$0xff] }
 0x242   :  { %13751 = vmatmul.mubr.msk.bf16.gmra.mrb[12].mxu0 %vm49_vm1, %v2780_v52  ;;  %v3075_v52 = vld [vmem:[#allocation2 + $0x8a] sm:$0xff] }
 0x243   :  { %13754 = vmatprep.mubr.msk.bf16.mxu0 %vm49_vm1, %v2781_v29  ;;  %v3076_v29 = vld [vmem:[#allocation2 + $0x92] sm:$0xff]  ;;  %v3104_v12 = vpack.c.bf16 %v3075_v52, %v3074_v47 }
 0x244   :  { %11089 = vperm.xlu1 %15649, %v16478_v41   ;;  %v2764_v41 = vld [vmem:[#allocation2 + $0x100] sm:$0xff]  ;;  %v3105_v53 = vpack.c.bf16 %v3077_v35, %v3076_v29 }
 0x245   :  { %v2786_v6 = vpack.c.bf16 %v2765_v61, %v2764_v41  ;;  %v3085_v41 = vld [vmem:[#allocation2 + $0xda] sm:$0xff] }
 0x248   :  { %11099 = vperm.xlu1 %15649, %v16496_v49   ;;  %v2769_v49 = vld [vmem:[#allocation2 + $0x128] sm:$0xff] }
 0x249   :  { %v2788_v14 = vpack.c.bf16 %v2769_v49, %v2768_v51  ;;  %v3089_v51 = vld [vmem:[#allocation2 + $0xfa] sm:$0xff] }
 0x24a   :  { %13755 = vmatmul.mubr.msk.bf16.gmra.mrb[16].mxu0 %vm49_vm1, %v2782_v60  ;;  %v3079_v60 = vld [vmem:[#allocation2 + $0xaa] sm:$0xff] }
 0x24b   :  { %13758 = vmatprep.mubr.msk.bf16.mxu0 %vm49_vm1, %v2783_v3  ;;  %v3080_v3 = vld [vmem:[#allocation2 + $0xb2] sm:$0xff]  ;;  %v3106_v2 = vpack.c.bf16 %v3079_v60, %v3078_v43 }
 0x24c   :  { %11109 = vperm.xlu1 %15649, %v16527_v56   ;;  %v2772_v56 = vld [vmem:[#allocation2 + $0x140] sm:$0xff]  ;;  %v3107_v46 = vpack.c.bf16 %v3081_v10, %v3080_v3 }
 0x24d   :  { %v2790_v17 = vpack.c.bf16 %v2772_v56, %v2772_v56  ;;  %v3093_v56 = vld [vmem:[#allocation2 + $0x11a] sm:$0xff] }
 0x252   :  { %13759 = vmatmul.mubr.msk.bf16.gmra.mrb[20].mxu0 %vm49_vm1, %v2784_v57  ;;  %v3083_v57 = vld [vmem:[#allocation2 + $0xca] sm:$0xff] }
 0x253   :  { %13762 = vmatprep.mubr.msk.bf16.mxu0 %vm49_vm1, %v2785_v23  ;;  %v3084_v23 = vld [vmem:[#allocation2 + $0xd2] sm:$0xff]  ;;  %v3108_v61 = vpack.c.bf16 %v3083_v57, %v3082_v59  ;;  %v219_v57 = vld [vmem:[%s20368_s2] sm:$0xff] }
 0x254   :  { %v3109_v22 = vpack.c.bf16 %v3085_v41, %v3084_v23 }
 0x25a   :  { %13763 = vmatmul.mubr.msk.bf16.gmra.mrb[24].mxu0 %vm49_vm1, %v2786_v6  ;;  %v3087_v6 = vld [vmem:[#allocation2 + $0xea] sm:$0xff] }
 0x25b   :  { %13766 = vmatprep.mubr.msk.bf16.mxu0 %vm49_vm1, %v2787_v55  ;;  %v3088_v55 = vld [vmem:[#allocation2 + $0xf2] sm:$0xff]  ;;  %v3110_v49 = vpack.c.bf16 %v3087_v6, %v3086_v4 }
 0x25c   :  { %v3111_v58 = vpack.c.bf16 %v3089_v51, %v3088_v55 }
 0x262   :  { %13767 = vmatmul.mubr.msk.bf16.gmra.mrb[28].mxu0 %vm49_vm1, %v2788_v14  ;;  %v3091_v14 = vld [vmem:[#allocation2 + $0x10a] sm:$0xff] }
 0x263   :  { %13770 = vmatprep.mubr.msk.bf16.mxu0 %vm49_vm1, %v2789_v34  ;;  %v3092_v34 = vld [vmem:[#allocation2 + $0x112] sm:$0xff]  ;;  %v3112_v18 = vpack.c.bf16 %v3091_v14, %v3090_v8 }
 0x264   :  { %v3113_v19 = vpack.c.bf16 %v3093_v56, %v3092_v34  ;;  %v17007_v56 = vpop.permute.xlu0 %3627 }
 0x265   :  { %v13658_v20 = vpop.f32.mrb[48].mxu0 }
 0x266   :  { %v16869_v16 = vadd.f32 %v13658_v20, %v16789_v63  ;;  %v2041_v54 = vpop.f32.mrb[49].mxu0  ;;  %v3069_v63 = vld [vmem:[#allocation2 + $0x5a] sm:$0xff]  ;;  %v3094_v20 = vld [vmem:[#allocation2 + $0x122] sm:$0xff] }
 0x267   :  { %v16872_v21 = vadd.f32 %v2041_v54, %v16793_v7  ;;  %v13659_v25 = vpop.f32.mrb[50].mxu0  ;;  %v3101_v44 = vpack.c.bf16 %v3069_v63, %v3068_v31  ;;  %v3070_v7 = vld [vmem:[#allocation2 + $0x62] sm:$0xff]  ;;  %v3095_v54 = vld [vmem:[#allocation2 + $0x12a] sm:$0xff] }
 0x268   :  { %v2044_v26 = vpop.f32.mrb[51].mxu0  ;;  %v3097_v25 = vld [vmem:[#allocation2 + $0x13a] sm:$0xff] }
 0x269   :  { %v16875_v5 = vadd.f32 %v2044_v26, %v16797_v13  ;;  %v3102_v13 = vpack.c.bf16 %v3071_v1, %v3070_v7 }
 0x26a   :  { %13771 = vmatmul.mubr.msk.bf16.gmra.mrb[60].mxu0 %vm49_vm1, %v2790_v17  ;;  %v3096_v17 = vld [vmem:[#allocation2 + $0x132] sm:$0xff] }
 0x26b   :  { %13776 = vmatprep.mubr.msk.bf16.mxu0 %vm49_vm1, %v3099_v0  ;;  %v3114_v0 = vpack.c.bf16 %v3095_v54, %v3094_v20  ;;  %v3115_v26 = vpack.c.bf16 %v3097_v25, %v3096_v17 }
 0x272   :  { %13777 = vmatmul.mubr.msk.bf16.vlgmr.msra.gmra.mrb[0].mxu0 %vm49_vm1, %v3100_v9  ;;  %v3116_v9 = vpack.c.bf16 %v3098_v40, %v3098_v40 }
 0x273   :  { %13780 = vmatprep.mubr.msk.bf16.mxu0 %vm49_vm1, %v3101_v44 }
 0x27a   :  { %13781 = vmatmul.mubr.msk.bf16.gmra.mrb[4].mxu0 %vm49_vm1, %v3102_v13 }
 0x27b   :  { %13784 = vmatprep.mubr.msk.bf16.mxu0 %vm49_vm1, %v3103_v38 }
 0x282   :  { %13785 = vmatmul.mubr.msk.bf16.gmra.mrb[8].mxu0 %vm49_vm1, %v3104_v12 }
 0x283   :  { %13788 = vmatprep.mubr.msk.bf16.mxu0 %vm49_vm1, %v3105_v53  ;;  %v3386_v53 = vlaneseq }
 0x285   :  { %v16989_v43 = vshrl.u32 %v3386_v53, 7 }
 0x287   :  { %20393 = vst [vmem:[#allocation10_spill] sm:$0xff] %v16989_v43 }
 0x28a   :  { %13789 = vmatmul.mubr.msk.bf16.gmra.mrb[12].mxu0 %vm49_vm1, %v3106_v2  ;;  %v3388_v2 = vsub.s32 0, %v16989_v43 }
 0x28b   :  { %13792 = vmatprep.mubr.msk.bf16.mxu0 %vm49_vm1, %v3107_v46 }
 0x292   :  { %13793 = vmatmul.mubr.msk.bf16.gmra.mrb[16].mxu0 %vm49_vm1, %v3108_v61  ;;  %v17001_v61 = vrot.slane %v219_v57, %v3388_v2 }
 0x293   :  { %13796 = vmatprep.mubr.msk.bf16.mxu0 %vm49_vm1, %v3109_v22 }
 0x29a   :  { %13797 = vmatmul.mubr.msk.bf16.gmra.mrb[20].mxu0 %vm49_vm1, %v3110_v49 }
 0x29b   :  { %13800 = vmatprep.mubr.msk.bf16.mxu0 %vm49_vm1, %v3111_v58 }
 0x2a2   :  { %13801 = vmatmul.mubr.msk.bf16.gmra.mrb[24].mxu0 %vm49_vm1, %v3112_v18 }
 0x2a3   :  { %13804 = vmatprep.mubr.msk.bf16.mxu0 %vm49_vm1, %v3113_v19 }
 0x2aa   :  { %13805 = vmatmul.mubr.msk.bf16.gmra.mrb[28].mxu0 %vm49_vm1, %v3114_v0 }
 0x2ab   :  { %13808 = vmatprep.mubr.msk.bf16.mxu0 %vm49_vm1, %v3115_v26 }
 0x2ad   :  { %v13696_v28 = vpop.f32.mrb[52].mxu0 }
 0x2ae   :  { %v2415_v31 = vadd.f32 %v13696_v28, %v16869_v16  ;;  %v2367_v63 = vpop.f32.mrb[53].mxu0  ;;  %v3901_v16 = vld [vmem:[%s20371_s5 + $0x4] sm:$0xf] }
 0x2af   :  { %v2413_v44 = vadd.f32 %v2367_v63, %v16872_v21  ;;  %v13697_v7 = vpop.f32.mrb[54].mxu0 }
 0x2b0   :  { %v2370_v1 = vpop.f32.mrb[55].mxu0  ;;  %v17020_v7 = vpop.permute.xlu0 %3637 }
 0x2b1   :  { %v2414_v36 = vadd.f32 %v2370_v1, %v16875_v5  ;;  %v5458_v5 = vld [vmem:[%s20371_s5 + $0x18] sm:$0xf] }
 0x2b2   :  { %13809 = vmatmul.mubr.msk.bf16.gmra.mrb[64].mxu0 %vm49_vm1, %v3116_v9  ;;  %vm3947_vm1 = vcmask 1043456  }
 0x2b3   :  { %v3949_v21 = vsel %vm3947_vm1, %v3901_v16, 0  ;;  %14186 = vmatprep.mubr.msk.bf16.mxu0 %vm15736_vm2, %v20392_v62  ;;  %v16984_v37 = vsel %vm3947_vm1, %v5458_v5, 0 }
 0x2b4   :  { %13813 = vmatpush3.bf16.msra.mxu1 %v3949_v21  ;;  %14185 = vmatpush3.bf16.msra.mxu0 %v16984_v37  ;;  %v17034_v2 = vpop.permute.xlu0 %3647 }
 0x2b5   :  { %13874 = vmatprep.subr.bf16.mxu1 %v20392_v62  ;;  %14308 = vmatprep.subr.bf16.mxu0 %v20392_v62 }
 0x2f5   :  { %v13734_v13 = vpop.f32.mrb[56].mxu0 }
 0x2f6   :  { %v2737_v38 = vadd.f32 %v13734_v13, %v2415_v31  ;;  %v2689_v47 = vpop.f32.mrb[57].mxu0  ;;  %v17013_v31 = vpop.permute.xlu1 %3632 }
 0x2f7   :  { %v2735_v52 = vadd.f32 %v2689_v47, %v2413_v44  ;;  %v13735_v29 = vpop.f32.mrb[58].mxu0 }
 0x2f8   :  { %v2692_v35 = vpop.f32.mrb[59].mxu0 }
 0x2f9   :  { %v2736_v12 = vadd.f32 %v2692_v35, %v2414_v36 }
 0x33d   :  { %v13772_v60 = vpop.f32.mrb[60].mxu0 }
 0x33e   :  { %v16991_v3 = vadd.f32 %v13772_v60, %v2737_v38  ;;  %v3015_v10 = vpop.f32.mrb[61].mxu0 }
 0x33f   :  { %v16994_v46 = vadd.f32 %v3015_v10, %v2735_v52  ;;  %v13773_v59 = vpop.f32.mrb[62].mxu0  ;;  %v17026_v52 = vpop.permute.xlu1 %3642 }
 0x340   :  { %v3018_v23 = vpop.f32.mrb[63].mxu0 }
 0x341   :  { %v16999_v41 = vadd.f32 %v3018_v23, %v2736_v12  ;;  %v3855_v12 = vld [vmem:[%s20371_s5] sm:$0xf] }
 0x345   :  { %v13778_v22 = vpop.f32.mrb[0].mxu0 }
 0x346   :  { %v3392_v4 = vadd.f32 %v13778_v22, %v17001_v61  ;;  %v3209_v6 = vpop.f32.mrb[1].mxu0 }
 0x347   :  { %v3390_v55 = vadd.f32 %v17001_v61, %v3209_v6  ;;  %v13779_v51 = vpop.f32.mrb[2].mxu0 }
 0x348   :  { %vm3427_vm10 = vcmp.ge.f32.partialorder %v3392_v4, 0.0  ;;  %v3462_v49 = vmul.f32 0.01, %v3392_v4  ;;  %v3393_v58 = vadd.f32 %v13779_v51, %v17001_v61  ;;  %v3212_v8 = vpop.f32.mrb[3].mxu0 }
 0x349   :  { %vm3425_vm11 = vcmp.ge.f32.partialorder %v3390_v55, 0.0  ;;  %v3460_v14 = vmul.f32 0.01, %v3390_v55  ;;  %v3391_v34 = vadd.f32 %v17001_v61, %v3212_v8  ;;  %v17045_v8 = vpop.permute.xlu1 %3652 }
 0x34a   :  { %v3497_v18 = vsel %vm3427_vm10, %v3392_v4, %v3462_v49  ;;  %vm3428_vm12 = vcmp.ge.f32.partialorder %v3393_v58, 0.0  ;;  %v3463_v19 = vmul.f32 0.01, %v3393_v58 }
 0x34b   :  { %v3742_v20 = vmul.f32 %v16821_v33, %v3497_v18  ;;  %v3495_v54 = vsel %vm3425_vm11, %v3390_v55, %v3460_v14  ;;  %vm3426_vm13 = vcmp.ge.f32.partialorder %v3391_v34, 0.0  ;;  %v3461_v17 = vmul.f32 0.01, %v3391_v34 }
 0x34c   :  { %v3740_v25 = vmul.f32 %v16812_v27, %v3495_v54  ;;  %v3498_v0 = vsel %vm3428_vm12, %v3393_v58, %v3463_v19  ;;  %v17051_v54 = vpop.permute.xlu0 %3657 }
 0x34d   :  { %3777 = vst.msk [vmem:[#allocation3 + $0x18] sm:$0xff] %vm93_vm0, %v3742_v20  ;;  %v3743_v26 = vmul.f32 %v16829_v11, %v3498_v0  ;;  %v3496_v40 = vsel %vm3426_vm13, %v3391_v34, %v3461_v17  ;;  %v13782_v28 = vpop.f32.mrb[4].mxu0 }
 0x34e   :  { %3775 = vst.msk [vmem:[#allocation3 + $0x8] sm:$0xff] %vm93_vm0, %v3740_v25  ;;  %v3741_v63 = vmul.f32 %v16819_v32, %v3496_v40  ;;  %v3396_v33 = vadd.f32 %v13782_v28, %v17001_v61  ;;  %v3225_v9 = vpop.f32.mrb[5].mxu0 }
 0x34f   :  { %3778 = vst.msk [vmem:[#allocation3 + $0x20] sm:$0xff] %vm93_vm0, %v3743_v26  ;;  %v3394_v27 = vadd.f32 %v17001_v61, %v3225_v9  ;;  %v13783_v44 = vpop.f32.mrb[6].mxu0  ;;  %v6012_v26 = vld [vmem:[%s20371_s5 + $0x20] sm:$0xf] }
 0x350   :  { %3776 = vst.msk [vmem:[#allocation3 + $0x10] sm:$0xff] %vm93_vm0, %v3741_v63  ;;  %vm3431_vm14 = vcmp.ge.f32.partialorder %v3396_v33, 0.0  ;;  %v3466_v11 = vmul.f32 0.01, %v3396_v33  ;;  %v3397_v1 = vadd.f32 %v13783_v44, %v17001_v61  ;;  %v3228_v36 = vpop.f32.mrb[7].mxu0 }
 0x351   :  { %vm3429_vm15 = vcmp.ge.f32.partialorder %v3394_v27, 0.0  ;;  %v3464_v16 = vmul.f32 0.01, %v3394_v27  ;;  %v3395_v32 = vadd.f32 %v17001_v61, %v3228_v36 }
 0x352   :  { %v3501_v21 = vsel %vm3431_vm14, %v3396_v33, %v3466_v11  ;;  %vm3432_vm3 = vcmp.ge.f32.partialorder %v3397_v1, 0.0  ;;  %v3467_v5 = vmul.f32 0.01, %v3397_v1 }
 0x353   :  { %v3746_v13 = vmul.f32 %v16835_v39, %v3501_v21  ;;  %v3499_v38 = vsel %vm3429_vm15, %v3394_v27, %v3464_v16  ;;  %vm3430_vm4 = vcmp.ge.f32.partialorder %v3395_v32, 0.0  ;;  %v3465_v47 = vmul.f32 0.01, %v3395_v32 }
 0x354   :  { %v3744_v29 = vmul.f32 %v16827_v24, %v3499_v38  ;;  %v3502_v35 = vsel %vm3432_vm3, %v3397_v1, %v3467_v5  ;;  %v3858_v1 = vld [vmem:[#allocation3 + $0x18] sm:$0xff]  ;;  %v17080_v38 = vpop.permute.xlu1 %3662 }
 0x355   :  { %3781 = vst.msk [vmem:[#allocation3 + $0x38] sm:$0xff] %vm93_vm0, %v3746_v13  ;;  %v3747_v53 = vmul.f32 %v16846_v30, %v3502_v35  ;;  %v3500_v60 = vsel %vm3430_vm4, %v3395_v32, %v3465_v47  ;;  %v13786_v10 = vpop.f32.mrb[8].mxu0  ;;  %v3856_v22 = vld [vmem:[#allocation3 + $0x8] sm:$0xff]  ;;  %v4150_v30 = vsel %vm3947_vm1, %v3855_v12, 0  ;;  %v6059_v13 = vsel %vm3947_vm1, %v6012_v26, 0 }
 0x356   :  { %3779 = vst.msk [vmem:[#allocation3 + $0x28] sm:$0xff] %vm93_vm0, %v3744_v29  ;;  %v3745_v39 = vmul.f32 %v16837_v42, %v3500_v60  ;;  %v3400_v59 = vadd.f32 %v13786_v10, %v17001_v61  ;;  %v3241_v24 = vpop.f32.mrb[9].mxu0  ;;  %v3859_v0 = vld [vmem:[#allocation3 + $0x20] sm:$0xff]  ;;  %v17089_v10 = vpop.permute.xlu0 %3667 }
 0x357   :  { %3782 = vst.msk [vmem:[#allocation3 + $0x40] sm:$0xff] %vm93_vm0, %v3747_v53  ;;  %v3398_v57 = vadd.f32 %v17001_v61, %v3241_v24  ;;  %v13787_v23 = vpop.f32.mrb[10].mxu0  ;;  %v3857_v4 = vld [vmem:[#allocation3 + $0x10] sm:$0xff]  ;;  %v3887_v32 = vpack.c.bf16 %v3859_v0, %v3858_v1 }
 0x358   :  { %3780 = vst.msk [vmem:[#allocation3 + $0x30] sm:$0xff] %vm93_vm0, %v3745_v39  ;;  %vm3435_vm5 = vcmp.ge.f32.partialorder %v3400_v59, 0.0  ;;  %v3470_v6 = vmul.f32 0.01, %v3400_v59  ;;  %v3401_v55 = vadd.f32 %v13787_v23, %v17001_v61  ;;  %v3244_v51 = vpop.f32.mrb[11].mxu0  ;;  %v3886_v42 = vpack.c.bf16 %v3857_v4, %v3856_v22 }
 0x359   :  { %vm3433_vm6 = vcmp.ge.f32.partialorder %v3398_v57, 0.0  ;;  %v3468_v49 = vmul.f32 0.01, %v3398_v57  ;;  %v3399_v58 = vadd.f32 %v17001_v61, %v3244_v51 }
 0x35a   :  { %v3505_v14 = vsel %vm3435_vm5, %v3400_v59, %v3470_v6  ;;  %vm3436_vm7 = vcmp.ge.f32.partialorder %v3401_v55, 0.0  ;;  %v3471_v34 = vmul.f32 0.01, %v3401_v55  ;;  %13815 = vmatmul.mubr.msk.bf16.vlgmr.msra.gmra.mrb[0].mxu1 %vm93_vm0, %v3886_v42 }
 0x35b   :  { %v3750_v18 = vmul.f32 %v16853_v48, %v3505_v14  ;;  %v3503_v19 = vsel %vm3433_vm6, %v3398_v57, %v3468_v49  ;;  %vm3434_vm8 = vcmp.ge.f32.partialorder %v3399_v58, 0.0  ;;  %v3469_v20 = vmul.f32 0.01, %v3399_v58  ;;  %13875 = vmatpush3.bf16.msra.mxu1 %v4150_v30  ;;  %13818 = vmatprep.mubr.msk.bf16.mxu1 %vm15736_vm2, %v20392_v62  ;;  %v17058_v48 = vld [vmem:[#allocation3 + $0x1e] sm:$0xff]  ;;  %v17108_v49 = vpop.permute.xlu1 %3672 }
 0x35c   :  { %v3748_v17 = vmul.f32 %v16844_v15, %v3503_v19  ;;  %v3506_v25 = vsel %vm3436_vm7, %v3401_v55, %v3471_v34  ;;  %13936 = vmatprep.subr.bf16.mxu1 %v20392_v62  ;;  %v17064_v9 = vld [vmem:[#allocation3 + $0x38] sm:$0xff] }
 0x35d   :  { %v17060_v40 = vld [vmem:[#allocation3 + $0x26] sm:$0xff]  ;;  %3785 = vst.msk [vmem:[#allocation3 + $0x58] sm:$0xff] %vm93_vm0, %v3750_v18  ;;  %v3751_v28 = vmul.f32 %v16860_v50, %v3506_v25  ;;  %v3504_v63 = vsel %vm3434_vm8, %v3399_v58, %v3469_v20  ;;  %v13790_v33 = vpop.f32.mrb[12].mxu0  ;;  %20394 = vst [vmem:[#allocation11_spill] sm:$0xff] %v17064_v9  ;;  %v17123_v25 = vpop.permute.xlu0 %3677 }
 0x35e   :  { %3783 = vst.msk [vmem:[#allocation3 + $0x48] sm:$0xff] %vm93_vm0, %v3748_v17  ;;  %v3749_v27 = vmul.f32 %v16855_v45, %v3504_v63  ;;  %v3404_v44 = vadd.f32 %v13790_v33, %v17001_v61  ;;  %v3257_v11 = vpop.f32.mrb[13].mxu0  ;;  %v17092_v24 = vld [vmem:[#allocation3 + $0x3e] sm:$0xff]  ;;  %v3860_v20 = vld [vmem:[#allocation3 + $0x28] sm:$0xff] }
 0x35f   :  { %v17071_v36 = vld [vmem:[#allocation3 + $0x30] sm:$0xff]  ;;  %3786 = vst.msk [vmem:[#allocation3 + $0x60] sm:$0xff] %vm93_vm0, %v3751_v28  ;;  %v3402_v50 = vadd.f32 %v17001_v61, %v3257_v11  ;;  %v13791_v16 = vpop.f32.mrb[14].mxu0 }
 0x360   :  { %20395 = vst [vmem:[#allocation12_spill] sm:$0xff] %v17071_v36  ;;  %v17075_v21 = vld [vmem:[#allocation3 + $0x2e] sm:$0xff]  ;;  %v17077_v5 = vld [vmem:[#allocation3 + $0x36] sm:$0xff]  ;;  %3784 = vst.msk [vmem:[#allocation3 + $0x50] sm:$0xff] %vm93_vm0, %v3749_v27  ;;  %vm3439_vm9 = vcmp.ge.f32.partialorder %v3404_v44, 0.0  ;;  %v3405_v29 = vadd.f32 %v13791_v16, %v17001_v61  ;;  %v3260_v35 = vpop.f32.mrb[15].mxu0  ;;  %v3888_v28 = vpack.c.bf16 %v17071_v36, %v3860_v20 }
 0x361   :  { %v3474_v47 = vmul.f32 0.01, %v3404_v44  ;;  %vm3437_vm10 = vcmp.ge.f32.partialorder %v3402_v50, 0.0  ;;  %v3472_v12 = vmul.f32 0.01, %v3402_v50  ;;  %v3403_v53 = vadd.f32 %v17001_v61, %v3260_v35 }
 0x362   :  { %v5443_v60 = vpack.c.bf16 %v17077_v5, %v17075_v21  ;;  %vm3440_vm11 = vcmp.ge.f32.partialorder %v3405_v29, 0.0  ;;  %v3475_v59 = vmul.f32 0.01, %v3405_v29  ;;  %13819 = vmatmul.mubr.msk.bf16.gmra.mrb[4].mxu1 %vm93_vm0, %v3887_v32 }
 0x363   :  { %v3509_v39 = vsel %vm3439_vm9, %v3404_v44, %v3474_v47  ;;  %v3507_v23 = vsel %vm3437_vm10, %v3402_v50, %v3472_v12  ;;  %vm3438_vm12 = vcmp.ge.f32.partialorder %v3403_v53, 0.0  ;;  %v3473_v22 = vmul.f32 0.01, %v3403_v53  ;;  %13822 = vmatprep.mubr.msk.bf16.mxu1 %vm15736_vm2, %v20392_v62  ;;  %v3683_v12 = vpop.permute.xlu1 %3682 }
 0x364   :  { %v3754_v57 = vmul.f32 %v17020_v7, %v3509_v39  ;;  %14187 = vmatmul.mubr.msk.bf16.vlgmr.msra.gmra.mrb[68].mxu0 %vm93_vm0, %v5443_v60  ;;  %v3752_v4 = vmul.f32 %v17007_v56, %v3507_v23  ;;  %v3510_v30 = vsel %vm3440_vm11, %v3405_v29, %v3475_v59  ;;  %v3863_v23 = vld [vmem:[#allocation3 + $0x40] sm:$0xff] }
 0x365   :  { %14190 = vmatprep.mubr.msk.bf16.mxu0 %vm15736_vm2, %v20392_v62  ;;  %14309 = vmatpush3.bf16.msra.mxu0 %v6059_v13  ;;  %v3755_v6 = vmul.f32 %v17026_v52, %v3510_v30  ;;  %v3508_v7 = vsel %vm3438_vm12, %v3403_v53, %v3473_v22  ;;  %v13794_v55 = vpop.f32.mrb[16].mxu0  ;;  %v17103_v51 = vld [vmem:[#allocation3 + $0x42] sm:$0xff]  ;;  %v17115_v52 = vld [vmem:[#allocation3 + $0x3a] sm:$0xff] }
 0x366   :  { %3789 = vst.msk [vmem:[#allocation3 + $0x78] sm:$0xff] %vm93_vm0, %v3754_v57  ;;  %14424 = vmatprep.subr.bf16.mxu0 %v20392_v62  ;;  %3787 = vst.msk [vmem:[#allocation3 + $0x68] sm:$0xff] %vm93_vm0, %v3752_v4  ;;  %v3753_v56 = vmul.f32 %v17013_v31, %v3508_v7  ;;  %v3408_v58 = vadd.f32 %v13794_v55, %v17001_v61  ;;  %v3273_v14 = vpop.f32.mrb[17].mxu0  ;;  %v17113_v34 = vld [vmem:[#allocation3 + $0x46] sm:$0xff]  ;;  %v17121_v17 = vpack.c.bf16 %v17103_v51, %v17115_v52  ;;  %v17133_v11 = vld [vmem:[#allocation3 + $0x5e] sm:$0xff] }
 0x367   :  { %3790 = vst.msk [vmem:[#allocation3 + $0x80] sm:$0xff] %vm93_vm0, %v3755_v6  ;;  %v3406_v18 = vadd.f32 %v17001_v61, %v3273_v14  ;;  %v13795_v19 = vpop.f32.mrb[18].mxu0  ;;  %v5444_v27 = vpack.c.bf16 %v17113_v34, %v17092_v24  ;;  %v17131_v44 = vld [vmem:[#allocation3 + $0x4e] sm:$0xff]  ;;  %v17136_v16 = vld [vmem:[#allocation3 + $0x56] sm:$0xff]  ;;  %v17163_v6 = vpop.permute.xlu0 %3687 }
 0x368   :  { %3788 = vst.msk [vmem:[#allocation3 + $0x70] sm:$0xff] %vm93_vm0, %v3753_v56  ;;  %vm3443_vm13 = vcmp.ge.f32.partialorder %v3408_v58, 0.0  ;;  %v3478_v31 = vmul.f32 0.01, %v3408_v58  ;;  %v3409_v0 = vadd.f32 %v13795_v19, %v17001_v61  ;;  %v3276_v26 = vpop.f32.mrb[19].mxu0  ;;  %v17138_v32 = vld [vmem:[#allocation3 + $0x4a] sm:$0xff] }
 0x369   :  { %vm3441_vm14 = vcmp.ge.f32.partialorder %v3406_v18, 0.0  ;;  %v3476_v63 = vmul.f32 0.01, %v3406_v18  ;;  %v3407_v33 = vadd.f32 %v17001_v61, %v3276_v26  ;;  %v17140_v13 = vld [vmem:[#allocation3 + $0x52] sm:$0xff]  ;;  %v17153_v22 = vld [vmem:[#allocation3 + $0x5a] sm:$0xff]  ;;  %v5445_v26 = vpack.c.bf16 %v17136_v16, %v17131_v44 }
 0x36a   :  { %v3513_v1 = vsel %vm3443_vm13, %v3408_v58, %v3478_v31  ;;  %vm3444_vm15 = vcmp.ge.f32.partialorder %v3409_v0, 0.0  ;;  %v3479_v50 = vmul.f32 0.01, %v3409_v0  ;;  %13823 = vmatmul.mubr.msk.bf16.gmra.mrb[8].mxu1 %vm93_vm0, %v3888_v28  ;;  %v17161_v30 = vpack.c.bf16 %v17140_v13, %v17138_v32 }
 0x36b   :  { %v3758_v47 = vmul.f32 %v17051_v54, %v3513_v1  ;;  %v3511_v29 = vsel %vm3441_vm14, %v3406_v18, %v3476_v63  ;;  %vm3442_vm3 = vcmp.ge.f32.partialorder %v3407_v33, 0.0  ;;  %v3477_v35 = vmul.f32 0.01, %v3407_v33  ;;  %13826 = vmatprep.mubr.msk.bf16.mxu1 %vm15736_vm2, %v20392_v62  ;;  %v17182_v63 = vpop.permute.xlu1 %3692 }
 0x36c   :  { %14191 = vmatmul.mubr.msk.bf16.gmra.mrb[72].mxu0 %vm93_vm0, %v5444_v27  ;;  %v3756_v53 = vmul.f32 %v17034_v2, %v3511_v29  ;;  %v3514_v60 = vsel %vm3444_vm15, %v3409_v0, %v3479_v50 }
 0x36d   :  { %14194 = vmatprep.mubr.msk.bf16.mxu0 %vm15736_vm2, %v20392_v62  ;;  %3793 = vst.msk [vmem:[#allocation3 + $0x98] sm:$0xff] %vm93_vm0, %v3758_v47  ;;  %v3759_v54 = vmul.f32 %v17080_v38, %v3514_v60  ;;  %v3512_v59 = vsel %vm3442_vm3, %v3407_v33, %v3477_v35  ;;  %v13798_v57 = vpop.f32.mrb[20].mxu0  ;;  %v17155_v4 = vld [vmem:[#allocation3 + $0x62] sm:$0xff]  ;;  %v3698_v60 = vpop.permute.xlu0 %3697 }
 0x36e   :  { %3791 = vst.msk [vmem:[#allocation3 + $0x88] sm:$0xff] %vm93_vm0, %v3756_v53  ;;  %v3757_v38 = vmul.f32 %v17045_v8, %v3512_v59  ;;  %v3412_v7 = vadd.f32 %v13798_v57, %v17001_v61  ;;  %v3289_v55 = vpop.f32.mrb[21].mxu0  ;;  %v17170_v56 = vpack.c.bf16 %v17155_v4, %v17153_v22  ;;  %v3889_v8 = vpack.c.bf16 %v3863_v23, %v17064_v9  ;;  %v17193_v53 = vld [vmem:[#allocation3 + $0x66] sm:$0xff] }
 0x36f   :  { %3794 = vst.msk [vmem:[#allocation3 + $0xa0] sm:$0xff] %vm93_vm0, %v3759_v54  ;;  %v3410_v58 = vadd.f32 %v17001_v61, %v3289_v55  ;;  %v13799_v14 = vpop.f32.mrb[22].mxu0  ;;  %v17180_v28 = vld [vmem:[#allocation3 + $0x6e] sm:$0xff]  ;;  %v17195_v54 = vld [vmem:[#allocation3 + $0x7e] sm:$0xff] }
 0x370   :  { %3792 = vst.msk [vmem:[#allocation3 + $0x90] sm:$0xff] %vm93_vm0, %v3757_v38  ;;  %vm3447_vm4 = vcmp.ge.f32.partialorder %v3412_v7, 0.0  ;;  %v3482_v18 = vmul.f32 0.01, %v3412_v7  ;;  %v3413_v19 = vadd.f32 %v13799_v14, %v17001_v61  ;;  %v3292_v20 = vpop.f32.mrb[23].mxu0  ;;  %v17185_v1 = vld [vmem:[#allocation3 + $0x6a] sm:$0xff] }
 0x371   :  { %vm3445_vm5 = vcmp.ge.f32.partialorder %v3410_v58, 0.0  ;;  %v3480_v31 = vmul.f32 0.01, %v3410_v58  ;;  %v3411_v0 = vadd.f32 %v17001_v61, %v3292_v20  ;;  %v17187_v50 = vld [vmem:[#allocation3 + $0x72] sm:$0xff]  ;;  %v17205_v14 = vld [vmem:[#allocation3 + $0x7a] sm:$0xff] }
 0x372   :  { %v3517_v33 = vsel %vm3447_vm4, %v3412_v7, %v3482_v18  ;;  %vm3448_vm6 = vcmp.ge.f32.partialorder %v3413_v19, 0.0  ;;  %v3483_v27 = vmul.f32 0.01, %v3413_v19  ;;  %13827 = vmatmul.mubr.msk.bf16.gmra.mrb[12].mxu1 %vm93_vm0, %v3889_v8 }
 0x373   :  { %v3762_v47 = vmul.f32 %v17123_v25, %v3517_v33  ;;  %v3515_v29 = vsel %vm3445_vm5, %v3410_v58, %v3480_v31  ;;  %vm3446_vm7 = vcmp.ge.f32.partialorder %v3411_v0, 0.0  ;;  %v3481_v35 = vmul.f32 0.01, %v3411_v0  ;;  %13830 = vmatprep.mubr.msk.bf16.mxu1 %vm15736_vm2, %v20392_v62  ;;  %v3865_v25 = vld [vmem:[#allocation3 + $0x50] sm:$0xff]  ;;  %v3864_v33 = vld [vmem:[#allocation3 + $0x48] sm:$0xff] }
 0x374   :  { %14195 = vmatmul.mubr.msk.bf16.gmra.mrb[76].mxu0 %vm93_vm0, %v5445_v26  ;;  %v3760_v59 = vmul.f32 %v17089_v10, %v3515_v29  ;;  %v3518_v57 = vsel %vm3448_vm6, %v3413_v19, %v3483_v27  ;;  %v17211_v10 = vpack.c.bf16 %v17187_v50, %v17185_v1  ;;  %v3703_v27 = vpop.permute.xlu1 %3702  ;;  %vm132_vm6 = vcmask 130048  }
 0x375   :  { %14198 = vmatprep.mubr.msk.bf16.mxu0 %vm15736_vm2, %v20392_v62  ;;  %v17202_v38 = vld [vmem:[#allocation3 + $0x86] sm:$0xff]  ;;  %3797 = vst.msk [vmem:[#allocation3 + $0xb8] sm:$0xff] %vm93_vm0, %v3762_v47  ;;  %v3763_v7 = vmul.f32 %v3683_v12, %v3518_v57  ;;  %v3516_v55 = vsel %vm3446_vm7, %v3411_v0, %v3481_v35  ;;  %v13802_v58 = vpop.f32.mrb[24].mxu0  ;;  %v3890_v35 = vpack.c.bf16 %v3865_v25, %v3864_v33 }
 0x376   :  { %v17207_v18 = vld [vmem:[#allocation3 + $0x82] sm:$0xff]  ;;  %3795 = vst.msk [vmem:[#allocation3 + $0xa8] sm:$0xff] %vm93_vm0, %v3760_v59  ;;  %v3761_v20 = vmul.f32 %v17108_v49, %v3516_v55  ;;  %v3416_v8 = vadd.f32 %v13802_v58, %v17001_v61  ;;  %v3305_v12 = vpop.f32.mrb[25].mxu0  ;;  %v3708_v55 = vpop.permute.xlu0 %3707 }
 0x377   :  { %v17220_v31 = vpack.c.bf16 %v17207_v18, %v17205_v14  ;;  %3798 = vst.msk [vmem:[#allocation3 + $0xc0] sm:$0xff] %vm93_vm0, %v3763_v7  ;;  %v3414_v0 = vadd.f32 %v17001_v61, %v3305_v12  ;;  %v13803_v26 = vpop.f32.mrb[26].mxu0  ;;  %v5446_v7 = vpack.c.bf16 %v17193_v53, %v17133_v11  ;;  %v17232_v45 = vld [vmem:[#allocation3 + $0x92] sm:$0xff] }
 0x378   :  { %3796 = vst.msk [vmem:[#allocation3 + $0xb0] sm:$0xff] %vm93_vm0, %v3761_v20  ;;  %vm3451_vm8 = vcmp.ge.f32.partialorder %v3416_v8, 0.0  ;;  %v3486_v47 = vmul.f32 0.01, %v3416_v8  ;;  %v3417_v49 = vadd.f32 %v13803_v26, %v17001_v61  ;;  %v3308_v29 = vpop.f32.mrb[27].mxu0  ;;  %v17230_v20 = vld [vmem:[#allocation3 + $0x8a] sm:$0xff] }
 0x379   :  { %vm3449_vm9 = vcmp.ge.f32.partialorder %v3414_v0, 0.0  ;;  %v3484_v59 = vmul.f32 0.01, %v3414_v0  ;;  %v3415_v57 = vadd.f32 %v17001_v61, %v3308_v29  ;;  %134 = vst.msk [vmem:[#allocation4 + $0x8] sm:$0xff] %vm132_vm6, %v20392_v62  ;;  %133 = vst.msk [vmem:[#allocation4] sm:$0xff] %vm132_vm6, %v20392_v62 }
 0x37a   :  { %v3521_v58 = vsel %vm3451_vm8, %v3416_v8, %v3486_v47  ;;  %vm3452_vm10 = vcmp.ge.f32.partialorder %v3417_v49, 0.0  ;;  %v3487_v12 = vmul.f32 0.01, %v3417_v49  ;;  %13831 = vmatmul.mubr.msk.bf16.gmra.mrb[16].mxu1 %vm93_vm0, %v3890_v35  ;;  %135 = vst.msk [vmem:[#allocation4 + $0x10] sm:$0xff] %vm132_vm6, %v20392_v62  ;;  %136 = vst.msk [vmem:[#allocation4 + $0x18] sm:$0xff] %vm132_vm6, %v20392_v62 }
 0x37b   :  { %v3766_v26 = vmul.f32 %v3698_v60, %v3521_v58  ;;  %v3519_v19 = vsel %vm3449_vm9, %v3414_v0, %v3484_v59  ;;  %vm3450_vm11 = vcmp.ge.f32.partialorder %v3415_v57, 0.0  ;;  %v3485_v25 = vmul.f32 0.01, %v3415_v57  ;;  %13834 = vmatprep.mubr.msk.bf16.mxu1 %vm15736_vm2, %v20392_v62  ;;  %v3867_v60 = vld [vmem:[#allocation3 + $0x60] sm:$0xff]  ;;  %v3713_v58 = vpop.permute.xlu1 %3712  ;;  %137 = vst.msk [vmem:[#allocation4 + $0x20] sm:$0xff] %vm132_vm6, %v20392_v62  ;;  %138 = vst.msk [vmem:[#allocation4 + $0x28] sm:$0xff] %vm132_vm6, %v20392_v62 }
 0x37c   :  { %14199 = vmatmul.mubr.msk.bf16.gmra.mrb[80].mxu0 %vm93_vm0, %v5446_v7  ;;  %v3764_v33 = vmul.f32 %v17163_v6, %v3519_v19  ;;  %v3522_v8 = vsel %vm3452_vm10, %v3417_v49, %v3487_v12  ;;  %v17241_v0 = vld [vmem:[#allocation3 + $0x9a] sm:$0xff]  ;;  %v17247_v7 = vpack.c.bf16 %v17232_v45, %v17230_v20  ;;  %139 = vst.msk [vmem:[#allocation4 + $0x30] sm:$0xff] %vm132_vm6, %v20392_v62  ;;  %140 = vst.msk [vmem:[#allocation4 + $0x38] sm:$0xff] %vm132_vm6, %v20392_v62 }
 0x37d   :  { %14202 = vmatprep.mubr.msk.bf16.mxu0 %vm15736_vm2, %v20392_v62  ;;  %3801 = vst.msk [vmem:[#allocation3 + $0xd8] sm:$0xff] %vm93_vm0, %v3766_v26  ;;  %v3767_v47 = vmul.f32 %v3703_v27, %v3522_v8  ;;  %v3520_v29 = vsel %vm3450_vm11, %v3415_v57, %v3485_v25  ;;  %v13806_v35 = vpop.f32.mrb[28].mxu0  ;;  %v17243_v59 = vld [vmem:[#allocation3 + $0xa2] sm:$0xff]  ;;  %v17252_v27 = vld [vmem:[#allocation3 + $0x76] sm:$0xff]  ;;  %v3718_v8 = vpop.permute.xlu0 %3717 }
 0x37e   :  { %3799 = vst.msk [vmem:[#allocation3 + $0xc8] sm:$0xff] %vm93_vm0, %v3764_v33  ;;  %v3765_v6 = vmul.f32 %v17182_v63, %v3520_v29  ;;  %v3420_v19 = vadd.f32 %v13806_v35, %v17001_v61  ;;  %v3321_v49 = vpop.f32.mrb[29].mxu0  ;;  %v17256_v57 = vpack.c.bf16 %v17243_v59, %v17241_v0  ;;  %v3866_v25 = vld [vmem:[#allocation3 + $0x58] sm:$0xff] }
 0x37f   :  { %3802 = vst.msk [vmem:[#allocation3 + $0xe0] sm:$0xff] %vm93_vm0, %v3767_v47  ;;  %v3418_v12 = vadd.f32 %v17001_v61, %v3321_v49  ;;  %v13807_v26 = vpop.f32.mrb[30].mxu0  ;;  %v3891_v35 = vpack.c.bf16 %v3867_v60, %v3866_v25  ;;  %v5447_v47 = vpack.c.bf16 %v17252_v27, %v17180_v28  ;;  %v17266_v39 = vld [vmem:[#allocation3 + $0xaa] sm:$0xff]  ;;  %v3723_v25 = vpop.permute.xlu1 %3722 }
 0x380   :  { %3800 = vst.msk [vmem:[#allocation3 + $0xd0] sm:$0xff] %vm93_vm0, %v3765_v6  ;;  %vm3455_vm12 = vcmp.ge.f32.partialorder %v3420_v19, 0.0  ;;  %v3490_v63 = vmul.f32 0.01, %v3420_v19  ;;  %v3421_v33 = vadd.f32 %v13807_v26, %v17001_v61  ;;  %v3324_v29 = vpop.f32.mrb[31].mxu0  ;;  %v17268_v6 = vld [vmem:[#allocation3 + $0xb2] sm:$0xff] }
 0x381   :  { %vm3453_vm13 = vcmp.ge.f32.partialorder %v3418_v12, 0.0  ;;  %v3488_v15 = vmul.f32 0.01, %v3418_v12  ;;  %v3419_v23 = vadd.f32 %v17001_v61, %v3324_v29  ;;  %141 = vst.msk [vmem:[#allocation4 + $0x40] sm:$0xff] %vm132_vm6, %v20392_v62  ;;  %142 = vst.msk [vmem:[#allocation4 + $0x48] sm:$0xff] %vm132_vm6, %v20392_v62 }
 0x382   :  { %v3525_v2 = vsel %vm3455_vm12, %v3420_v19, %v3490_v63  ;;  %vm3456_vm14 = vcmp.ge.f32.partialorder %v3421_v33, 0.0  ;;  %v3491_v49 = vmul.f32 0.01, %v3421_v33  ;;  %13835 = vmatmul.mubr.msk.bf16.gmra.mrb[20].mxu1 %vm93_vm0, %v3891_v35  ;;  %143 = vst.msk [vmem:[#allocation4 + $0x50] sm:$0xff] %vm132_vm6, %v20392_v62  ;;  %144 = vst.msk [vmem:[#allocation4 + $0x58] sm:$0xff] %vm132_vm6, %v20392_v62 }
 0x383   :  { %v3770_v42 = vmul.f32 %v3718_v8, %v3525_v2  ;;  %v3523_v26 = vsel %vm3453_vm13, %v3418_v12, %v3488_v15  ;;  %vm3454_vm15 = vcmp.ge.f32.partialorder %v3419_v23, 0.0  ;;  %v3489_v60 = vmul.f32 0.01, %v3419_v23  ;;  %13838 = vmatprep.mubr.msk.bf16.mxu1 %vm15736_vm2, %v20392_v62  ;;  %v3869_v2 = vld [vmem:[#allocation3 + $0x70] sm:$0xff]  ;;  %v17276_v15 = vld [vmem:[#allocation3 + $0xba] sm:$0xff]  ;;  %145 = vst.msk [vmem:[#allocation4 + $0x60] sm:$0xff] %vm132_vm6, %v20392_v62 }
 0x384   :  { %14203 = vmatmul.mubr.msk.bf16.gmra.mrb[84].mxu0 %vm93_vm0, %v5447_v47  ;;  %v3768_v29 = vmul.f32 %v3708_v55, %v3523_v26  ;;  %v3526_v19 = vsel %vm3456_vm14, %v3421_v33, %v3491_v49  ;;  %v17282_v8 = vpack.c.bf16 %v17268_v6, %v17266_v39  ;;  %v3728_v47 = vpop.permute.xlu0 %3727  ;;  %146 = vst.msk [vmem:[#allocation4 + $0x68] sm:$0xff] %vm132_vm6, %v20392_v62  ;;  %147 = vst.msk [vmem:[#allocation4 + $0x70] sm:$0xff] %vm132_vm6, %v20392_v62 }
 0x385   :  { %14310 = vmatprep.mubr.msk.bf16.mxu0 %vm15736_vm2, %v20392_v62  ;;  %3805 = vst.msk [vmem:[#allocation3 + $0xf8] sm:$0xff] %vm93_vm0, %v3770_v42  ;;  %v3771_v63 = vmul.f32 %v3723_v25, %v3526_v19  ;;  %v3524_v35 = vsel %vm3454_vm15, %v3419_v23, %v3489_v60  ;;  %v13810_v43 = vpop.f32.mrb[64].mxu0  ;;  %v17278_v12 = vld [vmem:[#allocation3 + $0xc2] sm:$0xff]  ;;  %v17286_v42 = vld [vmem:[#allocation3 + $0x32] sm:$0xff] }
 0x386   :  { %3803 = vst.msk [vmem:[#allocation3 + $0xe8] sm:$0xff] %vm93_vm0, %v3768_v29  ;;  %v3769_v55 = vmul.f32 %v3713_v58, %v3524_v35  ;;  %v3385_v33 = vadd.f32 %v13810_v43, %v16991_v3  ;;  %v3337_v49 = vpop.f32.mrb[65].mxu0  ;;  %v17290_v23 = vpack.c.bf16 %v17278_v12, %v17276_v15  ;;  %v3868_v25 = vld [vmem:[#allocation3 + $0x68] sm:$0xff] }
 0x387   :  { %3806 = vst.msk [vmem:[#allocation3 + $0x100] sm:$0xff] %vm93_vm0, %v3771_v63  ;;  %v3383_v26 = vadd.f32 %v3337_v49, %v16994_v46  ;;  %v13811_v60 = vpop.f32.mrb[66].mxu0  ;;  %v17294_v19 = vld [vmem:[#allocation3 + $0xca] sm:$0xff]  ;;  %v17296_v36 = vld [vmem:[#allocation3 + $0xd2] sm:$0xff]  ;;  %v3892_v58 = vpack.c.bf16 %v3869_v2, %v3868_v25  ;;  %v5997_v63 = vpack.c.bf16 %v17115_v52, %v17286_v42  ;;  %v3871_v25 = vld [vmem:[#allocation3 + $0x80] sm:$0xff] }
 0x388   :  { %3804 = vst.msk [vmem:[#allocation3 + $0xf0] sm:$0xff] %vm93_vm0, %v3769_v55  ;;  %v3424_v43 = vadd.f32 %v17001_v61, %v3385_v33  ;;  %v3340_v3 = vpop.f32.mrb[67].mxu0  ;;  %v17307_v49 = vpack.c.bf16 %v17296_v36, %v17294_v19 }
 0x389   :  { %v3422_v29 = vadd.f32 %v17001_v61, %v3383_v26  ;;  %v3384_v35 = vadd.f32 %v3340_v3, %v16999_v41  ;;  %v3738_v41 = vpop.permute.xlu0 %3737  ;;  %v17315_v3 = vld [vmem:[#allocation3 + $0xda] sm:$0xff]  ;;  %148 = vst.msk [vmem:[#allocation4 + $0x78] sm:$0xff] %vm132_vm6, %v20392_v62  ;;  %149 = vst.msk [vmem:[#allocation4 + $0x80] sm:$0xff] %vm132_vm6, %v20392_v62 }
 0x38a   :  { %vm3459_vm3 = vcmp.ge.f32.partialorder %v3424_v43, 0.0  ;;  %v3494_v46 = vmul.f32 0.01, %v3424_v43  ;;  %13839 = vmatmul.mubr.msk.bf16.gmra.mrb[24].mxu1 %vm93_vm0, %v3892_v58  ;;  %150 = vst.msk [vmem:[#allocation4 + $0x88] sm:$0xff] %vm132_vm6, %v20392_v62  ;;  %151 = vst.msk [vmem:[#allocation4 + $0x90] sm:$0xff] %vm132_vm6, %v20392_v62 }
 0x38b   :  { %vm3457_vm4 = vcmp.ge.f32.partialorder %v3422_v29, 0.0  ;;  %v3492_v55 = vmul.f32 0.01, %v3422_v29  ;;  %v3423_v33 = vadd.f32 %v17001_v61, %v3384_v35  ;;  %13842 = vmatprep.mubr.msk.bf16.mxu1 %vm15736_vm2, %v20392_v62  ;;  %152 = vst.msk [vmem:[#allocation4 + $0x98] sm:$0xff] %vm132_vm6, %v20392_v62  ;;  %153 = vst.msk [vmem:[#allocation4 + $0xa0] sm:$0xff] %vm132_vm6, %v20392_v62 }
 0x38c   :  { %14311 = vmatmul.mubr.msk.bf16.vlgmr.msra.gmra.mrb[88].mxu0 %vm93_vm0, %v5997_v63  ;;  %v3529_v2 = vsel %vm3459_vm3, %v3424_v43, %v3494_v46  ;;  %v3733_v63 = vpop.permute.xlu1 %3732  ;;  %v3870_v46 = vld [vmem:[#allocation3 + $0x78] sm:$0xff]  ;;  %154 = vst.msk [vmem:[#allocation4 + $0xa8] sm:$0xff] %vm132_vm6, %v20392_v62  ;;  %155 = vst.msk [vmem:[#allocation4 + $0xb0] sm:$0xff] %vm132_vm6, %v20392_v62  ;;  %vm164_vm3 = vcmask 128000  }
 0x38d   :  { %14314 = vmatprep.mubr.msk.bf16.mxu0 %vm15736_vm2, %v20392_v62  ;;  %v3774_v52 = vmul.f32 %v3738_v41, %v3529_v2  ;;  %v3527_v26 = vsel %vm3457_vm4, %v3422_v29, %v3492_v55  ;;  %vm3458_vm5 = vcmp.ge.f32.partialorder %v3423_v33, 0.0  ;;  %v3493_v60 = vmul.f32 0.01, %v3423_v33  ;;  %v17317_v58 = vld [vmem:[#allocation3 + $0xe2] sm:$0xff]  ;;  %156 = vst.msk [vmem:[#allocation4 + $0xb8] sm:$0xff] %vm132_vm6, %v20392_v62  ;;  %157 = vst.msk [vmem:[#allocation4 + $0xc0] sm:$0xff] %vm132_vm6, %v20392_v62 }
 0x38e   :  { %v3772_v61 = vmul.f32 %v3728_v47, %v3527_v26  ;;  %v17321_v35 = vpack.c.bf16 %v17317_v58, %v17315_v3  ;;  %v3893_v41 = vpack.c.bf16 %v3871_v25, %v3870_v46  ;;  %v5998_v47 = vpack.c.bf16 %v17138_v32, %v17103_v51  ;;  %v17342_v26 = vld [vmem:[#allocation3 + $0xfa] sm:$0xff]  ;;  %158 = vst.msk [vmem:[#allocation4 + $0xc8] sm:$0xff] %vm132_vm6, %v20392_v62 }
 0x38f   :  { %3809 = vst.msk [vmem:[#allocation3 + $0x118] sm:$0xff] %vm93_vm0, %v3774_v52  ;;  %v3528_v43 = vsel %vm3458_vm5, %v3423_v33, %v3493_v60  ;;  %v17324_v9 = vld [vmem:[#allocation3 + $0xea] sm:$0xff]  ;;  %v17326_v29 = vld [vmem:[#allocation3 + $0xf2] sm:$0xff]  ;;  %v5999_v25 = vpack.c.bf16 %v17153_v22, %v17140_v13  ;;  %v6000_v46 = vpack.c.bf16 %v17185_v1, %v17155_v4  ;;  %v3879_v4 = vld [vmem:[#allocation3 + $0xc0] sm:$0xff] }
 0x390   :  { %3807 = vst.msk [vmem:[#allocation3 + $0x108] sm:$0xff] %vm93_vm0, %v3772_v61  ;;  %v3773_v55 = vmul.f32 %v3733_v63, %v3528_v43  ;;  %v17333_v2 = vpack.c.bf16 %v17326_v29, %v17324_v9  ;;  %v3873_v33 = vld [vmem:[#allocation3 + $0x90] sm:$0xff]  ;;  %v3872_v52 = vld [vmem:[#allocation3 + $0x88] sm:$0xff]  ;;  %v3875_v61 = vld [vmem:[#allocation3 + $0xa0] sm:$0xff] }
 0x391   :  { %v3894_v32 = vpack.c.bf16 %v3873_v33, %v3872_v52  ;;  %v3874_v63 = vld [vmem:[#allocation3 + $0x98] sm:$0xff]  ;;  %v3877_v13 = vld [vmem:[#allocation3 + $0xb0] sm:$0xff]  ;;  %v3876_v22 = vld [vmem:[#allocation3 + $0xa8] sm:$0xff]  ;;  %v6002_v33 = vpack.c.bf16 %v17230_v20, %v17207_v18  ;;  %159 = vst.msk [vmem:[#allocation4 + $0xd0] sm:$0xff] %vm132_vm6, %v20392_v62 }
 0x392   :  { %3808 = vst.msk [vmem:[#allocation3 + $0x110] sm:$0xff] %vm93_vm0, %v3773_v55  ;;  %13843 = vmatmul.mubr.msk.bf16.gmra.mrb[28].mxu1 %vm93_vm0, %v3893_v41  ;;  %v3895_v43 = vpack.c.bf16 %v3875_v61, %v3874_v63  ;;  %v3896_v55 = vpack.c.bf16 %v3877_v13, %v3876_v22  ;;  %v6001_v41 = vpack.c.bf16 %v17205_v14, %v17187_v50  ;;  %v3878_v1 = vld [vmem:[#allocation3 + $0xb8] sm:$0xff]  ;;  %v3881_v50 = vld [vmem:[#allocation3 + $0xd0] sm:$0xff]  ;;  %v3880_v14 = vld [vmem:[#allocation3 + $0xc8] sm:$0xff] }
 0x393   :  { %13846 = vmatprep.mubr.msk.bf16.mxu1 %vm15736_vm2, %v20392_v62  ;;  %v3898_v52 = vpack.c.bf16 %v3881_v50, %v3880_v14  ;;  %v3883_v18 = vld [vmem:[#allocation3 + $0xe0] sm:$0xff]  ;;  %v3882_v20 = vld [vmem:[#allocation3 + $0xd8] sm:$0xff]  ;;  %v6004_v61 = vpack.c.bf16 %v17266_v39, %v17243_v59  ;;  %v3811_v39 = vld [vmem:[#allocation3 + $0xe] sm:$0xff]  ;;  %160 = vst.msk [vmem:[#allocation4 + $0xd8] sm:$0xff] %vm132_vm6, %v20392_v62 }
 0x394   :  { %14315 = vmatmul.mubr.msk.bf16.gmra.mrb[92].mxu0 %vm93_vm0, %v5998_v47  ;;  %v3897_v47 = vpack.c.bf16 %v3879_v4, %v3878_v1  ;;  %v4350_v59 = vld [vmem:[%s20371_s5 + $0x8] sm:$0xf]  ;;  %v20398_v4 = vpack.c.bf16 %v17133_v11, %v17136_v16  ;;  %v3827_v11 = vld [vmem:[#allocation3 + $0x8e] sm:$0xff]  ;;  %v3833_v14 = vld [vmem:[#allocation3 + $0xbe] sm:$0xff]  ;;  %161 = vst.msk [vmem:[#allocation4 + $0xe0] sm:$0xff] %vm132_vm6, %v20392_v62 }
 0x395   :  { %14318 = vmatprep.mubr.msk.bf16.mxu0 %vm15736_vm2, %v20392_v62  ;;  %v4397_v22 = vsel %vm3947_vm1, %v4350_v59, 0  ;;  %v3848_v16 = vpack.c.bf16 %v3827_v11, %v17202_v38  ;;  %v3832_v50 = vld [vmem:[#allocation3 + $0xb6] sm:$0xff]  ;;  %162 = vst.msk [vmem:[#allocation4 + $0xe8] sm:$0xff] %vm132_vm6, %v20392_v62  ;;  %163 = vst.msk [vmem:[#allocation4 + $0xf0] sm:$0xff] %vm132_vm6, %v20392_v62 }
 0x396   :  { %v4306_v11 = vld [vmem:[#allocation3 + $0x12] sm:$0xff]  ;;  %165 = vst.msk [vmem:[#allocation4 + $0xf8] sm:$0x3f] %vm164_vm3, %v20392_v62 }
 0x397   :  { %v17344_v51 = vld [vmem:[#allocation3 + $0x102] sm:$0xff] }
 0x39a   :  { %13847 = vmatmul.mubr.msk.bf16.gmra.mrb[32].mxu1 %vm93_vm0, %v3894_v32  ;;  %v6003_v32 = vpack.c.bf16 %v17241_v0, %v17232_v45  ;;  %v3885_v45 = vld [vmem:[#allocation3 + $0xf0] sm:$0xff]  ;;  %v3884_v0 = vld [vmem:[#allocation3 + $0xe8] sm:$0xff] }
 0x39b   :  { %13850 = vmatprep.mubr.msk.bf16.mxu1 %vm15736_vm2, %v20392_v62  ;;  %v3900_v63 = vpack.c.bf16 %v3885_v45, %v3884_v0 }
 0x39c   :  { %14319 = vmatmul.mubr.msk.bf16.gmra.mrb[96].mxu0 %vm93_vm0, %v5999_v25  ;;  %v3899_v25 = vpack.c.bf16 %v3883_v18, %v3882_v20  ;;  %v3835_v18 = vld [vmem:[#allocation3 + $0xce] sm:$0xff] }
 0x39d   :  { %14322 = vmatprep.mubr.msk.bf16.mxu0 %vm15736_vm2, %v20392_v62 }
 0x3a2   :  { %13851 = vmatmul.mubr.msk.bf16.gmra.mrb[36].mxu1 %vm93_vm0, %v3895_v43  ;;  %v6005_v43 = vpack.c.bf16 %v17276_v15, %v17268_v6  ;;  %v6006_v6 = vpack.c.bf16 %v17294_v19, %v17278_v12  ;;  %v3812_v15 = vld [vmem:[#allocation3 + $0x16] sm:$0xff]  ;;  %v3842_v12 = vpack.c.bf16 %v17075_v21, %v17060_v40  ;;  %v6008_v19 = vpack.c.bf16 %v17324_v9, %v17317_v58  ;;  %v5994_v9 = vld [vmem:[#allocation3 + $0x10a] sm:$0xff] }
 0x3a3   :  { %13854 = vmatprep.mubr.msk.bf16.mxu1 %vm15736_vm2, %v20392_v62  ;;  %v6010_v21 = vpack.c.bf16 %v5994_v9, %v17344_v51  ;;  %v20397_v58 = vpack.c.bf16 %v17131_v44, %v17113_v34  ;;  %v20399_v34 = vpack.c.bf16 %v17180_v28, %v17193_v53  ;;  %v3847_v44 = vpack.c.bf16 %v17195_v54, %v17252_v27  ;;  %v3828_v28 = vld [vmem:[#allocation3 + $0x96] sm:$0xff]  ;;  %v3829_v53 = vld [vmem:[#allocation3 + $0x9e] sm:$0xff]  ;;  %v3831_v27 = vld [vmem:[#allocation3 + $0xae] sm:$0xff] }
 0x3a4   :  { %14323 = vmatmul.mubr.msk.bf16.gmra.mrb[100].mxu0 %vm93_vm0, %v6000_v46  ;;  %v3810_v46 = vld [vmem:[#allocation3 + $0x6] sm:$0xff]  ;;  %v3849_v1 = vpack.c.bf16 %v3829_v53, %v3828_v28 }
 0x3a5   :  { %14326 = vmatprep.mubr.msk.bf16.mxu0 %vm15736_vm2, %v20392_v62  ;;  %v3840_v13 = vpack.c.bf16 %v3811_v39, %v3810_v46  ;;  %v3837_v39 = vld [vmem:[#allocation3 + $0xde] sm:$0xff] }
 0x3aa   :  { %13855 = vmatmul.mubr.msk.bf16.gmra.mrb[40].mxu1 %vm93_vm0, %v3896_v55  ;;  %v3841_v55 = vpack.c.bf16 %v17058_v48, %v3812_v15 }
 0x3ab   :  { %13858 = vmatprep.mubr.msk.bf16.mxu1 %vm15736_vm2, %v20392_v62 }
 0x3ac   :  { %14327 = vmatmul.mubr.msk.bf16.gmra.mrb[104].mxu0 %vm93_vm0, %v6001_v41  ;;  %v6007_v41 = vpack.c.bf16 %v17315_v3, %v17296_v36  ;;  %v6009_v36 = vpack.c.bf16 %v17342_v26, %v17326_v29  ;;  %v20396_v3 = vpack.c.bf16 %v17092_v24, %v17077_v5  ;;  %v5995_v5 = vld [vmem:[#allocation3 + $0x112] sm:$0xff]  ;;  %v5996_v24 = vld [vmem:[#allocation3 + $0x11a] sm:$0xff] }
 0x3ad   :  { %14330 = vmatprep.mubr.msk.bf16.mxu0 %vm15736_vm2, %v20392_v62  ;;  %v6011_v29 = vpack.c.bf16 %v5996_v24, %v5995_v5 }
 0x3b2   :  { %13859 = vmatmul.mubr.msk.bf16.gmra.mrb[44].mxu1 %vm93_vm0, %v3897_v47  ;;  %v3830_v47 = vld [vmem:[#allocation3 + $0xa6] sm:$0xff] }
 0x3b3   :  { %13862 = vmatprep.mubr.msk.bf16.mxu1 %vm15736_vm2, %v20392_v62 }
 0x3b4   :  { %14331 = vmatmul.mubr.msk.bf16.gmra.mrb[108].mxu0 %vm93_vm0, %v6002_v33  ;;  %v3850_v33 = vpack.c.bf16 %v3831_v27, %v3830_v47 }
 0x3b5   :  { %14334 = vmatprep.mubr.msk.bf16.mxu0 %vm15736_vm2, %v20392_v62 }
 0x3ba   :  { %13863 = vmatmul.mubr.msk.bf16.gmra.mrb[48].mxu1 %vm93_vm0, %v3898_v52  ;;  %v3851_v52 = vpack.c.bf16 %v3833_v14, %v3832_v50 }
 0x3bb   :  { %13866 = vmatprep.mubr.msk.bf16.mxu1 %vm15736_vm2, %v20392_v62 }
 0x3bc   :  { %14335 = vmatmul.mubr.msk.bf16.gmra.mrb[112].mxu0 %vm93_vm0, %v6003_v32 }
 0x3bd   :  { %14338 = vmatprep.mubr.msk.bf16.mxu0 %vm15736_vm2, %v20392_v62 }
 0x3c2   :  { %13867 = vmatmul.mubr.msk.bf16.gmra.mrb[52].mxu1 %vm93_vm0, %v3899_v25 }
 0x3c3   :  { %13870 = vmatprep.mubr.msk.bf16.mxu1 %vm15736_vm2, %v20392_v62 }
 0x3c4   :  { %14339 = vmatmul.mubr.msk.bf16.gmra.mrb[116].mxu0 %vm93_vm0, %v6004_v61  ;;  %v3834_v61 = vld [vmem:[#allocation3 + $0xc6] sm:$0xff] }
 0x3c5   :  { %14342 = vmatprep.mubr.msk.bf16.mxu0 %vm15736_vm2, %v20392_v62  ;;  %v3852_v0 = vpack.c.bf16 %v3835_v18, %v3834_v61 }
 0x3ca   :  { %13871 = vmatmul.mubr.msk.bf16.gmra.mrb[56].mxu1 %vm93_vm0, %v3900_v63 }
 0x3cb   :  { %13876 = vmatprep.mubr.msk.bf16.mxu1 %vm15736_vm2, %v20392_v62 }
 0x3cc   :  { %14343 = vmatmul.mubr.msk.bf16.gmra.mrb[120].mxu0 %vm93_vm0, %v6005_v43  ;;  %v3836_v43 = vld [vmem:[#allocation3 + $0xd6] sm:$0xff] }
 0x3cd   :  { %14346 = vmatprep.mubr.msk.bf16.mxu0 %vm15736_vm2, %v20392_v62 }
 0x3d2   :  { %13877 = vmatmul.mubr.msk.bf16.vlgmr.msra.gmra.mrb[60].mxu1 %vm93_vm0, %v3840_v13 }
 0x3d3   :  { %13937 = vmatpush3.bf16.msra.mxu1 %v4397_v22  ;;  %13880 = vmatprep.mubr.msk.bf16.mxu1 %vm15736_vm2, %v20392_v62 }
 0x3d4   :  { %14347 = vmatmul.mubr.msk.bf16.gmra.mrb[124].mxu0 %vm93_vm0, %v6006_v6  ;;  %13998 = vmatprep.subr.bf16.mxu1 %v20392_v62 }
 0x3d5   :  { %14350 = vmatprep.mubr.msk.bf16.mxu0 %vm15736_vm2, %v20392_v62 }
 0x3da   :  { %13881 = vmatmul.mubr.msk.bf16.gmra.mrb[64].mxu1 %vm93_vm0, %v3841_v55  ;;  %v3853_v55 = vpack.c.bf16 %v3837_v39, %v3836_v43  ;;  %v4307_v39 = vld [vmem:[#allocation3 + $0x1a] sm:$0xff] }
 0x3db   :  { %13884 = vmatprep.mubr.msk.bf16.mxu1 %vm15736_vm2, %v20392_v62 }
 0x3dc   :  { %14351 = vmatmul.mubr.msk.bf16.gmra.mrb[128].mxu0 %vm93_vm0, %v6007_v41 }
 0x3dd   :  { %14354 = vmatprep.mubr.msk.bf16.mxu0 %vm15736_vm2, %v20392_v62 }
 0x3e2   :  { %13885 = vmatmul.mubr.msk.bf16.gmra.mrb[68].mxu1 %vm93_vm0, %v3842_v12 }
 0x3e3   :  { %13888 = vmatprep.mubr.msk.bf16.mxu1 %vm15736_vm2, %v20392_v62 }
 0x3e4   :  { %14355 = vmatmul.mubr.msk.bf16.gmra.mrb[132].mxu0 %vm93_vm0, %v6008_v19  ;;  %v3839_v19 = vld [vmem:[#allocation3 + $0xee] sm:$0xff] }
 0x3e5   :  { %14358 = vmatprep.mubr.msk.bf16.mxu0 %vm15736_vm2, %v20392_v62 }
 0x3ea   :  { %13889 = vmatmul.mubr.msk.bf16.gmra.mrb[72].mxu1 %vm93_vm0, %v20396_v3 }
 0x3eb   :  { %13892 = vmatprep.mubr.msk.bf16.mxu1 %vm15736_vm2, %v20392_v62 }
 0x3ec   :  { %14359 = vmatmul.mubr.msk.bf16.gmra.mrb[136].mxu0 %vm93_vm0, %v6009_v36 }
 0x3ed   :  { %14362 = vmatprep.mubr.msk.bf16.mxu0 %vm15736_vm2, %v20392_v62 }
 0x3f2   :  { %13893 = vmatmul.mubr.msk.bf16.gmra.mrb[76].mxu1 %vm93_vm0, %v20397_v58  ;;  %v3838_v58 = vld [vmem:[#allocation3 + $0xe6] sm:$0xff] }
 0x3f3   :  { %13896 = vmatprep.mubr.msk.bf16.mxu1 %vm15736_vm2, %v20392_v62 }
 0x3f4   :  { %14363 = vmatmul.mubr.msk.bf16.gmra.mrb[140].mxu0 %vm93_vm0, %v6010_v21 }
 0x3f5   :  { %14366 = vmatprep.mubr.msk.bf16.mxu0 %vm15736_vm2, %v20392_v62 }
 0x3fa   :  { %13897 = vmatmul.mubr.msk.bf16.gmra.mrb[80].mxu1 %vm93_vm0, %v20398_v4 }
 0x3fb   :  { %13900 = vmatprep.mubr.msk.bf16.mxu1 %vm15736_vm2, %v20392_v62 }
 0x3fc   :  { %14367 = vmatmul.mubr.msk.bf16.gmra.mrb[144].mxu0 %vm93_vm0, %v6011_v29  ;;  %v3854_v29 = vpack.c.bf16 %v3839_v19, %v3838_v58  ;;  %v4309_v19 = vld [vmem:[#allocation3 + $0x2a] sm:$0xff] }
 0x3fd   :  { %14426 = vmatprep.mubr.msk.bf16.mxu0 %vm15736_vm2, %v20392_v62 }
 0x402   :  { %13901 = vmatmul.mubr.msk.bf16.gmra.mrb[84].mxu1 %vm93_vm0, %v20399_v34 }
 0x403   :  { %13904 = vmatprep.mubr.msk.bf16.mxu1 %vm15736_vm2, %v20392_v62 }
 0x40a   :  { %13905 = vmatmul.mubr.msk.bf16.gmra.mrb[88].mxu1 %vm93_vm0, %v3847_v44  ;;  %v4305_v44 = vld [vmem:[#allocation3 + $0xa] sm:$0xff] }
 0x40b   :  { %13908 = vmatprep.mubr.msk.bf16.mxu1 %vm15736_vm2, %v20392_v62  ;;  %v4335_v50 = vpack.c.bf16 %v4306_v11, %v4305_v44  ;;  %v17558_v44 = vpack.c.bf16 %v17286_v42, %v4309_v19 }
 0x412   :  { %13909 = vmatmul.mubr.msk.bf16.gmra.mrb[92].mxu1 %vm93_vm0, %v3848_v16  ;;  %v4627_v16 = vld [vmem:[%s20371_s5 + $0xc] sm:$0xf] }
 0x413   :  { %13912 = vmatprep.mubr.msk.bf16.mxu1 %vm15736_vm2, %v20392_v62  ;;  %v4674_v14 = vsel %vm3947_vm1, %v4627_v16, 0 }
 0x41a   :  { %13913 = vmatmul.mubr.msk.bf16.gmra.mrb[96].mxu1 %vm93_vm0, %v3849_v1 }
 0x41b   :  { %13916 = vmatprep.mubr.msk.bf16.mxu1 %vm15736_vm2, %v20392_v62 }
 0x422   :  { %13917 = vmatmul.mubr.msk.bf16.gmra.mrb[100].mxu1 %vm93_vm0, %v3850_v33 }
 0x423   :  { %13920 = vmatprep.mubr.msk.bf16.mxu1 %vm15736_vm2, %v20392_v62 }
 0x42a   :  { %13921 = vmatmul.mubr.msk.bf16.gmra.mrb[104].mxu1 %vm93_vm0, %v3851_v52 }
 0x42b   :  { %13924 = vmatprep.mubr.msk.bf16.mxu1 %vm15736_vm2, %v20392_v62 }
 0x42d   :  { %v17490_v32 = vpop.f32.mrb[0].mxu1 }
 0x42e   :  { %v13816_v20 = vpop.f32.mrb[1].mxu1 }
 0x42f   :  { %v17492_v25 = vpop.f32.mrb[2].mxu1  ;;  %v4308_v20 = vld [vmem:[#allocation3 + $0x22] sm:$0xff] }
 0x430   :  { %v13817_v45 = vpop.f32.mrb[3].mxu1 }
 0x432   :  { %13925 = vmatmul.mubr.msk.bf16.gmra.mrb[108].mxu1 %vm93_vm0, %v3852_v0 }
 0x433   :  { %13928 = vmatprep.mubr.msk.bf16.mxu1 %vm15736_vm2, %v20392_v62 }
 0x435   :  { %v17497_v63 = vpop.f32.mrb[4].mxu1 }
 0x436   :  { %v13820_v46 = vpop.f32.mrb[5].mxu1 }
 0x437   :  { %v17499_v59 = vpop.f32.mrb[68].mxu0  ;;  %v17501_v22 = vpop.f32.mrb[6].mxu1 }
 0x438   :  { %20400 = vst [vmem:[#allocation13_spill] sm:$0xff] %v17499_v59  ;;  %v14188_v13 = vpop.f32.mrb[69].mxu0  ;;  %v13821_v15 = vpop.f32.mrb[7].mxu1 }
 0x439   :  { %v17503_v6 = vpop.f32.mrb[70].mxu0  ;;  %v17543_v15 = vpack.c.bf16 %v4308_v20, %v4307_v39 }
 0x43a   :  { %20401 = vst [vmem:[#allocation14_spill] sm:$0xff] %v17503_v6  ;;  %v14189_v41 = vpop.f32.mrb[71].mxu0  ;;  %13929 = vmatmul.mubr.msk.bf16.gmra.mrb[112].mxu1 %vm93_vm0, %v3853_v55 }
 0x43b   :  { %13932 = vmatprep.mubr.msk.bf16.mxu1 %vm15736_vm2, %v20392_v62 }
 0x43d   :  { %v17508_v12 = vpop.f32.mrb[8].mxu1 }
 0x43e   :  { %v13824_v3 = vpop.f32.mrb[9].mxu1 }
 0x43f   :  { %v17510_v36 = vpop.f32.mrb[72].mxu0  ;;  %v17512_v21 = vpop.f32.mrb[10].mxu1 }
 0x440   :  { %20402 = vst [vmem:[#allocation15_spill] sm:$0xff] %v17510_v36  ;;  %v14192_v9 = vpop.f32.mrb[73].mxu0  ;;  %v13825_v24 = vpop.f32.mrb[11].mxu1 }
 0x441   :  { %v17514_v5 = vpop.f32.mrb[74].mxu0 }
 0x442   :  { %20403 = vst [vmem:[#allocation16_spill] sm:$0xff] %v17514_v5  ;;  %v14193_v4 = vpop.f32.mrb[75].mxu0  ;;  %13933 = vmatmul.mubr.msk.bf16.gmra.mrb[116].mxu1 %vm93_vm0, %v3854_v29 }
 0x443   :  { %13938 = vmatprep.mubr.msk.bf16.mxu1 %vm15736_vm2, %v20392_v62 }
 0x445   :  { %v17519_v34 = vpop.f32.mrb[12].mxu1 }
 0x446   :  { %v13828_v53 = vpop.f32.mrb[13].mxu1 }
 0x447   :  { %v17524_v28 = vpop.f32.mrb[76].mxu0  ;;  %v17526_v27 = vpop.f32.mrb[14].mxu1 }
 0x448   :  { %20404 = vst [vmem:[#allocation17_spill] sm:$0xff] %v17524_v28  ;;  %v14196_v1 = vpop.f32.mrb[77].mxu0  ;;  %v13829_v33 = vpop.f32.mrb[15].mxu1 }
 0x449   :  { %v17528_v47 = vpop.f32.mrb[78].mxu0 }
 0x44a   :  { %20405 = vst [vmem:[#allocation18_spill] sm:$0xff] %v17528_v47  ;;  %v14197_v52 = vpop.f32.mrb[79].mxu0  ;;  %13939 = vmatmul.mubr.msk.bf16.vlgmr.msra.gmra.mrb[120].mxu1 %vm93_vm0, %v4335_v50 }
 0x44b   :  { %13999 = vmatpush3.bf16.msra.mxu1 %v4674_v14  ;;  %13942 = vmatprep.mubr.msk.bf16.mxu1 %vm15736_vm2, %v20392_v62 }
 0x44c   :  { %14060 = vmatprep.subr.bf16.mxu1 %v20392_v62 }
 0x44d   :  { %v17535_v18 = vpop.f32.mrb[16].mxu1 }
 0x44e   :  { %v13832_v45 = vpop.f32.mrb[17].mxu1 }
 0x44f   :  { %v17537_v61 = vpop.f32.mrb[80].mxu0  ;;  %v17539_v43 = vpop.f32.mrb[18].mxu1 }
 0x450   :  { %20406 = vst [vmem:[#allocation19_spill] sm:$0xff] %v17537_v61  ;;  %v14200_v0 = vpop.f32.mrb[81].mxu0  ;;  %v13833_v13 = vpop.f32.mrb[19].mxu1 }
 0x451   :  { %v17541_v46 = vpop.f32.mrb[82].mxu0 }
 0x452   :  { %20407 = vst [vmem:[#allocation20_spill] sm:$0xff] %v17541_v46  ;;  %v14201_v55 = vpop.f32.mrb[83].mxu0  ;;  %13943 = vmatmul.mubr.msk.bf16.gmra.mrb[124].mxu1 %vm93_vm0, %v17543_v15 }
 0x453   :  { %13946 = vmatprep.mubr.msk.bf16.mxu1 %vm15736_vm2, %v20392_v62 }
 0x455   :  { %v17549_v41 = vpop.f32.mrb[20].mxu1 }
 0x456   :  { %v13836_v9 = vpop.f32.mrb[21].mxu1 }
 0x457   :  { %v17551_v3 = vpop.f32.mrb[84].mxu0  ;;  %v17553_v24 = vpop.f32.mrb[22].mxu1 }
 0x458   :  { %20408 = vst [vmem:[#allocation21_spill] sm:$0xff] %v17551_v3  ;;  %v14204_v58 = vpop.f32.mrb[85].mxu0  ;;  %v13837_v4 = vpop.f32.mrb[23].mxu1 }
 0x459   :  { %v17555_v29 = vpop.f32.mrb[86].mxu0 }
 0x45a   :  { %20409 = vst [vmem:[#allocation22_spill] sm:$0xff] %v17555_v29  ;;  %v14205_v11 = vpop.f32.mrb[87].mxu0  ;;  %13947 = vmatmul.mubr.msk.bf16.gmra.mrb[128].mxu1 %vm93_vm0, %v17558_v44 }
 0x45b   :  { %13950 = vmatprep.mubr.msk.bf16.mxu1 %vm15736_vm2, %v20392_v62 }
 0x45d   :  { %v17564_v16 = vpop.f32.mrb[24].mxu1 }
 0x45e   :  { %v13840_v1 = vpop.f32.mrb[25].mxu1 }
 0x45f   :  { %v17566_v53 = vpop.f32.mrb[88].mxu0  ;;  %v17568_v50 = vpop.f32.mrb[26].mxu1 }
 0x460   :  { %20410 = vst [vmem:[#allocation23_spill] sm:$0xff] %v17566_v53  ;;  %v14312_v33 = vpop.f32.mrb[89].mxu0  ;;  %v13841_v52 = vpop.f32.mrb[27].mxu1 }
 0x461   :  { %v17570_v14 = vpop.f32.mrb[90].mxu0 }
 0x462   :  { %20411 = vst [vmem:[#allocation24_spill] sm:$0xff] %v17570_v14  ;;  %v14313_v42 = vpop.f32.mrb[91].mxu0  ;;  %13951 = vmatmul.mubr.msk.bf16.gmra.mrb[132].mxu1 %vm93_vm0, %v17121_v17 }
 0x463   :  { %13954 = vmatprep.mubr.msk.bf16.mxu1 %vm15736_vm2, %v20392_v62 }
 0x465   :  { %v17576_v20 = vpop.f32.mrb[28].mxu1 }
 0x466   :  { %v13844_v0 = vpop.f32.mrb[29].mxu1 }
 0x467   :  { %v17578_v45 = vpop.f32.mrb[92].mxu0  ;;  %v17580_v13 = vpop.f32.mrb[30].mxu1 }
 0x468   :  { %20412 = vst [vmem:[#allocation25_spill] sm:$0xff] %v17578_v45  ;;  %v14316_v39 = vpop.f32.mrb[93].mxu0  ;;  %v13845_v19 = vpop.f32.mrb[31].mxu1 }
 0x469   :  { %v17582_v55 = vpop.f32.mrb[94].mxu0 }
 0x46a   :  { %20413 = vst [vmem:[#allocation26_spill] sm:$0xff] %v17582_v55  ;;  %v14317_v9 = vpop.f32.mrb[95].mxu0  ;;  %13955 = vmatmul.mubr.msk.bf16.gmra.mrb[136].mxu1 %vm93_vm0, %v17161_v30 }
 0x46b   :  { %13958 = vmatprep.mubr.msk.bf16.mxu1 %vm15736_vm2, %v20392_v62 }
 0x46d   :  { %v17588_v58 = vpop.f32.mrb[32].mxu1 }
 0x46e   :  { %v13848_v11 = vpop.f32.mrb[33].mxu1 }
 0x46f   :  { %v17590_v4 = vpop.f32.mrb[96].mxu0  ;;  %v17592_v33 = vpop.f32.mrb[34].mxu1 }
 0x470   :  { %20414 = vst [vmem:[#allocation27_spill] sm:$0xff] %v17590_v4  ;;  %v14320_v1 = vpop.f32.mrb[97].mxu0  ;;  %v13849_v42 = vpop.f32.mrb[35].mxu1 }
 0x471   :  { %v17594_v52 = vpop.f32.mrb[98].mxu0 }
 0x472   :  { %20415 = vst [vmem:[#allocation28_spill] sm:$0xff] %v17594_v52  ;;  %v14321_v0 = vpop.f32.mrb[99].mxu0  ;;  %13959 = vmatmul.mubr.msk.bf16.gmra.mrb[140].mxu1 %vm93_vm0, %v17170_v56 }
 0x473   :  { %13962 = vmatprep.mubr.msk.bf16.mxu1 %vm15736_vm2, %v20392_v62 }
 0x475   :  { %v17600_v39 = vpop.f32.mrb[36].mxu1 }
 0x476   :  { %v13852_v9 = vpop.f32.mrb[37].mxu1 }
 0x477   :  { %v17602_v19 = vpop.f32.mrb[100].mxu0  ;;  %v17604_v11 = vpop.f32.mrb[38].mxu1 }
 0x478   :  { %20416 = vst [vmem:[#allocation29_spill] sm:$0xff] %v17602_v19  ;;  %v14324_v60 = vpop.f32.mrb[101].mxu0  ;;  %v13853_v4 = vpop.f32.mrb[39].mxu1 }
 0x479   :  { %v17606_v1 = vpop.f32.mrb[102].mxu0 }
 0x47a   :  { %20417 = vst [vmem:[#allocation30_spill] sm:$0xff] %v17606_v1  ;;  %v14325_v52 = vpop.f32.mrb[103].mxu0  ;;  %13963 = vmatmul.mubr.msk.bf16.gmra.mrb[144].mxu1 %vm93_vm0, %v17211_v10 }
 0x47b   :  { %13966 = vmatprep.mubr.msk.bf16.mxu1 %vm15736_vm2, %v20392_v62 }
 0x47d   :  { %v17612_v42 = vpop.f32.mrb[40].mxu1 }
 0x47e   :  { %v13856_v55 = vpop.f32.mrb[41].mxu1 }
 0x47f   :  { %v17614_v0 = vpop.f32.mrb[104].mxu0  ;;  %v17616_v9 = vpop.f32.mrb[42].mxu1 }
 0x480   :  { %20418 = vst [vmem:[#allocation31_spill] sm:$0xff] %v17614_v0  ;;  %v14328_v19 = vpop.f32.mrb[105].mxu0  ;;  %v13857_v45 = vpop.f32.mrb[43].mxu1 }
 0x481   :  { %v17618_v60 = vpop.f32.mrb[106].mxu0 }
 0x482   :  { %20419 = vst [vmem:[#allocation32_spill] sm:$0xff] %v17618_v60  ;;  %v14329_v1 = vpop.f32.mrb[107].mxu0  ;;  %13967 = vmatmul.mubr.msk.bf16.gmra.mrb[148].mxu1 %vm93_vm0, %v17220_v31 }
 0x483   :  { %13970 = vmatprep.mubr.msk.bf16.mxu1 %vm15736_vm2, %v20392_v62 }
 0x485   :  { %v17624_v4 = vpop.f32.mrb[44].mxu1 }
 0x486   :  { %v13860_v14 = vpop.f32.mrb[45].mxu1 }
 0x487   :  { %v17626_v52 = vpop.f32.mrb[108].mxu0  ;;  %v17628_v55 = vpop.f32.mrb[46].mxu1 }
 0x488   :  { %20420 = vst [vmem:[#allocation33_spill] sm:$0xff] %v17626_v52  ;;  %v14332_v0 = vpop.f32.mrb[109].mxu0  ;;  %v13861_v53 = vpop.f32.mrb[47].mxu1 }
 0x489   :  { %v17630_v19 = vpop.f32.mrb[110].mxu0 }
 0x48a   :  { %20421 = vst [vmem:[#allocation34_spill] sm:$0xff] %v17630_v19  ;;  %v14333_v60 = vpop.f32.mrb[111].mxu0  ;;  %13971 = vmatmul.mubr.msk.bf16.gmra.mrb[152].mxu1 %vm93_vm0, %v17247_v7 }
 0x48b   :  { %13974 = vmatprep.mubr.msk.bf16.mxu1 %vm15736_vm2, %v20392_v62 }
 0x48d   :  { %v17636_v45 = vpop.f32.mrb[48].mxu1 }
 0x48e   :  { %v13864_v29 = vpop.f32.mrb[49].mxu1 }
 0x48f   :  { %v17638_v1 = vpop.f32.mrb[112].mxu0  ;;  %v17640_v14 = vpop.f32.mrb[50].mxu1 }
 0x490   :  { %20422 = vst [vmem:[#allocation35_spill] sm:$0xff] %v17638_v1  ;;  %v14336_v52 = vpop.f32.mrb[113].mxu0  ;;  %v13865_v3 = vpop.f32.mrb[51].mxu1 }
 0x491   :  { %v17642_v0 = vpop.f32.mrb[114].mxu0 }
 0x492   :  { %20423 = vst [vmem:[#allocation36_spill] sm:$0xff] %v17642_v0  ;;  %v14337_v19 = vpop.f32.mrb[115].mxu0  ;;  %13975 = vmatmul.mubr.msk.bf16.gmra.mrb[156].mxu1 %vm93_vm0, %v17256_v57 }
 0x493   :  { %13978 = vmatprep.mubr.msk.bf16.mxu1 %vm15736_vm2, %v20392_v62 }
 0x495   :  { %v17648_v53 = vpop.f32.mrb[52].mxu1 }
 0x496   :  { %v13868_v46 = vpop.f32.mrb[53].mxu1 }
 0x497   :  { %v17650_v60 = vpop.f32.mrb[116].mxu0  ;;  %v17652_v29 = vpop.f32.mrb[54].mxu1 }
 0x498   :  { %20424 = vst [vmem:[#allocation37_spill] sm:$0xff] %v17650_v60  ;;  %v14340_v1 = vpop.f32.mrb[117].mxu0  ;;  %v13869_v61 = vpop.f32.mrb[55].mxu1 }
 0x499   :  { %v17654_v52 = vpop.f32.mrb[118].mxu0 }
 0x49a   :  { %20425 = vst [vmem:[#allocation38_spill] sm:$0xff] %v17654_v52  ;;  %v14341_v0 = vpop.f32.mrb[119].mxu0  ;;  %13979 = vmatmul.mubr.msk.bf16.gmra.mrb[160].mxu1 %vm93_vm0, %v17282_v8 }
 0x49b   :  { %13982 = vmatprep.mubr.msk.bf16.mxu1 %vm15736_vm2, %v20392_v62 }
 0x49d   :  { %v17660_v3 = vpop.f32.mrb[56].mxu1 }
 0x49e   :  { %v13872_v47 = vpop.f32.mrb[57].mxu1 }
 0x49f   :  { %v17662_v19 = vpop.f32.mrb[120].mxu0  ;;  %v17664_v46 = vpop.f32.mrb[58].mxu1 }
 0x4a0   :  { %20426 = vst [vmem:[#allocation39_spill] sm:$0xff] %v17662_v19  ;;  %v14344_v60 = vpop.f32.mrb[121].mxu0  ;;  %v13873_v28 = vpop.f32.mrb[59].mxu1 }
 0x4a1   :  { %v17666_v1 = vpop.f32.mrb[122].mxu0 }
 0x4a2   :  { %20427 = vst [vmem:[#allocation40_spill] sm:$0xff] %v17666_v1  ;;  %v14345_v52 = vpop.f32.mrb[123].mxu0  ;;  %13983 = vmatmul.mubr.msk.bf16.gmra.mrb[164].mxu1 %vm93_vm0, %v17290_v23 }
 0x4a3   :  { %13986 = vmatprep.mubr.msk.bf16.mxu1 %vm15736_vm2, %v20392_v62 }
 0x4a5   :  { %v4186_v61 = vpop.f32.mrb[60].mxu1 }
 0x4a6   :  { %v17673_v0 = vadd.f32 %v4186_v61, %v17490_v32  ;;  %v13878_v47 = vpop.f32.mrb[61].mxu1 }
 0x4a7   :  { %v17675_v5 = vpop.f32.mrb[124].mxu0  ;;  %v4189_v19 = vpop.f32.mrb[62].mxu1 }
 0x4a8   :  { %20428 = vst [vmem:[#allocation41_spill] sm:$0xff] %v17675_v5  ;;  %v14348_v60 = vpop.f32.mrb[125].mxu0  ;;  %v17678_v36 = vadd.f32 %v4189_v19, %v17492_v25  ;;  %v13879_v52 = vpop.f32.mrb[63].mxu1 }
 0x4a9   :  { %v17680_v28 = vpop.f32.mrb[126].mxu0 }
 0x4aa   :  { %20429 = vst [vmem:[#allocation42_spill] sm:$0xff] %v17680_v28  ;;  %v14349_v1 = vpop.f32.mrb[127].mxu0  ;;  %13987 = vmatmul.mubr.msk.bf16.gmra.mrb[168].mxu1 %vm93_vm0, %v17307_v49 }
 0x4ab   :  { %13990 = vmatprep.mubr.msk.bf16.mxu1 %vm15736_vm2, %v20392_v62 }
 0x4ad   :  { %v4194_v32 = vpop.f32.mrb[64].mxu1 }
 0x4ae   :  { %v17687_v61 = vadd.f32 %v4194_v32, %v17497_v63  ;;  %v13882_v60 = vpop.f32.mrb[65].mxu1 }
 0x4af   :  { %v17689_v47 = vpop.f32.mrb[128].mxu0  ;;  %v4197_v25 = vpop.f32.mrb[66].mxu1 }
 0x4b0   :  { %20430 = vst [vmem:[#allocation43_spill] sm:$0xff] %v17689_v47  ;;  %v14352_v5 = vpop.f32.mrb[129].mxu0  ;;  %v17692_v19 = vadd.f32 %v4197_v25, %v17501_v22  ;;  %v13883_v1 = vpop.f32.mrb[67].mxu1 }
 0x4b1   :  { %v17694_v52 = vpop.f32.mrb[130].mxu0 }
 0x4b2   :  { %20431 = vst [vmem:[#allocation44_spill] sm:$0xff] %v17694_v52  ;;  %v14353_v28 = vpop.f32.mrb[131].mxu0  ;;  %13991 = vmatmul.mubr.msk.bf16.gmra.mrb[172].mxu1 %vm93_vm0, %v17321_v35 }
 0x4b3   :  { %13994 = vmatprep.mubr.msk.bf16.mxu1 %vm15736_vm2, %v20392_v62 }
 0x4b5   :  { %v4202_v63 = vpop.f32.mrb[68].mxu1 }
 0x4b6   :  { %v17701_v32 = vadd.f32 %v4202_v63, %v17508_v12  ;;  %v13886_v5 = vpop.f32.mrb[69].mxu1  ;;  %v4904_v63 = vld [vmem:[%s20371_s5 + $0x10] sm:$0xf] }
 0x4b7   :  { %v17703_v60 = vpop.f32.mrb[132].mxu0  ;;  %v4205_v22 = vpop.f32.mrb[70].mxu1  ;;  %v4951_v6 = vsel %vm3947_vm1, %v4904_v63, 0 }
 0x4b8   :  { %20432 = vst [vmem:[#allocation45_spill] sm:$0xff] %v17703_v60  ;;  %v14356_v47 = vpop.f32.mrb[133].mxu0  ;;  %v17706_v25 = vadd.f32 %v4205_v22, %v17512_v21  ;;  %v13887_v28 = vpop.f32.mrb[71].mxu1 }
 0x4b9   :  { %v17708_v1 = vpop.f32.mrb[134].mxu0 }
 0x4ba   :  { %20433 = vst [vmem:[#allocation46_spill] sm:$0xff] %v17708_v1  ;;  %v14357_v52 = vpop.f32.mrb[135].mxu0  ;;  %13995 = vmatmul.mubr.msk.bf16.gmra.mrb[176].mxu1 %vm93_vm0, %v17333_v2 }
 0x4bb   :  { %14000 = vmatprep.mubr.msk.bf16.mxu1 %vm15736_vm2, %v20392_v62 }
 0x4bd   :  { %v4210_v12 = vpop.f32.mrb[72].mxu1 }
 0x4be   :  { %v17718_v47 = vadd.f32 %v4210_v12, %v17519_v34  ;;  %v13890_v5 = vpop.f32.mrb[73].mxu1 }
 0x4bf   :  { %v17720_v21 = vpop.f32.mrb[136].mxu0  ;;  %v4213_v28 = vpop.f32.mrb[74].mxu1 }
 0x4c0   :  { %v14360_v22 = vpop.f32.mrb[137].mxu0  ;;  %v17723_v52 = vadd.f32 %v4213_v28, %v17526_v27  ;;  %v13891_v60 = vpop.f32.mrb[75].mxu1 }
 0x4c1   :  { %v17725_v1 = vpop.f32.mrb[138].mxu0 }
 0x4c2   :  { %v14361_v59 = vpop.f32.mrb[139].mxu0  ;;  %14001 = vmatmul.mubr.msk.bf16.vlgmr.msra.gmra.mrb[180].mxu1 %vm93_vm0, %v17543_v15 }
 0x4c3   :  { %14061 = vmatpush3.bf16.msra.mxu1 %v4951_v6  ;;  %14004 = vmatprep.mubr.msk.bf16.mxu1 %vm15736_vm2, %v20392_v62 }
 0x4c4   :  { %14122 = vmatprep.subr.bf16.mxu1 %v20392_v62 }
 0x4c5   :  { %v4218_v34 = vpop.f32.mrb[76].mxu1 }
 0x4c6   :  { %v17734_v12 = vadd.f32 %v4218_v34, %v17535_v18  ;;  %v13894_v5 = vpop.f32.mrb[77].mxu1 }
 0x4c7   :  { %v17736_v27 = vpop.f32.mrb[140].mxu0  ;;  %v4221_v22 = vpop.f32.mrb[78].mxu1 }
 0x4c8   :  { %v14364_v60 = vpop.f32.mrb[141].mxu0  ;;  %v17739_v59 = vadd.f32 %v4221_v22, %v17539_v43  ;;  %v13895_v6 = vpop.f32.mrb[79].mxu1 }
 0x4c9   :  { %v17741_v63 = vpop.f32.mrb[142].mxu0 }
 0x4ca   :  { %20434 = vst [vmem:[#allocation47_spill] sm:$0xff] %v17741_v63  ;;  %v14365_v15 = vpop.f32.mrb[143].mxu0  ;;  %14005 = vmatmul.mubr.msk.bf16.gmra.mrb[184].mxu1 %vm93_vm0, %v17558_v44 }
 0x4cb   :  { %14008 = vmatprep.mubr.msk.bf16.mxu1 %vm15736_vm2, %v20392_v62 }
 0x4cd   :  { %v4226_v18 = vpop.f32.mrb[80].mxu1 }
 0x4ce   :  { %v17748_v28 = vadd.f32 %v4226_v18, %v17549_v41  ;;  %v13898_v5 = vpop.f32.mrb[81].mxu1 }
 0x4cf   :  { %v17750_v34 = vpop.f32.mrb[144].mxu0  ;;  %v4229_v43 = vpop.f32.mrb[82].mxu1 }
 0x4d0   :  { %v14368_v60 = vpop.f32.mrb[145].mxu0  ;;  %v17753_v22 = vadd.f32 %v4229_v43, %v17553_v24  ;;  %v13899_v15 = vpop.f32.mrb[83].mxu1 }
 0x4d1   :  { %v17755_v6 = vpop.f32.mrb[146].mxu0 }
 0x4d2   :  { %v14369_v63 = vpop.f32.mrb[147].mxu0  ;;  %14009 = vmatmul.mubr.msk.bf16.gmra.mrb[188].mxu1 %vm93_vm0, %v17121_v17 }
 0x4d3   :  { %14012 = vmatprep.mubr.msk.bf16.mxu1 %vm15736_vm2, %v20392_v62 }
 0x4d5   :  { %v4234_v41 = vpop.f32.mrb[84].mxu1 }
 0x4d6   :  { %v17762_v44 = vadd.f32 %v4234_v41, %v17564_v16  ;;  %v13902_v18 = vpop.f32.mrb[85].mxu1 }
 0x4d7   :  { %v4237_v5 = vpop.f32.mrb[86].mxu1 }
 0x4d8   :  { %v17765_v60 = vadd.f32 %v4237_v5, %v17568_v50  ;;  %v13903_v24 = vpop.f32.mrb[87].mxu1 }
 0x4da   :  { %14013 = vmatmul.mubr.msk.bf16.gmra.mrb[192].mxu1 %vm93_vm0, %v17161_v30 }
 0x4db   :  { %14016 = vmatprep.mubr.msk.bf16.mxu1 %vm15736_vm2, %v20392_v62 }
 0x4dd   :  { %v4242_v17 = vpop.f32.mrb[88].mxu1 }
 0x4de   :  { %v17772_v63 = vadd.f32 %v4242_v17, %v17576_v20  ;;  %v13906_v43 = vpop.f32.mrb[89].mxu1 }
 0x4df   :  { %v4245_v15 = vpop.f32.mrb[90].mxu1 }
 0x4e0   :  { %v17775_v16 = vadd.f32 %v4245_v15, %v17580_v13  ;;  %v13907_v41 = vpop.f32.mrb[91].mxu1 }
 0x4e2   :  { %14017 = vmatmul.mubr.msk.bf16.gmra.mrb[196].mxu1 %vm93_vm0, %v17170_v56 }
 0x4e3   :  { %14020 = vmatprep.mubr.msk.bf16.mxu1 %vm15736_vm2, %v20392_v62 }
 0x4e5   :  { %v4250_v30 = vpop.f32.mrb[92].mxu1 }
 0x4e6   :  { %v17782_v50 = vadd.f32 %v4250_v30, %v17588_v58  ;;  %v13910_v18 = vpop.f32.mrb[93].mxu1 }
 0x4e7   :  { %v4253_v5 = vpop.f32.mrb[94].mxu1 }
 0x4e8   :  { %v17785_v20 = vadd.f32 %v4253_v5, %v17592_v33  ;;  %v13911_v24 = vpop.f32.mrb[95].mxu1 }
 0x4ea   :  { %14021 = vmatmul.mubr.msk.bf16.gmra.mrb[200].mxu1 %vm93_vm0, %v17211_v10 }
 0x4eb   :  { %14024 = vmatprep.mubr.msk.bf16.mxu1 %vm15736_vm2, %v20392_v62 }
 0x4ed   :  { %v4258_v56 = vpop.f32.mrb[96].mxu1 }
 0x4ee   :  { %v17792_v13 = vadd.f32 %v4258_v56, %v17600_v39  ;;  %v13914_v17 = vpop.f32.mrb[97].mxu1 }
 0x4ef   :  { %v4261_v43 = vpop.f32.mrb[98].mxu1 }
 0x4f0   :  { %v17795_v58 = vadd.f32 %v4261_v43, %v17604_v11  ;;  %v13915_v15 = vpop.f32.mrb[99].mxu1 }
 0x4f2   :  { %14025 = vmatmul.mubr.msk.bf16.gmra.mrb[204].mxu1 %vm93_vm0, %v17220_v31 }
 0x4f3   :  { %14028 = vmatprep.mubr.msk.bf16.mxu1 %vm15736_vm2, %v20392_v62 }
 0x4f5   :  { %v4266_v10 = vpop.f32.mrb[100].mxu1 }
 0x4f6   :  { %v17802_v33 = vadd.f32 %v4266_v10, %v17612_v42  ;;  %v13918_v41 = vpop.f32.mrb[101].mxu1 }
 0x4f7   :  { %v4269_v30 = vpop.f32.mrb[102].mxu1 }
 0x4f8   :  { %v17805_v39 = vadd.f32 %v4269_v30, %v17616_v9  ;;  %v13919_v18 = vpop.f32.mrb[103].mxu1 }
 0x4fa   :  { %14029 = vmatmul.mubr.msk.bf16.gmra.mrb[208].mxu1 %vm93_vm0, %v17247_v7 }
 0x4fb   :  { %14032 = vmatprep.mubr.msk.bf16.mxu1 %vm15736_vm2, %v20392_v62 }
 0x4fd   :  { %v4274_v31 = vpop.f32.mrb[104].mxu1 }
 0x4fe   :  { %v17812_v11 = vadd.f32 %v4274_v31, %v17624_v4  ;;  %v13922_v5 = vpop.f32.mrb[105].mxu1 }
 0x4ff   :  { %v4277_v24 = vpop.f32.mrb[106].mxu1 }
 0x500   :  { %v17815_v42 = vadd.f32 %v4277_v24, %v17628_v55  ;;  %v13923_v56 = vpop.f32.mrb[107].mxu1 }
 0x502   :  { %14033 = vmatmul.mubr.msk.bf16.gmra.mrb[212].mxu1 %vm93_vm0, %v17256_v57 }
 0x503   :  { %14036 = vmatprep.mubr.msk.bf16.mxu1 %vm15736_vm2, %v20392_v62 }
 0x505   :  { %v4282_v7 = vpop.f32.mrb[108].mxu1 }
 0x506   :  { %v17822_v9 = vadd.f32 %v4282_v7, %v17636_v45  ;;  %v13926_v17 = vpop.f32.mrb[109].mxu1 }
 0x507   :  { %v4285_v43 = vpop.f32.mrb[110].mxu1 }
 0x508   :  { %v17825_v4 = vadd.f32 %v4285_v43, %v17640_v14  ;;  %v13927_v15 = vpop.f32.mrb[111].mxu1 }
 0x50a   :  { %14037 = vmatmul.mubr.msk.bf16.gmra.mrb[216].mxu1 %vm93_vm0, %v17282_v8 }
 0x50b   :  { %14040 = vmatprep.mubr.msk.bf16.mxu1 %vm15736_vm2, %v20392_v62 }
 0x50d   :  { %v4290_v57 = vpop.f32.mrb[112].mxu1 }
 0x50e   :  { %v17832_v55 = vadd.f32 %v4290_v57, %v17648_v53  ;;  %v13930_v10 = vpop.f32.mrb[113].mxu1 }
 0x50f   :  { %v4293_v41 = vpop.f32.mrb[114].mxu1 }
 0x510   :  { %v17835_v45 = vadd.f32 %v4293_v41, %v17652_v29  ;;  %v13931_v30 = vpop.f32.mrb[115].mxu1 }
 0x511   :  { %v4860_v30 = vld [vmem:[#allocation3 + $0x24] sm:$0xff] }
 0x512   :  { %14041 = vmatmul.mubr.msk.bf16.gmra.mrb[220].mxu1 %vm93_vm0, %v17290_v23 }
 0x513   :  { %14044 = vmatprep.mubr.msk.bf16.mxu1 %vm15736_vm2, %v20392_v62 }
 0x515   :  { %v4298_v8 = vpop.f32.mrb[116].mxu1 }
 0x516   :  { %v17842_v14 = vadd.f32 %v4298_v8, %v17660_v3  ;;  %v13934_v18 = vpop.f32.mrb[117].mxu1 }
 0x517   :  { %v4301_v31 = vpop.f32.mrb[118].mxu1 }
 0x518   :  { %v17845_v53 = vadd.f32 %v4301_v31, %v17664_v46  ;;  %v13935_v5 = vpop.f32.mrb[119].mxu1  ;;  %v4859_v31 = vld [vmem:[#allocation3 + $0x1c] sm:$0xff] }
 0x51a   :  { %14045 = vmatmul.mubr.msk.bf16.gmra.mrb[224].mxu1 %vm93_vm0, %v17307_v49 }
 0x51b   :  { %14048 = vmatprep.mubr.msk.bf16.mxu1 %vm15736_vm2, %v20392_v62 }
 0x51d   :  { %v4433_v23 = vpop.f32.mrb[120].mxu1 }
 0x51e   :  { %v17852_v29 = vadd.f32 %v4433_v23, %v17673_v0  ;;  %v13940_v24 = vpop.f32.mrb[121].mxu1 }
 0x51f   :  { %v4436_v56 = vpop.f32.mrb[122].mxu1  ;;  %v4861_v24 = vld [vmem:[#allocation3 + $0x2c] sm:$0xff] }
 0x520   :  { %v17855_v3 = vadd.f32 %v4436_v56, %v17678_v36  ;;  %v13941_v7 = vpop.f32.mrb[123].mxu1  ;;  %v4862_v56 = vld [vmem:[#allocation3 + $0x34] sm:$0xff] }
 0x522   :  { %14049 = vmatmul.mubr.msk.bf16.gmra.mrb[228].mxu1 %vm93_vm0, %v17321_v35 }
 0x523   :  { %14052 = vmatprep.mubr.msk.bf16.mxu1 %vm15736_vm2, %v20392_v62 }
 0x525   :  { %v4441_v49 = vpop.f32.mrb[124].mxu1 }
 0x526   :  { %v17862_v46 = vadd.f32 %v4441_v49, %v17687_v61  ;;  %v13944_v17 = vpop.f32.mrb[125].mxu1 }
 0x527   :  { %v4444_v43 = vpop.f32.mrb[126].mxu1 }
 0x528   :  { %v17865_v0 = vadd.f32 %v4444_v43, %v17692_v19  ;;  %v13945_v15 = vpop.f32.mrb[127].mxu1  ;;  %v20435_v19 = vpack.c.bf16 %v17344_v51, %v17342_v26  ;;  %v4889_v51 = vpack.c.bf16 %v4860_v30, %v4859_v31 }
 0x529   :  { %v4890_v15 = vpack.c.bf16 %v4862_v56, %v4861_v24  ;;  %v4868_v24 = vld [vmem:[#allocation3 + $0x64] sm:$0xff] }
 0x52a   :  { %14053 = vmatmul.mubr.msk.bf16.gmra.mrb[232].mxu1 %vm93_vm0, %v17333_v2 }
 0x52b   :  { %14056 = vmatprep.mubr.msk.bf16.mxu1 %vm15736_vm2, %v20392_v62 }
 0x52d   :  { %v4449_v35 = vpop.f32.mrb[128].mxu1 }
 0x52e   :  { %v17872_v36 = vadd.f32 %v4449_v35, %v17701_v32  ;;  %v13948_v57 = vpop.f32.mrb[129].mxu1  ;;  %v5181_v32 = vld [vmem:[%s20371_s5 + $0x14] sm:$0xf] }
 0x52f   :  { %v4452_v10 = vpop.f32.mrb[130].mxu1  ;;  %v5228_v23 = vsel %vm3947_vm1, %v5181_v32, 0  ;;  %v4864_v57 = vld [vmem:[#allocation3 + $0x44] sm:$0xff] }
 0x530   :  { %v17875_v61 = vadd.f32 %v4452_v10, %v17706_v25  ;;  %v13949_v41 = vpop.f32.mrb[131].mxu1 }
 0x532   :  { %14057 = vmatmul.mubr.msk.bf16.gmra.mrb[236].mxu1 %vm93_vm0, %v20435_v19  ;;  %v4863_v19 = vld [vmem:[#allocation3 + $0x3c] sm:$0xff] }
 0x533   :  { %14062 = vmatprep.mubr.msk.bf16.mxu1 %vm15736_vm2, %v20392_v62  ;;  %v4891_v30 = vpack.c.bf16 %v4864_v57, %v4863_v19  ;;  %v4869_v57 = vld [vmem:[#allocation3 + $0x6c] sm:$0xff] }
 0x535   :  { %v4457_v2 = vpop.f32.mrb[132].mxu1 }
 0x536   :  { %v17887_v8 = vadd.f32 %v4457_v2, %v17718_v47  ;;  %v13952_v25 = vpop.f32.mrb[133].mxu1 }
 0x537   :  { %v4460_v18 = vpop.f32.mrb[134].mxu1  ;;  %v4865_v25 = vld [vmem:[#allocation3 + $0x4c] sm:$0xff] }
 0x538   :  { %v17890_v5 = vadd.f32 %v4460_v18, %v17723_v52  ;;  %v13953_v26 = vpop.f32.mrb[135].mxu1  ;;  %v4866_v18 = vld [vmem:[#allocation3 + $0x54] sm:$0xff] }
 0x53a   :  { %14063 = vmatmul.mubr.msk.bf16.vlgmr.msra.gmra.mrb[240].mxu1 %vm93_vm0, %v4889_v51 }
 0x53b   :  { %14123 = vmatpush3.bf16.msra.mxu1 %v5228_v23  ;;  %14066 = vmatprep.mubr.msk.bf16.mxu1 %vm15736_vm2, %v20392_v62  ;;  %v4892_v23 = vpack.c.bf16 %v4866_v18, %v4865_v25  ;;  %v4872_v25 = vld [vmem:[#allocation3 + $0x84] sm:$0xff] }
 0x53c   :  { %15208 = vmatprep.subr.bf16.mxu1 %v20392_v62 }
 0x53d   :  { %v4465_v47 = vpop.f32.mrb[136].mxu1 }
 0x53e   :  { %v17898_v7 = vadd.f32 %v4465_v47, %v17734_v12  ;;  %v13956_v52 = vpop.f32.mrb[137].mxu1 }
 0x53f   :  { %v4468_v49 = vpop.f32.mrb[138].mxu1 }
 0x540   :  { %v17901_v17 = vadd.f32 %v4468_v49, %v17739_v59  ;;  %v13957_v43 = vpop.f32.mrb[139].mxu1  ;;  %v4867_v49 = vld [vmem:[#allocation3 + $0x5c] sm:$0xff] }
 0x542   :  { %14067 = vmatmul.mubr.msk.bf16.gmra.mrb[244].mxu1 %vm93_vm0, %v4890_v15  ;;  %v4893_v15 = vpack.c.bf16 %v4868_v24, %v4867_v49  ;;  %v4873_v24 = vld [vmem:[#allocation3 + $0x8c] sm:$0xff] }
 0x543   :  { %14070 = vmatprep.mubr.msk.bf16.mxu1 %vm15736_vm2, %v20392_v62 }
 0x545   :  { %v4473_v35 = vpop.f32.mrb[140].mxu1 }
 0x546   :  { %v17907_v10 = vadd.f32 %v4473_v35, %v17748_v28  ;;  %v13960_v41 = vpop.f32.mrb[141].mxu1 }
 0x547   :  { %v4476_v12 = vpop.f32.mrb[142].mxu1  ;;  %v4870_v41 = vld [vmem:[#allocation3 + $0x74] sm:$0xff] }
 0x548   :  { %v17910_v2 = vadd.f32 %v4476_v12, %v17753_v22  ;;  %v13961_v59 = vpop.f32.mrb[143].mxu1 }
 0x54a   :  { %14071 = vmatmul.mubr.msk.bf16.gmra.mrb[248].mxu1 %vm93_vm0, %v4891_v30  ;;  %v4894_v30 = vpack.c.bf16 %v4870_v41, %v4869_v57  ;;  %v4876_v57 = vld [vmem:[#allocation3 + $0xa4] sm:$0xff] }
 0x54b   :  { %14074 = vmatprep.mubr.msk.bf16.mxu1 %vm15736_vm2, %v20392_v62 }
 0x54d   :  { %v4481_v32 = vpop.f32.mrb[144].mxu1 }
 0x54e   :  { %v17916_v31 = vadd.f32 %v4481_v32, %v17762_v44  ;;  %v13964_v28 = vpop.f32.mrb[145].mxu1 }
 0x54f   :  { %v4484_v26 = vpop.f32.mrb[146].mxu1 }
 0x550   :  { %v17919_v51 = vadd.f32 %v4484_v26, %v17765_v60  ;;  %v13965_v22 = vpop.f32.mrb[147].mxu1  ;;  %v4871_v26 = vld [vmem:[#allocation3 + $0x7c] sm:$0xff] }
 0x552   :  { %14075 = vmatmul.mubr.msk.bf16.gmra.mrb[252].mxu1 %vm93_vm0, %v4892_v23  ;;  %v4895_v23 = vpack.c.bf16 %v4872_v25, %v4871_v26  ;;  %v4877_v25 = vld [vmem:[#allocation3 + $0xac] sm:$0xff] }
 0x553   :  { %14078 = vmatprep.mubr.msk.bf16.mxu1 %vm15736_vm2, %v20392_v62 }
 0x555   :  { %v4489_v47 = vpop.f32.mrb[148].mxu1 }
 0x556   :  { %v17925_v56 = vadd.f32 %v4489_v47, %v17772_v63  ;;  %v13968_v52 = vpop.f32.mrb[149].mxu1 }
 0x557   :  { %v4492_v44 = vpop.f32.mrb[150].mxu1  ;;  %v4874_v52 = vld [vmem:[#allocation3 + $0x94] sm:$0xff] }
 0x558   :  { %v17928_v43 = vadd.f32 %v4492_v44, %v17775_v16  ;;  %v13969_v60 = vpop.f32.mrb[151].mxu1 }
 0x55a   :  { %14079 = vmatmul.mubr.msk.bf16.gmra.mrb[0].mxu1 %vm93_vm0, %v4893_v15  ;;  %v4896_v15 = vpack.c.bf16 %v4874_v52, %v4873_v24  ;;  %v4880_v24 = vld [vmem:[#allocation3 + $0xc4] sm:$0xff] }
 0x55b   :  { %14082 = vmatprep.mubr.msk.bf16.mxu1 %vm15736_vm2, %v20392_v62 }
 0x55d   :  { %v4497_v35 = vpop.f32.mrb[152].mxu1 }
 0x55e   :  { %v17934_v12 = vadd.f32 %v4497_v35, %v17782_v50  ;;  %v13972_v63 = vpop.f32.mrb[153].mxu1 }
 0x55f   :  { %v4500_v19 = vpop.f32.mrb[154].mxu1 }
 0x560   :  { %v17937_v59 = vadd.f32 %v4500_v19, %v17785_v20  ;;  %v13973_v16 = vpop.f32.mrb[155].mxu1  ;;  %v4875_v19 = vld [vmem:[#allocation3 + $0x9c] sm:$0xff] }
 0x562   :  { %14083 = vmatmul.mubr.msk.bf16.gmra.mrb[4].mxu1 %vm93_vm0, %v4894_v30  ;;  %v4897_v30 = vpack.c.bf16 %v4876_v57, %v4875_v19  ;;  %v4881_v57 = vld [vmem:[#allocation3 + $0xcc] sm:$0xff] }
 0x563   :  { %14086 = vmatprep.mubr.msk.bf16.mxu1 %vm15736_vm2, %v20392_v62 }
 0x565   :  { %v4505_v32 = vpop.f32.mrb[156].mxu1 }
 0x566   :  { %v17943_v18 = vadd.f32 %v4505_v32, %v17792_v13  ;;  %v13976_v28 = vpop.f32.mrb[157].mxu1 }
 0x567   :  { %v4508_v50 = vpop.f32.mrb[158].mxu1  ;;  %v4878_v28 = vld [vmem:[#allocation3 + $0xb4] sm:$0xff] }
 0x568   :  { %v17946_v22 = vadd.f32 %v4508_v50, %v17795_v58  ;;  %v13977_v20 = vpop.f32.mrb[159].mxu1 }
 0x56a   :  { %14087 = vmatmul.mubr.msk.bf16.gmra.mrb[8].mxu1 %vm93_vm0, %v4895_v23  ;;  %v4898_v23 = vpack.c.bf16 %v4878_v28, %v4877_v25  ;;  %v4884_v25 = vld [vmem:[#allocation3 + $0xe4] sm:$0xff] }
 0x56b   :  { %14090 = vmatprep.mubr.msk.bf16.mxu1 %vm15736_vm2, %v20392_v62 }
 0x56d   :  { %v4513_v47 = vpop.f32.mrb[160].mxu1 }
 0x56e   :  { %v17952_v44 = vadd.f32 %v4513_v47, %v17802_v33  ;;  %v13980_v13 = vpop.f32.mrb[161].mxu1 }
 0x56f   :  { %v4516_v49 = vpop.f32.mrb[162].mxu1 }
 0x570   :  { %v17955_v60 = vadd.f32 %v4516_v49, %v17805_v39  ;;  %v13981_v58 = vpop.f32.mrb[163].mxu1  ;;  %v4879_v49 = vld [vmem:[#allocation3 + $0xbc] sm:$0xff] }
 0x572   :  { %14091 = vmatmul.mubr.msk.bf16.gmra.mrb[12].mxu1 %vm93_vm0, %v4896_v15  ;;  %v4899_v15 = vpack.c.bf16 %v4880_v24, %v4879_v49  ;;  %v4885_v24 = vld [vmem:[#allocation3 + $0xec] sm:$0xff] }
 0x573   :  { %14094 = vmatprep.mubr.msk.bf16.mxu1 %vm15736_vm2, %v20392_v62 }
 0x575   :  { %v4521_v35 = vpop.f32.mrb[164].mxu1 }
 0x576   :  { %v17961_v41 = vadd.f32 %v4521_v35, %v17812_v11  ;;  %v13984_v63 = vpop.f32.mrb[165].mxu1 }
 0x577   :  { %v4524_v33 = vpop.f32.mrb[166].mxu1  ;;  %v4882_v63 = vld [vmem:[#allocation3 + $0xd4] sm:$0xff] }
 0x578   :  { %v17964_v16 = vadd.f32 %v4524_v33, %v17815_v42  ;;  %v13985_v39 = vpop.f32.mrb[167].mxu1 }
 0x57a   :  { %14095 = vmatmul.mubr.msk.bf16.gmra.mrb[16].mxu1 %vm93_vm0, %v4897_v30  ;;  %v4900_v30 = vpack.c.bf16 %v4882_v63, %v4881_v57  ;;  %v4888_v57 = vld [vmem:[#allocation3 + $0x104] sm:$0xff] }
 0x57b   :  { %14098 = vmatprep.mubr.msk.bf16.mxu1 %vm15736_vm2, %v20392_v62 }
 0x57d   :  { %v4529_v32 = vpop.f32.mrb[168].mxu1 }
 0x57e   :  { %v17970_v50 = vadd.f32 %v4529_v32, %v17822_v9  ;;  %v13988_v11 = vpop.f32.mrb[169].mxu1 }
 0x57f   :  { %v4532_v26 = vpop.f32.mrb[170].mxu1 }
 0x580   :  { %v17973_v20 = vadd.f32 %v4532_v26, %v17825_v4  ;;  %v13989_v42 = vpop.f32.mrb[171].mxu1  ;;  %v4883_v26 = vld [vmem:[#allocation3 + $0xdc] sm:$0xff] }
 0x582   :  { %14099 = vmatmul.mubr.msk.bf16.gmra.mrb[20].mxu1 %vm93_vm0, %v4898_v23  ;;  %v4901_v23 = vpack.c.bf16 %v4884_v25, %v4883_v26 }
 0x583   :  { %14102 = vmatprep.mubr.msk.bf16.mxu1 %vm15736_vm2, %v20392_v62 }
 0x585   :  { %v4537_v47 = vpop.f32.mrb[172].mxu1 }
 0x586   :  { %v17979_v52 = vadd.f32 %v4537_v47, %v17832_v55  ;;  %v13992_v13 = vpop.f32.mrb[173].mxu1 }
 0x587   :  { %v4540_v9 = vpop.f32.mrb[174].mxu1  ;;  %v4886_v13 = vld [vmem:[#allocation3 + $0xf4] sm:$0xff] }
 0x588   :  { %v17982_v58 = vadd.f32 %v4540_v9, %v17835_v45  ;;  %v13993_v4 = vpop.f32.mrb[175].mxu1 }
 0x58a   :  { %14103 = vmatmul.mubr.msk.bf16.gmra.mrb[24].mxu1 %vm93_vm0, %v4899_v15  ;;  %v4902_v15 = vpack.c.bf16 %v4886_v13, %v4885_v24 }
 0x58b   :  { %14106 = vmatprep.mubr.msk.bf16.mxu1 %vm15736_vm2, %v20392_v62 }
 0x58d   :  { %v4545_v35 = vpop.f32.mrb[176].mxu1 }
 0x58e   :  { %v17988_v33 = vadd.f32 %v4545_v35, %v17842_v14  ;;  %v13996_v55 = vpop.f32.mrb[177].mxu1 }
 0x58f   :  { %v4548_v19 = vpop.f32.mrb[178].mxu1 }
 0x590   :  { %v17991_v39 = vadd.f32 %v4548_v19, %v17845_v53  ;;  %v13997_v45 = vpop.f32.mrb[179].mxu1  ;;  %v4887_v19 = vld [vmem:[#allocation3 + $0xfc] sm:$0xff] }
 0x592   :  { %14107 = vmatmul.mubr.msk.bf16.gmra.mrb[28].mxu1 %vm93_vm0, %v4900_v30  ;;  %v4903_v30 = vpack.c.bf16 %v4888_v57, %v4887_v19  ;;  %v5143_v19 = vld [vmem:[#allocation3 + $0x56] sm:$0xff] }
 0x593   :  { %14110 = vmatprep.mubr.msk.bf16.mxu1 %vm15736_vm2, %v20392_v62 }
 0x595   :  { %v4710_v32 = vpop.f32.mrb[180].mxu1 }
 0x596   :  { %v17997_v28 = vadd.f32 %v4710_v32, %v17852_v29  ;;  %v14002_v11 = vpop.f32.mrb[181].mxu1 }
 0x597   :  { %v4713_v14 = vpop.f32.mrb[182].mxu1 }
 0x598   :  { %v18000_v42 = vadd.f32 %v4713_v14, %v17855_v3  ;;  %v14003_v53 = vpop.f32.mrb[183].mxu1 }
 0x599   :  { %v5138_v53 = vld [vmem:[#allocation3 + $0x2e] sm:$0xff] }
 0x59a   :  { %14111 = vmatmul.mubr.msk.bf16.gmra.mrb[32].mxu1 %vm93_vm0, %v4901_v23  ;;  %v5139_v23 = vld [vmem:[#allocation3 + $0x36] sm:$0xff] }
 0x59b   :  { %14114 = vmatprep.mubr.msk.bf16.mxu1 %vm15736_vm2, %v20392_v62 }
 0x59d   :  { %v4718_v47 = vpop.f32.mrb[184].mxu1 }
 0x59e   :  { %v18006_v9 = vadd.f32 %v4718_v47, %v17862_v46  ;;  %v14006_v29 = vpop.f32.mrb[185].mxu1 }
 0x59f   :  { %v4721_v49 = vpop.f32.mrb[186].mxu1  ;;  %v5141_v29 = vld [vmem:[#allocation3 + $0x46] sm:$0xff] }
 0x5a0   :  { %v18009_v4 = vadd.f32 %v4721_v49, %v17865_v0  ;;  %v14007_v3 = vpop.f32.mrb[187].mxu1 }
 0x5a2   :  { %14115 = vmatmul.mubr.msk.bf16.gmra.mrb[36].mxu1 %vm93_vm0, %v4902_v15  ;;  %v5140_v15 = vld [vmem:[#allocation3 + $0x3e] sm:$0xff] }
 0x5a3   :  { %14118 = vmatprep.mubr.msk.bf16.mxu1 %vm15736_vm2, %v20392_v62  ;;  %v5168_v57 = vpack.c.bf16 %v5141_v29, %v5140_v15 }
 0x5a5   :  { %v4726_v35 = vpop.f32.mrb[188].mxu1 }
 0x5a6   :  { %v18015_v63 = vadd.f32 %v4726_v35, %v17872_v36  ;;  %v14010_v55 = vpop.f32.mrb[189].mxu1 }
 0x5a7   :  { %v4729_v46 = vpop.f32.mrb[190].mxu1 }
 0x5a8   :  { %v18018_v45 = vadd.f32 %v4729_v46, %v17875_v61  ;;  %v14011_v0 = vpop.f32.mrb[191].mxu1  ;;  %v20436_v61 = vpack.c.bf16 %v17060_v40, %v17058_v48  ;;  %v5167_v40 = vpack.c.bf16 %v5139_v23, %v5138_v53  ;;  %v5142_v46 = vld [vmem:[#allocation3 + $0x4e] sm:$0xff]  ;;  %v5144_v53 = vld [vmem:[#allocation3 + $0x5e] sm:$0xff] }
 0x5aa   :  { %14119 = vmatmul.mubr.msk.bf16.gmra.mrb[40].mxu1 %vm93_vm0, %v4903_v30 }
 0x5ab   :  { %14124 = vmatprep.mubr.msk.bf16.mxu1 %vm15736_vm2, %v20392_v62 }
 0x5ad   :  { %v4734_v32 = vpop.f32.mrb[192].mxu1 }
 0x5ae   :  { %v18024_v25 = vadd.f32 %v4734_v32, %v17887_v8  ;;  %v14014_v11 = vpop.f32.mrb[193].mxu1 }
 0x5af   :  { %v4737_v36 = vpop.f32.mrb[194].mxu1  ;;  %v5169_v11 = vpack.c.bf16 %v5143_v19, %v5142_v46  ;;  %v5148_v46 = vld [vmem:[#allocation3 + $0x7e] sm:$0xff] }
 0x5b0   :  { %v18027_v14 = vadd.f32 %v4737_v36, %v17890_v5  ;;  %v14015_v26 = vpop.f32.mrb[195].mxu1 }
 0x5b1   :  { %v5145_v26 = vld [vmem:[#allocation3 + $0x66] sm:$0xff] }
 0x5b2   :  { %14125 = vmatmul.mubr.msk.bf16.vlgmr.msra.gmra.mrb[44].mxu1 %vm93_vm0, %v20436_v61 }
 0x5b3   :  { %15209 = vmatpush3.bf16.msra.mxu1 %v16984_v37  ;;  %14128 = vmatprep.mubr.msk.bf16.mxu1 %vm15736_vm2, %v20392_v62 }
 0x5b4   :  { %14246 = vmatprep.subr.bf16.mxu1 %v20392_v62 }
 0x5b5   :  { %v4742_v8 = vpop.f32.mrb[196].mxu1 }
 0x5b6   :  { %v18038_v47 = vadd.f32 %v4742_v8, %v17898_v7  ;;  %v14018_v5 = vpop.f32.mrb[197].mxu1 }
 0x5b7   :  { %v4745_v24 = vpop.f32.mrb[198].mxu1  ;;  %v5170_v5 = vpack.c.bf16 %v5145_v26, %v5144_v53 }
 0x5b8   :  { %v18041_v13 = vadd.f32 %v4745_v24, %v17901_v17  ;;  %v14019_v48 = vpop.f32.mrb[199].mxu1 }
 0x5b9   :  { %v5146_v48 = vld [vmem:[#allocation3 + $0x6e] sm:$0xff] }
 0x5ba   :  { %14129 = vmatmul.mubr.msk.bf16.gmra.mrb[48].mxu1 %vm93_vm0, %v5167_v40  ;;  %v5147_v40 = vld [vmem:[#allocation3 + $0x76] sm:$0xff] }
 0x5bb   :  { %14132 = vmatprep.mubr.msk.bf16.mxu1 %vm15736_vm2, %v20392_v62 }
 0x5bd   :  { %v4750_v37 = vpop.f32.mrb[200].mxu1 }
 0x5be   :  { %v18047_v49 = vadd.f32 %v4750_v37, %v17907_v10  ;;  %v14022_v3 = vpop.f32.mrb[201].mxu1 }
 0x5bf   :  { %v4753_v7 = vpop.f32.mrb[202].mxu1 }
 0x5c0   :  { %v18050_v35 = vadd.f32 %v4753_v7, %v17910_v2  ;;  %v14023_v17 = vpop.f32.mrb[203].mxu1  ;;  %v5171_v7 = vpack.c.bf16 %v5147_v40, %v5146_v48  ;;  %v5152_v48 = vld [vmem:[#allocation3 + $0x9e] sm:$0xff] }
 0x5c1   :  { %v5149_v17 = vld [vmem:[#allocation3 + $0x86] sm:$0xff] }
 0x5c2   :  { %14133 = vmatmul.mubr.msk.bf16.gmra.mrb[52].mxu1 %vm93_vm0, %v5168_v57 }
 0x5c3   :  { %14136 = vmatprep.mubr.msk.bf16.mxu1 %vm15736_vm2, %v20392_v62 }
 0x5c5   :  { %v4758_v55 = vpop.f32.mrb[204].mxu1 }
 0x5c6   :  { %v18056_v0 = vadd.f32 %v4758_v55, %v17916_v31  ;;  %v14026_v10 = vpop.f32.mrb[205].mxu1 }
 0x5c7   :  { %v4761_v30 = vpop.f32.mrb[206].mxu1  ;;  %v5172_v10 = vpack.c.bf16 %v5149_v17, %v5148_v46 }
 0x5c8   :  { %v18059_v32 = vadd.f32 %v4761_v30, %v17919_v51  ;;  %v14027_v2 = vpop.f32.mrb[207].mxu1 }
 0x5c9   :  { %v5150_v2 = vld [vmem:[#allocation3 + $0x8e] sm:$0xff] }
 0x5ca   :  { %14137 = vmatmul.mubr.msk.bf16.gmra.mrb[56].mxu1 %vm93_vm0, %v5169_v11  ;;  %v5151_v11 = vld [vmem:[#allocation3 + $0x96] sm:$0xff] }
 0x5cb   :  { %14140 = vmatprep.mubr.msk.bf16.mxu1 %vm15736_vm2, %v20392_v62 }
 0x5cd   :  { %v4766_v36 = vpop.f32.mrb[208].mxu1 }
 0x5ce   :  { %v18065_v61 = vadd.f32 %v4766_v36, %v17925_v56  ;;  %v14030_v8 = vpop.f32.mrb[209].mxu1 }
 0x5cf   :  { %v4769_v31 = vpop.f32.mrb[210].mxu1 }
 0x5d0   :  { %v18068_v23 = vadd.f32 %v4769_v31, %v17928_v43  ;;  %v14031_v51 = vpop.f32.mrb[211].mxu1  ;;  %v18097_v31 = vpack.c.bf16 %v5151_v11, %v5150_v2  ;;  %v5156_v2 = vld [vmem:[#allocation3 + $0xbe] sm:$0xff] }
 0x5d1   :  { %v5153_v51 = vld [vmem:[#allocation3 + $0xa6] sm:$0xff] }
 0x5d2   :  { %14141 = vmatmul.mubr.msk.bf16.gmra.mrb[60].mxu1 %vm93_vm0, %v5170_v5 }
 0x5d3   :  { %14144 = vmatprep.mubr.msk.bf16.mxu1 %vm15736_vm2, %v20392_v62 }
 0x5d5   :  { %v4774_v24 = vpop.f32.mrb[212].mxu1 }
 0x5d6   :  { %v18074_v37 = vadd.f32 %v4774_v24, %v17934_v12  ;;  %v14034_v56 = vpop.f32.mrb[213].mxu1 }
 0x5d7   :  { %v4777_v29 = vpop.f32.mrb[214].mxu1  ;;  %v18109_v56 = vpack.c.bf16 %v5153_v51, %v5152_v48 }
 0x5d8   :  { %v18077_v3 = vadd.f32 %v4777_v29, %v17937_v59  ;;  %v14035_v43 = vpop.f32.mrb[215].mxu1 }
 0x5d9   :  { %v5154_v43 = vld [vmem:[#allocation3 + $0xae] sm:$0xff] }
 0x5da   :  { %14145 = vmatmul.mubr.msk.bf16.gmra.mrb[64].mxu1 %vm93_vm0, %v5171_v7  ;;  %v5155_v7 = vld [vmem:[#allocation3 + $0xb6] sm:$0xff] }
 0x5db   :  { %14148 = vmatprep.mubr.msk.bf16.mxu1 %vm15736_vm2, %v20392_v62 }
 0x5dd   :  { %v4782_v15 = vpop.f32.mrb[216].mxu1 }
 0x5de   :  { %v18083_v57 = vadd.f32 %v4782_v15, %v17943_v18  ;;  %v14038_v55 = vpop.f32.mrb[217].mxu1 }
 0x5df   :  { %v4785_v12 = vpop.f32.mrb[218].mxu1 }
 0x5e0   :  { %v18086_v19 = vadd.f32 %v4785_v12, %v17946_v22  ;;  %v14039_v59 = vpop.f32.mrb[219].mxu1  ;;  %v18121_v12 = vpack.c.bf16 %v5155_v7, %v5154_v43 }
 0x5e1   :  { %v5157_v59 = vld [vmem:[#allocation3 + $0xc6] sm:$0xff] }
 0x5e2   :  { %14149 = vmatmul.mubr.msk.bf16.gmra.mrb[68].mxu1 %vm93_vm0, %v5172_v10 }
 0x5e3   :  { %14152 = vmatprep.mubr.msk.bf16.mxu1 %vm15736_vm2, %v20392_v62 }
 0x5e5   :  { %v4790_v30 = vpop.f32.mrb[220].mxu1 }
 0x5e6   :  { %v18092_v36 = vadd.f32 %v4790_v30, %v17952_v44  ;;  %v14042_v18 = vpop.f32.mrb[221].mxu1 }
 0x5e7   :  { %v4793_v26 = vpop.f32.mrb[222].mxu1  ;;  %v18133_v18 = vpack.c.bf16 %v5157_v59, %v5156_v2  ;;  %v5162_v59 = vld [vmem:[#allocation3 + $0xee] sm:$0xff] }
 0x5e8   :  { %v18095_v8 = vadd.f32 %v4793_v26, %v17955_v60  ;;  %v14043_v22 = vpop.f32.mrb[223].mxu1 }
 0x5e9   :  { %v5158_v22 = vld [vmem:[#allocation3 + $0xce] sm:$0xff] }
 0x5ea   :  { %14153 = vmatmul.mubr.msk.bf16.gmra.mrb[72].mxu1 %vm93_vm0, %v18097_v31 }
 0x5eb   :  { %14156 = vmatprep.mubr.msk.bf16.mxu1 %vm15736_vm2, %v20392_v62 }
 0x5ed   :  { %v4798_v53 = vpop.f32.mrb[224].mxu1 }
 0x5ee   :  { %v18104_v5 = vadd.f32 %v4798_v53, %v17961_v41  ;;  %v14046_v44 = vpop.f32.mrb[225].mxu1  ;;  %v5159_v53 = vld [vmem:[#allocation3 + $0xd6] sm:$0xff] }
 0x5ef   :  { %v4801_v24 = vpop.f32.mrb[226].mxu1  ;;  %v18145_v48 = vpack.c.bf16 %v5159_v53, %v5158_v22  ;;  %v5165_v53 = vld [vmem:[#allocation3 + $0x106] sm:$0xff] }
 0x5f0   :  { %v18107_v60 = vadd.f32 %v4801_v24, %v17964_v16  ;;  %v14047_v40 = vpop.f32.mrb[227].mxu1 }
 0x5f2   :  { %14157 = vmatmul.mubr.msk.bf16.gmra.mrb[76].mxu1 %vm93_vm0, %v18109_v56 }
 0x5f3   :  { %14160 = vmatprep.mubr.msk.bf16.mxu1 %vm15736_vm2, %v20392_v62 }
 0x5f5   :  { %v4806_v29 = vpop.f32.mrb[228].mxu1 }
 0x5f6   :  { %v18116_v41 = vadd.f32 %v4806_v29, %v17970_v50  ;;  %v14050_v15 = vpop.f32.mrb[229].mxu1  ;;  %v5161_v29 = vld [vmem:[#allocation3 + $0xe6] sm:$0xff] }
 0x5f7   :  { %v4809_v17 = vpop.f32.mrb[230].mxu1  ;;  %v5160_v15 = vld [vmem:[#allocation3 + $0xde] sm:$0xff] }
 0x5f8   :  { %v18119_v16 = vadd.f32 %v4809_v17, %v17973_v20  ;;  %v14051_v55 = vpop.f32.mrb[231].mxu1 }
 0x5f9   :  { %v18157_v55 = vpack.c.bf16 %v5161_v29, %v5160_v15 }
 0x5fa   :  { %14161 = vmatmul.mubr.msk.bf16.gmra.mrb[80].mxu1 %vm93_vm0, %v18121_v12 }
 0x5fb   :  { %14164 = vmatprep.mubr.msk.bf16.mxu1 %vm15736_vm2, %v20392_v62 }
 0x5fd   :  { %v4814_v46 = vpop.f32.mrb[232].mxu1 }
 0x5fe   :  { %v18128_v10 = vadd.f32 %v4814_v46, %v17979_v52  ;;  %v14054_v50 = vpop.f32.mrb[233].mxu1 }
 0x5ff   :  { %v4817_v30 = vpop.f32.mrb[234].mxu1  ;;  %v5163_v50 = vld [vmem:[#allocation3 + $0xf6] sm:$0xff] }
 0x600   :  { %v18131_v20 = vadd.f32 %v4817_v30, %v17982_v58  ;;  %v14055_v11 = vpop.f32.mrb[235].mxu1 }
 0x602   :  { %14165 = vmatmul.mubr.msk.bf16.gmra.mrb[84].mxu1 %vm93_vm0, %v18133_v18 }
 0x603   :  { %14168 = vmatprep.mubr.msk.bf16.mxu1 %vm15736_vm2, %v20392_v62 }
 0x605   :  { %v4822_v26 = vpop.f32.mrb[236].mxu1 }
 0x606   :  { %v18140_v52 = vadd.f32 %v4822_v26, %v17988_v33  ;;  %v14058_v51 = vpop.f32.mrb[237].mxu1  ;;  %v18169_v26 = vpack.c.bf16 %v5163_v50, %v5162_v59  ;;  %v20437_v50 = vpack.c.bf16 %v17202_v38, %v17195_v54 }
 0x607   :  { %v4825_v44 = vpop.f32.mrb[238].mxu1 }
 0x608   :  { %v18143_v58 = vadd.f32 %v4825_v44, %v17991_v39  ;;  %v14059_v24 = vpop.f32.mrb[239].mxu1 }
 0x609   :  { %v5164_v24 = vld [vmem:[#allocation3 + $0xfe] sm:$0xff] }
 0x60a   :  { %14169 = vmatmul.mubr.msk.bf16.gmra.mrb[88].mxu1 %vm93_vm0, %v18145_v48  ;;  %v18181_v29 = vpack.c.bf16 %v5165_v53, %v5164_v24 }
 0x60b   :  { %14172 = vmatprep.mubr.msk.bf16.mxu1 %vm15736_vm2, %v20392_v62 }
 0x60d   :  { %v4987_v40 = vpop.f32.mrb[240].mxu1 }
 0x60e   :  { %v18152_v43 = vadd.f32 %v4987_v40, %v17997_v28  ;;  %v14064_v33 = vpop.f32.mrb[241].mxu1 }
 0x60f   :  { %v4990_v7 = vpop.f32.mrb[242].mxu1 }
 0x610   :  { %v18155_v39 = vadd.f32 %v4990_v7, %v18000_v42  ;;  %v14065_v17 = vpop.f32.mrb[243].mxu1 }
 0x612   :  { %14173 = vmatmul.mubr.msk.bf16.gmra.mrb[92].mxu1 %vm93_vm0, %v18157_v55 }
 0x613   :  { %14176 = vmatprep.mubr.msk.bf16.mxu1 %vm15736_vm2, %v20392_v62 }
 0x615   :  { %v4995_v46 = vpop.f32.mrb[244].mxu1 }
 0x616   :  { %v18164_v28 = vadd.f32 %v4995_v46, %v18006_v9  ;;  %v14068_v30 = vpop.f32.mrb[245].mxu1 }
 0x617   :  { %v4998_v2 = vpop.f32.mrb[246].mxu1 }
 0x618   :  { %v18167_v42 = vadd.f32 %v4998_v2, %v18009_v4  ;;  %v14069_v11 = vpop.f32.mrb[247].mxu1 }
 0x61a   :  { %14177 = vmatmul.mubr.msk.bf16.gmra.mrb[96].mxu1 %vm93_vm0, %v18169_v26 }
 0x61b   :  { %14180 = vmatprep.mubr.msk.bf16.mxu1 %vm15736_vm2, %v20392_v62 }
 0x61d   :  { %v5003_v22 = vpop.f32.mrb[248].mxu1 }
 0x61e   :  { %v18176_v51 = vadd.f32 %v5003_v22, %v18015_v63  ;;  %v14072_v9 = vpop.f32.mrb[249].mxu1  ;;  %v5735_v63 = vld [vmem:[%s20371_s5 + $0x1c] sm:$0xf] }
 0x61f   :  { %v5006_v44 = vpop.f32.mrb[250].mxu1  ;;  %v5782_v59 = vsel %vm3947_vm1, %v5735_v63, 0 }
 0x620   :  { %v18179_v4 = vadd.f32 %v5006_v44, %v18018_v45  ;;  %v14073_v40 = vpop.f32.mrb[251].mxu1 }
 0x622   :  { %14181 = vmatmul.mubr.msk.bf16.gmra.mrb[100].mxu1 %vm93_vm0, %v18181_v29 }
 0x623   :  { %14206 = vmatprep.mubr.msk.bf16.mxu1 %vm15736_vm2, %v20392_v62 }
 0x625   :  { %v5011_v33 = vpop.f32.mrb[252].mxu1 }
 0x626   :  { %v18191_v7 = vadd.f32 %v5011_v33, %v18024_v25  ;;  %v14076_v15 = vpop.f32.mrb[253].mxu1 }
 0x627   :  { %v5014_v45 = vpop.f32.mrb[254].mxu1 }
 0x628   :  { %v18194_v17 = vadd.f32 %v5014_v45, %v18027_v14  ;;  %v14077_v46 = vpop.f32.mrb[255].mxu1 }
 0x62a   :  { %14207 = vmatmul.mubr.msk.bf16.vlgmr.msra.gmra.mrb[104].mxu1 %vm93_vm0, %v20437_v50 }
 0x62b   :  { %14247 = vmatpush3.bf16.msra.mxu1 %v5782_v59  ;;  %14210 = vmatprep.mubr.msk.bf16.mxu1 %vm15736_vm2, %v20392_v62 }
 0x62c   :  { %14370 = vmatprep.subr.bf16.mxu1 %v20392_v62 }
 0x62d   :  { %v5019_v25 = vpop.f32.mrb[0].mxu1 }
 0x62e   :  { %v18205_v30 = vadd.f32 %v5019_v25, %v18038_v47  ;;  %v14080_v14 = vpop.f32.mrb[1].mxu1 }
 0x62f   :  { %v5022_v2 = vpop.f32.mrb[2].mxu1 }
 0x630   :  { %v18208_v11 = vadd.f32 %v5022_v2, %v18041_v13  ;;  %v14081_v22 = vpop.f32.mrb[3].mxu1 }
 0x632   :  { %14211 = vmatmul.mubr.msk.bf16.gmra.mrb[108].mxu1 %vm93_vm0, %v18097_v31 }
 0x633   :  { %14214 = vmatprep.mubr.msk.bf16.mxu1 %vm15736_vm2, %v20392_v62 }
 0x635   :  { %v5027_v54 = vpop.f32.mrb[4].mxu1 }
 0x636   :  { %v18215_v38 = vadd.f32 %v5027_v54, %v18047_v49  ;;  %v14084_v53 = vpop.f32.mrb[5].mxu1 }
 0x637   :  { %v5030_v9 = vpop.f32.mrb[6].mxu1 }
 0x638   :  { %v18218_v47 = vadd.f32 %v5030_v9, %v18050_v35  ;;  %v14085_v44 = vpop.f32.mrb[7].mxu1 }
 0x63a   :  { %14215 = vmatmul.mubr.msk.bf16.gmra.mrb[112].mxu1 %vm93_vm0, %v18109_v56 }
 0x63b   :  { %14218 = vmatprep.mubr.msk.bf16.mxu1 %vm15736_vm2, %v20392_v62 }
 0x63d   :  { %v5035_v13 = vpop.f32.mrb[8].mxu1 }
 0x63e   :  { %v18225_v31 = vadd.f32 %v5035_v13, %v18056_v0  ;;  %v14088_v24 = vpop.f32.mrb[9].mxu1 }
 0x63f   :  { %v5038_v40 = vpop.f32.mrb[10].mxu1  ;;  %v5442_v24 = vld [vmem:[#allocation3 + $0x116] sm:$0xff] }
 0x640   :  { %v18228_v49 = vadd.f32 %v5038_v40, %v18059_v32  ;;  %v14089_v33 = vpop.f32.mrb[11].mxu1 }
 0x642   :  { %14219 = vmatmul.mubr.msk.bf16.gmra.mrb[116].mxu1 %vm93_vm0, %v18121_v12 }
 0x643   :  { %14222 = vmatprep.mubr.msk.bf16.mxu1 %vm15736_vm2, %v20392_v62 }
 0x645   :  { %v5043_v35 = vpop.f32.mrb[12].mxu1 }
 0x646   :  { %v18235_v56 = vadd.f32 %v5043_v35, %v18065_v61  ;;  %v14092_v63 = vpop.f32.mrb[13].mxu1 }
 0x647   :  { %v5046_v15 = vpop.f32.mrb[14].mxu1 }
 0x648   :  { %v18238_v0 = vadd.f32 %v5046_v15, %v18068_v23  ;;  %v14093_v45 = vpop.f32.mrb[15].mxu1 }
 0x64a   :  { %14223 = vmatmul.mubr.msk.bf16.gmra.mrb[120].mxu1 %vm93_vm0, %v18133_v18 }
 0x64b   :  { %14226 = vmatprep.mubr.msk.bf16.mxu1 %vm15736_vm2, %v20392_v62 }
 0x64d   :  { %v5051_v32 = vpop.f32.mrb[16].mxu1 }
 0x64e   :  { %v18245_v12 = vadd.f32 %v5051_v32, %v18074_v37  ;;  %v14096_v46 = vpop.f32.mrb[17].mxu1 }
 0x64f   :  { %v5054_v59 = vpop.f32.mrb[18].mxu1 }
 0x650   :  { %v18248_v61 = vadd.f32 %v5054_v59, %v18077_v3  ;;  %v14097_v50 = vpop.f32.mrb[19].mxu1  ;;  %v20438_v59 = vld [vmem:[#allocation11_spill] sm:$0xff] }
 0x651   :  { %v20439_v50 = vld [vmem:[#allocation12_spill] sm:$0xff] }
 0x652   :  { %14227 = vmatmul.mubr.msk.bf16.gmra.mrb[124].mxu1 %vm93_vm0, %v18145_v48 }
 0x653   :  { %14230 = vmatprep.mubr.msk.bf16.mxu1 %vm15736_vm2, %v20392_v62 }
 0x655   :  { %v5059_v23 = vpop.f32.mrb[20].mxu1 }
 0x656   :  { %v18255_v18 = vadd.f32 %v5059_v23, %v18083_v57  ;;  %v14100_v25 = vpop.f32.mrb[21].mxu1  ;;  %v20440_v23 = vpack.c.bf16 %v20438_v59, %v20439_v50 }
 0x657   :  { %v5062_v14 = vpop.f32.mrb[22].mxu1  ;;  %v5693_v25 = vld [vmem:[#allocation3 + $0x48] sm:$0xff] }
 0x658   :  { %v18258_v37 = vadd.f32 %v5062_v14, %v18086_v19  ;;  %v14101_v2 = vpop.f32.mrb[23].mxu1 }
 0x65a   :  { %14231 = vmatmul.mubr.msk.bf16.gmra.mrb[128].mxu1 %vm93_vm0, %v18157_v55 }
 0x65b   :  { %14234 = vmatprep.mubr.msk.bf16.mxu1 %vm15736_vm2, %v20392_v62 }
 0x65d   :  { %v5067_v3 = vpop.f32.mrb[24].mxu1 }
 0x65e   :  { %v18265_v48 = vadd.f32 %v5067_v3, %v18092_v36  ;;  %v14104_v22 = vpop.f32.mrb[25].mxu1  ;;  %v5692_v3 = vld [vmem:[#allocation3 + $0x40] sm:$0xff] }
 0x65f   :  { %v5070_v54 = vpop.f32.mrb[26].mxu1 }
 0x660   :  { %v18268_v57 = vadd.f32 %v5070_v54, %v18095_v8  ;;  %v14105_v53 = vpop.f32.mrb[27].mxu1 }
 0x661   :  { %v5721_v53 = vpack.c.bf16 %v5693_v25, %v5692_v3  ;;  %v20444_v25 = vld [vmem:[#allocation16_spill] sm:$0xff] }
 0x662   :  { %14235 = vmatmul.mubr.msk.bf16.gmra.mrb[132].mxu1 %vm93_vm0, %v18169_v26  ;;  %v5441_v26 = vld [vmem:[#allocation3 + $0x10e] sm:$0xff] }
 0x663   :  { %14238 = vmatprep.mubr.msk.bf16.mxu1 %vm15736_vm2, %v20392_v62  ;;  %v5457_v63 = vpack.c.bf16 %v5442_v24, %v5441_v26 }
 0x665   :  { %v5075_v19 = vpop.f32.mrb[28].mxu1 }
 0x666   :  { %v18275_v55 = vadd.f32 %v5075_v19, %v18104_v5  ;;  %v14108_v9 = vpop.f32.mrb[29].mxu1 }
 0x667   :  { %v5078_v44 = vpop.f32.mrb[30].mxu1  ;;  %v5694_v9 = vld [vmem:[#allocation3 + $0x50] sm:$0xff] }
 0x668   :  { %v18278_v36 = vadd.f32 %v5078_v44, %v18107_v60  ;;  %v14109_v13 = vpop.f32.mrb[31].mxu1 }
 0x66a   :  { %14239 = vmatmul.mubr.msk.bf16.gmra.mrb[136].mxu1 %vm93_vm0, %v18181_v29 }
 0x66b   :  { %14242 = vmatprep.mubr.msk.bf16.mxu1 %vm15736_vm2, %v20392_v62 }
 0x66d   :  { %v5083_v8 = vpop.f32.mrb[32].mxu1 }
 0x66e   :  { %v18285_v40 = vadd.f32 %v5083_v8, %v18116_v41  ;;  %v14112_v5 = vpop.f32.mrb[33].mxu1  ;;  %v15654_v41 = vld [vmem:[%s20372_s6 + $0x8] sm:$0xff]  }
 0x66f   :  { %v5086_v33 = vpop.f32.mrb[34].mxu1  ;;  %v5695_v8 = vld [vmem:[#allocation3 + $0x58] sm:$0xff] }
 0x670   :  { %v18288_v35 = vadd.f32 %v5086_v33, %v18119_v16  ;;  %v14113_v60 = vpop.f32.mrb[35].mxu1  ;;  %v5722_v5 = vpack.c.bf16 %v5695_v8, %v5694_v9  ;;  %v20446_v8 = vld [vmem:[#allocation18_spill] sm:$0xff] }
 0x671   :  { %v20442_v60 = vld [vmem:[#allocation14_spill] sm:$0xff] }
 0x672   :  { %14243 = vmatmul.mubr.msk.bf16.gmra.mrb[140].mxu1 %vm93_vm0, %v5457_v63 }
 0x673   :  { %14248 = vmatprep.mubr.msk.bf16.mxu1 %vm15736_vm2, %v20392_v62 }
 0x675   :  { %v5091_v29 = vpop.f32.mrb[36].mxu1 }
 0x676   :  { %v18294_v15 = vadd.f32 %v5091_v29, %v18128_v10  ;;  %v14116_v45 = vpop.f32.mrb[37].mxu1 }
 0x677   :  { %v5094_v32 = vpop.f32.mrb[38].mxu1 }
 0x678   :  { %v18300_v16 = vadd.f32 %v5094_v32, %v18131_v20  ;;  %v14117_v46 = vpop.f32.mrb[39].mxu1 }
 0x67a   :  { %14249 = vmatmul.mubr.msk.bf16.vlgmr.msra.gmra.mrb[144].mxu1 %vm93_vm0, %v20440_v23  ;;  %v20443_v23 = vld [vmem:[#allocation15_spill] sm:$0xff] }
 0x67b   :  { %14252 = vmatprep.mubr.msk.bf16.mxu1 %vm15736_vm2, %v20392_v62  ;;  %14371 = vmatpush3.bf16.msra.mxu1 %v15654_v41 }
 0x67c   :  { %14478 = vmatprep.subr.bf16.mxu1 %v20392_v62 }
 0x67d   :  { %v5099_v10 = vpop.f32.mrb[40].mxu1 }
 0x67e   :  { %v18310_v14 = vadd.f32 %v5099_v10, %v18140_v52  ;;  %v14120_v2 = vpop.f32.mrb[41].mxu1 }
 0x67f   :  { %v5102_v20 = vpop.f32.mrb[42].mxu1 }
 0x680   :  { %v18313_v22 = vadd.f32 %v5102_v20, %v18143_v58  ;;  %v14121_v54 = vpop.f32.mrb[43].mxu1  ;;  %v20441_v58 = vld [vmem:[#allocation13_spill] sm:$0xff] }
 0x682   :  { %14253 = vmatmul.mubr.msk.bf16.gmra.mrb[148].mxu1 %vm93_vm0, %v5721_v53 }
 0x683   :  { %14256 = vmatprep.mubr.msk.bf16.mxu1 %vm15736_vm2, %v20392_v62 }
 0x685   :  { %v5264_v19 = vpop.f32.mrb[44].mxu1 }
 0x686   :  { %v5383_v44 = vadd.f32 %v5264_v19, %v18152_v43  ;;  %v14126_v13 = vpop.f32.mrb[45].mxu1  ;;  %v5697_v43 = vld [vmem:[#allocation3 + $0x68] sm:$0xff] }
 0x687   :  { %v5267_v52 = vpop.f32.mrb[46].mxu1  ;;  %v20445_v13 = vld [vmem:[#allocation17_spill] sm:$0xff] }
 0x688   :  { %v5384_v26 = vadd.f32 %v5267_v52, %v18155_v39  ;;  %v14127_v24 = vpop.f32.mrb[47].mxu1  ;;  %v18321_v33 = vadd.f32 %v20441_v58, %v5383_v44  ;;  %v5696_v39 = vld [vmem:[#allocation3 + $0x60] sm:$0xff] }
 0x689   :  { %v5723_v50 = vpack.c.bf16 %v5697_v43, %v5696_v39  ;;  %v20448_v39 = vld [vmem:[#allocation20_spill] sm:$0xff] }
 0x68a   :  { %14257 = vmatmul.mubr.msk.bf16.gmra.mrb[152].mxu1 %vm93_vm0, %v5722_v5  ;;  %v18325_v63 = vadd.f32 %v20442_v60, %v5384_v26 }
 0x68b   :  { %14260 = vmatprep.mubr.msk.bf16.mxu1 %vm15736_vm2, %v20392_v62 }
 0x68d   :  { %v5272_v29 = vpop.f32.mrb[48].mxu1 }
 0x68e   :  { %v5385_v45 = vadd.f32 %v5272_v29, %v18164_v28  ;;  %v14130_v32 = vpop.f32.mrb[49].mxu1  ;;  %v5698_v28 = vld [vmem:[#allocation3 + $0x70] sm:$0xff] }
 0x68f   :  { %v5275_v41 = vpop.f32.mrb[50].mxu1  ;;  %v20447_v32 = vld [vmem:[#allocation19_spill] sm:$0xff] }
 0x690   :  { %v5386_v46 = vadd.f32 %v5275_v41, %v18167_v42  ;;  %v14131_v59 = vpop.f32.mrb[51].mxu1  ;;  %v18332_v10 = vadd.f32 %v20443_v23, %v5385_v45  ;;  %v5699_v42 = vld [vmem:[#allocation3 + $0x78] sm:$0xff] }
 0x691   :  { %v5724_v44 = vpack.c.bf16 %v5699_v42, %v5698_v28  ;;  %v20450_v42 = vld [vmem:[#allocation22_spill] sm:$0xff] }
 0x692   :  { %14261 = vmatmul.mubr.msk.bf16.gmra.mrb[156].mxu1 %vm93_vm0, %v5723_v50  ;;  %v18336_v2 = vadd.f32 %v20444_v25, %v5386_v46 }
 0x693   :  { %14264 = vmatprep.mubr.msk.bf16.mxu1 %vm15736_vm2, %v20392_v62 }
 0x695   :  { %v5280_v20 = vpop.f32.mrb[52].mxu1 }
 0x696   :  { %v5387_v3 = vadd.f32 %v5280_v20, %v18176_v51  ;;  %v14134_v54 = vpop.f32.mrb[53].mxu1  ;;  %v5701_v51 = vld [vmem:[#allocation3 + $0x88] sm:$0xff] }
 0x697   :  { %v5283_v53 = vpop.f32.mrb[54].mxu1  ;;  %v20449_v54 = vld [vmem:[#allocation21_spill] sm:$0xff] }
 0x698   :  { %v5388_v19 = vadd.f32 %v5283_v53, %v18179_v4  ;;  %v14135_v9 = vpop.f32.mrb[55].mxu1  ;;  %v18343_v52 = vadd.f32 %v20445_v13, %v5387_v3  ;;  %v5700_v4 = vld [vmem:[#allocation3 + $0x80] sm:$0xff] }
 0x699   :  { %v5725_v45 = vpack.c.bf16 %v5701_v51, %v5700_v4 }
 0x69a   :  { %14265 = vmatmul.mubr.msk.bf16.gmra.mrb[160].mxu1 %vm93_vm0, %v5724_v44  ;;  %v18347_v26 = vadd.f32 %v20446_v8, %v5388_v19  ;;  %v5704_v8 = vld [vmem:[#allocation3 + $0xa0] sm:$0xff] }
 0x69b   :  { %14268 = vmatprep.mubr.msk.bf16.mxu1 %vm15736_vm2, %v20392_v62 }
 0x69d   :  { %v5288_v24 = vpop.f32.mrb[56].mxu1 }
 0x69e   :  { %v5389_v5 = vadd.f32 %v5288_v24, %v18191_v7  ;;  %v14138_v58 = vpop.f32.mrb[57].mxu1  ;;  %v5702_v7 = vld [vmem:[#allocation3 + $0x90] sm:$0xff] }
 0x69f   :  { %v5291_v60 = vpop.f32.mrb[58].mxu1 }
 0x6a0   :  { %v5390_v29 = vadd.f32 %v5291_v60, %v18194_v17  ;;  %v14139_v43 = vpop.f32.mrb[59].mxu1  ;;  %v18354_v41 = vadd.f32 %v20447_v32, %v5389_v5  ;;  %v5703_v17 = vld [vmem:[#allocation3 + $0x98] sm:$0xff]  ;;  %v5706_v60 = vld [vmem:[#allocation3 + $0xb0] sm:$0xff] }
 0x6a1   :  { %v5726_v3 = vpack.c.bf16 %v5703_v17, %v5702_v7  ;;  %v5707_v43 = vld [vmem:[#allocation3 + $0xb8] sm:$0xff] }
 0x6a2   :  { %14269 = vmatmul.mubr.msk.bf16.gmra.mrb[164].mxu1 %vm93_vm0, %v5725_v45  ;;  %v18358_v46 = vadd.f32 %v20448_v39, %v5390_v29  ;;  %v5728_v32 = vpack.c.bf16 %v5707_v43, %v5706_v60 }
 0x6a3   :  { %14272 = vmatprep.mubr.msk.bf16.mxu1 %vm15736_vm2, %v20392_v62 }
 0x6a5   :  { %v5296_v59 = vpop.f32.mrb[60].mxu1 }
 0x6a6   :  { %v5391_v50 = vadd.f32 %v5296_v59, %v18205_v30  ;;  %v14142_v23 = vpop.f32.mrb[61].mxu1  ;;  %v5705_v30 = vld [vmem:[#allocation3 + $0xa8] sm:$0xff] }
 0x6a7   :  { %v5299_v25 = vpop.f32.mrb[62].mxu1  ;;  %v5727_v5 = vpack.c.bf16 %v5705_v30, %v5704_v8  ;;  %v5709_v59 = vld [vmem:[#allocation3 + $0xc8] sm:$0xff]  ;;  %v5708_v23 = vld [vmem:[#allocation3 + $0xc0] sm:$0xff] }
 0x6a8   :  { %v5392_v20 = vadd.f32 %v5299_v25, %v18208_v11  ;;  %v14143_v28 = vpop.f32.mrb[63].mxu1  ;;  %v18365_v53 = vadd.f32 %v20449_v54, %v5391_v50  ;;  %v5729_v17 = vpack.c.bf16 %v5709_v59, %v5708_v23 }
 0x6a9   :  { %v5710_v28 = vld [vmem:[#allocation3 + $0xd0] sm:$0xff] }
 0x6aa   :  { %14273 = vmatmul.mubr.msk.bf16.gmra.mrb[168].mxu1 %vm93_vm0, %v5726_v3  ;;  %v18369_v19 = vadd.f32 %v20450_v42, %v5392_v20  ;;  %v5711_v42 = vld [vmem:[#allocation3 + $0xd8] sm:$0xff] }
 0x6ab   :  { %14276 = vmatprep.mubr.msk.bf16.mxu1 %vm15736_vm2, %v20392_v62  ;;  %v5730_v30 = vpack.c.bf16 %v5711_v42, %v5710_v28 }
 0x6ad   :  { %v5304_v9 = vpop.f32.mrb[64].mxu1 }
 0x6ae   :  { %v18374_v44 = vadd.f32 %v5304_v9, %v18215_v38  ;;  %v14146_v13 = vpop.f32.mrb[65].mxu1 }
 0x6af   :  { %v5307_v11 = vpop.f32.mrb[66].mxu1 }
 0x6b0   :  { %v18377_v24 = vadd.f32 %v5307_v11, %v18218_v47  ;;  %v14147_v51 = vpop.f32.mrb[67].mxu1 }
 0x6b1   :  { %v5712_v51 = vld [vmem:[#allocation3 + $0xe0] sm:$0xff] }
 0x6b2   :  { %14277 = vmatmul.mubr.msk.bf16.gmra.mrb[172].mxu1 %vm93_vm0, %v5727_v5 }
 0x6b3   :  { %14280 = vmatprep.mubr.msk.bf16.mxu1 %vm15736_vm2, %v20392_v62 }
 0x6b5   :  { %v5312_v58 = vpop.f32.mrb[68].mxu1 }
 0x6b6   :  { %v18383_v4 = vadd.f32 %v5312_v58, %v18225_v31  ;;  %v14150_v38 = vpop.f32.mrb[69].mxu1 }
 0x6b7   :  { %v5315_v29 = vpop.f32.mrb[70].mxu1 }
 0x6b8   :  { %v18386_v45 = vadd.f32 %v5315_v29, %v18228_v49  ;;  %v14151_v47 = vpop.f32.mrb[71].mxu1  ;;  %v5714_v29 = vld [vmem:[#allocation3 + $0xf0] sm:$0xff] }
 0x6ba   :  { %14281 = vmatmul.mubr.msk.bf16.gmra.mrb[176].mxu1 %vm93_vm0, %v5728_v32  ;;  %v5715_v32 = vld [vmem:[#allocation3 + $0xf8] sm:$0xff] }
 0x6bb   :  { %14284 = vmatprep.mubr.msk.bf16.mxu1 %vm15736_vm2, %v20392_v62  ;;  %v5732_v59 = vpack.c.bf16 %v5715_v32, %v5714_v29 }
 0x6bd   :  { %v5320_v39 = vpop.f32.mrb[72].mxu1 }
 0x6be   :  { %v18392_v7 = vadd.f32 %v5320_v39, %v18235_v56  ;;  %v14154_v31 = vpop.f32.mrb[73].mxu1 }
 0x6bf   :  { %v5323_v50 = vpop.f32.mrb[74].mxu1 }
 0x6c0   :  { %v18395_v25 = vadd.f32 %v5323_v50, %v18238_v0  ;;  %v14155_v49 = vpop.f32.mrb[75].mxu1  ;;  %v5717_v50 = vld [vmem:[#allocation3 + $0x108] sm:$0xff] }
 0x6c2   :  { %14285 = vmatmul.mubr.msk.bf16.gmra.mrb[180].mxu1 %vm93_vm0, %v5729_v17  ;;  %v5716_v17 = vld [vmem:[#allocation3 + $0x100] sm:$0xff] }
 0x6c3   :  { %14288 = vmatprep.mubr.msk.bf16.mxu1 %vm15736_vm2, %v20392_v62  ;;  %v5733_v28 = vpack.c.bf16 %v5717_v50, %v5716_v17 }
 0x6c5   :  { %v5328_v20 = vpop.f32.mrb[76].mxu1 }
 0x6c6   :  { %v18401_v3 = vadd.f32 %v5328_v20, %v18245_v12  ;;  %v14158_v56 = vpop.f32.mrb[77].mxu1 }
 0x6c7   :  { %v5331_v54 = vpop.f32.mrb[78].mxu1  ;;  %v15655_v56 = vld [vmem:[%s20372_s6] sm:$0xff]  }
 0x6c8   :  { %v18404_v9 = vadd.f32 %v5331_v54, %v18248_v61  ;;  %v14159_v0 = vpop.f32.mrb[79].mxu1  ;;  %v5713_v61 = vld [vmem:[#allocation3 + $0xe8] sm:$0xff]  ;;  %14425 = vmatpush3.bf16.msra.mxu0 %v15655_v56  ;;  %v5718_v54 = vld [vmem:[#allocation3 + $0x110] sm:$0xff] }
 0x6c9   :  { %v5731_v60 = vpack.c.bf16 %v5713_v61, %v5712_v51  ;;  %14532 = vmatprep.subr.bf16.mxu0 %v20392_v62 }
 0x6ca   :  { %14289 = vmatmul.mubr.msk.bf16.gmra.mrb[184].mxu1 %vm93_vm0, %v5730_v30  ;;  %v5719_v30 = vld [vmem:[#allocation3 + $0x118] sm:$0xff] }
 0x6cb   :  { %14292 = vmatprep.mubr.msk.bf16.mxu1 %vm15736_vm2, %v20392_v62 }
 0x6cd   :  { %v5336_v12 = vpop.f32.mrb[80].mxu1 }
 0x6ce   :  { %v18472_v13 = vadd.f32 %v5336_v12, %v18255_v18  ;;  %v14162_v11 = vpop.f32.mrb[81].mxu1 }
 0x6cf   :  { %v5339_v8 = vpop.f32.mrb[82].mxu1  ;;  %v5734_v11 = vpack.c.bf16 %v5719_v30, %v5718_v54 }
 0x6d0   :  { %v18475_v5 = vadd.f32 %v5339_v8, %v18258_v37  ;;  %v14163_v58 = vpop.f32.mrb[83].mxu1 }
 0x6d2   :  { %14293 = vmatmul.mubr.msk.bf16.gmra.mrb[188].mxu1 %vm93_vm0, %v5731_v60 }
 0x6d3   :  { %14296 = vmatprep.mubr.msk.bf16.mxu1 %vm15736_vm2, %v20392_v62 }
 0x6d5   :  { %v5344_v38 = vpop.f32.mrb[84].mxu1 }
 0x6d6   :  { %v18481_v43 = vadd.f32 %v5344_v38, %v18265_v48  ;;  %v14166_v18 = vpop.f32.mrb[85].mxu1 }
 0x6d7   :  { %v5347_v47 = vpop.f32.mrb[86].mxu1 }
 0x6d8   :  { %v18484_v39 = vadd.f32 %v5347_v47, %v18268_v57  ;;  %v14167_v37 = vpop.f32.mrb[87].mxu1 }
 0x6da   :  { %14297 = vmatmul.mubr.msk.bf16.gmra.mrb[192].mxu1 %vm93_vm0, %v5732_v59 }
 0x6db   :  { %14300 = vmatprep.mubr.msk.bf16.mxu1 %vm15736_vm2, %v20392_v62 }
 0x6dd   :  { %v5352_v31 = vpop.f32.mrb[88].mxu1 }
 0x6de   :  { %v18490_v23 = vadd.f32 %v5352_v31, %v18275_v55  ;;  %v14170_v48 = vpop.f32.mrb[89].mxu1 }
 0x6df   :  { %v5355_v49 = vpop.f32.mrb[90].mxu1 }
 0x6e0   :  { %v18493_v20 = vadd.f32 %v5355_v49, %v18278_v36  ;;  %v14171_v57 = vpop.f32.mrb[91].mxu1 }
 0x6e2   :  { %14301 = vmatmul.mubr.msk.bf16.gmra.mrb[196].mxu1 %vm93_vm0, %v5733_v28 }
 0x6e3   :  { %14304 = vmatprep.mubr.msk.bf16.mxu1 %vm15736_vm2, %v20392_v62 }
 0x6e5   :  { %v5360_v55 = vpop.f32.mrb[92].mxu1 }
 0x6e6   :  { %v18503_v42 = vadd.f32 %v5360_v55, %v18285_v40  ;;  %v14174_v36 = vpop.f32.mrb[93].mxu1 }
 0x6e7   :  { %v5363_v0 = vpop.f32.mrb[94].mxu1 }
 0x6e8   :  { %v18506_v12 = vadd.f32 %v5363_v0, %v18288_v35  ;;  %v14175_v61 = vpop.f32.mrb[95].mxu1 }
 0x6ea   :  { %14305 = vmatmul.mubr.msk.bf16.gmra.mrb[200].mxu1 %vm93_vm0, %v5734_v11 }
 0x6eb   :  { %14372 = vmatprep.mubr.msk.bf16.mxu1 %vm15736_vm2, %v20392_v62 }
 0x6ed   :  { %v5368_v8 = vpop.f32.mrb[96].mxu1 }
 0x6ee   :  { %v5409_v51 = vadd.f32 %v5368_v8, %v18294_v15  ;;  %v14178_v58 = vpop.f32.mrb[97].mxu1 }
 0x6ef   :  { %v5371_v60 = vpop.f32.mrb[98].mxu1 }
 0x6f0   :  { %v5410_v40 = vadd.f32 %v5371_v60, %v18300_v16  ;;  %v14179_v38 = vpop.f32.mrb[99].mxu1 }
 0x6f5   :  { %v5376_v29 = vpop.f32.mrb[100].mxu1 }
 0x6f6   :  { %v5411_v18 = vadd.f32 %v5376_v29, %v18310_v14  ;;  %v14182_v35 = vpop.f32.mrb[101].mxu1 }
 0x6f7   :  { %v5379_v47 = vpop.f32.mrb[102].mxu1 }
 0x6f8   :  { %v5412_v32 = vadd.f32 %v5379_v47, %v18313_v22  ;;  %v14183_v37 = vpop.f32.mrb[103].mxu1 }
 0x6fd   :  { %v5581_v59 = vpop.f32.mrb[104].mxu1 }
 0x6fe   :  { %v18516_v31 = vadd.f32 %v5581_v59, %v18374_v44  ;;  %v14208_v50 = vpop.f32.mrb[105].mxu1 }
 0x6ff   :  { %v5584_v48 = vpop.f32.mrb[106].mxu1 }
 0x700   :  { %v18519_v15 = vadd.f32 %v5584_v48, %v18377_v24  ;;  %v14209_v49 = vpop.f32.mrb[107].mxu1 }
 0x705   :  { %v5589_v16 = vpop.f32.mrb[108].mxu1 }
 0x706   :  { %v18522_v17 = vadd.f32 %v5589_v16, %v18383_v4  ;;  %v14212_v14 = vpop.f32.mrb[109].mxu1 }
 0x707   :  { %v5592_v57 = vpop.f32.mrb[110].mxu1 }
 0x708   :  { %v18525_v28 = vadd.f32 %v5592_v57, %v18386_v45  ;;  %v14213_v22 = vpop.f32.mrb[111].mxu1 }
 0x70d   :  { %v5597_v56 = vpop.f32.mrb[112].mxu1 }
 0x70e   :  { %v18528_v44 = vadd.f32 %v5597_v56, %v18392_v7  ;;  %v14216_v55 = vpop.f32.mrb[113].mxu1 }
 0x70f   :  { %v5600_v54 = vpop.f32.mrb[114].mxu1 }
 0x710   :  { %v18531_v24 = vadd.f32 %v5600_v54, %v18395_v25  ;;  %v14217_v36 = vpop.f32.mrb[115].mxu1 }
 0x715   :  { %v5605_v0 = vpop.f32.mrb[116].mxu1 }
 0x716   :  { %v18534_v4 = vadd.f32 %v5605_v0, %v18401_v3  ;;  %v14220_v30 = vpop.f32.mrb[117].mxu1 }
 0x717   :  { %v5608_v61 = vpop.f32.mrb[118].mxu1 }
 0x718   :  { %v18537_v45 = vadd.f32 %v5608_v61, %v18404_v9  ;;  %v14221_v11 = vpop.f32.mrb[119].mxu1 }
 0x71d   :  { %v5613_v8 = vpop.f32.mrb[120].mxu1 }
 0x71e   :  { %v18540_v7 = vadd.f32 %v5613_v8, %v18472_v13  ;;  %v14224_v58 = vpop.f32.mrb[121].mxu1 }
 0x71f   :  { %v5616_v60 = vpop.f32.mrb[122].mxu1  ;;  %v20451_v58 = vld [vmem:[#allocation10_spill] sm:$0xff] }
 0x720   :  { %v18543_v25 = vadd.f32 %v5616_v60, %v18475_v5  ;;  %v14225_v38 = vpop.f32.mrb[123].mxu1 }
 0x725   :  { %v5621_v29 = vpop.f32.mrb[124].mxu1 }
 0x726   :  { %v18546_v3 = vadd.f32 %v5621_v29, %v18481_v43  ;;  %v14228_v35 = vpop.f32.mrb[125].mxu1 }
 0x727   :  { %v5624_v47 = vpop.f32.mrb[126].mxu1 }
 0x728   :  { %v18549_v9 = vadd.f32 %v5624_v47, %v18484_v39  ;;  %v14229_v37 = vpop.f32.mrb[127].mxu1 }
 0x72d   :  { %v5629_v59 = vpop.f32.mrb[128].mxu1 }
 0x72e   :  { %v18552_v13 = vadd.f32 %v5629_v59, %v18490_v23  ;;  %v14232_v50 = vpop.f32.mrb[129].mxu1 }
 0x72f   :  { %v5632_v48 = vpop.f32.mrb[130].mxu1  ;;  %v20453_v50 = vld [vmem:[#allocation24_spill] sm:$0xff] }
 0x730   :  { %v18555_v5 = vadd.f32 %v5632_v48, %v18493_v20  ;;  %v14233_v49 = vpop.f32.mrb[131].mxu1 }
 0x735   :  { %v5637_v16 = vpop.f32.mrb[132].mxu1 }
 0x736   :  { %v18558_v43 = vadd.f32 %v5637_v16, %v18503_v42  ;;  %v14236_v14 = vpop.f32.mrb[133].mxu1 }
 0x737   :  { %v5640_v57 = vpop.f32.mrb[134].mxu1  ;;  %v6401_v14 = vpop.permute.xlu1 %6400 }
 0x738   :  { %v18561_v39 = vadd.f32 %v5640_v57, %v18506_v12  ;;  %v14237_v22 = vpop.f32.mrb[135].mxu1  ;;  %v6246_v12 = vsub.s32 1, %v20451_v58 }
 0x73d   :  { %v5645_v56 = vpop.f32.mrb[136].mxu1 }
 0x73e   :  { %v18563_v55 = vadd.f32 %v5645_v56, %v5409_v51  ;;  %v14240_v23 = vpop.f32.mrb[137].mxu1  ;;  %v15716_v51 = vld [vmem:[%s20368_s2] sm:$0xff] }
 0x73f   :  { %v5648_v54 = vpop.f32.mrb[138].mxu1 }
 0x740   :  { %v18565_v36 = vadd.f32 %v5648_v54, %v5410_v40  ;;  %v14241_v20 = vpop.f32.mrb[139].mxu1  ;;  %v18576_v40 = vrot.slane %v15716_v51, %v6246_v12  ;;  %v20455_v51 = vld [vmem:[#allocation26_spill] sm:$0xff] }
 0x745   :  { %v5653_v0 = vpop.f32.mrb[140].mxu1 }
 0x746   :  { %v18567_v30 = vadd.f32 %v5653_v0, %v5411_v18  ;;  %v14244_v61 = vpop.f32.mrb[141].mxu1  ;;  %v20452_v18 = vld [vmem:[#allocation23_spill] sm:$0xff] }
 0x747   :  { %v5656_v42 = vpop.f32.mrb[142].mxu1  ;;  %v20454_v61 = vld [vmem:[#allocation25_spill] sm:$0xff] }
 0x748   :  { %v18569_v11 = vadd.f32 %v5656_v42, %v5412_v32  ;;  %v14245_v8 = vpop.f32.mrb[143].mxu1 }
 0x74d   :  { %v5818_v60 = vpop.f32.mrb[144].mxu1 }
 0x74e   :  { %v5937_v38 = vadd.f32 %v5818_v60, %v18321_v33  ;;  %v14250_v29 = vpop.f32.mrb[145].mxu1 }
 0x74f   :  { %v5821_v35 = vpop.f32.mrb[146].mxu1 }
 0x750   :  { %v6214_v47 = vadd.f32 %v20452_v18, %v5937_v38  ;;  %v5938_v37 = vadd.f32 %v5821_v35, %v18325_v63  ;;  %v14251_v32 = vpop.f32.mrb[147].mxu1  ;;  %v6406_v63 = vpop.permute.xlu0 %6405 }
 0x752   :  { %v6248_v59 = vadd.f32 %v18576_v40, %v6214_v47  ;;  %v6215_v48 = vadd.f32 %v20453_v50, %v5938_v37  ;;  %v6411_v47 = vpop.permute.xlu1 %6410 }
 0x754   :  { %vm6278_vm0 = vcmp.ge.f32.partialorder %v6248_v59, 0.0  ;;  %v6308_v49 = vmul.f32 0.01, %v6248_v59  ;;  %v6249_v33 = vadd.f32 %v18576_v40, %v6215_v48 }
 0x755   :  { %v5826_v16 = vpop.f32.mrb[148].mxu1 }
 0x756   :  { %v6338_v57 = vsel %vm6278_vm0, %v6248_v59, %v6308_v49  ;;  %vm6279_vm7 = vcmp.ge.f32.partialorder %v6249_v33, 0.0  ;;  %v6309_v22 = vmul.f32 0.01, %v6249_v33  ;;  %v5939_v56 = vadd.f32 %v5826_v16, %v18332_v10  ;;  %v14254_v23 = vpop.f32.mrb[149].mxu1  ;;  %v6416_v49 = vpop.permute.xlu0 %6415  ;;  %v20456_v16 = vld [vmem:[#allocation27_spill] sm:$0xff] }
 0x757   :  { %v6548_v54 = vmul.f32 %v6401_v14, %v6338_v57  ;;  %v5829_v20 = vpop.f32.mrb[150].mxu1 }
 0x758   :  { %v6339_v0 = vsel %vm6279_vm7, %v6249_v33, %v6309_v22  ;;  %v6216_v42 = vadd.f32 %v20454_v61, %v5939_v56  ;;  %v5940_v8 = vadd.f32 %v5829_v20, %v18336_v2  ;;  %v14255_v12 = vpop.f32.mrb[151].mxu1 }
 0x759   :  { %6578 = vst.msk [vmem:[#allocation4 + $0x8] sm:$0xff] %vm132_vm6, %v6548_v54  ;;  %v6549_v60 = vmul.f32 %v6406_v63, %v6339_v0  ;;  %v15656_v54 = vld [vmem:[%s20372_s6 + $0x10] sm:$0xff]   ;;  %v15657_v12 = vld [vmem:[%s20372_s6 + $0x18] sm:$0xff]  }
 0x75a   :  { %v6250_v38 = vadd.f32 %v18576_v40, %v6216_v42  ;;  %v6217_v29 = vadd.f32 %v20455_v51, %v5940_v8  ;;  %v20457_v63 = vld [vmem:[#allocation28_spill] sm:$0xff] }
 0x75b   :  { %6579 = vst.msk [vmem:[#allocation4 + $0x10] sm:$0xff] %vm132_vm6, %v6549_v60 }
 0x75c   :  { %vm6280_vm8 = vcmp.ge.f32.partialorder %v6250_v38, 0.0  ;;  %v6310_v10 = vmul.f32 0.01, %v6250_v38  ;;  %v6251_v35 = vadd.f32 %v18576_v40, %v6217_v29  ;;  %v6421_v29 = vpop.permute.xlu1 %6420 }
 0x75d   :  { %v5834_v18 = vpop.f32.mrb[152].mxu1 }
 0x75e   :  { %v6340_v37 = vsel %vm6280_vm8, %v6250_v38, %v6310_v10  ;;  %vm6281_vm9 = vcmp.ge.f32.partialorder %v6251_v35, 0.0  ;;  %v6311_v32 = vmul.f32 0.01, %v6251_v35  ;;  %v5941_v2 = vadd.f32 %v5834_v18, %v18343_v52  ;;  %v14258_v59 = vpop.f32.mrb[153].mxu1 }
 0x75f   :  { %v6550_v50 = vmul.f32 %v6411_v47, %v6340_v37  ;;  %v5837_v48 = vpop.f32.mrb[154].mxu1 }
 0x760   :  { %v6341_v33 = vsel %vm6281_vm9, %v6251_v35, %v6311_v32  ;;  %v6218_v14 = vadd.f32 %v20456_v16, %v5941_v2  ;;  %v5942_v57 = vadd.f32 %v5837_v48, %v18347_v26  ;;  %v14259_v22 = vpop.f32.mrb[155].mxu1  ;;  %v6648_v56 = vld [vmem:[#allocation4 + $0x8] sm:$0xff]  ;;  %v6426_v2 = vpop.permute.xlu0 %6425 }
 0x761   :  { %6580 = vst.msk [vmem:[#allocation4 + $0x18] sm:$0xff] %vm132_vm6, %v6550_v50  ;;  %v6551_v23 = vmul.f32 %v6416_v49, %v6341_v33  ;;  %v6608_v61 = vld [vmem:[#allocation4 + $0x6] sm:$0xff] }
 0x762   :  { %v6649_v20 = vld [vmem:[#allocation4 + $0x10] sm:$0xff]  ;;  %v6252_v52 = vadd.f32 %v18576_v40, %v6218_v14  ;;  %v6219_v0 = vadd.f32 %v20457_v63, %v5942_v57  ;;  %v20458_v50 = vld [vmem:[#allocation29_spill] sm:$0xff]  ;;  %v20459_v57 = vld [vmem:[#allocation30_spill] sm:$0xff] }
 0x763   :  { %v6609_v42 = vld [vmem:[#allocation4 + $0xe] sm:$0xff]  ;;  %6581 = vst.msk [vmem:[#allocation4 + $0x20] sm:$0xff] %vm132_vm6, %v6551_v23  ;;  %v6673_v8 = vpack.c.bf16 %v6649_v20, %v6648_v56 }
 0x764   :  { %v6633_v26 = vpack.c.bf16 %v6609_v42, %v6608_v61  ;;  %vm6282_vm10 = vcmp.ge.f32.partialorder %v6252_v52, 0.0  ;;  %v6312_v60 = vmul.f32 0.01, %v6252_v52  ;;  %v6253_v38 = vadd.f32 %v18576_v40, %v6219_v0  ;;  %v6431_v61 = vpop.permute.xlu1 %6430 }
 0x765   :  { %v5842_v51 = vpop.f32.mrb[156].mxu1  ;;  %14373 = vmatmul.mubr.msk.bf16.vlgmr.msra.gmra.mrb[204].mxu1 %vm132_vm6, %v6673_v8 }
 0x766   :  { %14427 = vmatmul.mubr.msk.bf16.vlgmr.msra.gmra.mrb[148].mxu0 %vm132_vm6, %v6633_v26  ;;  %v6342_v10 = vsel %vm6282_vm10, %v6252_v52, %v6312_v60  ;;  %vm6283_vm11 = vcmp.ge.f32.partialorder %v6253_v38, 0.0  ;;  %v6313_v35 = vmul.f32 0.01, %v6253_v38  ;;  %v5943_v18 = vadd.f32 %v5842_v51, %v18354_v41  ;;  %14479 = vmatpush3.bf16.msra.mxu1 %v15656_v54  ;;  %v14262_v47 = vpop.f32.mrb[157].mxu1  ;;  %v6436_v51 = vpop.permute.xlu0 %6435 }
 0x767   :  { %14376 = vmatprep.mubr.msk.bf16.mxu1 %vm15736_vm2, %v20392_v62  ;;  %v6552_v37 = vmul.f32 %v6421_v29, %v6342_v10  ;;  %v5845_v32 = vpop.f32.mrb[158].mxu1  ;;  %14430 = vmatprep.mubr.msk.bf16.mxu0 %vm15736_vm2, %v20392_v62  ;;  %v20460_v10 = vld [vmem:[#allocation31_spill] sm:$0xff] }
 0x768   :  { %14533 = vmatpush3.bf16.msra.mxu0 %v15657_v12  ;;  %v6343_v59 = vsel %vm6283_vm11, %v6253_v38, %v6313_v35  ;;  %v6220_v48 = vadd.f32 %v20458_v50, %v5943_v18  ;;  %v5944_v49 = vadd.f32 %v5845_v32, %v18358_v46  ;;  %v14263_v33 = vpop.f32.mrb[159].mxu1  ;;  %14586 = vmatprep.subr.bf16.mxu1 %v20392_v62  ;;  %v6650_v16 = vld [vmem:[#allocation4 + $0x18] sm:$0xff] }
 0x769   :  { %14640 = vmatprep.subr.bf16.mxu0 %v20392_v62  ;;  %6582 = vst.msk [vmem:[#allocation4 + $0x28] sm:$0xff] %vm132_vm6, %v6552_v37  ;;  %v6553_v41 = vmul.f32 %v6426_v2, %v6343_v59  ;;  %v6610_v23 = vld [vmem:[#allocation4 + $0x16] sm:$0xff] }
 0x76a   :  { %v6254_v14 = vadd.f32 %v18576_v40, %v6220_v48  ;;  %v6221_v22 = vadd.f32 %v20459_v57, %v5944_v49  ;;  %v6651_v56 = vld [vmem:[#allocation4 + $0x20] sm:$0xff]  ;;  %v20461_v48 = vld [vmem:[#allocation32_spill] sm:$0xff] }
 0x76b   :  { %v18619_v54 = vld [vmem:[#allocation4 + $0x1e] sm:$0xff]  ;;  %6583 = vst.msk [vmem:[#allocation4 + $0x30] sm:$0xff] %vm132_vm6, %v6553_v41  ;;  %v6674_v46 = vpack.c.bf16 %v6651_v56, %v6650_v16 }
 0x76c   :  { %v6634_v20 = vpack.c.bf16 %v18619_v54, %v6610_v23  ;;  %vm6284_vm12 = vcmp.ge.f32.partialorder %v6254_v14, 0.0  ;;  %v6314_v52 = vmul.f32 0.01, %v6254_v14  ;;  %v6255_v63 = vadd.f32 %v18576_v40, %v6221_v22  ;;  %v6441_v22 = vpop.permute.xlu1 %6440 }
 0x76d   :  { %v5850_v0 = vpop.f32.mrb[160].mxu1  ;;  %14377 = vmatmul.mubr.msk.bf16.gmra.mrb[208].mxu1 %vm132_vm6, %v6674_v46 }
 0x76e   :  { %14431 = vmatmul.mubr.msk.bf16.gmra.mrb[152].mxu0 %vm132_vm6, %v6634_v20  ;;  %v6344_v42 = vsel %vm6284_vm12, %v6254_v14, %v6314_v52  ;;  %vm6285_vm13 = vcmp.ge.f32.partialorder %v6255_v63, 0.0  ;;  %v6315_v8 = vmul.f32 0.01, %v6255_v63  ;;  %v5945_v26 = vadd.f32 %v5850_v0, %v18365_v53  ;;  %v14266_v12 = vpop.f32.mrb[161].mxu1  ;;  %14380 = vmatprep.mubr.msk.bf16.mxu1 %vm15736_vm2, %v20392_v62  ;;  %v6446_v0 = vpop.permute.xlu0 %6445 }
 0x76f   :  { %14434 = vmatprep.mubr.msk.bf16.mxu0 %vm15736_vm2, %v20392_v62  ;;  %v6554_v60 = vmul.f32 %v6431_v61, %v6344_v42  ;;  %v5853_v38 = vpop.f32.mrb[162].mxu1 }
 0x770   :  { %v6345_v29 = vsel %vm6285_vm13, %v6255_v63, %v6315_v8  ;;  %v6222_v35 = vadd.f32 %v20460_v10, %v5945_v26  ;;  %v5946_v18 = vadd.f32 %v5853_v38, %v18369_v19  ;;  %v14267_v47 = vpop.f32.mrb[163].mxu1  ;;  %v18633_v37 = vld [vmem:[#allocation4 + $0x26] sm:$0xff] }
 0x771   :  { %6584 = vst.msk [vmem:[#allocation4 + $0x38] sm:$0xff] %vm132_vm6, %v6554_v60  ;;  %v6555_v53 = vmul.f32 %v6436_v51, %v6345_v29  ;;  %v7813_v32 = vpack.c.bf16 %v18633_v37, %v18619_v54  ;;  %v6652_v33 = vld [vmem:[#allocation4 + $0x28] sm:$0xff]  ;;  %v20462_v26 = vld [vmem:[#allocation33_spill] sm:$0xff] }
 0x772   :  { %v18638_v2 = vld [vmem:[#allocation4 + $0x2e] sm:$0xff]  ;;  %v6256_v50 = vadd.f32 %v18576_v40, %v6222_v35  ;;  %v6223_v49 = vadd.f32 %v20461_v48, %v5946_v18 }
 0x773   :  { %v18640_v59 = vld [vmem:[#allocation4 + $0x30] sm:$0xff]  ;;  %6585 = vst.msk [vmem:[#allocation4 + $0x40] sm:$0xff] %vm132_vm6, %v6555_v53  ;;  %v6635_v41 = vpack.c.bf16 %v18638_v2, %v18633_v37  ;;  %v20463_v47 = vld [vmem:[#allocation34_spill] sm:$0xff] }
 0x774   :  { %v6675_v19 = vpack.c.bf16 %v18640_v59, %v6652_v33  ;;  %vm6286_vm14 = vcmp.ge.f32.partialorder %v6256_v50, 0.0  ;;  %v6316_v16 = vmul.f32 0.01, %v6256_v50  ;;  %v6257_v14 = vadd.f32 %v18576_v40, %v6223_v49 }
 0x775   :  { %v5858_v57 = vpop.f32.mrb[164].mxu1 }
 0x776   :  { %14381 = vmatmul.mubr.msk.bf16.gmra.mrb[212].mxu1 %vm132_vm6, %v6675_v19  ;;  %14435 = vmatmul.mubr.msk.bf16.gmra.mrb[156].mxu0 %vm132_vm6, %v6635_v41  ;;  %v6346_v56 = vsel %vm6286_vm14, %v6256_v50, %v6316_v16  ;;  %vm6287_vm15 = vcmp.ge.f32.partialorder %v6257_v14, 0.0  ;;  %v6317_v23 = vmul.f32 0.01, %v6257_v14  ;;  %v5947_v46 = vadd.f32 %v5858_v57, %v18516_v31  ;;  %v14270_v20 = vpop.f32.mrb[165].mxu1 }
 0x777   :  { %14384 = vmatprep.mubr.msk.bf16.mxu1 %vm15736_vm2, %v20392_v62  ;;  %14438 = vmatprep.mubr.msk.bf16.mxu0 %vm15736_vm2, %v20392_v62  ;;  %v6556_v52 = vmul.f32 %v6441_v22, %v6346_v56  ;;  %v5861_v63 = vpop.f32.mrb[166].mxu1 }
 0x778   :  { %v18656_v61 = vld [vmem:[#allocation4 + $0x36] sm:$0xff]  ;;  %v6347_v8 = vsel %vm6287_vm15, %v6257_v14, %v6317_v23  ;;  %v6224_v12 = vadd.f32 %v20462_v26, %v5947_v46  ;;  %v5948_v31 = vadd.f32 %v5861_v63, %v18519_v15  ;;  %v14271_v60 = vpop.f32.mrb[167].mxu1  ;;  %v6451_v14 = vpop.permute.xlu1 %6450 }
 0x779   :  { %v18658_v42 = vld [vmem:[#allocation4 + $0x38] sm:$0xff]  ;;  %6586 = vst.msk [vmem:[#allocation4 + $0x48] sm:$0xff] %vm132_vm6, %v6556_v52  ;;  %v6557_v51 = vmul.f32 %v6446_v0, %v6347_v8  ;;  %v8059_v29 = vpack.c.bf16 %v18656_v61, %v18638_v2  ;;  %v6456_v52 = vpop.permute.xlu0 %6455  ;;  %v20464_v0 = vld [vmem:[#allocation35_spill] sm:$0xff] }
 0x77a   :  { %v18663_v38 = vld [vmem:[#allocation4 + $0x32] sm:$0xff]  ;;  %v8305_v10 = vpack.c.bf16 %v18658_v42, %v18640_v59  ;;  %v18670_v35 = vld [vmem:[#allocation4 + $0x3a] sm:$0xff]  ;;  %v6258_v18 = vadd.f32 %v18576_v40, %v6224_v12  ;;  %v6225_v15 = vadd.f32 %v20463_v47, %v5948_v31 }
 0x77b   :  { %v6655_v53 = vld [vmem:[#allocation4 + $0x40] sm:$0xff]  ;;  %6587 = vst.msk [vmem:[#allocation4 + $0x50] sm:$0xff] %vm132_vm6, %v6557_v51  ;;  %v8551_v33 = vpack.c.bf16 %v18670_v35, %v18663_v38 }
 0x77c   :  { %v18674_v50 = vld [vmem:[#allocation4 + $0x3e] sm:$0xff]  ;;  %v6676_v48 = vpack.c.bf16 %v6655_v53, %v18658_v42  ;;  %vm6288_vm4 = vcmp.ge.f32.partialorder %v6258_v18, 0.0  ;;  %v6318_v19 = vmul.f32 0.01, %v6258_v18  ;;  %v6259_v41 = vadd.f32 %v18576_v40, %v6225_v15 }
 0x77d   :  { %v6636_v49 = vpack.c.bf16 %v18674_v50, %v18656_v61  ;;  %v5866_v16 = vpop.f32.mrb[168].mxu1 }
 0x77e   :  { %14385 = vmatmul.mubr.msk.bf16.gmra.mrb[216].mxu1 %vm132_vm6, %v6676_v48  ;;  %v6348_v57 = vsel %vm6288_vm4, %v6258_v18, %v6318_v19  ;;  %vm6289_vm5 = vcmp.ge.f32.partialorder %v6259_v41, 0.0  ;;  %v6319_v22 = vmul.f32 0.01, %v6259_v41  ;;  %v5949_v56 = vadd.f32 %v5866_v16, %v18522_v17  ;;  %v14274_v23 = vpop.f32.mrb[169].mxu1  ;;  %v20465_v18 = vld [vmem:[#allocation36_spill] sm:$0xff] }
 0x77f   :  { %14439 = vmatmul.mubr.msk.bf16.gmra.mrb[160].mxu0 %vm132_vm6, %v6636_v49  ;;  %14388 = vmatprep.mubr.msk.bf16.mxu1 %vm15736_vm2, %v20392_v62  ;;  %v6558_v46 = vmul.f32 %v6451_v14, %v6348_v57  ;;  %v5869_v20 = vpop.f32.mrb[170].mxu1  ;;  %v6461_v14 = vpop.permute.xlu1 %6460 }
 0x780   :  { %14442 = vmatprep.mubr.msk.bf16.mxu0 %vm15736_vm2, %v20392_v62  ;;  %v6349_v63 = vsel %vm6289_vm5, %v6259_v41, %v6319_v22  ;;  %v6226_v8 = vadd.f32 %v20464_v0, %v5949_v56  ;;  %v5950_v26 = vadd.f32 %v5869_v20, %v18525_v28  ;;  %v14275_v12 = vpop.f32.mrb[171].mxu1  ;;  %v18692_v31 = vld [vmem:[#allocation4 + $0x46] sm:$0xff] }
 0x781   :  { %6588 = vst.msk [vmem:[#allocation4 + $0x58] sm:$0xff] %vm132_vm6, %v6558_v46  ;;  %v6559_v17 = vmul.f32 %v6456_v52, %v6349_v63  ;;  %v7815_v60 = vpack.c.bf16 %v18692_v31, %v18674_v50  ;;  %v6656_v15 = vld [vmem:[#allocation4 + $0x48] sm:$0xff]  ;;  %v6466_v52 = vpop.permute.xlu0 %6465  ;;  %v20466_v0 = vld [vmem:[#allocation37_spill] sm:$0xff] }
 0x782   :  { %v6260_v51 = vadd.f32 %v18576_v40, %v6226_v8  ;;  %v6227_v47 = vadd.f32 %v20465_v18, %v5950_v26  ;;  %v6657_v53 = vld [vmem:[#allocation4 + $0x50] sm:$0xff]  ;;  %v8283_v2 = vld [vmem:[#allocation4 + $0x48] sm:$0xff] }
 0x783   :  { %v18699_v48 = vld [vmem:[#allocation4 + $0x4e] sm:$0xff]  ;;  %6589 = vst.msk [vmem:[#allocation4 + $0x60] sm:$0xff] %vm132_vm6, %v6559_v17  ;;  %v6677_v28 = vpack.c.bf16 %v6657_v53, %v6656_v15 }
 0x784   :  { %v6637_v49 = vpack.c.bf16 %v18699_v48, %v18692_v31  ;;  %vm6290_vm0 = vcmp.ge.f32.partialorder %v6260_v51, 0.0  ;;  %v6320_v19 = vmul.f32 0.01, %v6260_v51  ;;  %v6261_v41 = vadd.f32 %v18576_v40, %v6227_v47  ;;  %v20467_v47 = vld [vmem:[#allocation38_spill] sm:$0xff] }
 0x785   :  { %v5874_v16 = vpop.f32.mrb[172].mxu1 }
 0x786   :  { %14389 = vmatmul.mubr.msk.bf16.gmra.mrb[220].mxu1 %vm132_vm6, %v6677_v28  ;;  %v6350_v57 = vsel %vm6290_vm0, %v6260_v51, %v6320_v19  ;;  %vm6291_vm7 = vcmp.ge.f32.partialorder %v6261_v41, 0.0  ;;  %v6321_v22 = vmul.f32 0.01, %v6261_v41  ;;  %v5951_v56 = vadd.f32 %v5874_v16, %v18528_v44  ;;  %v14278_v23 = vpop.f32.mrb[173].mxu1 }
 0x787   :  { %14443 = vmatmul.mubr.msk.bf16.gmra.mrb[164].mxu0 %vm132_vm6, %v6637_v49  ;;  %14392 = vmatprep.mubr.msk.bf16.mxu1 %vm15736_vm2, %v20392_v62  ;;  %v6560_v46 = vmul.f32 %v6461_v14, %v6350_v57  ;;  %v5877_v20 = vpop.f32.mrb[174].mxu1  ;;  %v6471_v57 = vpop.permute.xlu1 %6470 }
 0x788   :  { %14446 = vmatprep.mubr.msk.bf16.mxu0 %vm15736_vm2, %v20392_v62  ;;  %v6351_v63 = vsel %vm6291_vm7, %v6261_v41, %v6321_v22  ;;  %v6228_v8 = vadd.f32 %v20466_v0, %v5951_v56  ;;  %v5952_v26 = vadd.f32 %v5877_v20, %v18531_v24  ;;  %v14279_v12 = vpop.f32.mrb[175].mxu1  ;;  %v18714_v17 = vld [vmem:[#allocation4 + $0x56] sm:$0xff] }
 0x789   :  { %6590 = vst.msk [vmem:[#allocation4 + $0x68] sm:$0xff] %vm132_vm6, %v6560_v46  ;;  %v6561_v44 = vmul.f32 %v6466_v52, %v6351_v63  ;;  %v7816_v51 = vpack.c.bf16 %v18714_v17, %v18699_v48  ;;  %v6658_v53 = vld [vmem:[#allocation4 + $0x58] sm:$0xff]  ;;  %v6476_v63 = vpop.permute.xlu0 %6475 }
 0x78a   :  { %v6262_v18 = vadd.f32 %v18576_v40, %v6228_v8  ;;  %v6229_v15 = vadd.f32 %v20467_v47, %v5952_v26  ;;  %v6659_v28 = vld [vmem:[#allocation4 + $0x60] sm:$0xff]  ;;  %v20468_v8 = vld [vmem:[#allocation39_spill] sm:$0xff] }
 0x78b   :  { %v18721_v49 = vld [vmem:[#allocation4 + $0x5e] sm:$0xff]  ;;  %6591 = vst.msk [vmem:[#allocation4 + $0x70] sm:$0xff] %vm132_vm6, %v6561_v44  ;;  %v6678_v24 = vpack.c.bf16 %v6659_v28, %v6658_v53 }
 0x78c   :  { %v6638_v19 = vpack.c.bf16 %v18721_v49, %v18714_v17  ;;  %vm6292_vm8 = vcmp.ge.f32.partialorder %v6262_v18, 0.0  ;;  %v6322_v41 = vmul.f32 0.01, %v6262_v18  ;;  %v6263_v16 = vadd.f32 %v18576_v40, %v6229_v15  ;;  %v20469_v53 = vld [vmem:[#allocation40_spill] sm:$0xff] }
 0x78d   :  { %v5882_v14 = vpop.f32.mrb[176].mxu1 }
 0x78e   :  { %14393 = vmatmul.mubr.msk.bf16.gmra.mrb[224].mxu1 %vm132_vm6, %v6678_v24  ;;  %v6352_v22 = vsel %vm6292_vm8, %v6262_v18, %v6322_v41  ;;  %vm6293_vm9 = vcmp.ge.f32.partialorder %v6263_v16, 0.0  ;;  %v6323_v56 = vmul.f32 0.01, %v6263_v16  ;;  %v5953_v23 = vadd.f32 %v5882_v14, %v18534_v4  ;;  %v14282_v46 = vpop.f32.mrb[177].mxu1 }
 0x78f   :  { %14447 = vmatmul.mubr.msk.bf16.gmra.mrb[168].mxu0 %vm132_vm6, %v6638_v19  ;;  %14396 = vmatprep.mubr.msk.bf16.mxu1 %vm15736_vm2, %v20392_v62  ;;  %v6562_v20 = vmul.f32 %v6471_v57, %v6352_v22  ;;  %v5885_v52 = vpop.f32.mrb[178].mxu1 }
 0x790   :  { %14450 = vmatprep.mubr.msk.bf16.mxu0 %vm15736_vm2, %v20392_v62  ;;  %v6353_v0 = vsel %vm6293_vm9, %v6263_v16, %v6323_v56  ;;  %v6230_v26 = vadd.f32 %v20468_v8, %v5953_v23  ;;  %v5954_v12 = vadd.f32 %v5885_v52, %v18537_v45  ;;  %v14283_v44 = vpop.f32.mrb[179].mxu1  ;;  %v18736_v18 = vld [vmem:[#allocation4 + $0x66] sm:$0xff]  ;;  %v6481_v56 = vpop.permute.xlu1 %6480 }
 0x791   :  { %6592 = vst.msk [vmem:[#allocation4 + $0x78] sm:$0xff] %vm132_vm6, %v6562_v20  ;;  %v6563_v4 = vmul.f32 %v6476_v63, %v6353_v0  ;;  %v7817_v47 = vpack.c.bf16 %v18736_v18, %v18721_v49  ;;  %v6660_v24 = vld [vmem:[#allocation4 + $0x68] sm:$0xff]  ;;  %v6486_v8 = vpop.permute.xlu0 %6485 }
 0x792   :  { %v6264_v15 = vadd.f32 %v18576_v40, %v6230_v26  ;;  %v6231_v28 = vadd.f32 %v20469_v53, %v5954_v12  ;;  %v6661_v19 = vld [vmem:[#allocation4 + $0x70] sm:$0xff]  ;;  %v20470_v12 = vld [vmem:[#allocation41_spill] sm:$0xff] }
 0x793   :  { %v18743_v41 = vld [vmem:[#allocation4 + $0x6e] sm:$0xff]  ;;  %6593 = vst.msk [vmem:[#allocation4 + $0x80] sm:$0xff] %vm132_vm6, %v6563_v4  ;;  %v6679_v45 = vpack.c.bf16 %v6661_v19, %v6660_v24 }
 0x794   :  { %v6639_v16 = vpack.c.bf16 %v18743_v41, %v18736_v18  ;;  %vm6294_vm10 = vcmp.ge.f32.partialorder %v6264_v15, 0.0  ;;  %v6324_v14 = vmul.f32 0.01, %v6264_v15  ;;  %v6265_v57 = vadd.f32 %v18576_v40, %v6231_v28  ;;  %v20471_v19 = vld [vmem:[#allocation42_spill] sm:$0xff] }
 0x795   :  { %v5890_v22 = vpop.f32.mrb[180].mxu1 }
 0x796   :  { %14397 = vmatmul.mubr.msk.bf16.gmra.mrb[228].mxu1 %vm132_vm6, %v6679_v45  ;;  %v6354_v23 = vsel %vm6294_vm10, %v6264_v15, %v6324_v14  ;;  %vm6295_vm11 = vcmp.ge.f32.partialorder %v6265_v57, 0.0  ;;  %v6325_v46 = vmul.f32 0.01, %v6265_v57  ;;  %v5955_v20 = vadd.f32 %v5890_v22, %v18540_v7  ;;  %v14286_v52 = vpop.f32.mrb[181].mxu1 }
 0x797   :  { %14451 = vmatmul.mubr.msk.bf16.gmra.mrb[172].mxu0 %vm132_vm6, %v6639_v16  ;;  %14400 = vmatprep.mubr.msk.bf16.mxu1 %vm15736_vm2, %v20392_v62  ;;  %v6564_v63 = vmul.f32 %v6481_v56, %v6354_v23  ;;  %v5893_v0 = vpop.f32.mrb[182].mxu1 }
 0x798   :  { %14454 = vmatprep.mubr.msk.bf16.mxu0 %vm15736_vm2, %v20392_v62  ;;  %v6355_v26 = vsel %vm6295_vm11, %v6265_v57, %v6325_v46  ;;  %v6232_v44 = vadd.f32 %v20470_v12, %v5955_v20  ;;  %v5956_v4 = vadd.f32 %v5893_v0, %v18543_v25  ;;  %v14287_v15 = vpop.f32.mrb[183].mxu1  ;;  %v18758_v53 = vld [vmem:[#allocation4 + $0x76] sm:$0xff]  ;;  %v6491_v20 = vpop.permute.xlu1 %6490  ;;  %vm166_vm11 = vcmask 195584  }
 0x799   :  { %6594 = vst.msk [vmem:[#allocation4 + $0x88] sm:$0xff] %vm132_vm6, %v6564_v63  ;;  %v6565_v7 = vmul.f32 %v6486_v8, %v6355_v26  ;;  %v7818_v28 = vpack.c.bf16 %v18758_v53, %v18743_v41  ;;  %v6662_v16 = vld [vmem:[#allocation4 + $0x78] sm:$0xff]  ;;  %v20472_v15 = vld [vmem:[#allocation43_spill] sm:$0xff] }
 0x79a   :  { %v6266_v24 = vadd.f32 %v18576_v40, %v6232_v44  ;;  %v6233_v45 = vadd.f32 %v20471_v19, %v5956_v4  ;;  %v6663_v14 = vld [vmem:[#allocation4 + $0x80] sm:$0xff]  ;;  %v6496_v44 = vpop.permute.xlu0 %6495  ;;  %168 = vst.msk [vmem:[#allocation5 + $0x8] sm:$0xff] %vm166_vm11, %v20392_v62  ;;  %167 = vst.msk [vmem:[#allocation5] sm:$0xff] %vm166_vm11, %v20392_v62 }
 0x79b   :  { %v18765_v57 = vld [vmem:[#allocation4 + $0x7e] sm:$0xff]  ;;  %6595 = vst.msk [vmem:[#allocation4 + $0x90] sm:$0xff] %vm132_vm6, %v6565_v7  ;;  %v6680_v25 = vpack.c.bf16 %v6663_v14, %v6662_v16 }
 0x79c   :  { %v6640_v22 = vpack.c.bf16 %v18765_v57, %v18758_v53  ;;  %vm6296_vm12 = vcmp.ge.f32.partialorder %v6266_v24, 0.0  ;;  %v6326_v56 = vmul.f32 0.01, %v6266_v24  ;;  %v6267_v23 = vadd.f32 %v18576_v40, %v6233_v45  ;;  %169 = vst.msk [vmem:[#allocation5 + $0x10] sm:$0xff] %vm166_vm11, %v20392_v62  ;;  %170 = vst.msk [vmem:[#allocation5 + $0x18] sm:$0xff] %vm166_vm11, %v20392_v62 }
 0x79d   :  { %v5898_v46 = vpop.f32.mrb[184].mxu1  ;;  %171 = vst.msk [vmem:[#allocation5 + $0x20] sm:$0xff] %vm166_vm11, %v20392_v62  ;;  %172 = vst.msk [vmem:[#allocation5 + $0x28] sm:$0xff] %vm166_vm11, %v20392_v62 }
 0x79e   :  { %14401 = vmatmul.mubr.msk.bf16.gmra.mrb[232].mxu1 %vm132_vm6, %v6680_v25  ;;  %v6356_v52 = vsel %vm6296_vm12, %v6266_v24, %v6326_v56  ;;  %vm6297_vm13 = vcmp.ge.f32.partialorder %v6267_v23, 0.0  ;;  %v6327_v63 = vmul.f32 0.01, %v6267_v23  ;;  %v5957_v0 = vadd.f32 %v5898_v46, %v18546_v3  ;;  %v14290_v8 = vpop.f32.mrb[185].mxu1  ;;  %v20473_v25 = vld [vmem:[#allocation44_spill] sm:$0xff]  ;;  %173 = vst.msk [vmem:[#allocation5 + $0x30] sm:$0xff] %vm166_vm11, %v20392_v62 }
 0x79f   :  { %14455 = vmatmul.mubr.msk.bf16.gmra.mrb[176].mxu0 %vm132_vm6, %v6640_v22  ;;  %14404 = vmatprep.mubr.msk.bf16.mxu1 %vm15736_vm2, %v20392_v62  ;;  %v6566_v26 = vmul.f32 %v6491_v20, %v6356_v52  ;;  %v5901_v12 = vpop.f32.mrb[186].mxu1  ;;  %v6501_v8 = vpop.permute.xlu1 %6500  ;;  %174 = vst.msk [vmem:[#allocation5 + $0x38] sm:$0xff] %vm166_vm11, %v20392_v62  ;;  %175 = vst.msk [vmem:[#allocation5 + $0x40] sm:$0xff] %vm166_vm11, %v20392_v62 }
 0x7a0   :  { %14458 = vmatprep.mubr.msk.bf16.mxu0 %vm15736_vm2, %v20392_v62  ;;  %v6357_v4 = vsel %vm6297_vm13, %v6267_v23, %v6327_v63  ;;  %v6234_v7 = vadd.f32 %v20472_v15, %v5957_v0  ;;  %v5958_v19 = vadd.f32 %v5901_v12, %v18549_v9  ;;  %v14291_v24 = vpop.f32.mrb[187].mxu1  ;;  %v18780_v45 = vld [vmem:[#allocation4 + $0x86] sm:$0xff]  ;;  %176 = vst.msk [vmem:[#allocation5 + $0x48] sm:$0xff] %vm166_vm11, %v20392_v62  ;;  %177 = vst.msk [vmem:[#allocation5 + $0x50] sm:$0xff] %vm166_vm11, %v20392_v62 }
 0x7a1   :  { %6596 = vst.msk [vmem:[#allocation4 + $0x98] sm:$0xff] %vm132_vm6, %v6566_v26  ;;  %v6567_v3 = vmul.f32 %v6496_v44, %v6357_v4  ;;  %v7819_v16 = vpack.c.bf16 %v18780_v45, %v18765_v57  ;;  %v6664_v56 = vld [vmem:[#allocation4 + $0x88] sm:$0xff] }
 0x7a2   :  { %v6268_v14 = vadd.f32 %v18576_v40, %v6234_v7  ;;  %v6235_v22 = vadd.f32 %v20473_v25, %v5958_v19  ;;  %v6665_v46 = vld [vmem:[#allocation4 + $0x90] sm:$0xff]  ;;  %v6506_v19 = vpop.permute.xlu0 %6505  ;;  %178 = vst.msk [vmem:[#allocation5 + $0x58] sm:$0xff] %vm166_vm11, %v20392_v62  ;;  %179 = vst.msk [vmem:[#allocation5 + $0x60] sm:$0xff] %vm166_vm11, %v20392_v62 }
 0x7a3   :  { %v18787_v23 = vld [vmem:[#allocation4 + $0x8e] sm:$0xff]  ;;  %6597 = vst.msk [vmem:[#allocation4 + $0xa0] sm:$0xff] %vm132_vm6, %v6567_v3  ;;  %v6681_v9 = vpack.c.bf16 %v6665_v46, %v6664_v56  ;;  %v20474_v3 = vld [vmem:[#allocation45_spill] sm:$0xff] }
 0x7a4   :  { %v6641_v20 = vpack.c.bf16 %v18787_v23, %v18780_v45  ;;  %vm6298_vm14 = vcmp.ge.f32.partialorder %v6268_v14, 0.0  ;;  %v6328_v52 = vmul.f32 0.01, %v6268_v14  ;;  %v6269_v63 = vadd.f32 %v18576_v40, %v6235_v22  ;;  %180 = vst.msk [vmem:[#allocation5 + $0x68] sm:$0xff] %vm166_vm11, %v20392_v62  ;;  %181 = vst.msk [vmem:[#allocation5 + $0x70] sm:$0xff] %vm166_vm11, %v20392_v62 }
 0x7a5   :  { %v5906_v0 = vpop.f32.mrb[188].mxu1  ;;  %182 = vst.msk [vmem:[#allocation5 + $0x78] sm:$0xff] %vm166_vm11, %v20392_v62  ;;  %183 = vst.msk [vmem:[#allocation5 + $0x80] sm:$0xff] %vm166_vm11, %v20392_v62 }
 0x7a6   :  { %14405 = vmatmul.mubr.msk.bf16.gmra.mrb[236].mxu1 %vm132_vm6, %v6681_v9  ;;  %v6358_v26 = vsel %vm6298_vm14, %v6268_v14, %v6328_v52  ;;  %vm6299_vm15 = vcmp.ge.f32.partialorder %v6269_v63, 0.0  ;;  %v6329_v12 = vmul.f32 0.01, %v6269_v63  ;;  %v5959_v44 = vadd.f32 %v5906_v0, %v18552_v13  ;;  %v14294_v4 = vpop.f32.mrb[189].mxu1  ;;  %184 = vst.msk [vmem:[#allocation5 + $0x88] sm:$0xff] %vm166_vm11, %v20392_v62  ;;  %185 = vst.msk [vmem:[#allocation5 + $0x90] sm:$0xff] %vm166_vm11, %v20392_v62 }
 0x7a7   :  { %14459 = vmatmul.mubr.msk.bf16.gmra.mrb[180].mxu0 %vm132_vm6, %v6641_v20  ;;  %14408 = vmatprep.mubr.msk.bf16.mxu1 %vm15736_vm2, %v20392_v62  ;;  %v6568_v15 = vmul.f32 %v6501_v8, %v6358_v26  ;;  %v5909_v7 = vpop.f32.mrb[190].mxu1  ;;  %v20475_v20 = vld [vmem:[#allocation46_spill] sm:$0xff]  ;;  %186 = vst.msk [vmem:[#allocation5 + $0x98] sm:$0xff] %vm166_vm11, %v20392_v62  ;;  %187 = vst.msk [vmem:[#allocation5 + $0xa0] sm:$0xff] %vm166_vm11, %v20392_v62 }
 0x7a8   :  { %14462 = vmatprep.mubr.msk.bf16.mxu0 %vm15736_vm2, %v20392_v62  ;;  %v6359_v24 = vsel %vm6299_vm15, %v6269_v63, %v6329_v12  ;;  %v6236_v25 = vadd.f32 %v20474_v3, %v5959_v44  ;;  %v5960_v22 = vadd.f32 %v5909_v7, %v18555_v5  ;;  %v14295_v14 = vpop.f32.mrb[191].mxu1  ;;  %v18802_v56 = vld [vmem:[#allocation4 + $0x96] sm:$0xff]  ;;  %188 = vst.msk [vmem:[#allocation5 + $0xa8] sm:$0xff] %vm166_vm11, %v20392_v62  ;;  %189 = vst.msk [vmem:[#allocation5 + $0xb0] sm:$0xff] %vm166_vm11, %v20392_v62 }
 0x7a9   :  { %6598 = vst.msk [vmem:[#allocation4 + $0xa8] sm:$0xff] %vm132_vm6, %v6568_v15  ;;  %v6569_v13 = vmul.f32 %v6506_v19, %v6359_v24  ;;  %v7820_v46 = vpack.c.bf16 %v18802_v56, %v18787_v23  ;;  %v6666_v0 = vld [vmem:[#allocation4 + $0x98] sm:$0xff]  ;;  %v6511_v15 = vpop.permute.xlu1 %6510  ;;  %v6516_v14 = vpop.permute.xlu0 %6515 }
 0x7aa   :  { %v6270_v9 = vadd.f32 %v18576_v40, %v6236_v25  ;;  %v6237_v52 = vadd.f32 %v20475_v20, %v5960_v22  ;;  %v6667_v8 = vld [vmem:[#allocation4 + $0xa0] sm:$0xff]  ;;  %190 = vst.msk [vmem:[#allocation5 + $0xb8] sm:$0xff] %vm166_vm11, %v20392_v62  ;;  %191 = vst.msk [vmem:[#allocation5 + $0xc0] sm:$0xff] %vm166_vm11, %v20392_v62 }
 0x7ab   :  { %v18809_v63 = vld [vmem:[#allocation4 + $0x9e] sm:$0xff]  ;;  %6599 = vst.msk [vmem:[#allocation4 + $0xb0] sm:$0xff] %vm132_vm6, %v6569_v13  ;;  %v6682_v5 = vpack.c.bf16 %v6667_v8, %v6666_v0 }
 0x7ac   :  { %v6642_v26 = vpack.c.bf16 %v18809_v63, %v18802_v56  ;;  %vm6300_vm3 = vcmp.ge.f32.partialorder %v6270_v9, 0.0  ;;  %v6330_v12 = vmul.f32 0.01, %v6270_v9  ;;  %v6271_v44 = vadd.f32 %v18576_v40, %v6237_v52  ;;  %192 = vst.msk [vmem:[#allocation5 + $0xc8] sm:$0xff] %vm166_vm11, %v20392_v62 }
 0x7ad   :  { %v5914_v4 = vpop.f32.mrb[192].mxu1 }
 0x7ae   :  { %14409 = vmatmul.mubr.msk.bf16.gmra.mrb[240].mxu1 %vm132_vm6, %v6682_v5  ;;  %v6360_v7 = vsel %vm6300_vm3, %v6270_v9, %v6330_v12  ;;  %vm6301_vm4 = vcmp.ge.f32.partialorder %v6271_v44, 0.0  ;;  %v6331_v19 = vmul.f32 0.01, %v6271_v44  ;;  %v5961_v24 = vadd.f32 %v5914_v4, %v18558_v43  ;;  %v14298_v3 = vpop.f32.mrb[193].mxu1 }
 0x7af   :  { %14463 = vmatmul.mubr.msk.bf16.gmra.mrb[184].mxu0 %vm132_vm6, %v6642_v26  ;;  %14412 = vmatprep.mubr.msk.bf16.mxu1 %vm15736_vm2, %v20392_v62  ;;  %v6570_v25 = vmul.f32 %v6511_v15, %v6360_v7  ;;  %v5917_v22 = vpop.f32.mrb[194].mxu1  ;;  %vm193_vm3 = vcmask 193536  }
 0x7b0   :  { %14466 = vmatprep.mubr.msk.bf16.mxu0 %vm15736_vm2, %v20392_v62  ;;  %v6361_v13 = vsel %vm6301_vm4, %v6271_v44, %v6331_v19  ;;  %v6238_v20 = vadd.f32 %v17720_v21, %v5961_v24  ;;  %v5962_v52 = vadd.f32 %v5917_v22, %v18561_v39  ;;  %v14299_v9 = vpop.f32.mrb[195].mxu1  ;;  %v18824_v0 = vld [vmem:[#allocation4 + $0xa6] sm:$0xff]  ;;  %194 = vst.msk [vmem:[#allocation5 + $0xd0] sm:$0x3f] %vm193_vm3, %v20392_v62 }
 0x7b1   :  { %6600 = vst.msk [vmem:[#allocation4 + $0xb8] sm:$0xff] %vm132_vm6, %v6570_v25  ;;  %v6571_v43 = vmul.f32 %v6516_v14, %v6361_v13  ;;  %v7821_v8 = vpack.c.bf16 %v18824_v0, %v18809_v63  ;;  %v6668_v12 = vld [vmem:[#allocation4 + $0xa8] sm:$0xff] }
 0x7b2   :  { %v6272_v5 = vadd.f32 %v18576_v40, %v6238_v20  ;;  %v6239_v26 = vadd.f32 %v17725_v1, %v5962_v52  ;;  %v6669_v4 = vld [vmem:[#allocation4 + $0xb0] sm:$0xff]  ;;  %v6521_v1 = vpop.permute.xlu1 %6520  ;;  %v6526_v20 = vpop.permute.xlu0 %6525 }
 0x7b3   :  { %v18831_v44 = vld [vmem:[#allocation4 + $0xae] sm:$0xff]  ;;  %6601 = vst.msk [vmem:[#allocation4 + $0xc0] sm:$0xff] %vm132_vm6, %v6571_v43  ;;  %v6683_v21 = vpack.c.bf16 %v6669_v4, %v6668_v12 }
 0x7b4   :  { %v6643_v39 = vpack.c.bf16 %v18831_v44, %v18824_v0  ;;  %vm6302_vm5 = vcmp.ge.f32.partialorder %v6272_v5, 0.0  ;;  %v6332_v15 = vmul.f32 0.01, %v6272_v5  ;;  %v6273_v7 = vadd.f32 %v18576_v40, %v6239_v26 }
 0x7b5   :  { %v5922_v19 = vpop.f32.mrb[196].mxu1 }
 0x7b6   :  { %14413 = vmatmul.mubr.msk.bf16.gmra.mrb[244].mxu1 %vm132_vm6, %v6683_v21  ;;  %v6362_v24 = vsel %vm6302_vm5, %v6272_v5, %v6332_v15  ;;  %vm6303_vm0 = vcmp.ge.f32.partialorder %v6273_v7, 0.0  ;;  %v6333_v3 = vmul.f32 0.01, %v6273_v7  ;;  %v5963_v25 = vadd.f32 %v5922_v19, %v18563_v55  ;;  %v14302_v22 = vpop.f32.mrb[197].mxu1  ;;  %v20476_v21 = vld [vmem:[#allocation47_spill] sm:$0xff] }
 0x7b7   :  { %14467 = vmatmul.mubr.msk.bf16.gmra.mrb[188].mxu0 %vm132_vm6, %v6643_v39  ;;  %14416 = vmatprep.mubr.msk.bf16.mxu1 %vm15736_vm2, %v20392_v62  ;;  %v6572_v14 = vmul.f32 %v6521_v1, %v6362_v24  ;;  %v5925_v13 = vpop.f32.mrb[198].mxu1 }
 0x7b8   :  { %14470 = vmatprep.mubr.msk.bf16.mxu0 %vm15736_vm2, %v20392_v62  ;;  %v6363_v52 = vsel %vm6303_vm0, %v6273_v7, %v6333_v3  ;;  %v6240_v9 = vadd.f32 %v17736_v27, %v5963_v25  ;;  %v5964_v43 = vadd.f32 %v5925_v13, %v18565_v36  ;;  %v14303_v5 = vpop.f32.mrb[199].mxu1  ;;  %v18846_v26 = vld [vmem:[#allocation4 + $0xb6] sm:$0xff]  ;;  %v6531_v25 = vpop.permute.xlu1 %6530 }
 0x7b9   :  { %6602 = vst.msk [vmem:[#allocation4 + $0xc8] sm:$0xff] %vm132_vm6, %v6572_v14  ;;  %v6573_v55 = vmul.f32 %v6526_v20, %v6363_v52  ;;  %v7822_v12 = vpack.c.bf16 %v18846_v26, %v18831_v44  ;;  %v6670_v15 = vld [vmem:[#allocation4 + $0xb8] sm:$0xff] }
 0x7ba   :  { %v6274_v4 = vadd.f32 %v18576_v40, %v6240_v9  ;;  %v6241_v39 = vadd.f32 %v20476_v21, %v5964_v43  ;;  %v6671_v19 = vld [vmem:[#allocation4 + $0xc0] sm:$0xff]  ;;  %v6536_v43 = vpop.permute.xlu0 %6535 }
 0x7bb   :  { %v18853_v7 = vld [vmem:[#allocation4 + $0xbe] sm:$0xff]  ;;  %6603 = vst.msk [vmem:[#allocation4 + $0xd0] sm:$0xff] %vm132_vm6, %v6573_v55  ;;  %v6684_v27 = vpack.c.bf16 %v6671_v19, %v6670_v15 }
 0x7bc   :  { %v6644_v36 = vpack.c.bf16 %v18853_v7, %v18846_v26  ;;  %vm6304_vm7 = vcmp.ge.f32.partialorder %v6274_v4, 0.0  ;;  %v6334_v1 = vmul.f32 0.01, %v6274_v4  ;;  %v6275_v24 = vadd.f32 %v18576_v40, %v6241_v39 }
 0x7bd   :  { %v5930_v3 = vpop.f32.mrb[200].mxu1 }
 0x7be   :  { %14417 = vmatmul.mubr.msk.bf16.gmra.mrb[248].mxu1 %vm132_vm6, %v6684_v27  ;;  %v6364_v22 = vsel %vm6304_vm7, %v6274_v4, %v6334_v1  ;;  %vm6305_vm8 = vcmp.ge.f32.partialorder %v6275_v24, 0.0  ;;  %v6335_v14 = vmul.f32 0.01, %v6275_v24  ;;  %v5965_v13 = vadd.f32 %v5930_v3, %v18567_v30  ;;  %v14306_v20 = vpop.f32.mrb[201].mxu1  ;;  %v6541_v3 = vpop.permute.xlu1 %6540 }
 0x7bf   :  { %14471 = vmatmul.mubr.msk.bf16.gmra.mrb[192].mxu0 %vm132_vm6, %v6644_v36  ;;  %14420 = vmatprep.mubr.msk.bf16.mxu1 %vm15736_vm2, %v20392_v62  ;;  %v6574_v52 = vmul.f32 %v6531_v25, %v6364_v22  ;;  %v5933_v9 = vpop.f32.mrb[202].mxu1 }
 0x7c0   :  { %14474 = vmatprep.mubr.msk.bf16.mxu0 %vm15736_vm2, %v20392_v62  ;;  %v6365_v5 = vsel %vm6305_vm8, %v6275_v24, %v6335_v14  ;;  %v6242_v55 = vadd.f32 %v17750_v34, %v5965_v13  ;;  %v5966_v21 = vadd.f32 %v5933_v9, %v18569_v11  ;;  %v14307_v4 = vpop.f32.mrb[203].mxu1  ;;  %v6672_v39 = vld [vmem:[#allocation4 + $0xc8] sm:$0xff]  ;;  %v6546_v14 = vpop.permute.xlu0 %6545  ;;  %v7051_v13 = vld [vmem:[#allocation4 + $0x12] sm:$0xff] }
 0x7c1   :  { %v18868_v15 = vld [vmem:[#allocation4 + $0xc6] sm:$0xff]  ;;  %6604 = vst.msk [vmem:[#allocation4 + $0xd8] sm:$0xff] %vm132_vm6, %v6574_v52  ;;  %v6575_v30 = vmul.f32 %v6536_v43, %v6365_v5  ;;  %v6685_v1 = vpack.c.bf16 %v6672_v39, %v6672_v39  ;;  %v7296_v43 = vld [vmem:[#allocation4 + $0x1a] sm:$0xff]  ;;  %v15659_v4 = vld [vmem:[%s20372_s6 + $0x28] sm:$0xff]  }
 0x7c2   :  { %v6276_v19 = vadd.f32 %v18576_v40, %v6242_v55  ;;  %v6243_v27 = vadd.f32 %v17755_v6, %v5966_v21  ;;  %v7823_v36 = vpack.c.bf16 %v18868_v15, %v18853_v7  ;;  %v6645_v34 = vpack.c.bf16 %v18868_v15, %v18868_v15  ;;  %v7297_v52 = vld [vmem:[#allocation4 + $0x22] sm:$0xff]  ;;  %v7050_v9 = vld [vmem:[#allocation4 + $0xa] sm:$0xff] }
 0x7c3   :  { %6605 = vst.msk [vmem:[#allocation4 + $0xe0] sm:$0xff] %vm132_vm6, %v6575_v30  ;;  %v15658_v5 = vld [vmem:[%s20372_s6 + $0x20] sm:$0xff]   ;;  %v7075_v55 = vpack.c.bf16 %v7051_v13, %v7050_v9  ;;  %v7321_v21 = vpack.c.bf16 %v7297_v52, %v7296_v43 }
 0x7c4   :  { %vm6306_vm9 = vcmp.ge.f32.partialorder %v6276_v19, 0.0  ;;  %v6336_v11 = vmul.f32 0.01, %v6276_v19  ;;  %v6277_v24 = vadd.f32 %v18576_v40, %v6243_v27  ;;  %v7298_v39 = vld [vmem:[#allocation4 + $0x2a] sm:$0xff]  ;;  %v7309_v13 = vld [vmem:[#allocation4 + $0x82] sm:$0xff] }
 0x7c5   :  { %v7322_v30 = vpack.c.bf16 %v18663_v38, %v7298_v39  ;;  %v7310_v9 = vld [vmem:[#allocation4 + $0x8a] sm:$0xff] }
 0x7c6   :  { %14421 = vmatmul.mubr.msk.bf16.gmra.mrb[252].mxu1 %vm132_vm6, %v6685_v1  ;;  %v6366_v25 = vsel %vm6306_vm9, %v6276_v19, %v6336_v11  ;;  %vm6307_vm10 = vcmp.ge.f32.partialorder %v6277_v24, 0.0  ;;  %v6337_v6 = vmul.f32 0.01, %v6277_v24  ;;  %v7301_v19 = vld [vmem:[#allocation4 + $0x42] sm:$0xff]  ;;  %v7303_v1 = vld [vmem:[#allocation4 + $0x52] sm:$0xff]  ;;  %v7314_v39 = vld [vmem:[#allocation4 + $0xaa] sm:$0xff] }
 0x7c7   :  { %14475 = vmatmul.mubr.msk.bf16.gmra.mrb[196].mxu0 %vm132_vm6, %v6645_v34  ;;  %14480 = vmatprep.mubr.msk.bf16.mxu1 %vm15736_vm2, %v20392_v62  ;;  %v6576_v22 = vmul.f32 %v6541_v3, %v6366_v25  ;;  %v7323_v27 = vpack.c.bf16 %v7301_v19, %v18670_v35  ;;  %v7302_v34 = vld [vmem:[#allocation4 + $0x4a] sm:$0xff]  ;;  %v7304_v3 = vld [vmem:[#allocation4 + $0x5a] sm:$0xff]  ;;  %v7317_v19 = vld [vmem:[#allocation4 + $0xc2] sm:$0xff] }
 0x7c8   :  { %14534 = vmatprep.mubr.msk.bf16.mxu0 %vm15736_vm2, %v20392_v62  ;;  %v6367_v20 = vsel %vm6307_vm10, %v6277_v24, %v6337_v6  ;;  %v7324_v11 = vpack.c.bf16 %v7303_v1, %v7302_v34  ;;  %v7305_v24 = vld [vmem:[#allocation4 + $0x62] sm:$0xff]  ;;  %v7307_v6 = vld [vmem:[#allocation4 + $0x72] sm:$0xff] }
 0x7c9   :  { %6606 = vst.msk [vmem:[#allocation4 + $0xe8] sm:$0xff] %vm132_vm6, %v6576_v22  ;;  %v6577_v40 = vmul.f32 %v6546_v14, %v6367_v20  ;;  %v7325_v25 = vpack.c.bf16 %v7305_v24, %v7304_v3  ;;  %v7306_v22 = vld [vmem:[#allocation4 + $0x6a] sm:$0xff]  ;;  %v7308_v20 = vld [vmem:[#allocation4 + $0x7a] sm:$0xff]  ;;  %v7319_v34 = vld [vmem:[#allocation4 + $0xd2] sm:$0xff] }
 0x7ca   :  { %v7326_v14 = vpack.c.bf16 %v7307_v6, %v7306_v22  ;;  %v7327_v52 = vpack.c.bf16 %v7309_v13, %v7308_v20  ;;  %v7320_v3 = vld [vmem:[#allocation4 + $0xda] sm:$0xff]  ;;  %v7543_v22 = vld [vmem:[#allocation4 + $0x24] sm:$0xff]  ;;  %v7810_v7 = vld [vmem:[#allocation4 + $0xce] sm:$0xff] }
 0x7cb   :  { %6607 = vst.msk [vmem:[#allocation4 + $0xf0] sm:$0xff] %vm132_vm6, %v6577_v40  ;;  %v7311_v40 = vld [vmem:[#allocation4 + $0x92] sm:$0xff]  ;;  %v7333_v6 = vpack.c.bf16 %v7320_v3, %v7320_v3  ;;  %v7547_v3 = vld [vmem:[#allocation4 + $0x44] sm:$0xff] }
 0x7cc   :  { %v7328_v43 = vpack.c.bf16 %v7311_v40, %v7310_v9  ;;  %v15660_v13 = vld [vmem:[%s20372_s6 + $0x30] sm:$0xff]  }
 0x7ce   :  { %14481 = vmatmul.mubr.msk.bf16.vlgmr.msra.gmra.mrb[0].mxu1 %vm132_vm6, %v7075_v55  ;;  %v7312_v55 = vld [vmem:[#allocation4 + $0x9a] sm:$0xff] }
 0x7cf   :  { %14535 = vmatmul.mubr.msk.bf16.vlgmr.msra.gmra.mrb[200].mxu0 %vm132_vm6, %v7321_v21  ;;  %14587 = vmatpush3.bf16.msra.mxu1 %v15658_v5  ;;  %v7313_v5 = vld [vmem:[#allocation4 + $0xa2] sm:$0xff] }
 0x7d0   :  { %14484 = vmatprep.mubr.msk.bf16.mxu1 %vm15736_vm2, %v20392_v62  ;;  %14538 = vmatprep.mubr.msk.bf16.mxu0 %vm15736_vm2, %v20392_v62 }
 0x7d1   :  { %14641 = vmatpush3.bf16.msra.mxu0 %v15659_v4  ;;  %14694 = vmatprep.subr.bf16.mxu1 %v20392_v62  ;;  %v7315_v4 = vld [vmem:[#allocation4 + $0xb2] sm:$0xff] }
 0x7d2   :  { %14748 = vmatprep.subr.bf16.mxu0 %v20392_v62 }
 0x7d6   :  { %14485 = vmatmul.mubr.msk.bf16.gmra.mrb[4].mxu1 %vm132_vm6, %v7321_v21  ;;  %v7329_v21 = vpack.c.bf16 %v7313_v5, %v7312_v55  ;;  %v7791_v5 = vld [vmem:[#allocation4 + $0x36] sm:$0xff] }
 0x7d7   :  { %14539 = vmatmul.mubr.msk.bf16.gmra.mrb[204].mxu0 %vm132_vm6, %v7322_v30  ;;  %14488 = vmatprep.mubr.msk.bf16.mxu1 %vm15736_vm2, %v20392_v62 }
 0x7d8   :  { %14542 = vmatprep.mubr.msk.bf16.mxu0 %vm15736_vm2, %v20392_v62 }
 0x7de   :  { %14489 = vmatmul.mubr.msk.bf16.gmra.mrb[8].mxu1 %vm132_vm6, %v7322_v30  ;;  %v7330_v30 = vpack.c.bf16 %v7315_v4, %v7314_v39  ;;  %v7544_v4 = vld [vmem:[#allocation4 + $0x2c] sm:$0xff] }
 0x7df   :  { %14543 = vmatmul.mubr.msk.bf16.gmra.mrb[208].mxu0 %vm132_vm6, %v7323_v27  ;;  %14492 = vmatprep.mubr.msk.bf16.mxu1 %vm15736_vm2, %v20392_v62  ;;  %v7790_v39 = vld [vmem:[#allocation4 + $0x2e] sm:$0xff] }
 0x7e0   :  { %14546 = vmatprep.mubr.msk.bf16.mxu0 %vm15736_vm2, %v20392_v62 }
 0x7e6   :  { %14493 = vmatmul.mubr.msk.bf16.gmra.mrb[12].mxu1 %vm132_vm6, %v7323_v27  ;;  %v7316_v27 = vld [vmem:[#allocation4 + $0xba] sm:$0xff] }
 0x7e7   :  { %14547 = vmatmul.mubr.msk.bf16.gmra.mrb[212].mxu0 %vm132_vm6, %v7324_v11  ;;  %14496 = vmatprep.mubr.msk.bf16.mxu1 %vm15736_vm2, %v20392_v62  ;;  %v7331_v1 = vpack.c.bf16 %v7317_v19, %v7316_v27 }
 0x7e8   :  { %14550 = vmatprep.mubr.msk.bf16.mxu0 %vm15736_vm2, %v20392_v62 }
 0x7ee   :  { %14497 = vmatmul.mubr.msk.bf16.gmra.mrb[16].mxu1 %vm132_vm6, %v7324_v11  ;;  %v7318_v11 = vld [vmem:[#allocation4 + $0xca] sm:$0xff] }
 0x7ef   :  { %14551 = vmatmul.mubr.msk.bf16.gmra.mrb[216].mxu0 %vm132_vm6, %v7325_v25  ;;  %14500 = vmatprep.mubr.msk.bf16.mxu1 %vm15736_vm2, %v20392_v62  ;;  %v7332_v24 = vpack.c.bf16 %v7319_v34, %v7318_v11  ;;  %v7814_v34 = vpack.c.bf16 %v7791_v5, %v7790_v39 }
 0x7f0   :  { %14554 = vmatprep.mubr.msk.bf16.mxu0 %vm15736_vm2, %v20392_v62 }
 0x7f6   :  { %14501 = vmatmul.mubr.msk.bf16.gmra.mrb[20].mxu1 %vm132_vm6, %v7325_v25  ;;  %v7087_v25 = vpack.c.bf16 %v7318_v11, %v7318_v11 }
 0x7f7   :  { %14555 = vmatmul.mubr.msk.bf16.gmra.mrb[220].mxu0 %vm132_vm6, %v7326_v14  ;;  %14504 = vmatprep.mubr.msk.bf16.mxu1 %vm15736_vm2, %v20392_v62 }
 0x7f8   :  { %14558 = vmatprep.mubr.msk.bf16.mxu0 %vm15736_vm2, %v20392_v62 }
 0x7fe   :  { %14505 = vmatmul.mubr.msk.bf16.gmra.mrb[24].mxu1 %vm132_vm6, %v7326_v14  ;;  %v7542_v14 = vld [vmem:[#allocation4 + $0x1c] sm:$0xff] }
 0x7ff   :  { %14559 = vmatmul.mubr.msk.bf16.gmra.mrb[224].mxu0 %vm132_vm6, %v7327_v52  ;;  %14508 = vmatprep.mubr.msk.bf16.mxu1 %vm15736_vm2, %v20392_v62  ;;  %v7567_v20 = vpack.c.bf16 %v7543_v22, %v7542_v14 }
 0x800   :  { %14562 = vmatprep.mubr.msk.bf16.mxu0 %vm15736_vm2, %v20392_v62 }
 0x806   :  { %14509 = vmatmul.mubr.msk.bf16.gmra.mrb[28].mxu1 %vm132_vm6, %v7327_v52  ;;  %v15661_v52 = vld [vmem:[%s20372_s6 + $0x38] sm:$0xff]  }
 0x807   :  { %14563 = vmatmul.mubr.msk.bf16.gmra.mrb[228].mxu0 %vm132_vm6, %v7328_v43  ;;  %14512 = vmatprep.mubr.msk.bf16.mxu1 %vm15736_vm2, %v20392_v62 }
 0x808   :  { %14566 = vmatprep.mubr.msk.bf16.mxu0 %vm15736_vm2, %v20392_v62 }
 0x80e   :  { %14513 = vmatmul.mubr.msk.bf16.gmra.mrb[32].mxu1 %vm132_vm6, %v7328_v43  ;;  %v7545_v43 = vld [vmem:[#allocation4 + $0x34] sm:$0xff] }
 0x80f   :  { %14567 = vmatmul.mubr.msk.bf16.gmra.mrb[232].mxu0 %vm132_vm6, %v7329_v21  ;;  %14516 = vmatprep.mubr.msk.bf16.mxu1 %vm15736_vm2, %v20392_v62 }
 0x810   :  { %14570 = vmatprep.mubr.msk.bf16.mxu0 %vm15736_vm2, %v20392_v62 }
 0x816   :  { %14517 = vmatmul.mubr.msk.bf16.gmra.mrb[36].mxu1 %vm132_vm6, %v7329_v21 }
 0x817   :  { %14571 = vmatmul.mubr.msk.bf16.gmra.mrb[236].mxu0 %vm132_vm6, %v7330_v30  ;;  %14520 = vmatprep.mubr.msk.bf16.mxu1 %vm15736_vm2, %v20392_v62 }
 0x818   :  { %14574 = vmatprep.mubr.msk.bf16.mxu0 %vm15736_vm2, %v20392_v62 }
 0x81e   :  { %14521 = vmatmul.mubr.msk.bf16.gmra.mrb[40].mxu1 %vm132_vm6, %v7330_v30 }
 0x81f   :  { %14575 = vmatmul.mubr.msk.bf16.gmra.mrb[240].mxu0 %vm132_vm6, %v7331_v1  ;;  %14524 = vmatprep.mubr.msk.bf16.mxu1 %vm15736_vm2, %v20392_v62 }
 0x820   :  { %14578 = vmatprep.mubr.msk.bf16.mxu0 %vm15736_vm2, %v20392_v62 }
 0x826   :  { %14525 = vmatmul.mubr.msk.bf16.gmra.mrb[44].mxu1 %vm132_vm6, %v7331_v1  ;;  %v7568_v1 = vpack.c.bf16 %v7545_v43, %v7544_v4 }
 0x827   :  { %14579 = vmatmul.mubr.msk.bf16.gmra.mrb[244].mxu0 %vm132_vm6, %v7332_v24  ;;  %14528 = vmatprep.mubr.msk.bf16.mxu1 %vm15736_vm2, %v20392_v62 }
 0x828   :  { %14582 = vmatprep.mubr.msk.bf16.mxu0 %vm15736_vm2, %v20392_v62 }
 0x82e   :  { %14529 = vmatmul.mubr.msk.bf16.gmra.mrb[48].mxu1 %vm132_vm6, %v7087_v25 }
 0x82f   :  { %14583 = vmatmul.mubr.msk.bf16.gmra.mrb[248].mxu0 %vm132_vm6, %v7333_v6  ;;  %14588 = vmatprep.mubr.msk.bf16.mxu1 %vm15736_vm2, %v20392_v62 }
 0x830   :  { %14642 = vmatprep.mubr.msk.bf16.mxu0 %vm15736_vm2, %v20392_v62 }
 0x836   :  { %14589 = vmatmul.mubr.msk.bf16.vlgmr.msra.gmra.mrb[52].mxu1 %vm132_vm6, %v7567_v20  ;;  %v7546_v20 = vld [vmem:[#allocation4 + $0x3c] sm:$0xff] }
 0x837   :  { %14643 = vmatmul.mubr.msk.bf16.vlgmr.msra.gmra.mrb[252].mxu0 %vm132_vm6, %v7813_v32  ;;  %14695 = vmatpush3.bf16.msra.mxu1 %v15660_v13  ;;  %v7569_v43 = vpack.c.bf16 %v7547_v3, %v7546_v20  ;;  %v7550_v20 = vld [vmem:[#allocation4 + $0x5c] sm:$0xff] }
 0x838   :  { %14592 = vmatprep.mubr.msk.bf16.mxu1 %vm15736_vm2, %v20392_v62  ;;  %14646 = vmatprep.mubr.msk.bf16.mxu0 %vm15736_vm2, %v20392_v62  ;;  %v6767_v40 = vpop.f32.mrb[204].mxu1 }
 0x839   :  { %14749 = vmatpush3.bf16.msra.mxu0 %v15661_v52  ;;  %v6948_v9 = vpop.f32.mrb[148].mxu0  ;;  %14802 = vmatprep.subr.bf16.mxu1 %v20392_v62  ;;  %v14374_v21 = vpop.f32.mrb[205].mxu1 }
 0x83a   :  { %v18991_v55 = vadd.f32 %v6948_v9, %v6767_v40  ;;  %v14428_v54 = vpop.f32.mrb[149].mxu0  ;;  %v6770_v37 = vpop.f32.mrb[206].mxu1 }
 0x83b   :  { %v6951_v32 = vpop.f32.mrb[150].mxu0  ;;  %v14375_v19 = vpop.f32.mrb[207].mxu1  ;;  %v7549_v54 = vld [vmem:[#allocation4 + $0x54] sm:$0xff] }
 0x83c   :  { %v18993_v30 = vadd.f32 %v6951_v32, %v6770_v37  ;;  %v14429_v27 = vpop.f32.mrb[151].mxu0 }
 0x83d   :  { %v7548_v27 = vld [vmem:[#allocation4 + $0x4c] sm:$0xff] }
 0x83e   :  { %14593 = vmatmul.mubr.msk.bf16.gmra.mrb[56].mxu1 %vm132_vm6, %v7568_v1 }
 0x83f   :  { %14647 = vmatmul.mubr.msk.bf16.gmra.mrb[32].mxu0 %vm132_vm6, %v7814_v34  ;;  %14596 = vmatprep.mubr.msk.bf16.mxu1 %vm15736_vm2, %v20392_v62 }
 0x840   :  { %14650 = vmatprep.mubr.msk.bf16.mxu0 %vm15736_vm2, %v20392_v62  ;;  %v6775_v11 = vpop.f32.mrb[208].mxu1 }
 0x841   :  { %v6956_v24 = vpop.f32.mrb[152].mxu0  ;;  %v14378_v6 = vpop.f32.mrb[209].mxu1 }
 0x842   :  { %v19001_v25 = vadd.f32 %v6956_v24, %v6775_v11  ;;  %v14432_v22 = vpop.f32.mrb[153].mxu0  ;;  %v6778_v14 = vpop.f32.mrb[210].mxu1  ;;  %v7551_v24 = vld [vmem:[#allocation4 + $0x64] sm:$0xff] }
 0x843   :  { %v6959_v13 = vpop.f32.mrb[154].mxu0  ;;  %v14379_v40 = vpop.f32.mrb[211].mxu1 }
 0x844   :  { %v19003_v52 = vadd.f32 %v6959_v13, %v6778_v14  ;;  %v14433_v9 = vpop.f32.mrb[155].mxu0 }
 0x846   :  { %14597 = vmatmul.mubr.msk.bf16.gmra.mrb[60].mxu1 %vm132_vm6, %v7569_v43 }
 0x847   :  { %14651 = vmatmul.mubr.msk.bf16.gmra.mrb[36].mxu0 %vm132_vm6, %v7815_v60  ;;  %14600 = vmatprep.mubr.msk.bf16.mxu1 %vm15736_vm2, %v20392_v62  ;;  %v7570_v60 = vpack.c.bf16 %v7549_v54, %v7548_v27 }
 0x848   :  { %14654 = vmatprep.mubr.msk.bf16.mxu0 %vm15736_vm2, %v20392_v62 }
 0x849   :  { %v6783_v5 = vpop.f32.mrb[212].mxu1  ;;  %v6964_v21 = vpop.f32.mrb[156].mxu0 }
 0x84a   :  { %v19014_v37 = vadd.f32 %v6964_v21, %v6783_v5  ;;  %v14382_v32 = vpop.f32.mrb[213].mxu1  ;;  %v14436_v4 = vpop.f32.mrb[157].mxu0  ;;  %v7553_v5 = vld [vmem:[#allocation4 + $0x74] sm:$0xff] }
 0x84b   :  { %v6786_v39 = vpop.f32.mrb[214].mxu1  ;;  %v6967_v19 = vpop.f32.mrb[158].mxu0 }
 0x84c   :  { %v19016_v1 = vadd.f32 %v6967_v19, %v6786_v39  ;;  %v14383_v50 = vpop.f32.mrb[215].mxu1  ;;  %v14437_v31 = vpop.f32.mrb[159].mxu0  ;;  %v7552_v19 = vld [vmem:[#allocation4 + $0x6c] sm:$0xff] }
 0x84e   :  { %14601 = vmatmul.mubr.msk.bf16.gmra.mrb[64].mxu1 %vm132_vm6, %v7570_v60  ;;  %v7555_v60 = vld [vmem:[#allocation4 + $0x84] sm:$0xff] }
 0x84f   :  { %14655 = vmatmul.mubr.msk.bf16.gmra.mrb[40].mxu0 %vm132_vm6, %v7816_v51  ;;  %14604 = vmatprep.mubr.msk.bf16.mxu1 %vm15736_vm2, %v20392_v62  ;;  %v7571_v51 = vpack.c.bf16 %v7551_v24, %v7550_v20 }
 0x850   :  { %14658 = vmatprep.mubr.msk.bf16.mxu0 %vm15736_vm2, %v20392_v62 }
 0x851   :  { %v6791_v34 = vpop.f32.mrb[216].mxu1 }
 0x852   :  { %v6972_v11 = vpop.f32.mrb[160].mxu0  ;;  %v14386_v6 = vpop.f32.mrb[217].mxu1 }
 0x853   :  { %v19027_v3 = vadd.f32 %v6972_v11, %v6791_v34  ;;  %v14440_v22 = vpop.f32.mrb[161].mxu0  ;;  %v6794_v14 = vpop.f32.mrb[218].mxu1 }
 0x854   :  { %v6975_v13 = vpop.f32.mrb[162].mxu0  ;;  %v14387_v48 = vpop.f32.mrb[219].mxu1 }
 0x855   :  { %v19029_v40 = vadd.f32 %v6975_v13, %v6794_v14  ;;  %v14441_v17 = vpop.f32.mrb[163].mxu0  ;;  %v7554_v14 = vld [vmem:[#allocation4 + $0x7c] sm:$0xff] }
 0x856   :  { %14605 = vmatmul.mubr.msk.bf16.gmra.mrb[68].mxu1 %vm132_vm6, %v7571_v51  ;;  %v7557_v17 = vld [vmem:[#allocation4 + $0x94] sm:$0xff] }
 0x857   :  { %14659 = vmatmul.mubr.msk.bf16.gmra.mrb[44].mxu0 %vm132_vm6, %v7817_v47  ;;  %14608 = vmatprep.mubr.msk.bf16.mxu1 %vm15736_vm2, %v20392_v62  ;;  %v7572_v47 = vpack.c.bf16 %v7553_v5, %v7552_v19 }
 0x858   :  { %14662 = vmatprep.mubr.msk.bf16.mxu0 %vm15736_vm2, %v20392_v62 }
 0x859   :  { %v6799_v9 = vpop.f32.mrb[220].mxu1 }
 0x85a   :  { %v6980_v43 = vpop.f32.mrb[164].mxu0  ;;  %v14390_v54 = vpop.f32.mrb[221].mxu1 }
 0x85b   :  { %v19040_v21 = vadd.f32 %v6980_v43, %v6799_v9  ;;  %v14444_v32 = vpop.f32.mrb[165].mxu0  ;;  %v6802_v4 = vpop.f32.mrb[222].mxu1 }
 0x85c   :  { %v6983_v39 = vpop.f32.mrb[166].mxu0  ;;  %v14391_v49 = vpop.f32.mrb[223].mxu1  ;;  %v7556_v32 = vld [vmem:[#allocation4 + $0x8c] sm:$0xff] }
 0x85d   :  { %v19042_v27 = vadd.f32 %v6983_v39, %v6802_v4  ;;  %v14445_v18 = vpop.f32.mrb[167].mxu0  ;;  %v7559_v49 = vld [vmem:[#allocation4 + $0xa4] sm:$0xff] }
 0x85e   :  { %14609 = vmatmul.mubr.msk.bf16.gmra.mrb[72].mxu1 %vm132_vm6, %v7572_v47 }
 0x85f   :  { %14663 = vmatmul.mubr.msk.bf16.gmra.mrb[48].mxu0 %vm132_vm6, %v7818_v28  ;;  %14612 = vmatprep.mubr.msk.bf16.mxu1 %vm15736_vm2, %v20392_v62  ;;  %v7573_v28 = vpack.c.bf16 %v7555_v60, %v7554_v14  ;;  %v7561_v14 = vld [vmem:[#allocation4 + $0xb4] sm:$0xff] }
 0x860   :  { %14666 = vmatprep.mubr.msk.bf16.mxu0 %vm15736_vm2, %v20392_v62 }
 0x861   :  { %v6807_v50 = vpop.f32.mrb[224].mxu1 }
 0x862   :  { %v6988_v31 = vpop.f32.mrb[168].mxu0  ;;  %v14394_v11 = vpop.f32.mrb[225].mxu1 }
 0x863   :  { %v19053_v34 = vadd.f32 %v6988_v31, %v6807_v50  ;;  %v14448_v24 = vpop.f32.mrb[169].mxu0  ;;  %v6810_v6 = vpop.f32.mrb[226].mxu1  ;;  %v7558_v11 = vld [vmem:[#allocation4 + $0x9c] sm:$0xff] }
 0x864   :  { %v6991_v22 = vpop.f32.mrb[170].mxu0  ;;  %v14395_v41 = vpop.f32.mrb[227].mxu1 }
 0x865   :  { %v19055_v13 = vadd.f32 %v6991_v22, %v6810_v6  ;;  %v14449_v53 = vpop.f32.mrb[171].mxu0 }
 0x866   :  { %14613 = vmatmul.mubr.msk.bf16.gmra.mrb[76].mxu1 %vm132_vm6, %v7573_v28 }
 0x867   :  { %14667 = vmatmul.mubr.msk.bf16.gmra.mrb[52].mxu0 %vm132_vm6, %v7819_v16  ;;  %14616 = vmatprep.mubr.msk.bf16.mxu1 %vm15736_vm2, %v20392_v62  ;;  %v7574_v16 = vpack.c.bf16 %v7557_v17, %v7556_v32  ;;  %v7560_v17 = vld [vmem:[#allocation4 + $0xac] sm:$0xff] }
 0x868   :  { %14670 = vmatprep.mubr.msk.bf16.mxu0 %vm15736_vm2, %v20392_v62 }
 0x869   :  { %v6815_v20 = vpop.f32.mrb[228].mxu1 }
 0x86a   :  { %v6996_v48 = vpop.f32.mrb[172].mxu0  ;;  %v14398_v9 = vpop.f32.mrb[229].mxu1 }
 0x86b   :  { %v19066_v51 = vadd.f32 %v6996_v48, %v6815_v20  ;;  %v14452_v43 = vpop.f32.mrb[173].mxu0  ;;  %v6818_v5 = vpop.f32.mrb[230].mxu1 }
 0x86c   :  { %v6999_v54 = vpop.f32.mrb[174].mxu0  ;;  %v14399_v57 = vpop.f32.mrb[231].mxu1 }
 0x86d   :  { %v19068_v4 = vadd.f32 %v6999_v54, %v6818_v5  ;;  %v14453_v45 = vpop.f32.mrb[175].mxu0  ;;  %v7563_v54 = vld [vmem:[#allocation4 + $0xc4] sm:$0xff] }
 0x86e   :  { %14617 = vmatmul.mubr.msk.bf16.gmra.mrb[80].mxu1 %vm132_vm6, %v7574_v16 }
 0x86f   :  { %14671 = vmatmul.mubr.msk.bf16.gmra.mrb[56].mxu0 %vm132_vm6, %v7820_v46  ;;  %14620 = vmatprep.mubr.msk.bf16.mxu1 %vm15736_vm2, %v20392_v62  ;;  %v7575_v46 = vpack.c.bf16 %v7559_v49, %v7558_v11 }
 0x870   :  { %14674 = vmatprep.mubr.msk.bf16.mxu0 %vm15736_vm2, %v20392_v62 }
 0x871   :  { %v6823_v39 = vpop.f32.mrb[232].mxu1 }
 0x872   :  { %v7004_v19 = vpop.f32.mrb[176].mxu0  ;;  %v14402_v47 = vpop.f32.mrb[233].mxu1 }
 0x873   :  { %v19079_v18 = vadd.f32 %v7004_v19, %v6823_v39  ;;  %v14456_v50 = vpop.f32.mrb[177].mxu0  ;;  %v6826_v31 = vpop.f32.mrb[234].mxu1  ;;  %v7562_v19 = vld [vmem:[#allocation4 + $0xbc] sm:$0xff] }
 0x874   :  { %v7007_v60 = vpop.f32.mrb[178].mxu0  ;;  %v14403_v23 = vpop.f32.mrb[235].mxu1 }
 0x875   :  { %v19081_v24 = vadd.f32 %v7007_v60, %v6826_v31  ;;  %v14457_v56 = vpop.f32.mrb[179].mxu0  ;;  %v7565_v31 = vld [vmem:[#allocation4 + $0xd4] sm:$0xff] }
 0x876   :  { %14621 = vmatmul.mubr.msk.bf16.gmra.mrb[84].mxu1 %vm132_vm6, %v7575_v46  ;;  %v7811_v60 = vld [vmem:[#allocation4 + $0xd6] sm:$0xff] }
 0x877   :  { %14675 = vmatmul.mubr.msk.bf16.gmra.mrb[60].mxu0 %vm132_vm6, %v7821_v8  ;;  %14624 = vmatprep.mubr.msk.bf16.mxu1 %vm15736_vm2, %v20392_v62  ;;  %v7576_v8 = vpack.c.bf16 %v7561_v14, %v7560_v17  ;;  %v7566_v17 = vld [vmem:[#allocation4 + $0xdc] sm:$0xff] }
 0x878   :  { %14678 = vmatprep.mubr.msk.bf16.mxu0 %vm15736_vm2, %v20392_v62 }
 0x879   :  { %v6831_v6 = vpop.f32.mrb[236].mxu1 }
 0x87a   :  { %v7012_v22 = vpop.f32.mrb[180].mxu0  ;;  %v14406_v53 = vpop.f32.mrb[237].mxu1 }
 0x87b   :  { %v19092_v41 = vadd.f32 %v7012_v22, %v6831_v6  ;;  %v14460_v28 = vpop.f32.mrb[181].mxu0  ;;  %v6834_v20 = vpop.f32.mrb[238].mxu1  ;;  %v7564_v22 = vld [vmem:[#allocation4 + $0xcc] sm:$0xff] }
 0x87c   :  { %v7015_v48 = vpop.f32.mrb[182].mxu0  ;;  %v14407_v63 = vpop.f32.mrb[239].mxu1  ;;  %v7578_v53 = vpack.c.bf16 %v7565_v31, %v7564_v22  ;;  %v19122_v28 = vpack.c.bf16 %v7811_v60, %v7810_v7  ;;  %v8037_v7 = vld [vmem:[#allocation4 + $0x46] sm:$0xff] }
 0x87d   :  { %v19094_v9 = vadd.f32 %v7015_v48, %v6834_v20  ;;  %v14461_v0 = vpop.f32.mrb[183].mxu0  ;;  %v19131_v63 = vld [vmem:[#allocation4 + $0xde] sm:$0xff] }
 0x87e   :  { %14625 = vmatmul.mubr.msk.bf16.gmra.mrb[88].mxu1 %vm132_vm6, %v7576_v8 }
 0x87f   :  { %14679 = vmatmul.mubr.msk.bf16.gmra.mrb[0].mxu0 %vm132_vm6, %v7822_v12  ;;  %14628 = vmatprep.mubr.msk.bf16.mxu1 %vm15736_vm2, %v20392_v62  ;;  %v7577_v12 = vpack.c.bf16 %v7563_v54, %v7562_v19  ;;  %v7825_v19 = vpack.c.bf16 %v19131_v63, %v19131_v63 }
 0x880   :  { %14682 = vmatprep.mubr.msk.bf16.mxu0 %vm15736_vm2, %v20392_v62 }
 0x881   :  { %v6839_v43 = vpop.f32.mrb[240].mxu1 }
 0x882   :  { %v7020_v5 = vpop.f32.mrb[184].mxu0  ;;  %v14410_v57 = vpop.f32.mrb[241].mxu1 }
 0x883   :  { %v19105_v32 = vadd.f32 %v7020_v5, %v6839_v43  ;;  %v14464_v45 = vpop.f32.mrb[185].mxu0  ;;  %v6842_v16 = vpop.f32.mrb[242].mxu1 }
 0x884   :  { %v7023_v39 = vpop.f32.mrb[186].mxu0  ;;  %v14411_v44 = vpop.f32.mrb[243].mxu1 }
 0x885   :  { %v19107_v49 = vadd.f32 %v7023_v39, %v6842_v16  ;;  %v14465_v26 = vpop.f32.mrb[187].mxu0  ;;  %v7579_v39 = vpack.c.bf16 %v7566_v17, %v7566_v17 }
 0x886   :  { %14629 = vmatmul.mubr.msk.bf16.gmra.mrb[92].mxu1 %vm132_vm6, %v7577_v12 }
 0x887   :  { %14683 = vmatmul.mubr.msk.bf16.gmra.mrb[4].mxu0 %vm132_vm6, %v7823_v36  ;;  %14632 = vmatprep.mubr.msk.bf16.mxu1 %vm15736_vm2, %v20392_v62 }
 0x888   :  { %14686 = vmatprep.mubr.msk.bf16.mxu0 %vm15736_vm2, %v20392_v62 }
 0x889   :  { %v6847_v47 = vpop.f32.mrb[244].mxu1 }
 0x88a   :  { %v7028_v50 = vpop.f32.mrb[188].mxu0  ;;  %v14414_v23 = vpop.f32.mrb[245].mxu1 }
 0x88b   :  { %v19118_v11 = vadd.f32 %v7028_v50, %v6847_v47  ;;  %v14468_v56 = vpop.f32.mrb[189].mxu0  ;;  %v6850_v46 = vpop.f32.mrb[246].mxu1  ;;  %v15662_v23 = vld [vmem:[%s20372_s6 + $0x40] sm:$0xff]  }
 0x88c   :  { %v7031_v6 = vpop.f32.mrb[190].mxu0  ;;  %v14415_v36 = vpop.f32.mrb[247].mxu1 }
 0x88d   :  { %v19120_v15 = vadd.f32 %v7031_v6, %v6850_v46  ;;  %v14469_v14 = vpop.f32.mrb[191].mxu0 }
 0x88e   :  { %14633 = vmatmul.mubr.msk.bf16.gmra.mrb[96].mxu1 %vm132_vm6, %v7578_v53  ;;  %v8282_v14 = vld [vmem:[#allocation4 + $0x40] sm:$0xff] }
 0x88f   :  { %14687 = vmatmul.mubr.msk.bf16.gmra.mrb[8].mxu0 %vm132_vm6, %v19122_v28  ;;  %14636 = vmatprep.mubr.msk.bf16.mxu1 %vm15736_vm2, %v20392_v62 }
 0x890   :  { %14690 = vmatprep.mubr.msk.bf16.mxu0 %vm15736_vm2, %v20392_v62 }
 0x891   :  { %v6855_v20 = vpop.f32.mrb[248].mxu1 }
 0x892   :  { %v7036_v48 = vpop.f32.mrb[192].mxu0  ;;  %v14418_v8 = vpop.f32.mrb[249].mxu1 }
 0x893   :  { %v19133_v0 = vadd.f32 %v7036_v48, %v6855_v20  ;;  %v14472_v43 = vpop.f32.mrb[193].mxu0  ;;  %v6858_v5 = vpop.f32.mrb[250].mxu1 }
 0x894   :  { %v7039_v54 = vpop.f32.mrb[194].mxu0  ;;  %v14419_v45 = vpop.f32.mrb[251].mxu1  ;;  %v8306_v43 = vpack.c.bf16 %v8283_v2, %v8282_v14  ;;  %v8041_v2 = vld [vmem:[#allocation4 + $0x66] sm:$0xff] }
 0x895   :  { %v19135_v57 = vadd.f32 %v7039_v54, %v6858_v5  ;;  %v14473_v16 = vpop.f32.mrb[195].mxu0  ;;  %v8039_v45 = vld [vmem:[#allocation4 + $0x56] sm:$0xff]  ;;  %v8286_v14 = vld [vmem:[#allocation4 + $0x60] sm:$0xff] }
 0x896   :  { %14637 = vmatmul.mubr.msk.bf16.gmra.mrb[100].mxu1 %vm132_vm6, %v7579_v39 }
 0x897   :  { %14691 = vmatmul.mubr.msk.bf16.gmra.mrb[12].mxu0 %vm132_vm6, %v7825_v19  ;;  %14696 = vmatprep.mubr.msk.bf16.mxu1 %vm15736_vm2, %v20392_v62 }
 0x898   :  { %14750 = vmatprep.mubr.msk.bf16.mxu0 %vm15736_vm2, %v20392_v62 }
 0x899   :  { %v6863_v44 = vpop.f32.mrb[252].mxu1 }
 0x89a   :  { %v7044_v26 = vpop.f32.mrb[196].mxu0  ;;  %v14422_v47 = vpop.f32.mrb[253].mxu1 }
 0x89b   :  { %v19145_v12 = vadd.f32 %v7044_v26, %v6863_v44  ;;  %v14476_v50 = vpop.f32.mrb[197].mxu0  ;;  %v6866_v31 = vpop.f32.mrb[254].mxu1  ;;  %v8038_v47 = vld [vmem:[#allocation4 + $0x4e] sm:$0xff] }
 0x89c   :  { %v7047_v60 = vpop.f32.mrb[198].mxu0  ;;  %v14423_v56 = vpop.f32.mrb[255].mxu1  ;;  %v8284_v50 = vld [vmem:[#allocation4 + $0x50] sm:$0xff] }
 0x89d   :  { %v14477_v46 = vpop.f32.mrb[199].mxu0 }
 0x89e   :  { %14697 = vmatmul.mubr.msk.bf16.vlgmr.msra.gmra.mrb[104].mxu1 %vm132_vm6, %v8059_v29  ;;  %v8061_v46 = vpack.c.bf16 %v8039_v45, %v8038_v47  ;;  %v8042_v47 = vld [vmem:[#allocation4 + $0x6e] sm:$0xff] }
 0x89f   :  { %14751 = vmatmul.mubr.msk.bf16.vlgmr.msra.gmra.mrb[16].mxu0 %vm132_vm6, %v8305_v10  ;;  %14803 = vmatpush3.bf16.msra.mxu1 %v15662_v23  ;;  %v8036_v10 = vld [vmem:[#allocation4 + $0x3e] sm:$0xff] }
 0x8a0   :  { %14700 = vmatprep.mubr.msk.bf16.mxu1 %vm15736_vm2, %v20392_v62  ;;  %14754 = vmatprep.mubr.msk.bf16.mxu0 %vm15736_vm2, %v20392_v62  ;;  %v8060_v8 = vpack.c.bf16 %v8037_v7, %v8036_v10  ;;  %v8040_v10 = vld [vmem:[#allocation4 + $0x5e] sm:$0xff] }
 0x8a1   :  { %15072 = vmatprep.subr.bf16.mxu1 %v20392_v62  ;;  %v7169_v6 = vpop.f32.mrb[0].mxu1 }
 0x8a2   :  { %v7415_v22 = vpop.f32.mrb[200].mxu0  ;;  %v7271_v61 = vadd.f32 %v7169_v6, %v18991_v55  ;;  %v14482_v29 = vpop.f32.mrb[1].mxu1 }
 0x8a3   :  { %v14536_v36 = vpop.f32.mrb[201].mxu0  ;;  %v7172_v59 = vpop.f32.mrb[2].mxu1 }
 0x8a4   :  { %v7418_v42 = vpop.f32.mrb[202].mxu0  ;;  %v19164_v53 = vadd.f32 %v7415_v22, %v7271_v61  ;;  %v7272_v20 = vadd.f32 %v7172_v59, %v18993_v30  ;;  %v14483_v48 = vpop.f32.mrb[3].mxu1  ;;  %v8285_v30 = vld [vmem:[#allocation4 + $0x58] sm:$0xff] }
 0x8a5   :  { %v14537_v17 = vpop.f32.mrb[203].mxu0  ;;  %v8307_v6 = vpack.c.bf16 %v8285_v30, %v8284_v50  ;;  %v8043_v30 = vld [vmem:[#allocation4 + $0x76] sm:$0xff] }
 0x8a6   :  { %v19167_v5 = vadd.f32 %v7418_v42, %v7272_v20  ;;  %14701 = vmatmul.mubr.msk.bf16.gmra.mrb[108].mxu1 %vm132_vm6, %v8060_v8  ;;  %v8288_v50 = vld [vmem:[#allocation4 + $0x70] sm:$0xff] }
 0x8a7   :  { %14755 = vmatmul.mubr.msk.bf16.gmra.mrb[20].mxu0 %vm132_vm6, %v8306_v43  ;;  %14704 = vmatprep.mubr.msk.bf16.mxu1 %vm15736_vm2, %v20392_v62  ;;  %v8062_v43 = vpack.c.bf16 %v8041_v2, %v8040_v10  ;;  %v8044_v10 = vld [vmem:[#allocation4 + $0x7e] sm:$0xff] }
 0x8a8   :  { %14758 = vmatprep.mubr.msk.bf16.mxu0 %vm15736_vm2, %v20392_v62 }
 0x8a9   :  { %v7177_v55 = vpop.f32.mrb[4].mxu1 }
 0x8aa   :  { %v7423_v54 = vpop.f32.mrb[204].mxu0  ;;  %v7273_v16 = vadd.f32 %v7177_v55, %v19001_v25  ;;  %v14486_v39 = vpop.f32.mrb[5].mxu1 }
 0x8ab   :  { %v14540_v19 = vpop.f32.mrb[205].mxu0  ;;  %v7180_v44 = vpop.f32.mrb[6].mxu1 }
 0x8ac   :  { %v7426_v26 = vpop.f32.mrb[206].mxu0  ;;  %v19176_v31 = vadd.f32 %v7423_v54, %v7273_v16  ;;  %v7274_v60 = vadd.f32 %v7180_v44, %v19003_v52  ;;  %v14487_v23 = vpop.f32.mrb[7].mxu1  ;;  %v8287_v52 = vld [vmem:[#allocation4 + $0x68] sm:$0xff] }
 0x8ad   :  { %v14541_v56 = vpop.f32.mrb[207].mxu0  ;;  %v8308_v55 = vpack.c.bf16 %v8287_v52, %v8286_v14  ;;  %v8045_v52 = vld [vmem:[#allocation4 + $0x86] sm:$0xff] }
 0x8ae   :  { %v19179_v22 = vadd.f32 %v7426_v26, %v7274_v60  ;;  %14705 = vmatmul.mubr.msk.bf16.gmra.mrb[112].mxu1 %vm132_vm6, %v8061_v46  ;;  %v8290_v14 = vld [vmem:[#allocation4 + $0x80] sm:$0xff] }
 0x8af   :  { %14759 = vmatmul.mubr.msk.bf16.gmra.mrb[24].mxu0 %vm132_vm6, %v8307_v6  ;;  %14708 = vmatprep.mubr.msk.bf16.mxu1 %vm15736_vm2, %v20392_v62  ;;  %v8063_v6 = vpack.c.bf16 %v8043_v30, %v8042_v47  ;;  %v8046_v47 = vld [vmem:[#allocation4 + $0x8e] sm:$0xff] }
 0x8b0   :  { %14762 = vmatprep.mubr.msk.bf16.mxu0 %vm15736_vm2, %v20392_v62 }
 0x8b1   :  { %v7185_v25 = vpop.f32.mrb[8].mxu1 }
 0x8b2   :  { %v7431_v7 = vpop.f32.mrb[208].mxu0  ;;  %v7275_v61 = vadd.f32 %v7185_v25, %v19014_v37  ;;  %v14490_v29 = vpop.f32.mrb[9].mxu1 }
 0x8b3   :  { %v14544_v36 = vpop.f32.mrb[209].mxu0  ;;  %v7188_v59 = vpop.f32.mrb[10].mxu1 }
 0x8b4   :  { %v7434_v42 = vpop.f32.mrb[210].mxu0  ;;  %v19188_v20 = vadd.f32 %v7431_v7, %v7275_v61  ;;  %v7276_v48 = vadd.f32 %v7188_v59, %v19016_v1  ;;  %v14491_v17 = vpop.f32.mrb[11].mxu1  ;;  %v8289_v1 = vld [vmem:[#allocation4 + $0x78] sm:$0xff] }
 0x8b5   :  { %v14545_v8 = vpop.f32.mrb[211].mxu0  ;;  %v8309_v25 = vpack.c.bf16 %v8289_v1, %v8288_v50  ;;  %v8047_v1 = vld [vmem:[#allocation4 + $0x96] sm:$0xff] }
 0x8b6   :  { %v19191_v54 = vadd.f32 %v7434_v42, %v7276_v48  ;;  %14709 = vmatmul.mubr.msk.bf16.gmra.mrb[116].mxu1 %vm132_vm6, %v8062_v43  ;;  %v8292_v50 = vld [vmem:[#allocation4 + $0x90] sm:$0xff] }
 0x8b7   :  { %14763 = vmatmul.mubr.msk.bf16.gmra.mrb[28].mxu0 %vm132_vm6, %v8308_v55  ;;  %14712 = vmatprep.mubr.msk.bf16.mxu1 %vm15736_vm2, %v20392_v62  ;;  %v8064_v55 = vpack.c.bf16 %v8045_v52, %v8044_v10  ;;  %v8048_v10 = vld [vmem:[#allocation4 + $0x9e] sm:$0xff] }
 0x8b8   :  { %14766 = vmatprep.mubr.msk.bf16.mxu0 %vm15736_vm2, %v20392_v62 }
 0x8b9   :  { %v7193_v37 = vpop.f32.mrb[12].mxu1 }
 0x8ba   :  { %v7439_v45 = vpop.f32.mrb[212].mxu0  ;;  %v7277_v16 = vadd.f32 %v7193_v37, %v19027_v3  ;;  %v14494_v39 = vpop.f32.mrb[13].mxu1 }
 0x8bb   :  { %v14548_v19 = vpop.f32.mrb[213].mxu0  ;;  %v7196_v44 = vpop.f32.mrb[14].mxu1 }
 0x8bc   :  { %v7442_v26 = vpop.f32.mrb[214].mxu0  ;;  %v19200_v60 = vadd.f32 %v7439_v45, %v7277_v16  ;;  %v7278_v23 = vadd.f32 %v7196_v44, %v19029_v40  ;;  %v14495_v56 = vpop.f32.mrb[15].mxu1  ;;  %v8291_v40 = vld [vmem:[#allocation4 + $0x88] sm:$0xff] }
 0x8bd   :  { %v14549_v46 = vpop.f32.mrb[215].mxu0  ;;  %v8310_v37 = vpack.c.bf16 %v8291_v40, %v8290_v14  ;;  %v8049_v40 = vld [vmem:[#allocation4 + $0xa6] sm:$0xff] }
 0x8be   :  { %v19203_v7 = vadd.f32 %v7442_v26, %v7278_v23  ;;  %14713 = vmatmul.mubr.msk.bf16.gmra.mrb[120].mxu1 %vm132_vm6, %v8063_v6  ;;  %v8294_v14 = vld [vmem:[#allocation4 + $0xa0] sm:$0xff] }
 0x8bf   :  { %14767 = vmatmul.mubr.msk.bf16.gmra.mrb[64].mxu0 %vm132_vm6, %v8309_v25  ;;  %14716 = vmatprep.mubr.msk.bf16.mxu1 %vm15736_vm2, %v20392_v62  ;;  %v8065_v25 = vpack.c.bf16 %v8047_v1, %v8046_v47  ;;  %v8050_v47 = vld [vmem:[#allocation4 + $0xae] sm:$0xff] }
 0x8c0   :  { %14770 = vmatprep.mubr.msk.bf16.mxu0 %vm15736_vm2, %v20392_v62 }
 0x8c1   :  { %v7201_v3 = vpop.f32.mrb[16].mxu1 }
 0x8c2   :  { %v7447_v2 = vpop.f32.mrb[216].mxu0  ;;  %v7279_v61 = vadd.f32 %v7201_v3, %v19040_v21  ;;  %v14498_v29 = vpop.f32.mrb[17].mxu1 }
 0x8c3   :  { %v14552_v36 = vpop.f32.mrb[217].mxu0  ;;  %v7204_v59 = vpop.f32.mrb[18].mxu1 }
 0x8c4   :  { %v7450_v42 = vpop.f32.mrb[218].mxu0  ;;  %v19212_v48 = vadd.f32 %v7447_v2, %v7279_v61  ;;  %v7280_v17 = vadd.f32 %v7204_v59, %v19042_v27  ;;  %v14499_v8 = vpop.f32.mrb[19].mxu1  ;;  %v8293_v27 = vld [vmem:[#allocation4 + $0x98] sm:$0xff] }
 0x8c5   :  { %v14553_v43 = vpop.f32.mrb[219].mxu0  ;;  %v8311_v3 = vpack.c.bf16 %v8293_v27, %v8292_v50  ;;  %v8051_v27 = vld [vmem:[#allocation4 + $0xb6] sm:$0xff] }
 0x8c6   :  { %v19215_v45 = vadd.f32 %v7450_v42, %v7280_v17  ;;  %14717 = vmatmul.mubr.msk.bf16.gmra.mrb[124].mxu1 %vm132_vm6, %v8064_v55  ;;  %v8296_v50 = vld [vmem:[#allocation4 + $0xb0] sm:$0xff] }
 0x8c7   :  { %14771 = vmatmul.mubr.msk.bf16.gmra.mrb[68].mxu0 %vm132_vm6, %v8310_v37  ;;  %14720 = vmatprep.mubr.msk.bf16.mxu1 %vm15736_vm2, %v20392_v62  ;;  %v8066_v37 = vpack.c.bf16 %v8049_v40, %v8048_v10  ;;  %v8052_v10 = vld [vmem:[#allocation4 + $0xbe] sm:$0xff] }
 0x8c8   :  { %14774 = vmatprep.mubr.msk.bf16.mxu0 %vm15736_vm2, %v20392_v62 }
 0x8c9   :  { %v7209_v21 = vpop.f32.mrb[20].mxu1 }
 0x8ca   :  { %v7455_v30 = vpop.f32.mrb[220].mxu0  ;;  %v7281_v16 = vadd.f32 %v7209_v21, %v19053_v34  ;;  %v14502_v39 = vpop.f32.mrb[21].mxu1 }
 0x8cb   :  { %v14556_v19 = vpop.f32.mrb[221].mxu0  ;;  %v7212_v44 = vpop.f32.mrb[22].mxu1 }
 0x8cc   :  { %v7458_v26 = vpop.f32.mrb[222].mxu0  ;;  %v19224_v23 = vadd.f32 %v7455_v30, %v7281_v16  ;;  %v7282_v56 = vadd.f32 %v7212_v44, %v19055_v13  ;;  %v14503_v46 = vpop.f32.mrb[23].mxu1  ;;  %v8295_v13 = vld [vmem:[#allocation4 + $0xa8] sm:$0xff] }
 0x8cd   :  { %v14557_v6 = vpop.f32.mrb[223].mxu0  ;;  %v8312_v21 = vpack.c.bf16 %v8295_v13, %v8294_v14  ;;  %v8053_v13 = vld [vmem:[#allocation4 + $0xc6] sm:$0xff] }
 0x8ce   :  { %v19227_v2 = vadd.f32 %v7458_v26, %v7282_v56  ;;  %14721 = vmatmul.mubr.msk.bf16.gmra.mrb[128].mxu1 %vm132_vm6, %v8065_v25  ;;  %v8298_v14 = vld [vmem:[#allocation4 + $0xc0] sm:$0xff] }
 0x8cf   :  { %14775 = vmatmul.mubr.msk.bf16.gmra.mrb[72].mxu0 %vm132_vm6, %v8311_v3  ;;  %14724 = vmatprep.mubr.msk.bf16.mxu1 %vm15736_vm2, %v20392_v62  ;;  %v8067_v3 = vpack.c.bf16 %v8051_v27, %v8050_v47 }
 0x8d0   :  { %14778 = vmatprep.mubr.msk.bf16.mxu0 %vm15736_vm2, %v20392_v62 }
 0x8d1   :  { %v7217_v34 = vpop.f32.mrb[24].mxu1 }
 0x8d2   :  { %v7463_v52 = vpop.f32.mrb[224].mxu0  ;;  %v7283_v61 = vadd.f32 %v7217_v34, %v19066_v51  ;;  %v14506_v29 = vpop.f32.mrb[25].mxu1 }
 0x8d3   :  { %v14560_v36 = vpop.f32.mrb[225].mxu0  ;;  %v7220_v59 = vpop.f32.mrb[26].mxu1 }
 0x8d4   :  { %v7466_v42 = vpop.f32.mrb[226].mxu0  ;;  %v19236_v17 = vadd.f32 %v7463_v52, %v7283_v61  ;;  %v7284_v8 = vadd.f32 %v7220_v59, %v19068_v4  ;;  %v14507_v43 = vpop.f32.mrb[27].mxu1  ;;  %v8297_v4 = vld [vmem:[#allocation4 + $0xb8] sm:$0xff] }
 0x8d5   :  { %v14561_v55 = vpop.f32.mrb[227].mxu0  ;;  %v8313_v34 = vpack.c.bf16 %v8297_v4, %v8296_v50  ;;  %v8301_v4 = vld [vmem:[#allocation4 + $0xd8] sm:$0xff] }
 0x8d6   :  { %v19239_v30 = vadd.f32 %v7466_v42, %v7284_v8  ;;  %14725 = vmatmul.mubr.msk.bf16.gmra.mrb[132].mxu1 %vm132_vm6, %v8066_v37 }
 0x8d7   :  { %14779 = vmatmul.mubr.msk.bf16.gmra.mrb[76].mxu0 %vm132_vm6, %v8312_v21  ;;  %14728 = vmatprep.mubr.msk.bf16.mxu1 %vm15736_vm2, %v20392_v62  ;;  %v8068_v21 = vpack.c.bf16 %v8053_v13, %v8052_v10 }
 0x8d8   :  { %14782 = vmatprep.mubr.msk.bf16.mxu0 %vm15736_vm2, %v20392_v62 }
 0x8d9   :  { %v7225_v51 = vpop.f32.mrb[28].mxu1 }
 0x8da   :  { %v7471_v1 = vpop.f32.mrb[228].mxu0  ;;  %v7285_v16 = vadd.f32 %v7225_v51, %v19079_v18  ;;  %v14510_v39 = vpop.f32.mrb[29].mxu1 }
 0x8db   :  { %v14564_v19 = vpop.f32.mrb[229].mxu0  ;;  %v7228_v44 = vpop.f32.mrb[30].mxu1 }
 0x8dc   :  { %v7474_v26 = vpop.f32.mrb[230].mxu0  ;;  %v19248_v56 = vadd.f32 %v7471_v1, %v7285_v16  ;;  %v7286_v46 = vadd.f32 %v7228_v44, %v19081_v24  ;;  %v14511_v6 = vpop.f32.mrb[31].mxu1  ;;  %v8299_v24 = vld [vmem:[#allocation4 + $0xc8] sm:$0xff] }
 0x8dd   :  { %v14565_v25 = vpop.f32.mrb[231].mxu0  ;;  %v8314_v51 = vpack.c.bf16 %v8299_v24, %v8298_v14 }
 0x8de   :  { %v19251_v52 = vadd.f32 %v7474_v26, %v7286_v46  ;;  %14729 = vmatmul.mubr.msk.bf16.gmra.mrb[136].mxu1 %vm132_vm6, %v8067_v3  ;;  %v8300_v26 = vld [vmem:[#allocation4 + $0xd0] sm:$0xff] }
 0x8df   :  { %14783 = vmatmul.mubr.msk.bf16.gmra.mrb[80].mxu0 %vm132_vm6, %v8313_v34  ;;  %14732 = vmatprep.mubr.msk.bf16.mxu1 %vm15736_vm2, %v20392_v62  ;;  %v8315_v25 = vpack.c.bf16 %v8301_v4, %v8300_v26 }
 0x8e0   :  { %14786 = vmatprep.mubr.msk.bf16.mxu0 %vm15736_vm2, %v20392_v62 }
 0x8e1   :  { %v7233_v18 = vpop.f32.mrb[32].mxu1 }
 0x8e2   :  { %v7479_v40 = vpop.f32.mrb[232].mxu0  ;;  %v7287_v61 = vadd.f32 %v7233_v18, %v19092_v41  ;;  %v14514_v29 = vpop.f32.mrb[33].mxu1  ;;  %v8057_v18 = vld [vmem:[#allocation4 + $0xe6] sm:$0xff] }
 0x8e3   :  { %v14568_v36 = vpop.f32.mrb[233].mxu0  ;;  %v7236_v59 = vpop.f32.mrb[34].mxu1  ;;  %v8070_v14 = vpack.c.bf16 %v8057_v18, %v19131_v63 }
 0x8e4   :  { %v7482_v42 = vpop.f32.mrb[234].mxu0  ;;  %v19260_v8 = vadd.f32 %v7479_v40, %v7287_v61  ;;  %v7288_v43 = vadd.f32 %v7236_v59, %v19094_v9  ;;  %v14515_v55 = vpop.f32.mrb[35].mxu1  ;;  %v8302_v36 = vld [vmem:[#allocation4 + $0xe0] sm:$0xff] }
 0x8e5   :  { %v14569_v37 = vpop.f32.mrb[235].mxu0 }
 0x8e6   :  { %v19263_v1 = vadd.f32 %v7482_v42, %v7288_v43  ;;  %14733 = vmatmul.mubr.msk.bf16.gmra.mrb[140].mxu1 %vm132_vm6, %v8068_v21  ;;  %v8304_v21 = vld [vmem:[#allocation4 + $0xf0] sm:$0xff] }
 0x8e7   :  { %14787 = vmatmul.mubr.msk.bf16.gmra.mrb[84].mxu0 %vm132_vm6, %v8314_v51  ;;  %14736 = vmatprep.mubr.msk.bf16.mxu1 %vm15736_vm2, %v20392_v62  ;;  %v8317_v26 = vpack.c.bf16 %v8304_v21, %v8304_v21 }
 0x8e8   :  { %14790 = vmatprep.mubr.msk.bf16.mxu0 %vm15736_vm2, %v20392_v62 }
 0x8e9   :  { %v7241_v41 = vpop.f32.mrb[36].mxu1 }
 0x8ea   :  { %v7487_v27 = vpop.f32.mrb[236].mxu0  ;;  %v7289_v9 = vadd.f32 %v7241_v41, %v19105_v32  ;;  %v14518_v16 = vpop.f32.mrb[37].mxu1 }
 0x8eb   :  { %v14572_v39 = vpop.f32.mrb[237].mxu0  ;;  %v7244_v19 = vpop.f32.mrb[38].mxu1 }
 0x8ec   :  { %v7490_v44 = vpop.f32.mrb[238].mxu0  ;;  %v19272_v47 = vadd.f32 %v7487_v27, %v7289_v9  ;;  %v7290_v50 = vadd.f32 %v7244_v19, %v19107_v49  ;;  %v14519_v46 = vpop.f32.mrb[39].mxu1  ;;  %v8303_v49 = vld [vmem:[#allocation4 + $0xe8] sm:$0xff] }
 0x8ed   :  { %v14573_v6 = vpop.f32.mrb[239].mxu0  ;;  %v8316_v43 = vpack.c.bf16 %v8303_v49, %v8302_v36 }
 0x8ee   :  { %v19275_v3 = vadd.f32 %v7490_v44, %v7290_v50  ;;  %14737 = vmatmul.mubr.msk.bf16.gmra.mrb[144].mxu1 %vm132_vm6, %v19122_v28 }
 0x8ef   :  { %14791 = vmatmul.mubr.msk.bf16.gmra.mrb[88].mxu0 %vm132_vm6, %v8315_v25  ;;  %14740 = vmatprep.mubr.msk.bf16.mxu1 %vm15736_vm2, %v20392_v62 }
 0x8f0   :  { %14794 = vmatprep.mubr.msk.bf16.mxu0 %vm15736_vm2, %v20392_v62 }
 0x8f1   :  { %v7249_v32 = vpop.f32.mrb[40].mxu1 }
 0x8f2   :  { %v7495_v34 = vpop.f32.mrb[240].mxu0  ;;  %v7291_v40 = vadd.f32 %v7249_v32, %v19118_v11  ;;  %v14522_v13 = vpop.f32.mrb[41].mxu1 }
 0x8f3   :  { %v14576_v24 = vpop.f32.mrb[241].mxu0  ;;  %v7252_v61 = vpop.f32.mrb[42].mxu1 }
 0x8f4   :  { %v7498_v29 = vpop.f32.mrb[242].mxu0  ;;  %v19285_v28 = vadd.f32 %v7495_v34, %v7291_v40  ;;  %v7292_v59 = vadd.f32 %v7252_v61, %v19120_v15  ;;  %v14523_v42 = vpop.f32.mrb[43].mxu1  ;;  %v8058_v15 = vld [vmem:[#allocation4 + $0xee] sm:$0xff] }
 0x8f5   :  { %v14577_v10 = vpop.f32.mrb[243].mxu0  ;;  %v8071_v44 = vpack.c.bf16 %v8058_v15, %v8058_v15  ;;  %v8529_v61 = vld [vmem:[#allocation4 + $0x4a] sm:$0xff]  ;;  %v8531_v15 = vld [vmem:[#allocation4 + $0x5a] sm:$0xff] }
 0x8f6   :  { %v19289_v55 = vadd.f32 %v7498_v29, %v7292_v59  ;;  %14741 = vmatmul.mubr.msk.bf16.gmra.mrb[148].mxu1 %vm132_vm6, %v8070_v14  ;;  %v8528_v10 = vld [vmem:[#allocation4 + $0x42] sm:$0xff] }
 0x8f7   :  { %14795 = vmatmul.mubr.msk.bf16.gmra.mrb[92].mxu0 %vm132_vm6, %v8316_v43  ;;  %14744 = vmatprep.mubr.msk.bf16.mxu1 %vm15736_vm2, %v20392_v62 }
 0x8f8   :  { %14798 = vmatprep.mubr.msk.bf16.mxu0 %vm15736_vm2, %v20392_v62 }
 0x8f9   :  { %v7257_v11 = vpop.f32.mrb[44].mxu1 }
 0x8fa   :  { %v7503_v37 = vpop.f32.mrb[244].mxu0  ;;  %v7293_v51 = vadd.f32 %v7257_v11, %v19133_v0  ;;  %v14526_v63 = vpop.f32.mrb[45].mxu1 }
 0x8fb   :  { %v14580_v41 = vpop.f32.mrb[245].mxu0  ;;  %v7260_v27 = vpop.f32.mrb[46].mxu1 }
 0x8fc   :  { %v7506_v4 = vpop.f32.mrb[246].mxu0  ;;  %v19298_v9 = vadd.f32 %v7503_v37, %v7293_v51  ;;  %v7294_v16 = vadd.f32 %v7260_v27, %v19135_v57  ;;  %v14527_v39 = vpop.f32.mrb[47].mxu1 }
 0x8fd   :  { %v14581_v19 = vpop.f32.mrb[247].mxu0 }
 0x8fe   :  { %v19301_v50 = vadd.f32 %v7506_v4, %v7294_v16  ;;  %14745 = vmatmul.mubr.msk.bf16.gmra.mrb[152].mxu1 %vm132_vm6, %v8071_v44 }
 0x8ff   :  { %14799 = vmatmul.mubr.msk.bf16.gmra.mrb[96].mxu0 %vm132_vm6, %v8317_v26  ;;  %14804 = vmatprep.mubr.msk.bf16.mxu1 %vm15736_vm2, %v20392_v62 }
 0x901   :  { %v7265_v0 = vpop.f32.mrb[48].mxu1 }
 0x902   :  { %v7511_v46 = vpop.f32.mrb[248].mxu0  ;;  %v7295_v6 = vadd.f32 %v7265_v0, %v19145_v12  ;;  %v14530_v25 = vpop.f32.mrb[49].mxu1 }
 0x903   :  { %v14584_v32 = vpop.f32.mrb[249].mxu0  ;;  %v7268_v57 = vpop.f32.mrb[50].mxu1 }
 0x904   :  { %v7514_v34 = vpop.f32.mrb[250].mxu0  ;;  %v19308_v18 = vadd.f32 %v7511_v46, %v7295_v6  ;;  %v14531_v49 = vpop.f32.mrb[51].mxu1  ;;  %v8533_v46 = vld [vmem:[#allocation4 + $0x6a] sm:$0xff] }
 0x905   :  { %v14585_v40 = vpop.f32.mrb[251].mxu0 }
 0x906   :  { %14805 = vmatmul.mubr.msk.bf16.vlgmr.msra.gmra.mrb[156].mxu1 %vm132_vm6, %v8551_v33  ;;  %v8552_v33 = vpack.c.bf16 %v8529_v61, %v8528_v10 }
 0x907   :  { %14808 = vmatprep.mubr.msk.bf16.mxu1 %vm15736_vm2, %v20392_v62 }
 0x909   :  { %v7661_v13 = vpop.f32.mrb[52].mxu1 }
 0x90a   :  { %v7907_v24 = vpop.f32.mrb[252].mxu0  ;;  %v7763_v12 = vadd.f32 %v7661_v13, %v19164_v53  ;;  %v14590_v29 = vpop.f32.mrb[53].mxu1 }
 0x90b   :  { %v14644_v36 = vpop.f32.mrb[253].mxu0  ;;  %v7664_v59 = vpop.f32.mrb[54].mxu1 }
 0x90c   :  { %v7910_v42 = vpop.f32.mrb[254].mxu0  ;;  %v19317_v14 = vadd.f32 %v7907_v24, %v7763_v12  ;;  %v7764_v43 = vadd.f32 %v7664_v59, %v19167_v5  ;;  %v14591_v38 = vpop.f32.mrb[55].mxu1  ;;  %v8530_v5 = vld [vmem:[#allocation4 + $0x52] sm:$0xff]  ;;  %v8535_v36 = vld [vmem:[#allocation4 + $0x7a] sm:$0xff] }
 0x90d   :  { %v14645_v35 = vpop.f32.mrb[255].mxu0  ;;  %v8553_v44 = vpack.c.bf16 %v8531_v15, %v8530_v5 }
 0x90e   :  { %v19320_v11 = vadd.f32 %v7910_v42, %v7764_v43  ;;  %14809 = vmatmul.mubr.msk.bf16.gmra.mrb[160].mxu1 %vm132_vm6, %v8552_v33 }
 0x90f   :  { %14812 = vmatprep.mubr.msk.bf16.mxu1 %vm15736_vm2, %v20392_v62 }
 0x911   :  { %v7669_v53 = vpop.f32.mrb[56].mxu1 }
 0x912   :  { %v7915_v37 = vpop.f32.mrb[32].mxu0  ;;  %v7765_v21 = vadd.f32 %v7669_v53, %v19176_v31  ;;  %v14594_v51 = vpop.f32.mrb[57].mxu1 }
 0x913   :  { %v14648_v63 = vpop.f32.mrb[33].mxu0  ;;  %v7672_v41 = vpop.f32.mrb[58].mxu1 }
 0x914   :  { %v7918_v27 = vpop.f32.mrb[34].mxu0  ;;  %v19326_v4 = vadd.f32 %v7915_v37, %v7765_v21  ;;  %v7766_v16 = vadd.f32 %v7672_v41, %v19179_v22  ;;  %v14595_v39 = vpop.f32.mrb[59].mxu1  ;;  %v8532_v22 = vld [vmem:[#allocation4 + $0x62] sm:$0xff]  ;;  %v8537_v63 = vld [vmem:[#allocation4 + $0x8a] sm:$0xff] }
 0x915   :  { %v14649_v19 = vpop.f32.mrb[35].mxu0  ;;  %v8554_v61 = vpack.c.bf16 %v8533_v46, %v8532_v22 }
 0x916   :  { %v19329_v26 = vadd.f32 %v7918_v27, %v7766_v16  ;;  %14813 = vmatmul.mubr.msk.bf16.gmra.mrb[164].mxu1 %vm132_vm6, %v8553_v44 }
 0x917   :  { %14816 = vmatprep.mubr.msk.bf16.mxu1 %vm15736_vm2, %v20392_v62 }
 0x919   :  { %v7677_v31 = vpop.f32.mrb[60].mxu1 }
 0x91a   :  { %v7923_v0 = vpop.f32.mrb[36].mxu0  ;;  %v7767_v6 = vadd.f32 %v7677_v31, %v19188_v20  ;;  %v14598_v25 = vpop.f32.mrb[61].mxu1 }
 0x91b   :  { %v14652_v32 = vpop.f32.mrb[37].mxu0  ;;  %v7680_v57 = vpop.f32.mrb[62].mxu1 }
 0x91c   :  { %v7926_v34 = vpop.f32.mrb[38].mxu0  ;;  %v19335_v49 = vadd.f32 %v7923_v0, %v7767_v6  ;;  %v7768_v40 = vadd.f32 %v7680_v57, %v19191_v54  ;;  %v14599_v13 = vpop.f32.mrb[63].mxu1  ;;  %v8534_v54 = vld [vmem:[#allocation4 + $0x72] sm:$0xff]  ;;  %v8539_v57 = vld [vmem:[#allocation4 + $0x9a] sm:$0xff] }
 0x91d   :  { %v14653_v24 = vpop.f32.mrb[39].mxu0  ;;  %v8555_v15 = vpack.c.bf16 %v8535_v36, %v8534_v54 }
 0x91e   :  { %v19338_v12 = vadd.f32 %v7926_v34, %v7768_v40  ;;  %14817 = vmatmul.mubr.msk.bf16.gmra.mrb[168].mxu1 %vm132_vm6, %v8554_v61  ;;  %v8538_v24 = vld [vmem:[#allocation4 + $0x92] sm:$0xff] }
 0x91f   :  { %14820 = vmatprep.mubr.msk.bf16.mxu1 %vm15736_vm2, %v20392_v62 }
 0x921   :  { %v7685_v20 = vpop.f32.mrb[64].mxu1 }
 0x922   :  { %v7931_v29 = vpop.f32.mrb[40].mxu0  ;;  %v7769_v59 = vadd.f32 %v7685_v20, %v19200_v60  ;;  %v14602_v42 = vpop.f32.mrb[65].mxu1 }
 0x923   :  { %v14656_v10 = vpop.f32.mrb[41].mxu0  ;;  %v7688_v43 = vpop.f32.mrb[66].mxu1 }
 0x924   :  { %v7934_v38 = vpop.f32.mrb[42].mxu0  ;;  %v19344_v35 = vadd.f32 %v7931_v29, %v7769_v59  ;;  %v7770_v33 = vadd.f32 %v7688_v43, %v19203_v7  ;;  %v14603_v53 = vpop.f32.mrb[67].mxu1  ;;  %v8536_v7 = vld [vmem:[#allocation4 + $0x82] sm:$0xff]  ;;  %v8557_v59 = vpack.c.bf16 %v8539_v57, %v8538_v24  ;;  %v8541_v43 = vld [vmem:[#allocation4 + $0xaa] sm:$0xff] }
 0x925   :  { %v14657_v37 = vpop.f32.mrb[43].mxu0  ;;  %v8556_v46 = vpack.c.bf16 %v8537_v63, %v8536_v7 }
 0x926   :  { %v19347_v21 = vadd.f32 %v7934_v38, %v7770_v33  ;;  %14821 = vmatmul.mubr.msk.bf16.gmra.mrb[172].mxu1 %vm132_vm6, %v8555_v15 }
 0x927   :  { %14824 = vmatprep.mubr.msk.bf16.mxu1 %vm15736_vm2, %v20392_v62 }
 0x929   :  { %v7693_v60 = vpop.f32.mrb[68].mxu1 }
 0x92a   :  { %v7939_v51 = vpop.f32.mrb[44].mxu0  ;;  %v7771_v41 = vadd.f32 %v7693_v60, %v19212_v48  ;;  %v14606_v27 = vpop.f32.mrb[69].mxu1  ;;  %v15663_v48 = vld [vmem:[%s20373_s7 + $0xc] sm:$0xff]  }
 0x92b   :  { %v14660_v5 = vpop.f32.mrb[45].mxu0  ;;  %v7696_v16 = vpop.f32.mrb[70].mxu1  ;;  %14856 = vmatprep.subr.bf16.mxu0 %v15663_v48 }
 0x92c   :  { %v7942_v39 = vpop.f32.mrb[46].mxu0  ;;  %v19353_v19 = vadd.f32 %v7939_v51, %v7771_v41  ;;  %v7772_v44 = vadd.f32 %v7696_v16, %v19215_v45  ;;  %v14607_v31 = vpop.f32.mrb[71].mxu1  ;;  %14857 = vmatpush3.bf16.msra.mxu0 %v15663_v48  ;;  %v8543_v16 = vld [vmem:[#allocation4 + $0xba] sm:$0xff] }
 0x92d   :  { %v14661_v0 = vpop.f32.mrb[47].mxu0 }
 0x92e   :  { %v19356_v6 = vadd.f32 %v7942_v39, %v7772_v44  ;;  %14825 = vmatmul.mubr.msk.bf16.gmra.mrb[176].mxu1 %vm132_vm6, %v8556_v46 }
 0x92f   :  { %14828 = vmatprep.mubr.msk.bf16.mxu1 %vm15736_vm2, %v20392_v62 }
 0x931   :  { %v7701_v25 = vpop.f32.mrb[72].mxu1 }
 0x932   :  { %v7947_v32 = vpop.f32.mrb[48].mxu0  ;;  %v7773_v45 = vadd.f32 %v7701_v25, %v19224_v23  ;;  %v14610_v34 = vpop.f32.mrb[73].mxu1 }
 0x933   :  { %v14664_v22 = vpop.f32.mrb[49].mxu0  ;;  %v7704_v40 = vpop.f32.mrb[74].mxu1 }
 0x934   :  { %v7950_v13 = vpop.f32.mrb[50].mxu0  ;;  %v19365_v61 = vadd.f32 %v7947_v32, %v7773_v45  ;;  %v7774_v20 = vadd.f32 %v7704_v40, %v19227_v2  ;;  %v14611_v29 = vpop.f32.mrb[75].mxu1  ;;  %v8540_v2 = vld [vmem:[#allocation4 + $0xa2] sm:$0xff]  ;;  %v8545_v22 = vld [vmem:[#allocation4 + $0xca] sm:$0xff] }
 0x935   :  { %v14665_v36 = vpop.f32.mrb[51].mxu0  ;;  %v8558_v41 = vpack.c.bf16 %v8541_v43, %v8540_v2 }
 0x936   :  { %v19368_v42 = vadd.f32 %v7950_v13, %v7774_v20  ;;  %14829 = vmatmul.mubr.msk.bf16.gmra.mrb[180].mxu1 %vm132_vm6, %v8557_v59 }
 0x937   :  { %14832 = vmatprep.mubr.msk.bf16.mxu1 %vm15736_vm2, %v20392_v62 }
 0x939   :  { %v7709_v23 = vpop.f32.mrb[76].mxu1 }
 0x93a   :  { %v7955_v10 = vpop.f32.mrb[52].mxu0  ;;  %v7775_v38 = vadd.f32 %v7709_v23, %v19236_v17  ;;  %v14614_v54 = vpop.f32.mrb[77].mxu1 }
 0x93b   :  { %v14668_v33 = vpop.f32.mrb[53].mxu0  ;;  %v7712_v53 = vpop.f32.mrb[78].mxu1 }
 0x93c   :  { %v7958_v37 = vpop.f32.mrb[54].mxu0  ;;  %v19374_v15 = vadd.f32 %v7955_v10, %v7775_v38  ;;  %v7776_v60 = vadd.f32 %v7712_v53, %v19239_v30  ;;  %v14615_v51 = vpop.f32.mrb[79].mxu1  ;;  %v8542_v30 = vld [vmem:[#allocation4 + $0xb2] sm:$0xff]  ;;  %v8547_v33 = vld [vmem:[#allocation4 + $0xda] sm:$0xff] }
 0x93d   :  { %v14669_v63 = vpop.f32.mrb[55].mxu0  ;;  %v8559_v57 = vpack.c.bf16 %v8543_v16, %v8542_v30 }
 0x93e   :  { %v19377_v27 = vadd.f32 %v7958_v37, %v7776_v60  ;;  %14833 = vmatmul.mubr.msk.bf16.gmra.mrb[184].mxu1 %vm132_vm6, %v8558_v41 }
 0x93f   :  { %14836 = vmatprep.mubr.msk.bf16.mxu1 %vm15736_vm2, %v20392_v62 }
 0x941   :  { %v7717_v17 = vpop.f32.mrb[80].mxu1 }
 0x942   :  { %v7963_v5 = vpop.f32.mrb[56].mxu0  ;;  %v7777_v39 = vadd.f32 %v7717_v17, %v19248_v56  ;;  %v14618_v7 = vpop.f32.mrb[81].mxu1 }
 0x943   :  { %v14672_v44 = vpop.f32.mrb[57].mxu0  ;;  %v7720_v31 = vpop.f32.mrb[82].mxu1  ;;  %v8549_v7 = vld [vmem:[#allocation4 + $0xea] sm:$0xff] }
 0x944   :  { %v7966_v0 = vpop.f32.mrb[58].mxu0  ;;  %v19383_v46 = vadd.f32 %v7963_v5, %v7777_v39  ;;  %v7778_v48 = vadd.f32 %v7720_v31, %v19251_v52  ;;  %v14619_v25 = vpop.f32.mrb[83].mxu1  ;;  %v8544_v52 = vld [vmem:[#allocation4 + $0xc2] sm:$0xff] }
 0x945   :  { %v14673_v32 = vpop.f32.mrb[59].mxu0  ;;  %v8560_v43 = vpack.c.bf16 %v8545_v22, %v8544_v52  ;;  %v8548_v25 = vld [vmem:[#allocation4 + $0xe2] sm:$0xff] }
 0x946   :  { %v19386_v45 = vadd.f32 %v7966_v0, %v7778_v48  ;;  %14837 = vmatmul.mubr.msk.bf16.gmra.mrb[188].mxu1 %vm132_vm6, %v8559_v57  ;;  %v8562_v22 = vpack.c.bf16 %v8549_v7, %v8548_v25 }
 0x947   :  { %14840 = vmatprep.mubr.msk.bf16.mxu1 %vm15736_vm2, %v20392_v62 }
 0x949   :  { %v7725_v56 = vpop.f32.mrb[84].mxu1 }
 0x94a   :  { %v7971_v34 = vpop.f32.mrb[60].mxu0  ;;  %v7779_v40 = vadd.f32 %v7725_v56, %v19260_v8  ;;  %v14622_v13 = vpop.f32.mrb[85].mxu1 }
 0x94b   :  { %v14676_v24 = vpop.f32.mrb[61].mxu0  ;;  %v7728_v20 = vpop.f32.mrb[86].mxu1 }
 0x94c   :  { %v7974_v29 = vpop.f32.mrb[62].mxu0  ;;  %v19392_v36 = vadd.f32 %v7971_v34, %v7779_v40  ;;  %v7780_v59 = vadd.f32 %v7728_v20, %v19263_v1  ;;  %v14623_v23 = vpop.f32.mrb[87].mxu1  ;;  %v8546_v1 = vld [vmem:[#allocation4 + $0xd2] sm:$0xff] }
 0x94d   :  { %v14677_v10 = vpop.f32.mrb[63].mxu0  ;;  %v8561_v16 = vpack.c.bf16 %v8547_v33, %v8546_v1  ;;  %v8550_v24 = vld [vmem:[#allocation4 + $0xf2] sm:$0xff] }
 0x94e   :  { %v19395_v38 = vadd.f32 %v7974_v29, %v7780_v59  ;;  %14841 = vmatmul.mubr.msk.bf16.gmra.mrb[192].mxu1 %vm132_vm6, %v8560_v43 }
 0x94f   :  { %14844 = vmatprep.mubr.msk.bf16.mxu1 %vm15736_vm2, %v20392_v62 }
 0x951   :  { %v7733_v8 = vpop.f32.mrb[88].mxu1 }
 0x952   :  { %v7979_v54 = vpop.f32.mrb[0].mxu0  ;;  %v7781_v53 = vadd.f32 %v7733_v8, %v19272_v47  ;;  %v14626_v37 = vpop.f32.mrb[89].mxu1 }
 0x953   :  { %v14680_v2 = vpop.f32.mrb[1].mxu0  ;;  %v7736_v60 = vpop.f32.mrb[90].mxu1 }
 0x954   :  { %v7982_v51 = vpop.f32.mrb[2].mxu0  ;;  %v19401_v63 = vadd.f32 %v7979_v54, %v7781_v53  ;;  %v7782_v41 = vadd.f32 %v7736_v60, %v19275_v3  ;;  %v14627_v17 = vpop.f32.mrb[91].mxu1  ;;  %v8563_v54 = vpack.c.bf16 %v8550_v24, %v8550_v24 }
 0x955   :  { %v14681_v5 = vpop.f32.mrb[3].mxu0 }
 0x956   :  { %v19456_v47 = vadd.f32 %v7982_v51, %v7782_v41  ;;  %14845 = vmatmul.mubr.msk.bf16.gmra.mrb[196].mxu1 %vm132_vm6, %v8561_v16 }
 0x957   :  { %14848 = vmatprep.mubr.msk.bf16.mxu1 %vm15736_vm2, %v20392_v62 }
 0x959   :  { %v7741_v3 = vpop.f32.mrb[92].mxu1 }
 0x95a   :  { %v7987_v39 = vpop.f32.mrb[4].mxu0  ;;  %v7783_v44 = vadd.f32 %v7741_v3, %v19285_v28  ;;  %v14630_v31 = vpop.f32.mrb[93].mxu1 }
 0x95b   :  { %v14684_v0 = vpop.f32.mrb[5].mxu0  ;;  %v7744_v30 = vpop.f32.mrb[94].mxu1 }
 0x95c   :  { %v7990_v48 = vpop.f32.mrb[6].mxu0  ;;  %v19462_v32 = vadd.f32 %v7987_v39, %v7783_v44  ;;  %v7784_v57 = vadd.f32 %v7744_v30, %v19289_v55  ;;  %v14631_v56 = vpop.f32.mrb[95].mxu1  ;;  %v15664_v44 = vld [vmem:[%s20373_s7 + $0x14] ss:$0 sps:$4 sm:$0xff]  }
 0x95d   :  { %v14685_v34 = vpop.f32.mrb[7].mxu0  ;;  %15635 = vmatprep.subr.msk.bf16.mxu0 %vm3947_vm1, %v15664_v44 }
 0x95e   :  { %v19465_v40 = vadd.f32 %v7990_v48, %v7784_v57  ;;  %14849 = vmatmul.mubr.msk.bf16.gmra.mrb[200].mxu1 %vm132_vm6, %v8562_v22  ;;  %v9182_v57 = vsel %vm3947_vm1, %v15664_v44, 0 }
 0x95f   :  { %14852 = vmatprep.mubr.msk.bf16.mxu1 %vm15736_vm2, %v20392_v62  ;;  %14859 = vmatpush3.bf16.msra.mxu0 %v9182_v57 }
 0x961   :  { %v7749_v28 = vpop.f32.mrb[96].mxu1 }
 0x962   :  { %v7995_v13 = vpop.f32.mrb[8].mxu0  ;;  %v7785_v20 = vadd.f32 %v7749_v28, %v19298_v9  ;;  %v14634_v29 = vpop.f32.mrb[97].mxu1 }
 0x963   :  { %v14688_v52 = vpop.f32.mrb[9].mxu0  ;;  %v7752_v59 = vpop.f32.mrb[98].mxu1 }
 0x964   :  { %v7998_v23 = vpop.f32.mrb[10].mxu0  ;;  %v19471_v55 = vadd.f32 %v7995_v13, %v7785_v20  ;;  %v7786_v10 = vadd.f32 %v7752_v59, %v19301_v50  ;;  %v14635_v43 = vpop.f32.mrb[99].mxu1 }
 0x965   :  { %v14689_v8 = vpop.f32.mrb[11].mxu0 }
 0x966   :  { %v19474_v33 = vadd.f32 %v7998_v23, %v7786_v10  ;;  %14853 = vmatmul.mubr.msk.bf16.gmra.mrb[204].mxu1 %vm132_vm6, %v8563_v54 }
 0x967   :  { %15076 = vmatprep.mubr.msk.bf16.mxu1 %vm15736_vm2, %v20392_v62 }
 0x969   :  { %v7757_v53 = vpop.f32.mrb[100].mxu1 }
 0x96a   :  { %v8003_v9 = vpop.f32.mrb[12].mxu0  ;;  %v7787_v37 = vadd.f32 %v7757_v53, %v19308_v18  ;;  %v14638_v2 = vpop.f32.mrb[101].mxu1 }
 0x96b   :  { %v14692_v60 = vpop.f32.mrb[13].mxu0  ;;  %v7760_v51 = vpop.f32.mrb[102].mxu1 }
 0x96c   :  { %v8006_v1 = vpop.f32.mrb[14].mxu0  ;;  %v19480_v41 = vadd.f32 %v8003_v9, %v7787_v37  ;;  %v14639_v50 = vpop.f32.mrb[103].mxu1 }
 0x96d   :  { %v14693_v17 = vpop.f32.mrb[15].mxu0 }
 0x971   :  { %v8153_v5 = vpop.f32.mrb[104].mxu1 }
 0x972   :  { %v8399_v16 = vpop.f32.mrb[16].mxu0  ;;  %v8255_v3 = vadd.f32 %v8153_v5, %v19317_v14  ;;  %v14698_v39 = vpop.f32.mrb[105].mxu1 }
 0x973   :  { %v14752_v7 = vpop.f32.mrb[17].mxu0  ;;  %v8156_v31 = vpop.f32.mrb[106].mxu1 }
 0x974   :  { %v8402_v18 = vpop.f32.mrb[18].mxu0  ;;  %v19486_v0 = vadd.f32 %v8399_v16, %v8255_v3  ;;  %v8256_v30 = vadd.f32 %v8156_v31, %v19320_v11  ;;  %v14699_v48 = vpop.f32.mrb[107].mxu1 }
 0x975   :  { %v14753_v25 = vpop.f32.mrb[19].mxu0 }
 0x976   :  { %v19491_v56 = vadd.f32 %v8402_v18, %v8256_v30 }
 0x979   :  { %v8161_v14 = vpop.f32.mrb[108].mxu1 }
 0x97a   :  { %v8407_v34 = vpop.f32.mrb[20].mxu0  ;;  %v8257_v22 = vadd.f32 %v8161_v14, %v19326_v4  ;;  %v14702_v28 = vpop.f32.mrb[109].mxu1 }
 0x97b   :  { %v14756_v13 = vpop.f32.mrb[21].mxu0  ;;  %v8164_v24 = vpop.f32.mrb[110].mxu1 }
 0x97c   :  { %v8410_v20 = vpop.f32.mrb[22].mxu0  ;;  %v19494_v29 = vadd.f32 %v8407_v34, %v8257_v22  ;;  %v8258_v11 = vadd.f32 %v8164_v24, %v19329_v26  ;;  %v14703_v52 = vpop.f32.mrb[111].mxu1 }
 0x97d   :  { %v14757_v59 = vpop.f32.mrb[23].mxu0 }
 0x97e   :  { %v19497_v23 = vadd.f32 %v8410_v20, %v8258_v11 }
 0x981   :  { %v8169_v10 = vpop.f32.mrb[112].mxu1 }
 0x982   :  { %v8415_v43 = vpop.f32.mrb[24].mxu0  ;;  %v8259_v8 = vadd.f32 %v8169_v10, %v19335_v49  ;;  %v14706_v54 = vpop.f32.mrb[113].mxu1 }
 0x983   :  { %v14760_v53 = vpop.f32.mrb[25].mxu0  ;;  %v8172_v9 = vpop.f32.mrb[114].mxu1 }
 0x984   :  { %v8418_v4 = vpop.f32.mrb[26].mxu0  ;;  %v19500_v37 = vadd.f32 %v8415_v43, %v8259_v8  ;;  %v8260_v2 = vadd.f32 %v8172_v9, %v19338_v12  ;;  %v14707_v60 = vpop.f32.mrb[115].mxu1 }
 0x985   :  { %v14761_v51 = vpop.f32.mrb[27].mxu0 }
 0x986   :  { %v19503_v1 = vadd.f32 %v8418_v4, %v8260_v2 }
 0x989   :  { %v8177_v26 = vpop.f32.mrb[116].mxu1 }
 0x98a   :  { %v8423_v50 = vpop.f32.mrb[28].mxu0  ;;  %v8261_v17 = vadd.f32 %v8177_v26, %v19344_v35  ;;  %v14710_v5 = vpop.f32.mrb[117].mxu1 }
 0x98b   :  { %v14764_v16 = vpop.f32.mrb[29].mxu0  ;;  %v8180_v3 = vpop.f32.mrb[118].mxu1 }
 0x98c   :  { %v8426_v49 = vpop.f32.mrb[30].mxu0  ;;  %v19506_v39 = vadd.f32 %v8423_v50, %v8261_v17  ;;  %v8262_v7 = vadd.f32 %v8180_v3, %v19347_v21  ;;  %v14711_v44 = vpop.f32.mrb[119].mxu1 }
 0x98d   :  { %v14765_v31 = vpop.f32.mrb[31].mxu0 }
 0x98e   :  { %v19509_v18 = vadd.f32 %v8426_v49, %v8262_v7 }
 0x991   :  { %v8185_v12 = vpop.f32.mrb[120].mxu1 }
 0x992   :  { %v8431_v30 = vpop.f32.mrb[64].mxu0  ;;  %v8263_v48 = vadd.f32 %v8185_v12, %v19353_v19  ;;  %v14714_v25 = vpop.f32.mrb[121].mxu1 }
 0x993   :  { %v14768_v57 = vpop.f32.mrb[65].mxu0  ;;  %v8188_v14 = vpop.f32.mrb[122].mxu1 }
 0x994   :  { %v8434_v35 = vpop.f32.mrb[66].mxu0  ;;  %v19512_v34 = vadd.f32 %v8431_v30, %v8263_v48  ;;  %v8264_v22 = vadd.f32 %v8188_v14, %v19356_v6  ;;  %v14715_v28 = vpop.f32.mrb[123].mxu1  ;;  %v19524_v6 = vld [vmem:[%s20373_s7] sm:$0xff]  }
 0x995   :  { %v14769_v13 = vpop.f32.mrb[67].mxu0  ;;  %14880 = vmatprep.subr.bf16.mxu0 %v19524_v6 }
 0x996   :  { %v19515_v24 = vadd.f32 %v8434_v35, %v8264_v22 }
 0x999   :  { %v8193_v21 = vpop.f32.mrb[124].mxu1 }
 0x99a   :  { %v8439_v20 = vpop.f32.mrb[68].mxu0  ;;  %v8265_v11 = vadd.f32 %v8193_v21, %v19365_v61  ;;  %v14718_v52 = vpop.f32.mrb[125].mxu1 }
 0x99b   :  { %v14772_v59 = vpop.f32.mrb[69].mxu0  ;;  %v8196_v10 = vpop.f32.mrb[126].mxu1 }
 0x99c   :  { %v8442_v19 = vpop.f32.mrb[70].mxu0  ;;  %v19518_v43 = vadd.f32 %v8439_v20, %v8265_v11  ;;  %v8266_v8 = vadd.f32 %v8196_v10, %v19368_v42  ;;  %v14719_v54 = vpop.f32.mrb[127].mxu1 }
 0x99d   :  { %v14773_v53 = vpop.f32.mrb[71].mxu0 }
 0x99e   :  { %v19526_v9 = vadd.f32 %v8442_v19, %v8266_v8 }
 0x9a1   :  { %v8201_v61 = vpop.f32.mrb[128].mxu1 }
 0x9a2   :  { %v8447_v4 = vpop.f32.mrb[72].mxu0  ;;  %v8267_v2 = vadd.f32 %v8201_v61, %v19374_v15  ;;  %v14722_v60 = vpop.f32.mrb[129].mxu1 }
 0x9a3   :  { %v14776_v51 = vpop.f32.mrb[73].mxu0  ;;  %v8204_v26 = vpop.f32.mrb[130].mxu1 }
 0x9a4   :  { %v8450_v50 = vpop.f32.mrb[74].mxu0  ;;  %v19530_v42 = vadd.f32 %v8447_v4, %v8267_v2  ;;  %v8268_v17 = vadd.f32 %v8204_v26, %v19377_v27  ;;  %v14723_v5 = vpop.f32.mrb[131].mxu1 }
 0x9a5   :  { %v14777_v16 = vpop.f32.mrb[75].mxu0 }
 0x9a6   :  { %v19533_v3 = vadd.f32 %v8450_v50, %v8268_v17 }
 0x9a9   :  { %v8209_v49 = vpop.f32.mrb[132].mxu1 }
 0x9aa   :  { %v8455_v7 = vpop.f32.mrb[76].mxu0  ;;  %v8269_v44 = vadd.f32 %v8209_v49, %v19383_v46  ;;  %v14726_v31 = vpop.f32.mrb[133].mxu1 }
 0x9ab   :  { %v14780_v12 = vpop.f32.mrb[77].mxu0  ;;  %v8212_v30 = vpop.f32.mrb[134].mxu1 }
 0x9ac   :  { %v8458_v15 = vpop.f32.mrb[78].mxu0  ;;  %v19536_v48 = vadd.f32 %v8455_v7, %v8269_v44  ;;  %v8270_v25 = vadd.f32 %v8212_v30, %v19386_v45  ;;  %v14727_v57 = vpop.f32.mrb[135].mxu1 }
 0x9ad   :  { %v14781_v14 = vpop.f32.mrb[79].mxu0 }
 0x9ae   :  { %v19539_v35 = vadd.f32 %v8458_v15, %v8270_v25 }
 0x9b1   :  { %v8217_v27 = vpop.f32.mrb[136].mxu1 }
 0x9b2   :  { %v8463_v22 = vpop.f32.mrb[80].mxu0  ;;  %v8271_v28 = vadd.f32 %v8217_v27, %v19392_v36  ;;  %v14730_v13 = vpop.f32.mrb[137].mxu1 }
 0x9b3   :  { %v14784_v21 = vpop.f32.mrb[81].mxu0  ;;  %v8220_v20 = vpop.f32.mrb[138].mxu1 }
 0x9b4   :  { %v8466_v46 = vpop.f32.mrb[82].mxu0  ;;  %v19542_v11 = vadd.f32 %v8463_v22, %v8271_v28  ;;  %v8272_v52 = vadd.f32 %v8220_v20, %v19395_v38  ;;  %v14731_v59 = vpop.f32.mrb[139].mxu1 }
 0x9b5   :  { %v14785_v10 = vpop.f32.mrb[83].mxu0 }
 0x9b6   :  { %v19545_v19 = vadd.f32 %v8466_v46, %v8272_v52 }
 0x9b9   :  { %v8225_v45 = vpop.f32.mrb[140].mxu1 }
 0x9ba   :  { %v8471_v8 = vpop.f32.mrb[84].mxu0  ;;  %v8273_v54 = vadd.f32 %v8225_v45, %v19401_v63  ;;  %v14734_v53 = vpop.f32.mrb[141].mxu1 }
 0x9bb   :  { %v14788_v61 = vpop.f32.mrb[85].mxu0  ;;  %v8228_v4 = vpop.f32.mrb[142].mxu1 }
 0x9bc   :  { %v8474_v36 = vpop.f32.mrb[86].mxu0  ;;  %v19548_v2 = vadd.f32 %v8471_v8, %v8273_v54  ;;  %v8274_v60 = vadd.f32 %v8228_v4, %v19456_v47  ;;  %v14735_v51 = vpop.f32.mrb[143].mxu1  ;;  %v8774_v4 = vsub.s32 2, %v20451_v58 }
 0x9bd   :  { %v14789_v26 = vpop.f32.mrb[87].mxu0 }
 0x9be   :  { %v19551_v50 = vadd.f32 %v8474_v36, %v8274_v60 }
 0x9c1   :  { %v8233_v38 = vpop.f32.mrb[144].mxu1 }
 0x9c2   :  { %v8479_v17 = vpop.f32.mrb[88].mxu0  ;;  %v8275_v5 = vadd.f32 %v8233_v38, %v19462_v32  ;;  %v14738_v16 = vpop.f32.mrb[145].mxu1 }
 0x9c3   :  { %v14792_v49 = vpop.f32.mrb[89].mxu0  ;;  %v8236_v7 = vpop.f32.mrb[146].mxu1 }
 0x9c4   :  { %v8482_v63 = vpop.f32.mrb[90].mxu0  ;;  %v19554_v44 = vadd.f32 %v8479_v17, %v8275_v5  ;;  %v8276_v31 = vadd.f32 %v8236_v7, %v19465_v40  ;;  %v14739_v12 = vpop.f32.mrb[147].mxu1 }
 0x9c5   :  { %v14793_v30 = vpop.f32.mrb[91].mxu0  ;;  %v8904_v7 = vpop.permute.xlu1 %8903 }
 0x9c6   :  { %v19557_v15 = vadd.f32 %v8482_v63, %v8276_v31 }
 0x9c9   :  { %v8241_v47 = vpop.f32.mrb[148].mxu1 }
 0x9ca   :  { %v8487_v25 = vpop.f32.mrb[92].mxu0  ;;  %v8277_v57 = vadd.f32 %v8241_v47, %v19471_v55  ;;  %v14742_v14 = vpop.f32.mrb[149].mxu1 }
 0x9cb   :  { %v14796_v27 = vpop.f32.mrb[93].mxu0  ;;  %v8244_v22 = vpop.f32.mrb[150].mxu1 }
 0x9cc   :  { %v8490_v32 = vpop.f32.mrb[94].mxu0  ;;  %v19560_v28 = vadd.f32 %v8487_v25, %v8277_v57  ;;  %v8278_v13 = vadd.f32 %v8244_v22, %v19474_v33  ;;  %v14743_v21 = vpop.f32.mrb[151].mxu1  ;;  %v15717_v33 = vld [vmem:[%s20368_s2] sm:$0xff] }
 0x9cd   :  { %v14797_v20 = vpop.f32.mrb[95].mxu0  ;;  %v19572_v36 = vrot.slane %v15717_v33, %v8774_v4  ;;  %v8909_v47 = vpop.permute.xlu0 %8908 }
 0x9ce   :  { %v19563_v46 = vadd.f32 %v8490_v32, %v8278_v13  ;;  %v8914_v20 = vpop.permute.xlu1 %8913 }
 0x9d1   :  { %v8249_v40 = vpop.f32.mrb[152].mxu1 }
 0x9d2   :  { %v8495_v52 = vpop.f32.mrb[96].mxu0  ;;  %v8279_v59 = vadd.f32 %v8249_v40, %v19480_v41  ;;  %v14746_v10 = vpop.f32.mrb[153].mxu1 }
 0x9d3   :  { %v14800_v45 = vpop.f32.mrb[97].mxu0  ;;  %v8252_v8 = vpop.f32.mrb[154].mxu1 }
 0x9d4   :  { %v8498_v55 = vpop.f32.mrb[98].mxu0  ;;  %v19566_v54 = vadd.f32 %v8495_v52, %v8279_v59  ;;  %v14747_v53 = vpop.f32.mrb[155].mxu1 }
 0x9d5   :  { %v14801_v61 = vpop.f32.mrb[99].mxu0  ;;  %v8919_v10 = vpop.permute.xlu0 %8918 }
 0x9d9   :  { %v8645_v60 = vpop.f32.mrb[156].mxu1 }
 0x9da   :  { %v8747_v51 = vadd.f32 %v8645_v60, %v19486_v0  ;;  %v14806_v41 = vpop.f32.mrb[157].mxu1 }
 0x9db   :  { %v8648_v26 = vpop.f32.mrb[158].mxu1 }
 0x9dc   :  { %v8776_v38 = vadd.f32 %v19572_v36, %v8747_v51  ;;  %v8748_v17 = vadd.f32 %v8648_v26, %v19491_v56  ;;  %v14807_v5 = vpop.f32.mrb[159].mxu1 }
 0x9de   :  { %vm8801_vm6 = vcmp.ge.f32.partialorder %v8776_v38, 0.0  ;;  %v8826_v16 = vmul.f32 0.01, %v8776_v38  ;;  %v8777_v49 = vadd.f32 %v19572_v36, %v8748_v17 }
 0x9e0   :  { %v8851_v63 = vsel %vm8801_vm6, %v8776_v38, %v8826_v16  ;;  %vm8802_vm12 = vcmp.ge.f32.partialorder %v8777_v49, 0.0  ;;  %v8827_v31 = vmul.f32 0.01, %v8777_v49 }
 0x9e1   :  { %v9026_v12 = vmul.f32 %v8904_v7, %v8851_v63  ;;  %v8653_v30 = vpop.f32.mrb[160].mxu1 }
 0x9e2   :  { %v8852_v25 = vsel %vm8802_vm12, %v8777_v49, %v8827_v31  ;;  %v8749_v0 = vadd.f32 %v8653_v30, %v19494_v29  ;;  %v14810_v57 = vpop.f32.mrb[161].mxu1  ;;  %v8929_v49 = vpop.permute.xlu0 %8928 }
 0x9e3   :  { %9051 = vst.msk [vmem:[#allocation5 + $0x8] sm:$0xff] %vm166_vm11, %v9026_v12  ;;  %v9027_v14 = vmul.f32 %v8909_v47, %v8852_v25  ;;  %v8656_v56 = vpop.f32.mrb[162].mxu1 }
 0x9e4   :  { %v8778_v27 = vadd.f32 %v19572_v36, %v8749_v0  ;;  %v8750_v22 = vadd.f32 %v8656_v56, %v19497_v23  ;;  %v14811_v32 = vpop.f32.mrb[163].mxu1 }
 0x9e5   :  { %9052 = vst.msk [vmem:[#allocation5 + $0x10] sm:$0xff] %vm166_vm11, %v9027_v14 }
 0x9e6   :  { %vm8803_vm13 = vcmp.ge.f32.partialorder %v8778_v27, 0.0  ;;  %v8828_v13 = vmul.f32 0.01, %v8778_v27  ;;  %v8779_v21 = vadd.f32 %v19572_v36, %v8750_v22 }
 0x9e8   :  { %v8853_v40 = vsel %vm8803_vm13, %v8778_v27, %v8828_v13  ;;  %vm8804_vm14 = vcmp.ge.f32.partialorder %v8779_v21, 0.0  ;;  %v8829_v29 = vmul.f32 0.01, %v8779_v21  ;;  %v15666_v27 = vld [vmem:[%s20373_s7 + $0x8] ss:$0 sps:$4 sm:$0xff]  }
 0x9e9   :  { %v9028_v52 = vmul.f32 %v8914_v20, %v8853_v40  ;;  %v8661_v59 = vpop.f32.mrb[164].mxu1  ;;  %v9337_v40 = vsel %vm3947_vm1, %v15666_v27, 0 }
 0x9ea   :  { %v8854_v45 = vsel %vm8804_vm14, %v8779_v21, %v8829_v29  ;;  %v8751_v8 = vadd.f32 %v8661_v59, %v19500_v37  ;;  %v14814_v55 = vpop.f32.mrb[165].mxu1  ;;  %v9109_v60 = vld [vmem:[#allocation5 + $0x8] sm:$0xff]  ;;  %v8924_v37 = vpop.permute.xlu1 %8923  ;;  %v19608_v29 = vld [vmem:[%s20373_s7 + $0x18] sm:$0xff]  }
 0x9eb   :  { %9053 = vst.msk [vmem:[#allocation5 + $0x18] sm:$0xff] %vm166_vm11, %v9028_v52  ;;  %v9029_v23 = vmul.f32 %v8919_v10, %v8854_v45  ;;  %v8664_v53 = vpop.f32.mrb[166].mxu1  ;;  %v8939_v52 = vpop.permute.xlu0 %8938 }
 0x9ec   :  { %v8780_v61 = vadd.f32 %v19572_v36, %v8751_v8  ;;  %v8752_v4 = vadd.f32 %v8664_v53, %v19503_v1  ;;  %v14815_v33 = vpop.f32.mrb[167].mxu1  ;;  %v9110_v51 = vld [vmem:[#allocation5 + $0x10] sm:$0xff] }
 0x9ed   :  { %9054 = vst.msk [vmem:[#allocation5 + $0x20] sm:$0xff] %vm166_vm11, %v9029_v23  ;;  %v9129_v41 = vpack.c.bf16 %v9110_v51, %v9109_v60 }
 0x9ee   :  { %vm8805_vm15 = vcmp.ge.f32.partialorder %v8780_v61, 0.0  ;;  %v8830_v26 = vmul.f32 0.01, %v8780_v61  ;;  %v8781_v38 = vadd.f32 %v19572_v36, %v8752_v4  ;;  %v8934_v32 = vpop.permute.xlu1 %8933 }
 0x9ef   :  { %14860 = vmatprep.mubr.msk.bf16.mxu0 %vm166_vm11, %v9129_v41 }
 0x9f0   :  { %v8855_v17 = vsel %vm8805_vm15, %v8780_v61, %v8830_v26  ;;  %vm8806_vm4 = vcmp.ge.f32.partialorder %v8781_v38, 0.0  ;;  %v8831_v5 = vmul.f32 0.01, %v8781_v38 }
 0x9f1   :  { %v9030_v1 = vmul.f32 %v8924_v37, %v8855_v17  ;;  %v8669_v16 = vpop.f32.mrb[168].mxu1 }
 0x9f2   :  { %v8856_v7 = vsel %vm8806_vm4, %v8781_v38, %v8831_v5  ;;  %v8753_v63 = vadd.f32 %v8669_v16, %v19506_v39  ;;  %v14818_v31 = vpop.f32.mrb[169].mxu1  ;;  %v9111_v47 = vld [vmem:[#allocation5 + $0x18] sm:$0xff]  ;;  %v8944_v38 = vpop.permute.xlu1 %8943 }
 0x9f3   :  { %9055 = vst.msk [vmem:[#allocation5 + $0x28] sm:$0xff] %vm166_vm11, %v9030_v1  ;;  %v9031_v12 = vmul.f32 %v8929_v49, %v8856_v7  ;;  %v8672_v30 = vpop.f32.mrb[170].mxu1  ;;  %v8949_v1 = vpop.permute.xlu0 %8948 }
 0x9f4   :  { %v9112_v25 = vld [vmem:[#allocation5 + $0x20] sm:$0xff]  ;;  %v8782_v0 = vadd.f32 %v19572_v36, %v8753_v63  ;;  %v8754_v57 = vadd.f32 %v8672_v30, %v19509_v18  ;;  %v14819_v14 = vpop.f32.mrb[171].mxu1 }
 0x9f5   :  { %v9130_v56 = vpack.c.bf16 %v9112_v25, %v9111_v47  ;;  %9056 = vst.msk [vmem:[#allocation5 + $0x30] sm:$0xff] %vm166_vm11, %v9031_v12  ;;  %v19610_v59 = vld [vmem:[#allocation5 + $0x1e] sm:$0xff] }
 0x9f6   :  { %vm8807_vm5 = vcmp.ge.f32.partialorder %v8782_v0, 0.0  ;;  %v8832_v39 = vmul.f32 0.01, %v8782_v0  ;;  %v8783_v22 = vadd.f32 %v19572_v36, %v8754_v57 }
 0x9f7   :  { %14861 = vmatmul.mubr.msk.bf16.vlgmr.msra.gmra.mrb[100].mxu0 %vm166_vm11, %v9130_v56 }
 0x9f8   :  { %v8857_v13 = vsel %vm8807_vm5, %v8782_v0, %v8832_v39  ;;  %vm8808_vm0 = vcmp.ge.f32.partialorder %v8783_v22, 0.0  ;;  %v8833_v21 = vmul.f32 0.01, %v8783_v22  ;;  %14881 = vmatpush3.bf16.msra.mxu0 %v19524_v6 }
 0x9f9   :  { %v9032_v18 = vmul.f32 %v8934_v32, %v8857_v13  ;;  %v8677_v20 = vpop.f32.mrb[172].mxu1  ;;  %15636 = vmatprep.subr.msk.bf16.mxu0 %vm3947_vm1, %v15666_v27  ;;  %v8954_v32 = vpop.permute.xlu1 %8953 }
 0x9fa   :  { %v8858_v10 = vsel %vm8808_vm0, %v8783_v22, %v8833_v21  ;;  %v8755_v45 = vadd.f32 %v8677_v20, %v19512_v34  ;;  %v14822_v8 = vpop.f32.mrb[173].mxu1  ;;  %v19613_v55 = vld [vmem:[#allocation5 + $0x26] sm:$0xff]  ;;  %v8959_v20 = vpop.permute.xlu0 %8958 }
 0x9fb   :  { %9057 = vst.msk [vmem:[#allocation5 + $0x38] sm:$0xff] %vm166_vm11, %v9032_v18  ;;  %v9033_v6 = vmul.f32 %v8939_v52, %v8858_v10  ;;  %v8680_v23 = vpop.f32.mrb[174].mxu1  ;;  %v9113_v60 = vld [vmem:[#allocation5 + $0x28] sm:$0xff] }
 0x9fc   :  { %v8784_v61 = vadd.f32 %v19572_v36, %v8755_v45  ;;  %v8756_v4 = vadd.f32 %v8680_v23, %v19515_v24  ;;  %v14823_v33 = vpop.f32.mrb[175].mxu1  ;;  %14883 = vmatpush3.bf16.msra.mxu0 %v9337_v40  ;;  %v19621_v34 = vld [vmem:[#allocation5 + $0x30] sm:$0xff] }
 0x9fd   :  { %9058 = vst.msk [vmem:[#allocation5 + $0x40] sm:$0xff] %vm166_vm11, %v9033_v6  ;;  %14904 = vmatprep.subr.bf16.mxu0 %v19608_v29  ;;  %v9131_v26 = vpack.c.bf16 %v19621_v34, %v9113_v60  ;;  %v19627_v16 = vld [vmem:[#allocation5 + $0x2e] sm:$0xff] }
 0x9fe   :  { %vm8809_vm7 = vcmp.ge.f32.partialorder %v8784_v61, 0.0  ;;  %v8834_v51 = vmul.f32 0.01, %v8784_v61  ;;  %v8785_v41 = vadd.f32 %v19572_v36, %v8756_v4 }
 0x9ff   :  { %14864 = vmatprep.mubr.msk.bf16.mxu0 %vm166_vm11, %v9131_v26 }
 0xa00   :  { %v8859_v37 = vsel %vm8809_vm7, %v8784_v61, %v8834_v51  ;;  %vm8810_vm8 = vcmp.ge.f32.partialorder %v8785_v41, 0.0  ;;  %v8835_v17 = vmul.f32 0.01, %v8785_v41 }
 0xa01   :  { %v9034_v24 = vmul.f32 %v8944_v38, %v8859_v37  ;;  %v8685_v5 = vpop.f32.mrb[176].mxu1 }
 0xa02   :  { %v19629_v49 = vld [vmem:[#allocation5 + $0x36] sm:$0xff]  ;;  %v8860_v7 = vsel %vm8810_vm8, %v8785_v41, %v8835_v17  ;;  %v8757_v63 = vadd.f32 %v8685_v5, %v19518_v43  ;;  %v14826_v31 = vpop.f32.mrb[177].mxu1 }
 0xa03   :  { %v19634_v12 = vpack.c.bf16 %v19629_v49, %v19627_v16  ;;  %9059 = vst.msk [vmem:[#allocation5 + $0x48] sm:$0xff] %vm166_vm11, %v9034_v24  ;;  %v9035_v30 = vmul.f32 %v8949_v1, %v8860_v7  ;;  %v8688_v47 = vpop.f32.mrb[178].mxu1  ;;  %v19637_v25 = vld [vmem:[#allocation5 + $0x38] sm:$0xff]  ;;  %v8964_v1 = vpop.permute.xlu1 %8963 }
 0xa04   :  { %v19639_v0 = vld [vmem:[#allocation5 + $0x40] sm:$0xff]  ;;  %v8786_v57 = vadd.f32 %v19572_v36, %v8757_v63  ;;  %v8758_v14 = vadd.f32 %v8688_v47, %v19526_v9  ;;  %v14827_v56 = vpop.f32.mrb[179].mxu1 }
 0xa05   :  { %9060 = vst.msk [vmem:[#allocation5 + $0x50] sm:$0xff] %vm166_vm11, %v9035_v30  ;;  %v9132_v27 = vpack.c.bf16 %v19639_v0, %v19637_v25  ;;  %v19650_v40 = vld [vmem:[#allocation5 + $0x3e] sm:$0xff]  ;;  %v8969_v30 = vpop.permute.xlu0 %8968 }
 0xa06   :  { %vm8811_vm9 = vcmp.ge.f32.partialorder %v8786_v57, 0.0  ;;  %v8836_v39 = vmul.f32 0.01, %v8786_v57  ;;  %v8787_v22 = vadd.f32 %v19572_v36, %v8758_v14 }
 0xa07   :  { %14865 = vmatmul.mubr.msk.bf16.gmra.mrb[104].mxu0 %vm166_vm11, %v9132_v27 }
 0xa08   :  { %v8861_v13 = vsel %vm8811_vm9, %v8786_v57, %v8836_v39  ;;  %vm8812_vm10 = vcmp.ge.f32.partialorder %v8787_v22, 0.0  ;;  %v8837_v21 = vmul.f32 0.01, %v8787_v22 }
 0xa09   :  { %v9036_v9 = vmul.f32 %v8954_v32, %v8861_v13  ;;  %v8693_v18 = vpop.f32.mrb[180].mxu1 }
 0xa0a   :  { %v19652_v52 = vld [vmem:[#allocation5 + $0x46] sm:$0xff]  ;;  %v8862_v45 = vsel %vm8812_vm10, %v8787_v22, %v8837_v21  ;;  %v8759_v8 = vadd.f32 %v8693_v18, %v19530_v42  ;;  %v14830_v6 = vpop.f32.mrb[181].mxu1 }
 0xa0b   :  { %v19654_v10 = vld [vmem:[#allocation5 + $0x48] sm:$0xff]  ;;  %v19659_v23 = vpack.c.bf16 %v19652_v52, %v19650_v40  ;;  %9061 = vst.msk [vmem:[#allocation5 + $0x58] sm:$0xff] %vm166_vm11, %v9036_v9  ;;  %v9037_v4 = vmul.f32 %v8959_v20, %v8862_v45  ;;  %v8696_v33 = vpop.f32.mrb[182].mxu1 }
 0xa0c   :  { %v19664_v60 = vld [vmem:[#allocation5 + $0x42] sm:$0xff]  ;;  %v19666_v51 = vld [vmem:[#allocation5 + $0x4a] sm:$0xff]  ;;  %v8788_v41 = vadd.f32 %v19572_v36, %v8759_v8  ;;  %v8760_v42 = vadd.f32 %v8696_v33, %v19533_v3  ;;  %v14831_v26 = vpop.f32.mrb[183].mxu1 }
 0xa0d   :  { %v19670_v38 = vld [vmem:[#allocation5 + $0x50] sm:$0xff]  ;;  %9062 = vst.msk [vmem:[#allocation5 + $0x60] sm:$0xff] %vm166_vm11, %v9037_v4 }
 0xa0e   :  { %v9133_v17 = vpack.c.bf16 %v19670_v38, %v19654_v10  ;;  %vm8813_vm6 = vcmp.ge.f32.partialorder %v8788_v41, 0.0  ;;  %v8838_v24 = vmul.f32 0.01, %v8788_v41  ;;  %v8789_v5 = vadd.f32 %v19572_v36, %v8760_v42  ;;  %v19682_v27 = vld [vmem:[#allocation5 + $0x4e] sm:$0xff] }
 0xa10   :  { %14868 = vmatprep.mubr.msk.bf16.mxu0 %vm166_vm11, %v9133_v17  ;;  %v8863_v7 = vsel %vm8813_vm6, %v8788_v41, %v8838_v24  ;;  %vm8814_vm12 = vcmp.ge.f32.partialorder %v8789_v5, 0.0  ;;  %v8839_v3 = vmul.f32 0.01, %v8789_v5  ;;  %vm195_vm6 = vcmask 261120  }
 0xa11   :  { %v9038_v63 = vmul.f32 %v8964_v1, %v8863_v7  ;;  %v8701_v31 = vpop.f32.mrb[184].mxu1  ;;  %199 = vst.msk [vmem:[#allocation6 + $0x18] sm:$0xff] %vm195_vm6, %v20392_v62  ;;  %197 = vst.msk [vmem:[#allocation6 + $0x8] sm:$0xff] %vm195_vm6, %v20392_v62 }
 0xa12   :  { %v8864_v47 = vsel %vm8814_vm12, %v8789_v5, %v8839_v3  ;;  %v8761_v57 = vadd.f32 %v8701_v31, %v19536_v48  ;;  %v14834_v14 = vpop.f32.mrb[185].mxu1  ;;  %v19680_v56 = vld [vmem:[#allocation5 + $0x58] sm:$0xff]  ;;  %v8979_v5 = vpop.permute.xlu0 %8978  ;;  %198 = vst.msk [vmem:[#allocation6 + $0x10] sm:$0xff] %vm195_vm6, %v20392_v62  ;;  %200 = vst.msk [vmem:[#allocation6 + $0x20] sm:$0xff] %vm195_vm6, %v20392_v62 }
 0xa13   :  { %v19684_v39 = vld [vmem:[#allocation5 + $0x56] sm:$0xff]  ;;  %9063 = vst.msk [vmem:[#allocation5 + $0x68] sm:$0xff] %vm166_vm11, %v9038_v63  ;;  %v9039_v22 = vmul.f32 %v8969_v30, %v8864_v47  ;;  %v8704_v32 = vpop.f32.mrb[186].mxu1 }
 0xa14   :  { %v19689_v13 = vpack.c.bf16 %v19684_v39, %v19682_v27  ;;  %v8790_v48 = vadd.f32 %v19572_v36, %v8761_v57  ;;  %v8762_v9 = vadd.f32 %v8704_v32, %v19539_v35  ;;  %v14835_v18 = vpop.f32.mrb[187].mxu1  ;;  %v19695_v20 = vld [vmem:[#allocation5 + $0x60] sm:$0xff]  ;;  %v19697_v45 = vld [vmem:[#allocation5 + $0x52] sm:$0xff]  ;;  %v8974_v35 = vpop.permute.xlu1 %8973  ;;  %201 = vst.msk [vmem:[#allocation6 + $0x28] sm:$0xff] %vm195_vm6, %v20392_v62  ;;  %202 = vst.msk [vmem:[#allocation6 + $0x30] sm:$0xff] %vm195_vm6, %v20392_v62 }
 0xa15   :  { %20477 = vst [vmem:[#allocation11_spill] sm:$0xff] %v19695_v20  ;;  %v19699_v8 = vld [vmem:[#allocation5 + $0x5a] sm:$0xff]  ;;  %9064 = vst.msk [vmem:[#allocation5 + $0x70] sm:$0xff] %vm166_vm11, %v9039_v22  ;;  %v9134_v6 = vpack.c.bf16 %v19695_v20, %v19680_v56 }
 0xa16   :  { %vm8815_vm13 = vcmp.ge.f32.partialorder %v8790_v48, 0.0  ;;  %v8840_v33 = vmul.f32 0.01, %v8790_v48  ;;  %v8791_v41 = vadd.f32 %v19572_v36, %v8762_v9  ;;  %v19711_v31 = vld [vmem:[#allocation5 + $0x5e] sm:$0xff]  ;;  %203 = vst.msk [vmem:[#allocation6 + $0x38] sm:$0xff] %vm195_vm6, %v20392_v62  ;;  %204 = vst.msk [vmem:[#allocation6 + $0x40] sm:$0xff] %vm195_vm6, %v20392_v62 }
 0xa17   :  { %14869 = vmatmul.mubr.msk.bf16.gmra.mrb[108].mxu0 %vm166_vm11, %v9134_v6  ;;  %205 = vst.msk [vmem:[#allocation6 + $0x48] sm:$0xff] %vm195_vm6, %v20392_v62  ;;  %206 = vst.msk [vmem:[#allocation6 + $0x50] sm:$0xff] %vm195_vm6, %v20392_v62 }
 0xa18   :  { %v8865_v42 = vsel %vm8815_vm13, %v8790_v48, %v8840_v33  ;;  %vm8816_vm14 = vcmp.ge.f32.partialorder %v8791_v41, 0.0  ;;  %v8841_v26 = vmul.f32 0.01, %v8791_v41  ;;  %207 = vst.msk [vmem:[#allocation6 + $0x58] sm:$0xff] %vm195_vm6, %v20392_v62  ;;  %208 = vst.msk [vmem:[#allocation6 + $0x60] sm:$0xff] %vm195_vm6, %v20392_v62 }
 0xa19   :  { %v9040_v17 = vmul.f32 %v8974_v35, %v8865_v42  ;;  %v8709_v24 = vpop.f32.mrb[188].mxu1  ;;  %209 = vst.msk [vmem:[#allocation6 + $0x68] sm:$0xff] %vm195_vm6, %v20392_v62  ;;  %210 = vst.msk [vmem:[#allocation6 + $0x70] sm:$0xff] %vm195_vm6, %v20392_v62 }
 0xa1a   :  { %v8866_v1 = vsel %vm8816_vm14, %v8791_v41, %v8841_v26  ;;  %v8763_v7 = vadd.f32 %v8709_v24, %v19542_v11  ;;  %v14838_v3 = vpop.f32.mrb[189].mxu1  ;;  %v19709_v63 = vld [vmem:[#allocation5 + $0x68] sm:$0xff]  ;;  %211 = vst.msk [vmem:[#allocation6 + $0x78] sm:$0xff] %vm195_vm6, %v20392_v62  ;;  %212 = vst.msk [vmem:[#allocation6 + $0x80] sm:$0xff] %vm195_vm6, %v20392_v62 }
 0xa1b   :  { %v19713_v30 = vld [vmem:[#allocation5 + $0x66] sm:$0xff]  ;;  %9065 = vst.msk [vmem:[#allocation5 + $0x78] sm:$0xff] %vm166_vm11, %v9040_v17  ;;  %v9041_v47 = vmul.f32 %v8979_v5, %v8866_v1  ;;  %v8712_v57 = vpop.f32.mrb[190].mxu1  ;;  %v8989_v1 = vpop.permute.xlu0 %8988 }
 0xa1c   :  { %v19718_v14 = vpack.c.bf16 %v19713_v30, %v19711_v31  ;;  %v8792_v11 = vadd.f32 %v19572_v36, %v8763_v7  ;;  %v8764_v32 = vadd.f32 %v8712_v57, %v19545_v19  ;;  %v14839_v48 = vpop.f32.mrb[191].mxu1  ;;  %v19724_v9 = vld [vmem:[#allocation5 + $0x70] sm:$0xff]  ;;  %v19726_v18 = vld [vmem:[#allocation5 + $0x62] sm:$0xff]  ;;  %v8984_v19 = vpop.permute.xlu1 %8983  ;;  %213 = vst.msk [vmem:[#allocation6 + $0x88] sm:$0xff] %vm195_vm6, %v20392_v62  ;;  %214 = vst.msk [vmem:[#allocation6 + $0x90] sm:$0xff] %vm195_vm6, %v20392_v62 }
 0xa1d   :  { %20478 = vst [vmem:[#allocation12_spill] sm:$0xff] %v19724_v9  ;;  %v19728_v6 = vld [vmem:[#allocation5 + $0x6a] sm:$0xff]  ;;  %9066 = vst.msk [vmem:[#allocation5 + $0x80] sm:$0xff] %vm166_vm11, %v9041_v47  ;;  %v9135_v33 = vpack.c.bf16 %v19724_v9, %v19709_v63 }
 0xa1e   :  { %vm8817_vm15 = vcmp.ge.f32.partialorder %v8792_v11, 0.0  ;;  %v8842_v35 = vmul.f32 0.01, %v8792_v11  ;;  %v8793_v42 = vadd.f32 %v19572_v36, %v8764_v32  ;;  %v19740_v48 = vld [vmem:[#allocation5 + $0x6e] sm:$0xff]  ;;  %215 = vst.msk [vmem:[#allocation6 + $0x98] sm:$0xff] %vm195_vm6, %v20392_v62  ;;  %216 = vst.msk [vmem:[#allocation6 + $0xa0] sm:$0xff] %vm195_vm6, %v20392_v62 }
 0xa1f   :  { %14872 = vmatprep.mubr.msk.bf16.mxu0 %vm166_vm11, %v9135_v33  ;;  %v8999_v37 = vpop.permute.xlu0 %8998 }
 0xa20   :  { %v8867_v26 = vsel %vm8817_vm15, %v8792_v11, %v8842_v35  ;;  %vm8818_vm3 = vcmp.ge.f32.partialorder %v8793_v42, 0.0  ;;  %v8843_v17 = vmul.f32 0.01, %v8793_v42 }
 0xa21   :  { %v9042_v24 = vmul.f32 %v8984_v19, %v8867_v26  ;;  %v8717_v5 = vpop.f32.mrb[192].mxu1 }
 0xa22   :  { %v8868_v7 = vsel %vm8818_vm3, %v8793_v42, %v8843_v17  ;;  %v8765_v3 = vadd.f32 %v8717_v5, %v19548_v2  ;;  %v14842_v47 = vpop.f32.mrb[193].mxu1  ;;  %v19738_v57 = vld [vmem:[#allocation5 + $0x78] sm:$0xff] }
 0xa23   :  { %20479 = vst [vmem:[#allocation13_spill] sm:$0xff] %v19738_v57  ;;  %v19742_v41 = vld [vmem:[#allocation5 + $0x76] sm:$0xff]  ;;  %9067 = vst.msk [vmem:[#allocation5 + $0x88] sm:$0xff] %vm166_vm11, %v9042_v24  ;;  %v9043_v32 = vmul.f32 %v8989_v1, %v8868_v7  ;;  %v8720_v33 = vpop.f32.mrb[194].mxu1  ;;  %v9009_v43 = vpop.permute.xlu0 %9008 }
 0xa24   :  { %v19747_v11 = vpack.c.bf16 %v19742_v41, %v19740_v48  ;;  %v8794_v2 = vadd.f32 %v19572_v36, %v8765_v3  ;;  %v8766_v42 = vadd.f32 %v8720_v33, %v19551_v50  ;;  %v14843_v19 = vpop.f32.mrb[195].mxu1  ;;  %v19753_v26 = vld [vmem:[#allocation5 + $0x80] sm:$0xff]  ;;  %v19755_v17 = vld [vmem:[#allocation5 + $0x72] sm:$0xff]  ;;  %v8994_v50 = vpop.permute.xlu1 %8993 }
 0xa25   :  { %20480 = vst [vmem:[#allocation14_spill] sm:$0xff] %v19753_v26  ;;  %v19757_v5 = vld [vmem:[#allocation5 + $0x7a] sm:$0xff]  ;;  %9068 = vst.msk [vmem:[#allocation5 + $0x90] sm:$0xff] %vm166_vm11, %v9043_v32  ;;  %v9136_v24 = vpack.c.bf16 %v19753_v26, %v19738_v57 }
 0xa26   :  { %vm8819_vm4 = vcmp.ge.f32.partialorder %v8794_v2, 0.0  ;;  %v8844_v7 = vmul.f32 0.01, %v8794_v2  ;;  %v8795_v3 = vadd.f32 %v19572_v36, %v8766_v42  ;;  %v19769_v1 = vld [vmem:[#allocation5 + $0x7e] sm:$0xff] }
 0xa27   :  { %14873 = vmatmul.mubr.msk.bf16.gmra.mrb[112].mxu0 %vm166_vm11, %v9136_v24 }
 0xa28   :  { %v8869_v47 = vsel %vm8819_vm4, %v8794_v2, %v8844_v7  ;;  %vm8820_vm5 = vcmp.ge.f32.partialorder %v8795_v3, 0.0  ;;  %v8845_v33 = vmul.f32 0.01, %v8795_v3 }
 0xa29   :  { %v9044_v19 = vmul.f32 %v8994_v50, %v8869_v47  ;;  %v8725_v4 = vpop.f32.mrb[196].mxu1 }
 0xa2a   :  { %v8870_v32 = vsel %vm8820_vm5, %v8795_v3, %v8845_v33  ;;  %v8767_v35 = vadd.f32 %v8725_v4, %v19554_v44  ;;  %v14846_v22 = vpop.f32.mrb[197].mxu1  ;;  %v19767_v21 = vld [vmem:[#allocation5 + $0x88] sm:$0xff] }
 0xa2b   :  { %20481 = vst [vmem:[#allocation15_spill] sm:$0xff] %v19767_v21  ;;  %v19771_v61 = vld [vmem:[#allocation5 + $0x86] sm:$0xff]  ;;  %9069 = vst.msk [vmem:[#allocation5 + $0x98] sm:$0xff] %vm166_vm11, %v9044_v19  ;;  %v9045_v42 = vmul.f32 %v8999_v37, %v8870_v32  ;;  %v8728_v24 = vpop.f32.mrb[198].mxu1 }
 0xa2c   :  { %v19776_v2 = vpack.c.bf16 %v19771_v61, %v19769_v1  ;;  %v8796_v44 = vadd.f32 %v19572_v36, %v8767_v35  ;;  %v8768_v4 = vadd.f32 %v8728_v24, %v19557_v15  ;;  %v14847_v22 = vpop.f32.mrb[199].mxu1  ;;  %v19782_v3 = vld [vmem:[#allocation5 + $0x90] sm:$0xff]  ;;  %v19784_v50 = vld [vmem:[#allocation5 + $0x82] sm:$0xff]  ;;  %v9004_v15 = vpop.permute.xlu1 %9003 }
 0xa2d   :  { %20482 = vst [vmem:[#allocation16_spill] sm:$0xff] %v19782_v3  ;;  %v19786_v47 = vld [vmem:[#allocation5 + $0x8a] sm:$0xff]  ;;  %9070 = vst.msk [vmem:[#allocation5 + $0xa0] sm:$0xff] %vm166_vm11, %v9045_v42  ;;  %v9137_v37 = vpack.c.bf16 %v19782_v3, %v19767_v21 }
 0xa2e   :  { %vm8821_vm0 = vcmp.ge.f32.partialorder %v8796_v44, 0.0  ;;  %v8846_v19 = vmul.f32 0.01, %v8796_v44  ;;  %v8797_v35 = vadd.f32 %v19572_v36, %v8768_v4  ;;  %v19798_v33 = vld [vmem:[#allocation5 + $0x8e] sm:$0xff] }
 0xa2f   :  { %14876 = vmatprep.mubr.msk.bf16.mxu0 %vm166_vm11, %v9137_v37 }
 0xa30   :  { %v8871_v32 = vsel %vm8821_vm0, %v8796_v44, %v8846_v19  ;;  %vm8822_vm7 = vcmp.ge.f32.partialorder %v8797_v35, 0.0  ;;  %v8847_v24 = vmul.f32 0.01, %v8797_v35  ;;  %v9077_v44 = vld [vmem:[#allocation5 + $0xe] sm:$0xff] }
 0xa31   :  { %v9046_v22 = vmul.f32 %v9004_v15, %v8871_v32  ;;  %v8733_v7 = vpop.f32.mrb[200].mxu1 }
 0xa32   :  { %v8872_v42 = vsel %vm8822_vm7, %v8797_v35, %v8847_v24  ;;  %v8769_v53 = vadd.f32 %v8733_v7, %v19560_v28  ;;  %v14850_v58 = vpop.f32.mrb[201].mxu1  ;;  %v19796_v26 = vld [vmem:[#allocation5 + $0x98] sm:$0xff] }
 0xa33   :  { %20483 = vst [vmem:[#allocation17_spill] sm:$0xff] %v19796_v26  ;;  %v19800_v21 = vld [vmem:[#allocation5 + $0x96] sm:$0xff]  ;;  %9071 = vst.msk [vmem:[#allocation5 + $0xa8] sm:$0xff] %vm166_vm11, %v9046_v22  ;;  %v9047_v4 = vmul.f32 %v9009_v43, %v8872_v42  ;;  %v8736_v37 = vpop.f32.mrb[202].mxu1  ;;  %v9076_v22 = vld [vmem:[#allocation5 + $0x6] sm:$0xff] }
 0xa34   :  { %v19805_v19 = vpack.c.bf16 %v19800_v21, %v19798_v33  ;;  %v8798_v58 = vadd.f32 %v19572_v36, %v8769_v53  ;;  %v8770_v28 = vadd.f32 %v8736_v37, %v19563_v46  ;;  %v14851_v7 = vpop.f32.mrb[203].mxu1  ;;  %v19811_v15 = vld [vmem:[#allocation5 + $0xa0] sm:$0xff]  ;;  %v19813_v32 = vld [vmem:[#allocation5 + $0x92] sm:$0xff]  ;;  %v9096_v37 = vpack.c.bf16 %v9077_v44, %v9076_v22 }
 0xa35   :  { %20484 = vst [vmem:[#allocation18_spill] sm:$0xff] %v19811_v15  ;;  %v19815_v24 = vld [vmem:[#allocation5 + $0x9a] sm:$0xff]  ;;  %9072 = vst.msk [vmem:[#allocation5 + $0xb0] sm:$0xff] %vm166_vm11, %v9047_v4  ;;  %v9138_v43 = vpack.c.bf16 %v19811_v15, %v19796_v26  ;;  %v9014_v7 = vpop.permute.xlu1 %9013  ;;  %v9019_v15 = vpop.permute.xlu0 %9018 }
 0xa36   :  { %vm8823_vm8 = vcmp.ge.f32.partialorder %v8798_v58, 0.0  ;;  %v8848_v53 = vmul.f32 0.01, %v8798_v58  ;;  %v8799_v46 = vadd.f32 %v19572_v36, %v8770_v28  ;;  %v9078_v44 = vld [vmem:[#allocation5 + $0x16] sm:$0xff] }
 0xa37   :  { %14877 = vmatmul.mubr.msk.bf16.gmra.mrb[116].mxu0 %vm166_vm11, %v9138_v43 }
 0xa38   :  { %v8873_v35 = vsel %vm8823_vm8, %v8798_v58, %v8848_v53  ;;  %vm8824_vm9 = vcmp.ge.f32.partialorder %v8799_v46, 0.0  ;;  %v8849_v3 = vmul.f32 0.01, %v8799_v46  ;;  %14884 = vmatprep.mubr.msk.bf16.mxu0 %vm166_vm11, %v9096_v37  ;;  %v9102_v37 = vpack.c.bf16 %v19740_v48, %v19713_v30  ;;  %v9663_v48 = vld [vmem:[#allocation5 + $0x32] sm:$0xff] }
 0xa39   :  { %v9048_v4 = vmul.f32 %v9014_v7, %v8873_v35  ;;  %v8741_v9 = vpop.f32.mrb[204].mxu1  ;;  %v9097_v35 = vpack.c.bf16 %v19610_v59, %v9078_v44  ;;  %v15670_v7 = vld [vmem:[%s20373_s7 + $0x2c] ss:$0 sps:$4 sm:$0xff]   ;;  %v19884_v44 = vld [vmem:[#allocation5 + $0x3a] sm:$0xff] }
 0xa3a   :  { %v8874_v26 = vsel %vm8824_vm9, %v8799_v46, %v8849_v3  ;;  %v8771_v57 = vadd.f32 %v8741_v9, %v19566_v54  ;;  %v14854_v42 = vpop.f32.mrb[205].mxu1  ;;  %v19828_v58 = vld [vmem:[#allocation5 + $0xa2] sm:$0xff]  ;;  %v9101_v46 = vpack.c.bf16 %v19711_v31, %v19684_v39  ;;  %v9452_v31 = vld [vmem:[#allocation5 + $0xa] sm:$0xff] }
 0xa3b   :  { %9073 = vst.msk [vmem:[#allocation5 + $0xb8] sm:$0xff] %vm166_vm11, %v9048_v4  ;;  %v9049_v20 = vmul.f32 %v9019_v15, %v8874_v26  ;;  %v8744_v28 = vpop.f32.mrb[206].mxu1  ;;  %v15668_v54 = vld [vmem:[%s20373_s7 + $0x20] ss:$0 sps:$4 sm:$0xff]   ;;  %v15669_v42 = vld [vmem:[%s20373_s7 + $0x24] sm:$0xff]  }
 0xa3c   :  { %v8800_v43 = vadd.f32 %v19572_v36, %v8771_v57  ;;  %v14855_v22 = vpop.f32.mrb[207].mxu1  ;;  %v19830_v53 = vld [vmem:[#allocation5 + $0xaa] sm:$0xff]  ;;  %v9098_v36 = vpack.c.bf16 %v19627_v16, %v19613_v55  ;;  %v9024_v57 = vpop.permute.xlu1 %9023  ;;  %v9525_v15 = vsel %vm3947_vm1, %v15668_v54, 0  ;;  %v9099_v16 = vpack.c.bf16 %v19650_v40, %v19629_v49  ;;  %v15671_v28 = vld [vmem:[%s20373_s7 + $0x30] sm:$0xff]  }
 0xa3d   :  { %9074 = vst.msk [vmem:[#allocation5 + $0xc0] sm:$0xff] %vm166_vm11, %v9049_v20  ;;  %v10727_v9 = vpack.c.bf16 %v19830_v53, %v19828_v58  ;;  %v9103_v49 = vpack.c.bf16 %v19769_v1, %v19742_v41  ;;  %v9104_v40 = vpack.c.bf16 %v19798_v33, %v19771_v61  ;;  %v9455_v41 = vld [vmem:[#allocation5 + $0x22] sm:$0xff]  ;;  %v9454_v1 = vld [vmem:[#allocation5 + $0x1a] sm:$0xff]  ;;  %v9662_v33 = vld [vmem:[#allocation5 + $0x2a] sm:$0xff]  ;;  %v9476_v22 = vpack.c.bf16 %v19697_v45, %v19666_v51 }
 0xa3e   :  { %vm8825_vm10 = vcmp.ge.f32.partialorder %v8800_v43, 0.0  ;;  %v8850_v26 = vmul.f32 0.01, %v8800_v43  ;;  %v9473_v61 = vpack.c.bf16 %v9455_v41, %v9454_v1  ;;  %v9681_v4 = vpack.c.bf16 %v9663_v48, %v9662_v33  ;;  %v15675_v1 = vld [vmem:[%s20373_s7 + $0x48] sm:$0xff]   ;;  %v9877_v33 = vld [vmem:[#allocation5 + $0x64] sm:$0xff] }
 0xa3f   :  { %14885 = vmatmul.mubr.msk.bf16.vlgmr.msra.gmra.mrb[100].mxu0 %vm166_vm11, %v9097_v35  ;;  %v9477_v35 = vpack.c.bf16 %v19726_v18, %v19699_v8 }
 0xa40   :  { %v8875_v3 = vsel %vm8825_vm10, %v8800_v43, %v8850_v26  ;;  %14905 = vmatpush3.bf16.msra.mxu0 %v19608_v29  ;;  %14888 = vmatprep.mubr.msk.bf16.mxu0 %vm166_vm11, %v9098_v36  ;;  %v9100_v29 = vpack.c.bf16 %v19682_v27, %v19652_v52  ;;  %v19868_v52 = vld [vmem:[#allocation5 + $0x9e] sm:$0xff]  ;;  %v9453_v27 = vld [vmem:[#allocation5 + $0x12] sm:$0xff]  ;;  %v9475_v43 = vpack.c.bf16 %v19664_v60, %v19884_v44 }
 0xa41   :  { %v9050_v20 = vmul.f32 %v9024_v57, %v8875_v3  ;;  %15637 = vmatprep.subr.msk.bf16.mxu0 %vm3947_vm1, %v15668_v54  ;;  %v9105_v39 = vpack.c.bf16 %v19868_v52, %v19800_v21  ;;  %v9472_v30 = vpack.c.bf16 %v9453_v27, %v9452_v31  ;;  %v9733_v21 = vsel %vm3947_vm1, %v15670_v7, 0  ;;  %v15672_v3 = vld [vmem:[%s20373_s7 + $0x38] ss:$0 sps:$4 sm:$0xff]   ;;  %v9870_v27 = vld [vmem:[#allocation5 + $0x2c] sm:$0xff] }
 0xa42   :  { %v9478_v54 = vpack.c.bf16 %v19755_v17, %v19728_v6  ;;  %v9479_v26 = vpack.c.bf16 %v19784_v50, %v19757_v5  ;;  %v9480_v36 = vpack.c.bf16 %v19813_v32, %v19786_v47  ;;  %v9481_v57 = vpack.c.bf16 %v19828_v58, %v19815_v24  ;;  %v9872_v31 = vld [vmem:[#allocation5 + $0x3c] sm:$0xff]  ;;  %v20125_v58 = vld [vmem:[%s20368_s2] sm:$0xff] }
 0xa43   :  { %9075 = vst.msk [vmem:[#allocation5 + $0xc8] sm:$0xff] %vm166_vm11, %v9050_v20  ;;  %v9941_v20 = vsel %vm3947_vm1, %v15672_v3, 0 }
 0xa44   :  { %14907 = vmatpush3.bf16.msra.mxu0 %v9525_v15  ;;  %v15673_v15 = vld [vmem:[%s20373_s7 + $0x3c] sm:$0xff]  }
 0xa45   :  { %14928 = vmatprep.subr.bf16.mxu0 %v15669_v42 }
 0xa47   :  { %14889 = vmatmul.mubr.msk.bf16.gmra.mrb[104].mxu0 %vm166_vm11, %v9099_v16  ;;  %v9869_v16 = vld [vmem:[#allocation5 + $0x24] sm:$0xff] }
 0xa48   :  { %14892 = vmatprep.mubr.msk.bf16.mxu0 %vm166_vm11, %v9100_v29 }
 0xa4f   :  { %14893 = vmatmul.mubr.msk.bf16.gmra.mrb[108].mxu0 %vm166_vm11, %v9101_v46  ;;  %v9868_v46 = vld [vmem:[#allocation5 + $0x1c] sm:$0xff] }
 0xa50   :  { %14896 = vmatprep.mubr.msk.bf16.mxu0 %vm166_vm11, %v9102_v37  ;;  %v9888_v37 = vpack.c.bf16 %v9869_v16, %v9868_v46  ;;  %v9884_v16 = vld [vmem:[#allocation5 + $0x9c] sm:$0xff]  ;;  %v9887_v46 = vld [vmem:[#allocation5 + $0xb4] sm:$0xff] }
 0xa57   :  { %14897 = vmatmul.mubr.msk.bf16.gmra.mrb[112].mxu0 %vm166_vm11, %v9103_v49  ;;  %v9871_v49 = vld [vmem:[#allocation5 + $0x34] sm:$0xff] }
 0xa58   :  { %14900 = vmatprep.mubr.msk.bf16.mxu0 %vm166_vm11, %v9104_v40  ;;  %v9873_v40 = vld [vmem:[#allocation5 + $0x44] sm:$0xff] }
 0xa59   :  { %v9890_v41 = vpack.c.bf16 %v9873_v40, %v9872_v31  ;;  %v20485_v40 = vpack.c.bf16 %v19613_v55, %v19610_v59  ;;  %v15677_v59 = vld [vmem:[%s20373_s7 + $0x54] sm:$0xff]   ;;  %v10093_v55 = vld [vmem:[#allocation5 + $0xa6] sm:$0xff] }
 0xa5a   :  { %v10104_v31 = vpack.c.bf16 %v10093_v55, %v19868_v52  ;;  %v15682_v52 = vld [vmem:[%s20374_s8 + $0x18] sm:$0xff]  }
 0xa5f   :  { %14901 = vmatmul.mubr.msk.bf16.gmra.mrb[116].mxu0 %vm166_vm11, %v9105_v39  ;;  %v9889_v39 = vpack.c.bf16 %v9871_v49, %v9870_v27  ;;  %v15676_v27 = vld [vmem:[%s20373_s7 + $0x50] ss:$0 sps:$4 sm:$0xff]  }
 0xa60   :  { %14908 = vmatprep.mubr.msk.bf16.mxu0 %vm166_vm11, %v9472_v30  ;;  %v15674_v30 = vld [vmem:[%s20373_s7 + $0x44] ss:$0 sps:$4 sm:$0xff]  }
 0xa61   :  { %v10149_v48 = vsel %vm3947_vm1, %v15674_v30, 0 }
 0xa67   :  { %14909 = vmatmul.mubr.msk.bf16.vlgmr.msra.gmra.mrb[100].mxu0 %vm166_vm11, %v9473_v61 }
 0xa68   :  { %14929 = vmatpush3.bf16.msra.mxu0 %v15669_v42  ;;  %14912 = vmatprep.mubr.msk.bf16.mxu0 %vm166_vm11, %v9681_v4  ;;  %v19924_v42 = vld [vmem:[#allocation5 + $0xb2] sm:$0xff] }
 0xa69   :  { %15638 = vmatprep.subr.msk.bf16.mxu0 %vm3947_vm1, %v15670_v7  ;;  %v9689_v29 = vpack.c.bf16 %v19924_v42, %v19830_v53  ;;  %v9874_v7 = vld [vmem:[#allocation5 + $0x4c] sm:$0xff] }
 0xa6c   :  { %14931 = vmatpush3.bf16.msra.mxu0 %v9733_v21  ;;  %v9876_v21 = vld [vmem:[#allocation5 + $0x5c] sm:$0xff] }
 0xa6d   :  { %14952 = vmatprep.subr.bf16.mxu0 %v15671_v28 }
 0xa6f   :  { %14913 = vmatmul.mubr.msk.bf16.gmra.mrb[104].mxu0 %vm166_vm11, %v9475_v43 }
 0xa70   :  { %14916 = vmatprep.mubr.msk.bf16.mxu0 %vm166_vm11, %v9476_v22 }
 0xa77   :  { %14917 = vmatmul.mubr.msk.bf16.gmra.mrb[108].mxu0 %vm166_vm11, %v9477_v35 }
 0xa78   :  { %14920 = vmatprep.mubr.msk.bf16.mxu0 %vm166_vm11, %v9478_v54 }
 0xa7f   :  { %14921 = vmatmul.mubr.msk.bf16.gmra.mrb[112].mxu0 %vm166_vm11, %v9479_v26 }
 0xa80   :  { %14924 = vmatprep.mubr.msk.bf16.mxu0 %vm166_vm11, %v9480_v36 }
 0xa87   :  { %14925 = vmatmul.mubr.msk.bf16.gmra.mrb[116].mxu0 %vm166_vm11, %v9481_v57 }
 0xa88   :  { %14932 = vmatprep.mubr.msk.bf16.mxu0 %vm166_vm11, %v9473_v61  ;;  %v9875_v61 = vld [vmem:[#allocation5 + $0x54] sm:$0xff] }
 0xa8f   :  { %14933 = vmatmul.mubr.msk.bf16.vlgmr.msra.gmra.mrb[100].mxu0 %vm166_vm11, %v9681_v4  ;;  %v9891_v4 = vpack.c.bf16 %v9875_v61, %v9874_v7  ;;  %v15678_v61 = vld [vmem:[%s20373_s7 + $0x5c] ss:$0 sps:$4 sm:$0xff]   ;;  %v15679_v7 = vld [vmem:[%s20373_s7 + $0x60] sm:$0xff]  }
 0xa90   :  { %14953 = vmatpush3.bf16.msra.mxu0 %v15671_v28  ;;  %14936 = vmatprep.mubr.msk.bf16.mxu0 %vm166_vm11, %v9475_v43  ;;  %v9892_v28 = vpack.c.bf16 %v9877_v33, %v9876_v21  ;;  %v9879_v43 = vld [vmem:[#allocation5 + $0x74] sm:$0xff]  ;;  %v10565_v33 = vsel %vm3947_vm1, %v15678_v61, 0  ;;  %v20491_v21 = vld [vmem:[#allocation13_spill] sm:$0xff] }
 0xa91   :  { %15639 = vmatprep.subr.msk.bf16.mxu0 %vm3947_vm1, %v15672_v3  ;;  %v9885_v3 = vld [vmem:[#allocation5 + $0xa4] sm:$0xff] }
 0xa94   :  { %14955 = vmatpush3.bf16.msra.mxu0 %v9941_v20  ;;  %v9882_v20 = vld [vmem:[#allocation5 + $0x8c] sm:$0xff] }
 0xa95   :  { %14976 = vmatprep.subr.bf16.mxu0 %v15673_v15 }
 0xa97   :  { %14937 = vmatmul.mubr.msk.bf16.gmra.mrb[104].mxu0 %vm166_vm11, %v9476_v22  ;;  %v9881_v22 = vld [vmem:[#allocation5 + $0x84] sm:$0xff] }
 0xa98   :  { %14940 = vmatprep.mubr.msk.bf16.mxu0 %vm166_vm11, %v9477_v35  ;;  %v9878_v35 = vld [vmem:[#allocation5 + $0x6c] sm:$0xff] }
 0xa9f   :  { %14941 = vmatmul.mubr.msk.bf16.gmra.mrb[108].mxu0 %vm166_vm11, %v9478_v54  ;;  %v9893_v54 = vpack.c.bf16 %v9879_v43, %v9878_v35  ;;  %v20495_v43 = vld [vmem:[#allocation14_spill] sm:$0xff] }
 0xaa0   :  { %14944 = vmatprep.mubr.msk.bf16.mxu0 %vm166_vm11, %v9479_v26  ;;  %v9880_v26 = vld [vmem:[#allocation5 + $0x7c] sm:$0xff] }
 0xaa7   :  { %14945 = vmatmul.mubr.msk.bf16.gmra.mrb[112].mxu0 %vm166_vm11, %v9480_v36  ;;  %v9894_v36 = vpack.c.bf16 %v9881_v22, %v9880_v26  ;;  %v20498_v22 = vld [vmem:[#allocation16_spill] sm:$0xff] }
 0xaa8   :  { %14948 = vmatprep.mubr.msk.bf16.mxu0 %vm166_vm11, %v9481_v57  ;;  %v9883_v57 = vld [vmem:[#allocation5 + $0x94] sm:$0xff] }
 0xaa9   :  { %v10509_v26 = vld [vmem:[#allocation5 + $0xb8] sm:$0xff] }
 0xaaf   :  { %14949 = vmatmul.mubr.msk.bf16.gmra.mrb[116].mxu0 %vm166_vm11, %v9689_v29  ;;  %v9896_v29 = vpack.c.bf16 %v9885_v3, %v9884_v16 }
 0xab0   :  { %14956 = vmatprep.mubr.msk.bf16.mxu0 %vm166_vm11, %v9888_v37  ;;  %v9886_v37 = vld [vmem:[#allocation5 + $0xac] sm:$0xff] }
 0xab1   :  { %v9897_v49 = vpack.c.bf16 %v9887_v46, %v9886_v37  ;;  %v20501_v37 = vpack.c.bf16 %v19666_v51, %v19664_v60  ;;  %v20505_v60 = vpack.c.bf16 %v19786_v47, %v19784_v50  ;;  %v20506_v51 = vpack.c.bf16 %v19815_v24, %v19813_v32  ;;  %v11015_v50 = vpop.permute.xlu1 %11014  ;;  %v20507_v24 = vld [vmem:[#allocation10_spill] sm:$0xff] }
 0xab5   :  { %v11030_v32 = vpop.permute.xlu1 %11029 }
 0xab7   :  { %14957 = vmatmul.mubr.msk.bf16.vlgmr.msra.gmra.mrb[100].mxu0 %vm166_vm11, %v9889_v39  ;;  %v10357_v39 = vsel %vm3947_vm1, %v15676_v27, 0 }
 0xab8   :  { %14977 = vmatpush3.bf16.msra.mxu0 %v15673_v15  ;;  %14960 = vmatprep.mubr.msk.bf16.mxu0 %vm166_vm11, %v9890_v41  ;;  %v9895_v15 = vpack.c.bf16 %v9883_v57, %v9882_v20  ;;  %v10095_v41 = vld [vmem:[#allocation5 + $0xb6] sm:$0xff]  ;;  %v10511_v20 = vld [vmem:[#allocation5 + $0xc8] sm:$0xff] }
 0xab9   :  { %15640 = vmatprep.subr.msk.bf16.mxu0 %vm3947_vm1, %v15674_v30  ;;  %v15681_v30 = vld [vmem:[%s20374_s8 + $0x10] sm:$0xff]   ;;  %v10508_v57 = vld [vmem:[#allocation5 + $0xb0] sm:$0xff] }
 0xaba   :  { %15073 = vmatpush3.bf16.msra.mxu1 %v15681_v30  ;;  %v10520_v3 = vpack.c.bf16 %v10509_v26, %v10508_v57 }
 0xabb   :  { %15074 = vmatprep.subr.bf16.mxu1 %v20392_v62 }
 0xabc   :  { %14979 = vmatpush3.bf16.msra.mxu0 %v10149_v48  ;;  %v10094_v48 = vld [vmem:[#allocation5 + $0xae] sm:$0xff] }
 0xabd   :  { %15000 = vmatprep.subr.bf16.mxu0 %v15675_v1 }
 0xabe   :  { %15075 = vmatpush3.bf16.msra.mxu1 %v15682_v52 }
 0xabf   :  { %14961 = vmatmul.mubr.msk.bf16.gmra.mrb[104].mxu0 %vm166_vm11, %v9891_v4  ;;  %15080 = vmatprep.subr.bf16.mxu1 %v20392_v62 }
 0xac0   :  { %14964 = vmatprep.mubr.msk.bf16.mxu0 %vm166_vm11, %v9892_v28  ;;  %v20494_v28 = vld [vmem:[#allocation15_spill] sm:$0xff] }
 0xac7   :  { %14965 = vmatmul.mubr.msk.bf16.gmra.mrb[108].mxu0 %vm166_vm11, %v9893_v54  ;;  %v10507_v54 = vld [vmem:[#allocation5 + $0xa8] sm:$0xff] }
 0xac8   :  { %14968 = vmatprep.mubr.msk.bf16.mxu0 %vm166_vm11, %v9894_v36 }
 0xacf   :  { %14969 = vmatmul.mubr.msk.bf16.gmra.mrb[112].mxu0 %vm166_vm11, %v9895_v15  ;;  %v10510_v15 = vld [vmem:[#allocation5 + $0xc0] sm:$0xff] }
 0xad0   :  { %14972 = vmatprep.mubr.msk.bf16.mxu0 %vm166_vm11, %v9896_v29  ;;  %v10521_v16 = vpack.c.bf16 %v10511_v20, %v10510_v15  ;;  %v10700_v29 = vld [vmem:[#allocation5 + $0x32] sm:$0xff] }
 0xad1   :  { %v10720_v46 = vpack.c.bf16 %v19884_v44, %v10700_v29  ;;  %v20504_v44 = vpack.c.bf16 %v19757_v5, %v19755_v17  ;;  %v11020_v5 = vpop.permute.xlu0 %11019 }
 0xad5   :  { %v11025_v47 = vpop.permute.xlu0 %11024 }
 0xad7   :  { %14973 = vmatmul.mubr.msk.bf16.gmra.mrb[116].mxu0 %vm166_vm11, %v9897_v49  ;;  %v20502_v49 = vpack.c.bf16 %v19699_v8, %v19697_v45  ;;  %v10717_v45 = vld [vmem:[#allocation5 + $0xba] sm:$0xff] }
 0xad8   :  { %14980 = vmatprep.mubr.msk.bf16.mxu0 %vm166_vm11, %v20485_v40  ;;  %v20503_v40 = vpack.c.bf16 %v19728_v6, %v19726_v18  ;;  %v10728_v8 = vpack.c.bf16 %v10717_v45, %v19924_v42  ;;  %v10718_v18 = vld [vmem:[#allocation5 + $0xc2] sm:$0xff]  ;;  %v10719_v6 = vld [vmem:[#allocation5 + $0xca] sm:$0xff]  ;;  %v20120_v42 = vpop.permute.xlu1 %11039 }
 0xad9   :  { %v10729_v17 = vpack.c.bf16 %v10719_v6, %v10718_v18 }
 0xadf   :  { %14981 = vmatmul.mubr.msk.bf16.vlgmr.msra.gmra.mrb[100].mxu0 %vm166_vm11, %v19634_v12 }
 0xae0   :  { %15001 = vmatpush3.bf16.msra.mxu0 %v15675_v1  ;;  %14984 = vmatprep.mubr.msk.bf16.mxu0 %vm166_vm11, %v19659_v23  ;;  %v10105_v1 = vpack.c.bf16 %v10095_v41, %v10094_v48  ;;  %v11050_v41 = vpop.permute.xlu1 %11049 }
 0xae1   :  { %15641 = vmatprep.subr.msk.bf16.mxu0 %vm3947_vm1, %v15676_v27  ;;  %v10910_v27 = vsub.s32 3, %v20507_v24 }
 0xae3   :  { %v20128_v53 = vrot.slane %v20125_v58, %v10910_v27 }
 0xae4   :  { %15003 = vmatpush3.bf16.msra.mxu0 %v10357_v39  ;;  %v11035_v39 = vpop.permute.xlu0 %11034 }
 0xae5   :  { %15024 = vmatprep.subr.bf16.mxu0 %v15677_v59 }
 0xae7   :  { %14985 = vmatmul.mubr.msk.bf16.gmra.mrb[104].mxu0 %vm166_vm11, %v19689_v13 }
 0xae8   :  { %14988 = vmatprep.mubr.msk.bf16.mxu0 %vm166_vm11, %v19718_v14 }
 0xaef   :  { %14989 = vmatmul.mubr.msk.bf16.gmra.mrb[108].mxu0 %vm166_vm11, %v19747_v11 }
 0xaf0   :  { %14992 = vmatprep.mubr.msk.bf16.mxu0 %vm166_vm11, %v19776_v2 }
 0xaf7   :  { %14993 = vmatmul.mubr.msk.bf16.gmra.mrb[112].mxu0 %vm166_vm11, %v19805_v19 }
 0xaf8   :  { %14996 = vmatprep.mubr.msk.bf16.mxu0 %vm166_vm11, %v10104_v31 }
 0xaff   :  { %14997 = vmatmul.mubr.msk.bf16.gmra.mrb[116].mxu0 %vm166_vm11, %v10105_v1 }
 0xb00   :  { %15004 = vmatprep.mubr.msk.bf16.mxu0 %vm166_vm11, %v19634_v12  ;;  %v10303_v12 = vld [vmem:[#allocation5 + $0xc6] sm:$0xff] }
 0xb07   :  { %15005 = vmatmul.mubr.msk.bf16.vlgmr.msra.gmra.mrb[100].mxu0 %vm166_vm11, %v19659_v23  ;;  %v10302_v23 = vld [vmem:[#allocation5 + $0xbe] sm:$0xff] }
 0xb08   :  { %15025 = vmatpush3.bf16.msra.mxu0 %v15677_v59  ;;  %15008 = vmatprep.mubr.msk.bf16.mxu0 %vm166_vm11, %v19689_v13  ;;  %v10313_v13 = vpack.c.bf16 %v10303_v12, %v10302_v23  ;;  %v11045_v59 = vpop.permute.xlu0 %11044 }
 0xb09   :  { %15642 = vmatprep.subr.msk.bf16.mxu0 %vm3947_vm1, %v15678_v61 }
 0xb0c   :  { %15027 = vmatpush3.bf16.msra.mxu0 %v10565_v33 }
 0xb0d   :  { %15048 = vmatprep.subr.bf16.mxu0 %v15679_v7 }
 0xb0f   :  { %15009 = vmatmul.mubr.msk.bf16.gmra.mrb[104].mxu0 %vm166_vm11, %v19718_v14  ;;  %v20486_v14 = vpack.c.bf16 %v19637_v25, %v19621_v34  ;;  %v20489_v25 = vld [vmem:[#allocation11_spill] sm:$0xff] }
 0xb10   :  { %15012 = vmatprep.mubr.msk.bf16.mxu0 %vm166_vm11, %v19747_v11  ;;  %v15680_v11 = vld [vmem:[%s20373_s7 + $0x68] ss:$0 sps:$4 sm:$0xff]   ;;  %v20490_v4 = vpack.c.bf16 %v19709_v63, %v20489_v25  ;;  %v20500_v63 = vld [vmem:[#allocation18_spill] sm:$0xff] }
 0xb11   :  { %v10773_v34 = vsel %vm3947_vm1, %v15680_v11, 0  ;;  %v10519_v36 = vpack.c.bf16 %v10507_v54, %v20500_v63 }
 0xb17   :  { %15013 = vmatmul.mubr.msk.bf16.gmra.mrb[108].mxu0 %vm166_vm11, %v19776_v2  ;;  %v20487_v2 = vpack.c.bf16 %v19654_v10, %v19639_v0  ;;  %v20492_v0 = vld [vmem:[#allocation12_spill] sm:$0xff] }
 0xb18   :  { %15016 = vmatprep.mubr.msk.bf16.mxu0 %vm166_vm11, %v19805_v19  ;;  %v20488_v19 = vpack.c.bf16 %v19680_v56, %v19670_v38  ;;  %v20493_v10 = vpack.c.bf16 %v20491_v21, %v20492_v0  ;;  %v20496_v38 = vpack.c.bf16 %v20494_v28, %v20495_v43  ;;  %v20497_v56 = vld [vmem:[#allocation17_spill] sm:$0xff]  ;;  %v20137_v0 = vpop.permute.xlu1 %11059 }
 0xb19   :  { %v20499_v35 = vpack.c.bf16 %v20497_v56, %v20498_v22 }
 0xb1c   :  { %v11070_v29 = vpop.permute.xlu1 %11069 }
 0xb1f   :  { %15017 = vmatmul.mubr.msk.bf16.gmra.mrb[112].mxu0 %vm166_vm11, %v10104_v31 }
 0xb20   :  { %15020 = vmatprep.mubr.msk.bf16.mxu0 %vm166_vm11, %v10105_v1 }
 0xb27   :  { %15021 = vmatmul.mubr.msk.bf16.gmra.mrb[116].mxu0 %vm166_vm11, %v10313_v13 }
 0xb28   :  { %15028 = vmatprep.mubr.msk.bf16.mxu0 %vm166_vm11, %v20486_v14 }
 0xb2f   :  { %15029 = vmatmul.mubr.msk.bf16.vlgmr.msra.gmra.mrb[100].mxu0 %vm166_vm11, %v20487_v2  ;;  %v20134_v2 = vpop.permute.xlu0 %11054 }
 0xb30   :  { %15049 = vmatpush3.bf16.msra.mxu0 %v15679_v7  ;;  %15032 = vmatprep.mubr.msk.bf16.mxu0 %vm166_vm11, %v20488_v19 }
 0xb31   :  { %15643 = vmatprep.subr.msk.bf16.mxu0 %vm3947_vm1, %v15680_v11 }
 0xb34   :  { %15051 = vmatpush3.bf16.msra.mxu0 %v10773_v34 }
 0xb37   :  { %15033 = vmatmul.mubr.msk.bf16.gmra.mrb[104].mxu0 %vm166_vm11, %v20490_v4 }
 0xb38   :  { %15036 = vmatprep.mubr.msk.bf16.mxu0 %vm166_vm11, %v20493_v10 }
 0xb3f   :  { %15037 = vmatmul.mubr.msk.bf16.gmra.mrb[108].mxu0 %vm166_vm11, %v20496_v38 }
 0xb40   :  { %15040 = vmatprep.mubr.msk.bf16.mxu0 %vm166_vm11, %v20499_v35 }
 0xb47   :  { %15041 = vmatmul.mubr.msk.bf16.gmra.mrb[112].mxu0 %vm166_vm11, %v10519_v36  ;;  %v11065_v36 = vpop.permute.xlu0 %11064 }
 0xb48   :  { %15044 = vmatprep.mubr.msk.bf16.mxu0 %vm166_vm11, %v10520_v3 }
 0xb4f   :  { %15045 = vmatmul.mubr.msk.bf16.gmra.mrb[116].mxu0 %vm166_vm11, %v10521_v16 }
 0xb50   :  { %15052 = vmatprep.mubr.msk.bf16.mxu0 %vm166_vm11, %v10720_v46 }
 0xb57   :  { %15053 = vmatmul.mubr.msk.bf16.vlgmr.msra.gmra.mrb[100].mxu0 %vm166_vm11, %v20501_v37 }
 0xb58   :  { %15056 = vmatprep.mubr.msk.bf16.mxu0 %vm166_vm11, %v20502_v49 }
 0xb5f   :  { %15057 = vmatmul.mubr.msk.bf16.gmra.mrb[104].mxu0 %vm166_vm11, %v20503_v40 }
 0xb60   :  { %15060 = vmatprep.mubr.msk.bf16.mxu0 %vm166_vm11, %v20504_v44 }
 0xb67   :  { %15061 = vmatmul.mubr.msk.bf16.gmra.mrb[108].mxu0 %vm166_vm11, %v20505_v60 }
 0xb68   :  { %15064 = vmatprep.mubr.msk.bf16.mxu0 %vm166_vm11, %v20506_v51 }
 0xb6f   :  { %15065 = vmatmul.mubr.msk.bf16.gmra.mrb[112].mxu0 %vm166_vm11, %v10727_v9 }
 0xb70   :  { %15068 = vmatprep.mubr.msk.bf16.mxu0 %vm166_vm11, %v10728_v8 }
 0xb77   :  { %15069 = vmatmul.mubr.msk.bf16.gmra.mrb[116].mxu0 %vm166_vm11, %v10729_v17  ;;  %v15683_v17 = vld [vmem:[%s20374_s8] sm:$0xff]  }
 0xc2a   :  { %v15054_v9 = vpop.f32.mrb[100].mxu0 }
 0xc2b   :  { %v10914_v55 = vadd.f32 %v15054_v9, %v20128_v53  ;;  %v10809_v31 = vpop.f32.mrb[101].mxu0  ;;  %v20160_v9 = vpop.permute.xlu1 %11079 }
 0xc2c   :  { %v10912_v30 = vadd.f32 %v20128_v53, %v10809_v31  ;;  %v15055_v52 = vpop.f32.mrb[102].mxu0 }
 0xc2d   :  { %vm10934_vm1 = vcmp.ge.f32.partialorder %v10914_v55, 0.0  ;;  %v10954_v48 = vmul.f32 0.01, %v10914_v55  ;;  %v10915_v1 = vadd.f32 %v15055_v52, %v20128_v53  ;;  %v10812_v61 = vpop.f32.mrb[103].mxu0 }
 0xc2e   :  { %vm10932_vm11 = vcmp.ge.f32.partialorder %v10912_v30, 0.0  ;;  %v10952_v33 = vmul.f32 0.01, %v10912_v30  ;;  %v10913_v7 = vadd.f32 %v20128_v53, %v10812_v61 }
 0xc2f   :  { %v10974_v12 = vsel %vm10934_vm1, %v10914_v55, %v10954_v48  ;;  %vm10935_vm12 = vcmp.ge.f32.partialorder %v10915_v1, 0.0  ;;  %v10955_v23 = vmul.f32 0.01, %v10915_v1 }
 0xc30   :  { %v11114_v13 = vmul.f32 %v11025_v47, %v10974_v12  ;;  %v10972_v14 = vsel %vm10932_vm11, %v10912_v30, %v10952_v33  ;;  %vm10933_vm13 = vcmp.ge.f32.partialorder %v10913_v7, 0.0  ;;  %v10953_v11 = vmul.f32 0.01, %v10913_v7 }
 0xc31   :  { %v11112_v19 = vmul.f32 %v11015_v50, %v10972_v14  ;;  %v10975_v34 = vsel %vm10935_vm12, %v10915_v1, %v10955_v23 }
 0xc32   :  { %11134 = vst.msk [vmem:[#allocation6 + $0x18] sm:$0xff] %vm195_vm6, %v11114_v13  ;;  %v11115_v25 = vmul.f32 %v11030_v32, %v10975_v34  ;;  %v10973_v4 = vsel %vm10933_vm13, %v10913_v7, %v10953_v11  ;;  %v15058_v21 = vpop.f32.mrb[104].mxu0  ;;  %v15685_v34 = vld [vmem:[%s20374_s8 + $0x20] sm:$0xff]  }
 0xc33   :  { %11132 = vst.msk [vmem:[#allocation6 + $0x8] sm:$0xff] %vm195_vm6, %v11112_v19  ;;  %v11113_v10 = vmul.f32 %v11020_v5, %v10973_v4  ;;  %v10918_v28 = vadd.f32 %v15058_v21, %v20128_v53  ;;  %v10825_v43 = vpop.f32.mrb[105].mxu0  ;;  %v20155_v5 = vpop.permute.xlu0 %11074 }
 0xc34   :  { %11135 = vst.msk [vmem:[#allocation6 + $0x20] sm:$0xff] %vm195_vm6, %v11115_v25  ;;  %v10916_v38 = vadd.f32 %v20128_v53, %v10825_v43  ;;  %v15059_v56 = vpop.f32.mrb[106].mxu0  ;;  %v11090_v25 = vpop.permute.xlu1 %11089 }
 0xc35   :  { %11133 = vst.msk [vmem:[#allocation6 + $0x10] sm:$0xff] %vm195_vm6, %v11113_v10  ;;  %vm10938_vm14 = vcmp.ge.f32.partialorder %v10918_v28, 0.0  ;;  %v10958_v22 = vmul.f32 0.01, %v10918_v28  ;;  %v10919_v35 = vadd.f32 %v15059_v56, %v20128_v53  ;;  %v10828_v54 = vpop.f32.mrb[107].mxu0 }
 0xc36   :  { %vm10936_vm15 = vcmp.ge.f32.partialorder %v10916_v38, 0.0  ;;  %v10956_v26 = vmul.f32 0.01, %v10916_v38  ;;  %v10917_v63 = vadd.f32 %v20128_v53, %v10828_v54 }
 0xc37   :  { %v10978_v57 = vsel %vm10938_vm14, %v10918_v28, %v10958_v22  ;;  %vm10939_vm3 = vcmp.ge.f32.partialorder %v10919_v35, 0.0  ;;  %v10959_v3 = vmul.f32 0.01, %v10919_v35  ;;  %v11085_v23 = vpop.permute.xlu0 %11084 }
 0xc38   :  { %v11118_v20 = vmul.f32 %v11045_v59, %v10978_v57  ;;  %v10976_v15 = vsel %vm10936_vm15, %v10916_v38, %v10956_v26  ;;  %vm10937_vm4 = vcmp.ge.f32.partialorder %v10917_v63, 0.0  ;;  %v10957_v16 = vmul.f32 0.01, %v10917_v63  ;;  %v15686_v26 = vld [vmem:[%s20374_s8 + $0x28] sm:$0xff]  }
 0xc39   :  { %v11116_v46 = vmul.f32 %v11035_v39, %v10976_v15  ;;  %v10979_v37 = vsel %vm10939_vm3, %v10919_v35, %v10959_v3  ;;  %vm12214_vm3 = vcmask 13312  }
 0xc3a   :  { %11138 = vst.msk [vmem:[#allocation6 + $0x38] sm:$0xff] %vm195_vm6, %v11118_v20  ;;  %v11119_v49 = vmul.f32 %v11050_v41, %v10979_v37  ;;  %v10977_v40 = vsel %vm10937_vm4, %v10917_v63, %v10957_v16  ;;  %v15062_v44 = vpop.f32.mrb[108].mxu0  ;;  %v15684_v41 = vld [vmem:[%s20374_s8 + $0x8] sm:$0xff]   ;;  %v11152_v12 = vld [vmem:[#allocation6 + $0x8] sm:$0x3f] }
 0xc3b   :  { %11136 = vst.msk [vmem:[#allocation6 + $0x28] sm:$0xff] %vm195_vm6, %v11116_v46  ;;  %v11117_v60 = vmul.f32 %v20120_v42, %v10977_v40  ;;  %v10922_v51 = vadd.f32 %v15062_v44, %v20128_v53  ;;  %v10841_v45 = vpop.f32.mrb[109].mxu0  ;;  %v11153_v10 = vpack.c.bf16 %v11152_v12, %v11152_v12  ;;  %v11095_v63 = vpop.permute.xlu0 %11094  ;;  %v11274_v16 = vld [vmem:[#allocation6 + $0x1c] sm:$0x3f]  ;;  %v15692_v12 = vld [vmem:[%s20374_s8 + $0x58] sm:$0xff]  }
 0xc3c   :  { %v11158_v8 = vld [vmem:[#allocation6 + $0x12] sm:$0x3f]  ;;  %11139 = vst.msk [vmem:[#allocation6 + $0x40] sm:$0xff] %vm195_vm6, %v11119_v49  ;;  %v10920_v18 = vadd.f32 %v20128_v53, %v10841_v45  ;;  %v15063_v6 = vpop.f32.mrb[110].mxu0 }
 0xc3d   :  { %v11159_v50 = vpack.c.bf16 %v11158_v8, %v11158_v8  ;;  %11137 = vst.msk [vmem:[#allocation6 + $0x30] sm:$0xff] %vm195_vm6, %v11117_v60  ;;  %vm10942_vm5 = vcmp.ge.f32.partialorder %v10922_v51, 0.0  ;;  %v10962_v47 = vmul.f32 0.01, %v10922_v51  ;;  %v10923_v32 = vadd.f32 %v15063_v6, %v20128_v53  ;;  %v10844_v27 = vpop.f32.mrb[111].mxu0  ;;  %v15687_v60 = vld [vmem:[%s20374_s8 + $0x30] sm:$0xff]  }
 0xc3e   :  { %vm10940_vm0 = vcmp.ge.f32.partialorder %v10920_v18, 0.0  ;;  %v10960_v39 = vmul.f32 0.01, %v10920_v18  ;;  %v10921_v42 = vadd.f32 %v20128_v53, %v10844_v27 }
 0xc3f   :  { %v10982_v59 = vsel %vm10942_vm5, %v10922_v51, %v10962_v47  ;;  %vm10943_vm7 = vcmp.ge.f32.partialorder %v10923_v32, 0.0  ;;  %v10963_v55 = vmul.f32 0.01, %v10923_v32  ;;  %15077 = vmatmul.mubr.msk.bf16.vlgmr.msra.gmra.mrb[208].mxu1 %vm195_vm6, %v11159_v50 }
 0xc40   :  { %v11122_v31 = vmul.f32 %v11065_v36, %v10982_v59  ;;  %v10980_v30 = vsel %vm10940_vm0, %v10920_v18, %v10960_v39  ;;  %vm10941_vm8 = vcmp.ge.f32.partialorder %v10921_v42, 0.0  ;;  %v10961_v52 = vmul.f32 0.01, %v10921_v42  ;;  %15081 = vmatpush3.bf16.msra.mxu1 %v15683_v17  ;;  %15084 = vmatprep.mubr.msk.bf16.mxu1 %vm15736_vm2, %v20392_v62 }
 0xc41   :  { %v11120_v48 = vmul.f32 %v20134_v2, %v10980_v30  ;;  %v10983_v1 = vsel %vm10943_vm7, %v10923_v32, %v10963_v55  ;;  %15082 = vmatprep.subr.bf16.mxu1 %v20392_v62  ;;  %v11275_v18 = vpack.c.bf16 %v11274_v16, %v11274_v16 }
 0xc42   :  { %11142 = vst.msk [vmem:[#allocation6 + $0x58] sm:$0xff] %vm195_vm6, %v11122_v31  ;;  %v11123_v61 = vmul.f32 %v11070_v29, %v10983_v1  ;;  %v10981_v33 = vsel %vm10941_vm8, %v10921_v42, %v10961_v52  ;;  %v15066_v7 = vpop.f32.mrb[112].mxu0  ;;  %v11100_v29 = vpop.permute.xlu1 %11099  ;;  %v15688_v42 = vld [vmem:[%s20374_s8 + $0x38] sm:$0xff]   ;;  %v15690_v1 = vld [vmem:[%s20374_s8 + $0x48] sm:$0xff]  }
 0xc43   :  { %11140 = vst.msk [vmem:[#allocation6 + $0x48] sm:$0xff] %vm195_vm6, %v11120_v48  ;;  %v11121_v13 = vmul.f32 %v20137_v0, %v10981_v33  ;;  %v10926_v14 = vadd.f32 %v15066_v7, %v20128_v53  ;;  %v10857_v11 = vpop.f32.mrb[113].mxu0  ;;  %v11336_v30 = vld [vmem:[#allocation6 + $0x26] sm:$0x3f] }
 0xc44   :  { %11143 = vst.msk [vmem:[#allocation6 + $0x60] sm:$0xff] %vm195_vm6, %v11123_v61  ;;  %v10924_v2 = vadd.f32 %v20128_v53, %v10857_v11  ;;  %15083 = vmatpush3.bf16.msra.mxu1 %v15684_v41  ;;  %v15067_v19 = vpop.f32.mrb[114].mxu0  ;;  %v15689_v41 = vld [vmem:[%s20374_s8 + $0x40] sm:$0xff]   ;;  %v11337_v48 = vpack.c.bf16 %v11336_v30, %v11336_v30  ;;  %v15691_v33 = vld [vmem:[%s20374_s8 + $0x50] sm:$0xff]   ;;  %v15694_v11 = vld [vmem:[%s20374_s8 + $0x68] sm:$0xff]  }
 0xc45   :  { %11141 = vst.msk [vmem:[#allocation6 + $0x50] sm:$0xff] %vm195_vm6, %v11121_v13  ;;  %vm10946_vm9 = vcmp.ge.f32.partialorder %v10926_v14, 0.0  ;;  %v10966_v4 = vmul.f32 0.01, %v10926_v14  ;;  %v10927_v21 = vadd.f32 %v15067_v19, %v20128_v53  ;;  %v10860_v0 = vpop.f32.mrb[115].mxu0  ;;  %15088 = vmatprep.subr.bf16.mxu1 %v20392_v62  ;;  %v15693_v13 = vld [vmem:[%s20374_s8 + $0x60] sm:$0xff]  }
 0xc46   :  { %vm10944_vm10 = vcmp.ge.f32.partialorder %v10924_v2, 0.0  ;;  %v10964_v28 = vmul.f32 0.01, %v10924_v2  ;;  %v10925_v43 = vadd.f32 %v20128_v53, %v10860_v0  ;;  %v11398_v61 = vld [vmem:[#allocation6 + $0x30] sm:$0x3f]  ;;  %v15695_v19 = vld [vmem:[%s20374_s8 + $0x70] sm:$0xff]  }
 0xc47   :  { %v10986_v38 = vsel %vm10946_vm9, %v10926_v14, %v10966_v4  ;;  %vm10947_vm1 = vcmp.ge.f32.partialorder %v10927_v21, 0.0  ;;  %v10967_v56 = vmul.f32 0.01, %v10927_v21  ;;  %15085 = vmatmul.mubr.msk.bf16.vlgmr.msra.gmra.mrb[212].mxu1 %vm195_vm6, %v11153_v10  ;;  %v11399_v7 = vpack.c.bf16 %v11398_v61, %v11398_v61  ;;  %v15698_v10 = vld [vmem:[%s20374_s8 + $0x88] sm:$0xff]  }
 0xc48   :  { %v11126_v22 = vmul.f32 %v11085_v23, %v10986_v38  ;;  %v10984_v35 = vsel %vm10944_vm10, %v10924_v2, %v10964_v28  ;;  %vm10945_vm11 = vcmp.ge.f32.partialorder %v10925_v43, 0.0  ;;  %v10965_v54 = vmul.f32 0.01, %v10925_v43  ;;  %15089 = vmatpush3.bf16.msra.mxu1 %v15685_v34  ;;  %15092 = vmatprep.mubr.msk.bf16.mxu1 %vm15736_vm2, %v20392_v62  ;;  %v11460_v23 = vld [vmem:[#allocation6 + $0x3a] sm:$0x3f] }
 0xc49   :  { %v11124_v36 = vmul.f32 %v20155_v5, %v10984_v35  ;;  %v10987_v57 = vsel %vm10947_vm1, %v10927_v21, %v10967_v56  ;;  %15090 = vmatprep.subr.bf16.mxu1 %v20392_v62  ;;  %v11105_v5 = vpop.permute.xlu0 %11104  ;;  %v11461_v14 = vpack.c.bf16 %v11460_v23, %v11460_v23  ;;  %v15697_v21 = vld [vmem:[%s20374_s8 + $0x80] sm:$0xff]   ;;  %v11646_v28 = vld [vmem:[#allocation6 + $0x58] sm:$0x3f]  ;;  %v15700_v56 = vld [vmem:[%s20374_s8 + $0x98] sm:$0xff]  }
 0xc4a   :  { %11146 = vst.msk [vmem:[#allocation6 + $0x78] sm:$0xff] %vm195_vm6, %v11126_v22  ;;  %v11127_v3 = vmul.f32 %v11090_v25, %v10987_v57  ;;  %v10985_v20 = vsel %vm10945_vm11, %v10925_v43, %v10965_v54  ;;  %v15070_v15 = vpop.f32.mrb[116].mxu0  ;;  %v11522_v2 = vld [vmem:[#allocation6 + $0x44] sm:$0x3f]  ;;  %v11647_v38 = vpack.c.bf16 %v11646_v28, %v11646_v28  ;;  %v15701_v35 = vld [vmem:[%s20374_s8 + $0xa0] sm:$0xff]  }
 0xc4b   :  { %11144 = vst.msk [vmem:[#allocation6 + $0x68] sm:$0xff] %vm195_vm6, %v11124_v36  ;;  %v11125_v46 = vmul.f32 %v20160_v9, %v10985_v20  ;;  %v10930_v37 = vadd.f32 %v15070_v15, %v20128_v53  ;;  %v10873_v49 = vpop.f32.mrb[117].mxu0  ;;  %v11110_v9 = vpop.permute.xlu1 %11109  ;;  %v11523_v34 = vpack.c.bf16 %v11522_v2, %v11522_v2  ;;  %v15696_v25 = vld [vmem:[%s20374_s8 + $0x78] sm:$0xff]   ;;  %v15699_v43 = vld [vmem:[%s20374_s8 + $0x90] sm:$0xff]   ;;  %v15705_v15 = vld [vmem:[%s20374_s8 + $0xc0] sm:$0xff]  }
 0xc4c   :  { %11147 = vst.msk [vmem:[#allocation6 + $0x80] sm:$0xff] %vm195_vm6, %v11127_v3  ;;  %v10928_v40 = vadd.f32 %v20128_v53, %v10873_v49  ;;  %15091 = vmatpush3.bf16.msra.mxu1 %v15686_v26  ;;  %v15071_v44 = vpop.f32.mrb[118].mxu0  ;;  %v11584_v4 = vld [vmem:[#allocation6 + $0x4e] sm:$0x3f]  ;;  %v11708_v22 = vld [vmem:[#allocation6 + $0x62] sm:$0x3f] }
 0xc4d   :  { %11145 = vst.msk [vmem:[#allocation6 + $0x70] sm:$0xff] %vm195_vm6, %v11125_v46  ;;  %vm10950_vm12 = vcmp.ge.f32.partialorder %v10930_v37, 0.0  ;;  %v10970_v51 = vmul.f32 0.01, %v10930_v37  ;;  %v10931_v45 = vadd.f32 %v15071_v44, %v20128_v53  ;;  %v10876_v8 = vpop.f32.mrb[119].mxu0  ;;  %15096 = vmatprep.subr.bf16.mxu1 %v20392_v62  ;;  %v11585_v0 = vpack.c.bf16 %v11584_v4, %v11584_v4  ;;  %v15702_v26 = vld [vmem:[%s20374_s8 + $0xa8] sm:$0xff]  }
 0xc4e   :  { %vm10948_vm13 = vcmp.ge.f32.partialorder %v10928_v40, 0.0  ;;  %v10968_v6 = vmul.f32 0.01, %v10928_v40  ;;  %v10929_v17 = vadd.f32 %v20128_v53, %v10876_v8  ;;  %v11709_v54 = vpack.c.bf16 %v11708_v22, %v11708_v22  ;;  %v15703_v36 = vld [vmem:[%s20374_s8 + $0xb0] sm:$0xff]   ;;  %v15704_v3 = vld [vmem:[%s20374_s8 + $0xb8] sm:$0xff]  }
 0xc4f   :  { %v10990_v50 = vsel %vm10950_vm12, %v10930_v37, %v10970_v51  ;;  %vm10951_vm14 = vcmp.ge.f32.partialorder %v10931_v45, 0.0  ;;  %v10971_v47 = vmul.f32 0.01, %v10931_v45  ;;  %15093 = vmatmul.mubr.msk.bf16.vlgmr.msra.gmra.mrb[216].mxu1 %vm195_vm6, %v11275_v18  ;;  %v15707_v37 = vld [vmem:[%s20374_s8 + $0xd0] sm:$0xff]  }
 0xc50   :  { %v11130_v32 = vmul.f32 %v11105_v5, %v10990_v50  ;;  %v10988_v27 = vsel %vm10948_vm13, %v10928_v40, %v10968_v6  ;;  %vm10949_vm15 = vcmp.ge.f32.partialorder %v10929_v17, 0.0  ;;  %v10969_v39 = vmul.f32 0.01, %v10929_v17  ;;  %15097 = vmatpush3.bf16.msra.mxu1 %v15687_v60  ;;  %15100 = vmatprep.mubr.msk.bf16.mxu1 %vm15736_vm2, %v20392_v62  ;;  %v15708_v40 = vld [vmem:[%s20374_s8 + $0xd8] sm:$0xff]   ;;  %v15709_v60 = vld [vmem:[%s20374_s8 + $0xe0] sm:$0xff]   ;;  %v15711_v18 = vld [vmem:[%s20374_s8 + $0xf0] sm:$0xff]  }
 0xc51   :  { %v11128_v53 = vmul.f32 %v11095_v63, %v10988_v27  ;;  %v10991_v59 = vsel %vm10951_vm14, %v10931_v45, %v10971_v47  ;;  %15098 = vmatprep.subr.bf16.mxu1 %v20392_v62  ;;  %v15710_v45 = vld [vmem:[%s20374_s8 + $0xe8] sm:$0xff]   ;;  %v15713_v47 = vld [vmem:[%s20375_s9] sm:$0xff]  }
 0xc52   :  { %11150 = vst.msk [vmem:[#allocation6 + $0x98] sm:$0xff] %vm195_vm6, %v11130_v32  ;;  %v11131_v55 = vmul.f32 %v11110_v9, %v10991_v59  ;;  %v10989_v31 = vsel %vm10949_vm15, %v10929_v17, %v10969_v39  ;;  %v15712_v17 = vld [vmem:[%s20374_s8 + $0xf8] sm:$0xff]   ;;  %v15714_v32 = vld [vmem:[%s20375_s9 + $0x8] sm:$0xff]  }
 0xc53   :  { %11148 = vst.msk [vmem:[#allocation6 + $0x88] sm:$0xff] %vm195_vm6, %v11128_v53  ;;  %v11129_v52 = vmul.f32 %v11100_v29, %v10989_v31  ;;  %v15706_v29 = vld [vmem:[%s20374_s8 + $0xc8] sm:$0xff]   ;;  %v11894_v46 = vld [vmem:[#allocation6 + $0x80] sm:$0x3f] }
 0xc54   :  { %11151 = vst.msk [vmem:[#allocation6 + $0xa0] sm:$0xff] %vm195_vm6, %v11131_v55  ;;  %15099 = vmatpush3.bf16.msra.mxu1 %v15688_v42  ;;  %v11770_v63 = vld [vmem:[#allocation6 + $0x6c] sm:$0x3f]  ;;  %v11832_v20 = vld [vmem:[#allocation6 + $0x76] sm:$0x3f]  ;;  %v11895_v49 = vpack.c.bf16 %v11894_v46, %v11894_v46 }
 0xc55   :  { %11149 = vst.msk [vmem:[#allocation6 + $0x90] sm:$0xff] %vm195_vm6, %v11129_v52  ;;  %15104 = vmatprep.subr.bf16.mxu1 %v20392_v62  ;;  %v11771_v57 = vpack.c.bf16 %v11770_v63, %v11770_v63  ;;  %v11833_v16 = vpack.c.bf16 %v11832_v20, %v11832_v20 }
 0xc57   :  { %15101 = vmatmul.mubr.msk.bf16.vlgmr.msra.gmra.mrb[220].mxu1 %vm195_vm6, %v11337_v48 }
 0xc58   :  { %15105 = vmatpush3.bf16.msra.mxu1 %v15689_v41  ;;  %15108 = vmatprep.mubr.msk.bf16.mxu1 %vm15736_vm2, %v20392_v62 }
 0xc59   :  { %15106 = vmatprep.subr.bf16.mxu1 %v20392_v62 }
 0xc5a   :  { %v11956_v44 = vld [vmem:[#allocation6 + $0x8a] sm:$0x3f] }
 0xc5b   :  { %v11957_v51 = vpack.c.bf16 %v11956_v44, %v11956_v44  ;;  %v12080_v5 = vld [vmem:[#allocation6 + $0x9e] sm:$0x3f] }
 0xc5c   :  { %15107 = vmatpush3.bf16.msra.mxu1 %v15690_v1  ;;  %v12018_v8 = vld [vmem:[#allocation6 + $0x94] sm:$0x3f]  ;;  %v12081_v50 = vpack.c.bf16 %v12080_v5, %v12080_v5 }
 0xc5d   :  { %15112 = vmatprep.subr.bf16.mxu1 %v20392_v62  ;;  %v12019_v6 = vpack.c.bf16 %v12018_v8, %v12018_v8 }
 0xc5f   :  { %15109 = vmatmul.mubr.msk.bf16.vlgmr.msra.gmra.mrb[224].mxu1 %vm195_vm6, %v11399_v7 }
 0xc60   :  { %15113 = vmatpush3.bf16.msra.mxu1 %v15691_v33  ;;  %15116 = vmatprep.mubr.msk.bf16.mxu1 %vm15736_vm2, %v20392_v62 }
 0xc61   :  { %15114 = vmatprep.subr.bf16.mxu1 %v20392_v62 }
 0xc64   :  { %15115 = vmatpush3.bf16.msra.mxu1 %v15692_v12 }
 0xc65   :  { %15120 = vmatprep.subr.bf16.mxu1 %v20392_v62 }
 0xc67   :  { %15117 = vmatmul.mubr.msk.bf16.vlgmr.msra.gmra.mrb[228].mxu1 %vm195_vm6, %v11461_v14 }
 0xc68   :  { %15121 = vmatpush3.bf16.msra.mxu1 %v15693_v13  ;;  %15124 = vmatprep.mubr.msk.bf16.mxu1 %vm15736_vm2, %v20392_v62 }
 0xc69   :  { %15122 = vmatprep.subr.bf16.mxu1 %v20392_v62 }
 0xc6c   :  { %15123 = vmatpush3.bf16.msra.mxu1 %v15694_v11 }
 0xc6d   :  { %15128 = vmatprep.subr.bf16.mxu1 %v20392_v62 }
 0xc6f   :  { %15125 = vmatmul.mubr.msk.bf16.vlgmr.msra.gmra.mrb[232].mxu1 %vm195_vm6, %v11523_v34 }
 0xc70   :  { %15129 = vmatpush3.bf16.msra.mxu1 %v15695_v19  ;;  %15132 = vmatprep.mubr.msk.bf16.mxu1 %vm15736_vm2, %v20392_v62 }
 0xc71   :  { %15130 = vmatprep.subr.bf16.mxu1 %v20392_v62 }
 0xc74   :  { %15131 = vmatpush3.bf16.msra.mxu1 %v15696_v25 }
 0xc75   :  { %15136 = vmatprep.subr.bf16.mxu1 %v20392_v62 }
 0xc77   :  { %15133 = vmatmul.mubr.msk.bf16.vlgmr.msra.gmra.mrb[236].mxu1 %vm195_vm6, %v11585_v0 }
 0xc78   :  { %15137 = vmatpush3.bf16.msra.mxu1 %v15697_v21  ;;  %15140 = vmatprep.mubr.msk.bf16.mxu1 %vm15736_vm2, %v20392_v62 }
 0xc79   :  { %15138 = vmatprep.subr.bf16.mxu1 %v20392_v62 }
 0xc7c   :  { %15139 = vmatpush3.bf16.msra.mxu1 %v15698_v10 }
 0xc7d   :  { %15144 = vmatprep.subr.bf16.mxu1 %v20392_v62 }
 0xc7f   :  { %15141 = vmatmul.mubr.msk.bf16.vlgmr.msra.gmra.mrb[240].mxu1 %vm195_vm6, %v11647_v38 }
 0xc80   :  { %15145 = vmatpush3.bf16.msra.mxu1 %v15699_v43  ;;  %15148 = vmatprep.mubr.msk.bf16.mxu1 %vm15736_vm2, %v20392_v62 }
 0xc81   :  { %15146 = vmatprep.subr.bf16.mxu1 %v20392_v62 }
 0xc84   :  { %15147 = vmatpush3.bf16.msra.mxu1 %v15700_v56 }
 0xc85   :  { %15152 = vmatprep.subr.bf16.mxu1 %v20392_v62 }
 0xc87   :  { %15149 = vmatmul.mubr.msk.bf16.vlgmr.msra.gmra.mrb[244].mxu1 %vm195_vm6, %v11709_v54 }
 0xc88   :  { %15153 = vmatpush3.bf16.msra.mxu1 %v15701_v35  ;;  %15156 = vmatprep.mubr.msk.bf16.mxu1 %vm15736_vm2, %v20392_v62 }
 0xc89   :  { %15154 = vmatprep.subr.bf16.mxu1 %v20392_v62 }
 0xc8c   :  { %15155 = vmatpush3.bf16.msra.mxu1 %v15702_v26 }
 0xc8d   :  { %15160 = vmatprep.subr.bf16.mxu1 %v20392_v62 }
 0xc8f   :  { %15157 = vmatmul.mubr.msk.bf16.vlgmr.msra.gmra.mrb[248].mxu1 %vm195_vm6, %v11771_v57 }
 0xc90   :  { %15161 = vmatpush3.bf16.msra.mxu1 %v15703_v36  ;;  %15164 = vmatprep.mubr.msk.bf16.mxu1 %vm15736_vm2, %v20392_v62 }
 0xc91   :  { %15162 = vmatprep.subr.bf16.mxu1 %v20392_v62 }
 0xc94   :  { %15163 = vmatpush3.bf16.msra.mxu1 %v15704_v3 }
 0xc95   :  { %15168 = vmatprep.subr.bf16.mxu1 %v20392_v62 }
 0xc97   :  { %15165 = vmatmul.mubr.msk.bf16.vlgmr.msra.gmra.mrb[252].mxu1 %vm195_vm6, %v11833_v16 }
 0xc98   :  { %15169 = vmatpush3.bf16.msra.mxu1 %v15705_v15  ;;  %15172 = vmatprep.mubr.msk.bf16.mxu1 %vm15736_vm2, %v20392_v62 }
 0xc99   :  { %15170 = vmatprep.subr.bf16.mxu1 %v20392_v62 }
 0xc9c   :  { %15171 = vmatpush3.bf16.msra.mxu1 %v15706_v29 }
 0xc9d   :  { %15176 = vmatprep.subr.bf16.mxu1 %v20392_v62 }
 0xc9f   :  { %15173 = vmatmul.mubr.msk.bf16.vlgmr.msra.gmra.mrb[0].mxu1 %vm195_vm6, %v11895_v49 }
 0xca0   :  { %15177 = vmatpush3.bf16.msra.mxu1 %v15707_v37  ;;  %15180 = vmatprep.mubr.msk.bf16.mxu1 %vm15736_vm2, %v20392_v62 }
 0xca1   :  { %15178 = vmatprep.subr.bf16.mxu1 %v20392_v62 }
 0xca4   :  { %15179 = vmatpush3.bf16.msra.mxu1 %v15708_v40 }
 0xca5   :  { %15184 = vmatprep.subr.bf16.mxu1 %v20392_v62 }
 0xca7   :  { %15181 = vmatmul.mubr.msk.bf16.vlgmr.msra.gmra.mrb[4].mxu1 %vm195_vm6, %v11957_v51 }
 0xca8   :  { %15185 = vmatpush3.bf16.msra.mxu1 %v15709_v60  ;;  %15188 = vmatprep.mubr.msk.bf16.mxu1 %vm15736_vm2, %v20392_v62 }
 0xca9   :  { %15186 = vmatprep.subr.bf16.mxu1 %v20392_v62 }
 0xcac   :  { %15187 = vmatpush3.bf16.msra.mxu1 %v15710_v45 }
 0xcad   :  { %15192 = vmatprep.subr.bf16.mxu1 %v20392_v62 }
 0xcaf   :  { %15189 = vmatmul.mubr.msk.bf16.vlgmr.msra.gmra.mrb[8].mxu1 %vm195_vm6, %v12019_v6 }
 0xcb0   :  { %15193 = vmatpush3.bf16.msra.mxu1 %v15711_v18  ;;  %15196 = vmatprep.mubr.msk.bf16.mxu1 %vm15736_vm2, %v20392_v62 }
 0xcb1   :  { %15194 = vmatprep.subr.bf16.mxu1 %v20392_v62 }
 0xcb4   :  { %15195 = vmatpush3.bf16.msra.mxu1 %v15712_v17 }
 0xcb5   :  { %15200 = vmatprep.subr.bf16.mxu1 %v20392_v62 }
 0xcb7   :  { %15197 = vmatmul.mubr.msk.bf16.vlgmr.msra.gmra.mrb[12].mxu1 %vm195_vm6, %v12081_v50 }
 0xcb8   :  { %15204 = vmatprep.mubr.msk.bf16.mxu1 %vm15736_vm2, %v20392_v62  ;;  %15201 = vmatpush3.bf16.msra.mxu1 %v15713_v47 }
 0xcb9   :  { %15202 = vmatprep.subr.bf16.mxu1 %v20392_v62 }
 0xcbc   :  { %15203 = vmatpush3.bf16.msra.mxu1 %v15714_v32 }
 0xd12   :  { %v11213_v27 = vpop.f32.mrb[208].mxu1 }
 0xd13   :  { %v15078_v39 = vpop.f32.mrb[209].mxu1 }
 0xd14   :  { %v11216_v42 = vpop.f32.mrb[210].mxu1 }
 0xd15   :  { %v15079_v9 = vpop.f32.mrb[211].mxu1 }
 0xd1a   :  { %v11268_v53 = vpop.f32.mrb[212].mxu1 }
 0xd1b   :  { %v11269_v59 = vadd.f32 %v11268_v53, %v11213_v27  ;;  %v15086_v55 = vpop.f32.mrb[213].mxu1 }
 0xd1c   :  { %v11271_v31 = vpop.f32.mrb[214].mxu1 }
 0xd1d   :  { %v15087_v30 = vpop.f32.mrb[215].mxu1 }
 0xd22   :  { %v11329_v52 = vpop.f32.mrb[216].mxu1 }
 0xd23   :  { %v11335_v41 = vadd.f32 %v11329_v52, %v11269_v59  ;;  %v15094_v48 = vpop.f32.mrb[217].mxu1 }
 0xd24   :  { %v11332_v1 = vpop.f32.mrb[218].mxu1 }
 0xd25   :  { %v15095_v61 = vpop.f32.mrb[219].mxu1  ;;  %v12144_v1 = vsub.s32 4, %v20507_v24 }
 0xd27   :  { %v12145_v61 = vrot.slane %v20125_v58, %v12144_v1 }
 0xd2a   :  { %v11391_v62 = vpop.f32.mrb[220].mxu1 }
 0xd2b   :  { %v11397_v33 = vadd.f32 %v11391_v62, %v11335_v41  ;;  %v15102_v7 = vpop.f32.mrb[221].mxu1 }
 0xd2c   :  { %v11394_v12 = vpop.f32.mrb[222].mxu1 }
 0xd2d   :  { %v15103_v23 = vpop.f32.mrb[223].mxu1 }
 0xd32   :  { %v11453_v13 = vpop.f32.mrb[224].mxu1 }
 0xd33   :  { %v11459_v14 = vadd.f32 %v11453_v13, %v11397_v33  ;;  %v15110_v11 = vpop.f32.mrb[225].mxu1 }
 0xd34   :  { %v11456_v2 = vpop.f32.mrb[226].mxu1  ;;  %v12154_v11 = vsub.s32 5, %v20507_v24 }
 0xd35   :  { %v15111_v19 = vpop.f32.mrb[227].mxu1 }
 0xd36   :  { %v12155_v2 = vrot.slane %v20125_v58, %v12154_v11 }
 0xd3a   :  { %v11515_v34 = vpop.f32.mrb[228].mxu1 }
 0xd3b   :  { %v11521_v25 = vadd.f32 %v11515_v34, %v11459_v14  ;;  %v15118_v4 = vpop.f32.mrb[229].mxu1 }
 0xd3c   :  { %v11518_v21 = vpop.f32.mrb[230].mxu1 }
 0xd3d   :  { %v15119_v0 = vpop.f32.mrb[231].mxu1 }
 0xd42   :  { %v11577_v10 = vpop.f32.mrb[232].mxu1 }
 0xd43   :  { %v11583_v28 = vadd.f32 %v11577_v10, %v11521_v25  ;;  %v15126_v43 = vpop.f32.mrb[233].mxu1 }
 0xd44   :  { %v11580_v38 = vpop.f32.mrb[234].mxu1 }
 0xd45   :  { %v15127_v56 = vpop.f32.mrb[235].mxu1 }
 0xd4a   :  { %v11639_v22 = vpop.f32.mrb[236].mxu1 }
 0xd4b   :  { %v11645_v35 = vadd.f32 %v11639_v22, %v11583_v28  ;;  %v15134_v54 = vpop.f32.mrb[237].mxu1 }
 0xd4c   :  { %v11642_v26 = vpop.f32.mrb[238].mxu1 }
 0xd4d   :  { %v15135_v63 = vpop.f32.mrb[239].mxu1 }
 0xd52   :  { %v11701_v36 = vpop.f32.mrb[240].mxu1 }
 0xd53   :  { %v11707_v57 = vadd.f32 %v11701_v36, %v11645_v35  ;;  %v15142_v3 = vpop.f32.mrb[241].mxu1 }
 0xd54   :  { %v11704_v20 = vpop.f32.mrb[242].mxu1 }
 0xd55   :  { %v15143_v15 = vpop.f32.mrb[243].mxu1 }
 0xd5a   :  { %v11763_v16 = vpop.f32.mrb[244].mxu1 }
 0xd5b   :  { %v11769_v29 = vadd.f32 %v11763_v16, %v11707_v57  ;;  %v15150_v46 = vpop.f32.mrb[245].mxu1 }
 0xd5c   :  { %v11766_v37 = vpop.f32.mrb[246].mxu1 }
 0xd5d   :  { %v15151_v49 = vpop.f32.mrb[247].mxu1 }
 0xd62   :  { %v11825_v40 = vpop.f32.mrb[248].mxu1 }
 0xd63   :  { %v11831_v44 = vadd.f32 %v11825_v40, %v11769_v29  ;;  %v15158_v60 = vpop.f32.mrb[249].mxu1 }
 0xd64   :  { %v11828_v51 = vpop.f32.mrb[250].mxu1 }
 0xd65   :  { %v15159_v45 = vpop.f32.mrb[251].mxu1 }
 0xd6a   :  { %v11887_v8 = vpop.f32.mrb[252].mxu1 }
 0xd6b   :  { %v11893_v18 = vadd.f32 %v11887_v8, %v11831_v44  ;;  %v15166_v6 = vpop.f32.mrb[253].mxu1 }
 0xd6c   :  { %v11890_v17 = vpop.f32.mrb[254].mxu1 }
 0xd6d   :  { %v15167_v5 = vpop.f32.mrb[255].mxu1 }
 0xd72   :  { %v11949_v50 = vpop.f32.mrb[0].mxu1 }
 0xd73   :  { %v11955_v47 = vadd.f32 %v11949_v50, %v11893_v18  ;;  %v15174_v32 = vpop.f32.mrb[1].mxu1 }
 0xd74   :  { %v11952_v27 = vpop.f32.mrb[2].mxu1 }
 0xd75   :  { %v15175_v39 = vpop.f32.mrb[3].mxu1 }
 0xd7a   :  { %v12011_v42 = vpop.f32.mrb[4].mxu1 }
 0xd7b   :  { %v12017_v9 = vadd.f32 %v12011_v42, %v11955_v47  ;;  %v15182_v53 = vpop.f32.mrb[5].mxu1 }
 0xd7c   :  { %v12014_v59 = vpop.f32.mrb[6].mxu1 }
 0xd7d   :  { %v15183_v55 = vpop.f32.mrb[7].mxu1 }
 0xd82   :  { %v12073_v31 = vpop.f32.mrb[8].mxu1 }
 0xd83   :  { %v12079_v30 = vadd.f32 %v12073_v31, %v12017_v9  ;;  %v15190_v52 = vpop.f32.mrb[9].mxu1 }
 0xd84   :  { %v12076_v41 = vpop.f32.mrb[10].mxu1 }
 0xd85   :  { %v15191_v48 = vpop.f32.mrb[11].mxu1 }
 0xd8a   :  { %v12135_v62 = vpop.f32.mrb[12].mxu1 }
 0xd8b   :  { %v12141_v33 = vadd.f32 %v12135_v62, %v12079_v30  ;;  %v15198_v7 = vpop.f32.mrb[13].mxu1 }
 0xd8c   :  { %v12138_v12 = vpop.f32.mrb[14].mxu1 }
 0xd8d   :  { %v12146_v23 = vadd.f32 %v12145_v61, %v12141_v33  ;;  %v15199_v13 = vpop.f32.mrb[15].mxu1 }
 0xd8f   :  { %v12147_v14 = vpack.c.bf16 %v12146_v23, %v12146_v23 }
 0xd91   :  { %15205 = vmatmul.mubr.msk.bf16.vlgmr.msra.gmra.mrb[16].mxu1 %vm195_vm6, %v12147_v14 }
 0xe64   :  { %v12205_v19 = vpop.f32.mrb[16].mxu1 }
 0xe65   :  { %v12206_v34 = vadd.f32 %v12205_v19, %v12155_v2  ;;  %v15206_v25 = vpop.f32.mrb[17].mxu1 }
 0xe66   :  { %v12208_v4 = vpop.f32.mrb[18].mxu1 }
 0xe67   :  { %vm12211_vm2 = vcmp.ge.f32.partialorder %v12206_v34, 0.0  ;;  %v12212_v21 = vmul.f32 0.01, %v12206_v34  ;;  %v15207_v0 = vpop.f32.mrb[19].mxu1 }
 0xe69   :  { %v12213_v10 = vsel %vm12211_vm2, %v12206_v34, %v12212_v21 }
 0xe6a   :  { %12215 = vst.msk [vmem:[%s20376_s10] sm:$0x3f] %vm12214_vm3, %v12213_v10 }
 0xe6b   :  { %12220 = vsyncpa [#allocation8], 1 }

</bundles_post_ra>
